<compile_context>
chip_gen: v5e
topology: v5e:2x2
jax: 0.10.0
libtpu: 0.0.40
codegen_flags: <defaults>
</compile_context>

<pallas_src>
import functools

import jax
import jax.numpy as jnp
from jax.experimental import pallas as pl
from jax.experimental.pallas import tpu as pltpu

EPS = 1e-5      # BatchNorm2d default eps
_PADL = 128     # lane zero-padding for shifted im2col windows (>= W + 1, 128-aligned)


def _dense_block_kernel(x_ref, mask_ref, *refs, block_channels, width, c_total,
                        precision):
    """Fused DenseBlock forward.

    x_ref    : (N, C0, H*W)       input features, spatial flattened onto lanes
    mask_ref : (16, N*H*W)        rows 0..8 = 3x3 tap validity masks (f32 0/1)
    refs[:-3]: per conv_block: gamma (Cin,1), beta (Cin,1), w (Cout,9*Cin), b (Cout,1)
    refs[-3] : output (N, C_total, H*W)   channel-concatenated features
    refs[-2] : VMEM scratch (C_total_pad, N*H*W)        persistent f32 feature slab
    refs[-1] : VMEM scratch (max_Cin_pad, 2*PADL+N*H*W) lane-padded activations
    """
    o_ref, slab, a_scratch = refs[-3], refs[-2], refs[-1]
    param_refs = refs[:-3]

    n_batch, c0, hw = x_ref.shape
    m = n_batch * hw

    # Seed the persistent feature slab with the input once (dense-net concat
    # target).  All subsequent BN statistics read this f32 slab, never o_ref.
    for n in range(n_batch):
        slab[0:c0, n * hw:(n + 1) * hw] = x_ref[n].astype(jnp.float32)

    # Zero ONLY the two lane-pad regions of the activation scratch (both must be
    # zero: masks multiply pad contents by 0, and 0 * stale NaN would propagate).
    # The centre columns are fully overwritten every block.
    pad_rows = a_scratch.shape[0]
    a_scratch[:, 0:_PADL] = jnp.zeros((pad_rows, _PADL), jnp.float32)
    a_scratch[:, _PADL + m:] = jnp.zeros((pad_rows, _PADL), jnp.float32)

    c_off = c0
    for i, (cin, cout) in enumerate(block_channels):
        gamma_ref, beta_ref, w_ref, b_ref = param_refs[4 * i:4 * i + 4]

        # Current concatenated features (already f32, already batch-on-lanes).
        cur = slab[0:cin, :]                                           # (Cin, M)

        # BatchNorm (training mode: batch statistics, biased variance), with the
        # centering folded into the affine shift.
        mean = jnp.mean(cur, axis=1, keepdims=True)                    # (Cin, 1)
        var = jnp.mean(jnp.square(cur - mean), axis=1, keepdims=True)  # (Cin, 1)
        scale = gamma_ref[...] * jax.lax.rsqrt(var + EPS)              # (Cin, 1)
        shift = beta_ref[...] - mean * scale                           # (Cin, 1)

        # BN + ReLU once over the whole tile (hoisted out of the 9-tap loop),
        # then stage it in the lane-padded scratch so shifted windows can be
        # read with the conv's zero padding realised by the pad columns + masks.
        act = jnp.maximum(cur * scale + shift, 0.0)                    # (Cin, M)
        a_scratch[0:cin, _PADL:_PADL + m] = act

        # 3x3 conv as 9 masked, lane-shifted MXU matmuls accumulated in f32
        # vregs (no im2col materialization -> no k_scratch write + re-read).
        acc = jnp.zeros((cout, m), jnp.float32)
        k = 0
        for dy in (-1, 0, 1):
            for dx in (-1, 0, 1):
                s = dy * width + dx
                if s == 0:
                    patch = act                                        # centre tap
                else:
                    patch = (a_scratch[0:cin, _PADL + s:_PADL + s + m]
                             * mask_ref[k:k + 1, :])
                acc = acc + jnp.dot(w_ref[:, k * cin:(k + 1) * cin], patch,
                                    preferred_element_type=jnp.float32,
                                    precision=precision)
                k += 1
        y = acc + b_ref[...]                                           # (Cout, M)

        # Dense-net channel concat: drop the new features into their slab slot.
        slab[c_off:c_off + cout, :] = y
        c_off += cout

    # Final output: one aligned, full-height, lane-dense store per batch sample
    # (replaces the sublane-masked channel-slot stores at offsets 0 / 4 / 14).
    for n in range(n_batch):
        o_ref[n, :, :] = slab[0:c_total, n * hw:(n + 1) * hw].astype(o_ref.dtype)


def _pad8(c):
    return -(-c // 8) * 8


def dense_block_forward(x_nchw, params, *, precision=jax.lax.Precision.HIGHEST):
    """DenseBlock forward.  x_nchw: (N, C0, H, W); params: list of (gamma, beta, w_oihw, b)."""
    n, c0, h, w = x_nchw.shape
    hw = h * w
    m = n * hw
    x_flat = x_nchw.reshape(n, c0, hw)          # free reshape (no transpose, no pad)

    # 3x3 tap validity masks over the merged (batch, y, x) lane axis, built once
    # in the wrapper (keeps ~30 VPU ops and mask live-state out of the kernel
    # prologue).  Lane p = n*H*W + y*W + x; tap (dy,dx) valid iff (y+dy, x+dx)
    # lies inside the image -> reproduces zero padding and kills cross-sample
    # bleed of the lane-shifted windows.
    q = jnp.arange(m, dtype=jnp.int32) % hw
    yy, xx = q // w, q % w
    rows = []
    for dy in (-1, 0, 1):
        for dx in (-1, 0, 1):
            ok = (yy + dy >= 0) & (yy + dy < h) & (xx + dx >= 0) & (xx + dx < w)
            rows.append(ok.astype(jnp.float32))
    masks = jnp.pad(jnp.stack(rows), ((0, 16 - 9), (0, 0)))   # (16, M), 8-aligned

    flat_args = [x_flat, masks]
    block_channels = []
    c_total = c0
    for gamma, beta, wgt, bias in params:
        cout, cin = wgt.shape[0], wgt.shape[1]
        block_channels.append((cin, cout))
        # OIHW -> (Cout, 9*Cin); column index = (ky*3 + kx)*Cin + c (tap-major),
        # matching the tap enumeration in the kernel.
        w2 = jnp.transpose(wgt, (0, 2, 3, 1)).reshape(cout, 9 * cin)
        flat_args += [gamma.reshape(cin, 1), beta.reshape(cin, 1), w2,
                      bias.reshape(cout, 1)]
        c_total += cout
    max_cin = max(cin for cin, _ in block_channels)

    kernel = functools.partial(
        _dense_block_kernel, block_channels=tuple(block_channels),
        width=w, c_total=c_total, precision=precision)
    vmem = pl.BlockSpec(memory_space=pltpu.MemorySpace.VMEM)

    out = pl.pallas_call(
        kernel,
        out_shape=jax.ShapeDtypeStruct((n, c_total, hw), x_nchw.dtype),
        in_specs=[vmem] * len(flat_args),
        out_specs=vmem,
        scratch_shapes=[
            pltpu.VMEM((_pad8(c_total), m), jnp.float32),              # feature slab
            pltpu.VMEM((_pad8(max_cin), 2 * _PADL + m), jnp.float32),  # padded act
        ],
    )(*flat_args)
    return out.reshape(n, c_total, h, w)        # free reshape back to NCHW


def dense_block_reference(x_nchw, params):
    """Pure-JAX reference (NCHW, matches PyTorch training-mode semantics)."""
    x = x_nchw
    for gamma, beta, w, b in params:
        mean = jnp.mean(x, axis=(0, 2, 3), keepdims=True)
        var = jnp.mean((x - mean) ** 2, axis=(0, 2, 3), keepdims=True)
        y = (x - mean) / jnp.sqrt(var + EPS)
        y = y * gamma[None, :, None, None] + beta[None, :, None, None]
        y = jnp.maximum(y, 0.0)
        y = jax.lax.conv_general_dilated(
            y, w, window_strides=(1, 1), padding=((1, 1), (1, 1)),
            dimension_numbers=("NCHW", "OIHW", "NCHW"),
            precision=jax.lax.Precision.HIGHEST,
        ) + b[None, :, None, None]
        x = jnp.concatenate([x, y], axis=1)
    return x


if __name__ == "__main__":
    key = jax.random.PRNGKey(0)
    kx, kp = jax.random.split(key)

    # Small shapes consistent with DenseBlock(2, 4, 10): NCHW input (2, 4, 16, 16).
    n, c0, h, w = 2, 4, 16, 16
    num_convs, growth = 2, 10
    x = jax.random.uniform(kx, (n, c0, h, w), jnp.float32)

    # Deterministic parameters.  Non-default gamma/beta on purpose to exercise
    # the general (beta != 0) border-mask path.
    params = []
    pkeys = jax.random.split(kp, 4 * num_convs)
    for i in range(num_convs):
        in_c = c0 + i * growth
        bound = 1.0 / (in_c * 9) ** 0.5
        wgt = jax.random.uniform(pkeys[4 * i], (growth, in_c, 3, 3), jnp.float32,
                                 -bound, bound)
        bias = jax.random.uniform(pkeys[4 * i + 1], (growth,), jnp.float32,
                                  -bound, bound)
        gamma = 1.0 + 0.1 * jax.random.normal(pkeys[4 * i + 2], (in_c,), jnp.float32)
        beta = 0.1 * jax.random.normal(pkeys[4 * i + 3], (in_c,), jnp.float32)
        params.append((gamma, beta, wgt, bias))

    fwd = jax.jit(dense_block_forward)
    out = jax.block_until_ready(fwd(x, params))
    ref = jax.block_until_ready(dense_block_reference(x, params))

    assert out.shape == (n, c0 + num_convs * growth, h, w), out.shape
    max_err = float(jnp.max(jnp.abs(out - ref)))
    if not jnp.allclose(out, ref, rtol=1e-4, atol=1e-4):
        raise AssertionError(
            f"Pallas DenseBlock mismatch vs reference, max abs err {max_err:e}")

    print("KERNEL_OK")
</pallas_src>

<mosaic_0001>
module attributes {stable_mosaic.version = 11 : i64} {
  func.func @_dense_block_kernel(%arg0: memref<2x4x256xf32, #tpu.memory_space<vmem>>, %arg1: memref<16x512xf32, #tpu.memory_space<vmem>>, %arg2: memref<4x1xf32, #tpu.memory_space<vmem>>, %arg3: memref<4x1xf32, #tpu.memory_space<vmem>>, %arg4: memref<10x36xf32, #tpu.memory_space<vmem>>, %arg5: memref<10x1xf32, #tpu.memory_space<vmem>>, %arg6: memref<14x1xf32, #tpu.memory_space<vmem>>, %arg7: memref<14x1xf32, #tpu.memory_space<vmem>>, %arg8: memref<10x126xf32, #tpu.memory_space<vmem>>, %arg9: memref<10x1xf32, #tpu.memory_space<vmem>>, %arg10: memref<2x24x256xf32, #tpu.memory_space<vmem>>, %arg11: memref<24x512xf32, #tpu.memory_space<vmem>>, %arg12: memref<16x768xf32, #tpu.memory_space<vmem>>) attributes {dimension_semantics = [], scalar_prefetch = 0 : i64, scratch_operands = 2 : i64, tpu.core_type = #tpu.core_type<tc>} {
    %c0 = arith.constant 0 : index
    %c0_0 = arith.constant 0 : index
    %c0_1 = arith.constant 0 : index
    %0 = vector.load %arg0[%c0, %c0_0, %c0_1] : memref<2x4x256xf32, #tpu.memory_space<vmem>>, vector<1x4x256xf32>
    %1 = vector.shape_cast %0 : vector<1x4x256xf32> to vector<4x256xf32>
    %c0_2 = arith.constant 0 : index
    %c0_3 = arith.constant 0 : index
    %2 = vector.load %arg11[%c0_2, %c0_3] : memref<24x512xf32, #tpu.memory_space<vmem>>, vector<4x256xf32>
    tpu.vector_store %arg11[%c0_2, %c0_3], %1 {strides = array<i32>} : memref<24x512xf32, #tpu.memory_space<vmem>>, vector<4x256xf32>,
    %c1 = arith.constant 1 : index
    %c0_4 = arith.constant 0 : index
    %c0_5 = arith.constant 0 : index
    %3 = vector.load %arg0[%c1, %c0_4, %c0_5] : memref<2x4x256xf32, #tpu.memory_space<vmem>>, vector<1x4x256xf32>
    %4 = vector.shape_cast %3 : vector<1x4x256xf32> to vector<4x256xf32>
    %c0_6 = arith.constant 0 : index
    %c256 = arith.constant 256 : index
    %5 = vector.load %arg11[%c0_6, %c256] : memref<24x512xf32, #tpu.memory_space<vmem>>, vector<4x256xf32>
    tpu.vector_store %arg11[%c0_6, %c256], %4 {strides = array<i32>} : memref<24x512xf32, #tpu.memory_space<vmem>>, vector<4x256xf32>,
    %cst = arith.constant 0.000000e+00 : f32
    %6 = vector.broadcast %cst : f32 to vector<16x128xf32>
    %c0_7 = arith.constant 0 : index
    %c0_8 = arith.constant 0 : index
    %7 = vector.load %arg12[%c0_7, %c0_8] : memref<16x768xf32, #tpu.memory_space<vmem>>, vector<16x128xf32>
    tpu.vector_store %arg12[%c0_7, %c0_8], %6 {strides = array<i32>} : memref<16x768xf32, #tpu.memory_space<vmem>>, vector<16x128xf32>,
    %cst_9 = arith.constant 0.000000e+00 : f32
    %8 = vector.broadcast %cst_9 : f32 to vector<16x128xf32>
    %c0_10 = arith.constant 0 : index
    %c640 = arith.constant 640 : index
    %9 = vector.load %arg12[%c0_10, %c640] : memref<16x768xf32, #tpu.memory_space<vmem>>, vector<16x128xf32>
    tpu.vector_store %arg12[%c0_10, %c640], %8 {strides = array<i32>} : memref<16x768xf32, #tpu.memory_space<vmem>>, vector<16x128xf32>,
    %c0_11 = arith.constant 0 : index
    %c0_12 = arith.constant 0 : index
    %10 = vector.load %arg11[%c0_11, %c0_12] : memref<24x512xf32, #tpu.memory_space<vmem>>, vector<4x512xf32>
    %cst_13 = arith.constant dense<0.000000e+00> : vector<4xf32>
    %11 = vector.multi_reduction <add>, %10, %cst_13 [1] : vector<4x512xf32> to vector<4xf32>
    %12 = vector.shape_cast %11 : vector<4xf32> to vector<4x1xf32>
    %cst_14 = arith.constant 5.120000e+02 : f32
    %13 = vector.broadcast %cst_14 : f32 to vector<4x1xf32>
    %14 = arith.divf %12, %13 : vector<4x1xf32>
    %15 = vector.broadcast %14 : vector<4x1xf32> to vector<4x512xf32>
    %16 = arith.subf %10, %15 : vector<4x512xf32>
    %17 = arith.mulf %16, %16 : vector<4x512xf32>
    %cst_15 = arith.constant dense<0.000000e+00> : vector<4xf32>
    %18 = vector.multi_reduction <add>, %17, %cst_15 [1] : vector<4x512xf32> to vector<4xf32>
    %19 = vector.shape_cast %18 : vector<4xf32> to vector<4x1xf32>
    %cst_16 = arith.constant 5.120000e+02 : f32
    %20 = vector.broadcast %cst_16 : f32 to vector<4x1xf32>
    %21 = arith.divf %19, %20 : vector<4x1xf32>
    %c0_17 = arith.constant 0 : index
    %c0_18 = arith.constant 0 : index
    %22 = vector.load %arg2[%c0_17, %c0_18] : memref<4x1xf32, #tpu.memory_space<vmem>>, vector<4x1xf32>
    %cst_19 = arith.constant 9.99999974E-6 : f32
    %23 = vector.broadcast %cst_19 : f32 to vector<4x1xf32>
    %24 = arith.addf %21, %23 : vector<4x1xf32>
    %25 = math.rsqrt %24 : vector<4x1xf32>
    %26 = arith.mulf %22, %25 : vector<4x1xf32>
    %c0_20 = arith.constant 0 : index
    %c0_21 = arith.constant 0 : index
    %27 = vector.load %arg3[%c0_20, %c0_21] : memref<4x1xf32, #tpu.memory_space<vmem>>, vector<4x1xf32>
    %28 = arith.mulf %14, %26 : vector<4x1xf32>
    %29 = arith.subf %27, %28 : vector<4x1xf32>
    %30 = vector.broadcast %26 : vector<4x1xf32> to vector<4x512xf32>
    %31 = arith.mulf %10, %30 : vector<4x512xf32>
    %32 = vector.broadcast %29 : vector<4x1xf32> to vector<4x512xf32>
    %33 = arith.addf %31, %32 : vector<4x512xf32>
    %cst_22 = arith.constant 0.000000e+00 : f32
    %34 = vector.broadcast %cst_22 : f32 to vector<4x512xf32>
    %35 = arith.maximumf %33, %34 : vector<4x512xf32>
    %c0_23 = arith.constant 0 : index
    %c128 = arith.constant 128 : index
    %36 = vector.load %arg12[%c0_23, %c128] : memref<16x768xf32, #tpu.memory_space<vmem>>, vector<4x512xf32>
    tpu.vector_store %arg12[%c0_23, %c128], %35 {strides = array<i32>} : memref<16x768xf32, #tpu.memory_space<vmem>>, vector<4x512xf32>,
    %cst_24 = arith.constant 0.000000e+00 : f32
    %37 = vector.broadcast %cst_24 : f32 to vector<10x512xf32>
    %c0_25 = arith.constant 0 : index
    %c111 = arith.constant 111 : index
    %38 = vector.load %arg12[%c0_25, %c111] : memref<16x768xf32, #tpu.memory_space<vmem>>, vector<4x512xf32>
    %c0_26 = arith.constant 0 : index
    %c0_27 = arith.constant 0 : index
    %39 = vector.load %arg1[%c0_26, %c0_27] : memref<16x512xf32, #tpu.memory_space<vmem>>, vector<1x512xf32>
    %40 = vector.broadcast %39 : vector<1x512xf32> to vector<4x512xf32>
    %41 = arith.mulf %38, %40 : vector<4x512xf32>
    %c0_28 = arith.constant 0 : index
    %c0_29 = arith.constant 0 : index
    %42 = vector.load %arg4[%c0_28, %c0_29] : memref<10x36xf32, #tpu.memory_space<vmem>>, vector<10x4xf32>
    %cst_30 = arith.constant dense<0.000000e+00> : vector<10x512xf32>
    %43 = tpu.matmul %42, %41, %cst_30 {dimension_numbers = #tpu.dot_dimension_numbers<[1], [0], [0], [1], [0, 0, 1, 1], [], []>, precision = #tpu.contract_precision<fp32>} : vector<10x4xf32>, vector<4x512xf32>, vector<10x512xf32> -> vector<10x512xf32>
    %44 = arith.addf %37, %43 : vector<10x512xf32>
    %c0_31 = arith.constant 0 : index
    %c112 = arith.constant 112 : index
    %45 = vector.load %arg12[%c0_31, %c112] : memref<16x768xf32, #tpu.memory_space<vmem>>, vector<4x512xf32>
    %c1_32 = arith.constant 1 : index
    %c0_33 = arith.constant 0 : index
    %46 = vector.load %arg1[%c1_32, %c0_33] : memref<16x512xf32, #tpu.memory_space<vmem>>, vector<1x512xf32>
    %47 = vector.broadcast %46 : vector<1x512xf32> to vector<4x512xf32>
    %48 = arith.mulf %45, %47 : vector<4x512xf32>
    %c0_34 = arith.constant 0 : index
    %c4 = arith.constant 4 : index
    %49 = vector.load %arg4[%c0_34, %c4] : memref<10x36xf32, #tpu.memory_space<vmem>>, vector<10x4xf32>
    %cst_35 = arith.constant dense<0.000000e+00> : vector<10x512xf32>
    %50 = tpu.matmul %49, %48, %cst_35 {dimension_numbers = #tpu.dot_dimension_numbers<[1], [0], [0], [1], [0, 0, 1, 1], [], []>, precision = #tpu.contract_precision<fp32>} : vector<10x4xf32>, vector<4x512xf32>, vector<10x512xf32> -> vector<10x512xf32>
    %51 = arith.addf %44, %50 : vector<10x512xf32>
    %c0_36 = arith.constant 0 : index
    %c113 = arith.constant 113 : index
    %52 = vector.load %arg12[%c0_36, %c113] : memref<16x768xf32, #tpu.memory_space<vmem>>, vector<4x512xf32>
    %c2 = arith.constant 2 : index
    %c0_37 = arith.constant 0 : index
    %53 = vector.load %arg1[%c2, %c0_37] : memref<16x512xf32, #tpu.memory_space<vmem>>, vector<1x512xf32>
    %54 = vector.broadcast %53 : vector<1x512xf32> to vector<4x512xf32>
    %55 = arith.mulf %52, %54 : vector<4x512xf32>
    %c0_38 = arith.constant 0 : index
    %c8 = arith.constant 8 : index
    %56 = vector.load %arg4[%c0_38, %c8] : memref<10x36xf32, #tpu.memory_space<vmem>>, vector<10x4xf32>
    %cst_39 = arith.constant dense<0.000000e+00> : vector<10x512xf32>
    %57 = tpu.matmul %56, %55, %cst_39 {dimension_numbers = #tpu.dot_dimension_numbers<[1], [0], [0], [1], [0, 0, 1, 1], [], []>, precision = #tpu.contract_precision<fp32>} : vector<10x4xf32>, vector<4x512xf32>, vector<10x512xf32> -> vector<10x512xf32>
    %58 = arith.addf %51, %57 : vector<10x512xf32>
    %c0_40 = arith.constant 0 : index
    %c127 = arith.constant 127 : index
    %59 = vector.load %arg12[%c0_40, %c127] : memref<16x768xf32, #tpu.memory_space<vmem>>, vector<4x512xf32>
    %c3 = arith.constant 3 : index
    %c0_41 = arith.constant 0 : index
    %60 = vector.load %arg1[%c3, %c0_41] : memref<16x512xf32, #tpu.memory_space<vmem>>, vector<1x512xf32>
    %61 = vector.broadcast %60 : vector<1x512xf32> to vector<4x512xf32>
    %62 = arith.mulf %59, %61 : vector<4x512xf32>
    %c0_42 = arith.constant 0 : index
    %c12 = arith.constant 12 : index
    %63 = vector.load %arg4[%c0_42, %c12] : memref<10x36xf32, #tpu.memory_space<vmem>>, vector<10x4xf32>
    %cst_43 = arith.constant dense<0.000000e+00> : vector<10x512xf32>
    %64 = tpu.matmul %63, %62, %cst_43 {dimension_numbers = #tpu.dot_dimension_numbers<[1], [0], [0], [1], [0, 0, 1, 1], [], []>, precision = #tpu.contract_precision<fp32>} : vector<10x4xf32>, vector<4x512xf32>, vector<10x512xf32> -> vector<10x512xf32>
    %65 = arith.addf %58, %64 : vector<10x512xf32>
    %c0_44 = arith.constant 0 : index
    %c16 = arith.constant 16 : index
    %66 = vector.load %arg4[%c0_44, %c16] : memref<10x36xf32, #tpu.memory_space<vmem>>, vector<10x4xf32>
    %cst_45 = arith.constant dense<0.000000e+00> : vector<10x512xf32>
    %67 = tpu.matmul %66, %35, %cst_45 {dimension_numbers = #tpu.dot_dimension_numbers<[1], [0], [0], [1], [0, 0, 1, 1], [], []>, precision = #tpu.contract_precision<fp32>} : vector<10x4xf32>, vector<4x512xf32>, vector<10x512xf32> -> vector<10x512xf32>
    %68 = arith.addf %65, %67 : vector<10x512xf32>
    %c0_46 = arith.constant 0 : index
    %c129 = arith.constant 129 : index
    %69 = vector.load %arg12[%c0_46, %c129] : memref<16x768xf32, #tpu.memory_space<vmem>>, vector<4x512xf32>
    %c5 = arith.constant 5 : index
    %c0_47 = arith.constant 0 : index
    %70 = vector.load %arg1[%c5, %c0_47] : memref<16x512xf32, #tpu.memory_space<vmem>>, vector<1x512xf32>
    %71 = vector.broadcast %70 : vector<1x512xf32> to vector<4x512xf32>
    %72 = arith.mulf %69, %71 : vector<4x512xf32>
    %c0_48 = arith.constant 0 : index
    %c20 = arith.constant 20 : index
    %73 = vector.load %arg4[%c0_48, %c20] : memref<10x36xf32, #tpu.memory_space<vmem>>, vector<10x4xf32>
    %cst_49 = arith.constant dense<0.000000e+00> : vector<10x512xf32>
    %74 = tpu.matmul %73, %72, %cst_49 {dimension_numbers = #tpu.dot_dimension_numbers<[1], [0], [0], [1], [0, 0, 1, 1], [], []>, precision = #tpu.contract_precision<fp32>} : vector<10x4xf32>, vector<4x512xf32>, vector<10x512xf32> -> vector<10x512xf32>
    %75 = arith.addf %68, %74 : vector<10x512xf32>
    %c0_50 = arith.constant 0 : index
    %c143 = arith.constant 143 : index
    %76 = vector.load %arg12[%c0_50, %c143] : memref<16x768xf32, #tpu.memory_space<vmem>>, vector<4x512xf32>
    %c6 = arith.constant 6 : index
    %c0_51 = arith.constant 0 : index
    %77 = vector.load %arg1[%c6, %c0_51] : memref<16x512xf32, #tpu.memory_space<vmem>>, vector<1x512xf32>
    %78 = vector.broadcast %77 : vector<1x512xf32> to vector<4x512xf32>
    %79 = arith.mulf %76, %78 : vector<4x512xf32>
    %c0_52 = arith.constant 0 : index
    %c24 = arith.constant 24 : index
    %80 = vector.load %arg4[%c0_52, %c24] : memref<10x36xf32, #tpu.memory_space<vmem>>, vector<10x4xf32>
    %cst_53 = arith.constant dense<0.000000e+00> : vector<10x512xf32>
    %81 = tpu.matmul %80, %79, %cst_53 {dimension_numbers = #tpu.dot_dimension_numbers<[1], [0], [0], [1], [0, 0, 1, 1], [], []>, precision = #tpu.contract_precision<fp32>} : vector<10x4xf32>, vector<4x512xf32>, vector<10x512xf32> -> vector<10x512xf32>
    %82 = arith.addf %75, %81 : vector<10x512xf32>
    %c0_54 = arith.constant 0 : index
    %c144 = arith.constant 144 : index
    %83 = vector.load %arg12[%c0_54, %c144] : memref<16x768xf32, #tpu.memory_space<vmem>>, vector<4x512xf32>
    %c7 = arith.constant 7 : index
    %c0_55 = arith.constant 0 : index
    %84 = vector.load %arg1[%c7, %c0_55] : memref<16x512xf32, #tpu.memory_space<vmem>>, vector<1x512xf32>
    %85 = vector.broadcast %84 : vector<1x512xf32> to vector<4x512xf32>
    %86 = arith.mulf %83, %85 : vector<4x512xf32>
    %c0_56 = arith.constant 0 : index
    %c28 = arith.constant 28 : index
    %87 = vector.load %arg4[%c0_56, %c28] : memref<10x36xf32, #tpu.memory_space<vmem>>, vector<10x4xf32>
    %cst_57 = arith.constant dense<0.000000e+00> : vector<10x512xf32>
    %88 = tpu.matmul %87, %86, %cst_57 {dimension_numbers = #tpu.dot_dimension_numbers<[1], [0], [0], [1], [0, 0, 1, 1], [], []>, precision = #tpu.contract_precision<fp32>} : vector<10x4xf32>, vector<4x512xf32>, vector<10x512xf32> -> vector<10x512xf32>
    %89 = arith.addf %82, %88 : vector<10x512xf32>
    %c0_58 = arith.constant 0 : index
    %c145 = arith.constant 145 : index
    %90 = vector.load %arg12[%c0_58, %c145] : memref<16x768xf32, #tpu.memory_space<vmem>>, vector<4x512xf32>
    %c8_59 = arith.constant 8 : index
    %c0_60 = arith.constant 0 : index
    %91 = vector.load %arg1[%c8_59, %c0_60] : memref<16x512xf32, #tpu.memory_space<vmem>>, vector<1x512xf32>
    %92 = vector.broadcast %91 : vector<1x512xf32> to vector<4x512xf32>
    %93 = arith.mulf %90, %92 : vector<4x512xf32>
    %c0_61 = arith.constant 0 : index
    %c32 = arith.constant 32 : index
    %94 = vector.load %arg4[%c0_61, %c32] : memref<10x36xf32, #tpu.memory_space<vmem>>, vector<10x4xf32>
    %cst_62 = arith.constant dense<0.000000e+00> : vector<10x512xf32>
    %95 = tpu.matmul %94, %93, %cst_62 {dimension_numbers = #tpu.dot_dimension_numbers<[1], [0], [0], [1], [0, 0, 1, 1], [], []>, precision = #tpu.contract_precision<fp32>} : vector<10x4xf32>, vector<4x512xf32>, vector<10x512xf32> -> vector<10x512xf32>
    %96 = arith.addf %89, %95 : vector<10x512xf32>
    %c0_63 = arith.constant 0 : index
    %c0_64 = arith.constant 0 : index
    %97 = vector.load %arg5[%c0_63, %c0_64] : memref<10x1xf32, #tpu.memory_space<vmem>>, vector<10x1xf32>
    %98 = vector.broadcast %97 : vector<10x1xf32> to vector<10x512xf32>
    %99 = arith.addf %96, %98 : vector<10x512xf32>
    %c4_65 = arith.constant 4 : index
    %c0_66 = arith.constant 0 : index
    %100 = vector.load %arg11[%c4_65, %c0_66] : memref<24x512xf32, #tpu.memory_space<vmem>>, vector<10x512xf32>
    tpu.vector_store %arg11[%c4_65, %c0_66], %99 {strides = array<i32>} : memref<24x512xf32, #tpu.memory_space<vmem>>, vector<10x512xf32>,
    %c0_67 = arith.constant 0 : index
    %c0_68 = arith.constant 0 : index
    %101 = vector.load %arg11[%c0_67, %c0_68] : memref<24x512xf32, #tpu.memory_space<vmem>>, vector<14x512xf32>
    %cst_69 = arith.constant dense<0.000000e+00> : vector<14xf32>
    %102 = vector.multi_reduction <add>, %101, %cst_69 [1] : vector<14x512xf32> to vector<14xf32>
    %103 = vector.shape_cast %102 : vector<14xf32> to vector<14x1xf32>
    %cst_70 = arith.constant 5.120000e+02 : f32
    %104 = vector.broadcast %cst_70 : f32 to vector<14x1xf32>
    %105 = arith.divf %103, %104 : vector<14x1xf32>
    %106 = vector.broadcast %105 : vector<14x1xf32> to vector<14x512xf32>
    %107 = arith.subf %101, %106 : vector<14x512xf32>
    %108 = arith.mulf %107, %107 : vector<14x512xf32>
    %cst_71 = arith.constant dense<0.000000e+00> : vector<14xf32>
    %109 = vector.multi_reduction <add>, %108, %cst_71 [1] : vector<14x512xf32> to vector<14xf32>
    %110 = vector.shape_cast %109 : vector<14xf32> to vector<14x1xf32>
    %cst_72 = arith.constant 5.120000e+02 : f32
    %111 = vector.broadcast %cst_72 : f32 to vector<14x1xf32>
    %112 = arith.divf %110, %111 : vector<14x1xf32>
    %c0_73 = arith.constant 0 : index
    %c0_74 = arith.constant 0 : index
    %113 = vector.load %arg6[%c0_73, %c0_74] : memref<14x1xf32, #tpu.memory_space<vmem>>, vector<14x1xf32>
    %cst_75 = arith.constant 9.99999974E-6 : f32
    %114 = vector.broadcast %cst_75 : f32 to vector<14x1xf32>
    %115 = arith.addf %112, %114 : vector<14x1xf32>
    %116 = math.rsqrt %115 : vector<14x1xf32>
    %117 = arith.mulf %113, %116 : vector<14x1xf32>
    %c0_76 = arith.constant 0 : index
    %c0_77 = arith.constant 0 : index
    %118 = vector.load %arg7[%c0_76, %c0_77] : memref<14x1xf32, #tpu.memory_space<vmem>>, vector<14x1xf32>
    %119 = arith.mulf %105, %117 : vector<14x1xf32>
    %120 = arith.subf %118, %119 : vector<14x1xf32>
    %121 = vector.broadcast %117 : vector<14x1xf32> to vector<14x512xf32>
    %122 = arith.mulf %101, %121 : vector<14x512xf32>
    %123 = vector.broadcast %120 : vector<14x1xf32> to vector<14x512xf32>
    %124 = arith.addf %122, %123 : vector<14x512xf32>
    %cst_78 = arith.constant 0.000000e+00 : f32
    %125 = vector.broadcast %cst_78 : f32 to vector<14x512xf32>
    %126 = arith.maximumf %124, %125 : vector<14x512xf32>
    %c0_79 = arith.constant 0 : index
    %c128_80 = arith.constant 128 : index
    %127 = vector.load %arg12[%c0_79, %c128_80] : memref<16x768xf32, #tpu.memory_space<vmem>>, vector<14x512xf32>
    tpu.vector_store %arg12[%c0_79, %c128_80], %126 {strides = array<i32>} : memref<16x768xf32, #tpu.memory_space<vmem>>, vector<14x512xf32>,
    %cst_81 = arith.constant 0.000000e+00 : f32
    %128 = vector.broadcast %cst_81 : f32 to vector<10x512xf32>
    %c0_82 = arith.constant 0 : index
    %c111_83 = arith.constant 111 : index
    %129 = vector.load %arg12[%c0_82, %c111_83] : memref<16x768xf32, #tpu.memory_space<vmem>>, vector<14x512xf32>
    %c0_84 = arith.constant 0 : index
    %c0_85 = arith.constant 0 : index
    %130 = vector.load %arg1[%c0_84, %c0_85] : memref<16x512xf32, #tpu.memory_space<vmem>>, vector<1x512xf32>
    %131 = vector.broadcast %130 : vector<1x512xf32> to vector<14x512xf32>
    %132 = arith.mulf %129, %131 : vector<14x512xf32>
    %c0_86 = arith.constant 0 : index
    %c0_87 = arith.constant 0 : index
    %133 = vector.load %arg8[%c0_86, %c0_87] : memref<10x126xf32, #tpu.memory_space<vmem>>, vector<10x14xf32>
    %cst_88 = arith.constant dense<0.000000e+00> : vector<10x512xf32>
    %134 = tpu.matmul %133, %132, %cst_88 {dimension_numbers = #tpu.dot_dimension_numbers<[1], [0], [0], [1], [0, 0, 1, 1], [], []>, precision = #tpu.contract_precision<fp32>} : vector<10x14xf32>, vector<14x512xf32>, vector<10x512xf32> -> vector<10x512xf32>
    %135 = arith.addf %128, %134 : vector<10x512xf32>
    %c0_89 = arith.constant 0 : index
    %c112_90 = arith.constant 112 : index
    %136 = vector.load %arg12[%c0_89, %c112_90] : memref<16x768xf32, #tpu.memory_space<vmem>>, vector<14x512xf32>
    %c1_91 = arith.constant 1 : index
    %c0_92 = arith.constant 0 : index
    %137 = vector.load %arg1[%c1_91, %c0_92] : memref<16x512xf32, #tpu.memory_space<vmem>>, vector<1x512xf32>
    %138 = vector.broadcast %137 : vector<1x512xf32> to vector<14x512xf32>
    %139 = arith.mulf %136, %138 : vector<14x512xf32>
    %c0_93 = arith.constant 0 : index
    %c14 = arith.constant 14 : index
    %140 = vector.load %arg8[%c0_93, %c14] : memref<10x126xf32, #tpu.memory_space<vmem>>, vector<10x14xf32>
    %cst_94 = arith.constant dense<0.000000e+00> : vector<10x512xf32>
    %141 = tpu.matmul %140, %139, %cst_94 {dimension_numbers = #tpu.dot_dimension_numbers<[1], [0], [0], [1], [0, 0, 1, 1], [], []>, precision = #tpu.contract_precision<fp32>} : vector<10x14xf32>, vector<14x512xf32>, vector<10x512xf32> -> vector<10x512xf32>
    %142 = arith.addf %135, %141 : vector<10x512xf32>
    %c0_95 = arith.constant 0 : index
    %c113_96 = arith.constant 113 : index
    %143 = vector.load %arg12[%c0_95, %c113_96] : memref<16x768xf32, #tpu.memory_space<vmem>>, vector<14x512xf32>
    %c2_97 = arith.constant 2 : index
    %c0_98 = arith.constant 0 : index
    %144 = vector.load %arg1[%c2_97, %c0_98] : memref<16x512xf32, #tpu.memory_space<vmem>>, vector<1x512xf32>
    %145 = vector.broadcast %144 : vector<1x512xf32> to vector<14x512xf32>
    %146 = arith.mulf %143, %145 : vector<14x512xf32>
    %c0_99 = arith.constant 0 : index
    %c28_100 = arith.constant 28 : index
    %147 = vector.load %arg8[%c0_99, %c28_100] : memref<10x126xf32, #tpu.memory_space<vmem>>, vector<10x14xf32>
    %cst_101 = arith.constant dense<0.000000e+00> : vector<10x512xf32>
    %148 = tpu.matmul %147, %146, %cst_101 {dimension_numbers = #tpu.dot_dimension_numbers<[1], [0], [0], [1], [0, 0, 1, 1], [], []>, precision = #tpu.contract_precision<fp32>} : vector<10x14xf32>, vector<14x512xf32>, vector<10x512xf32> -> vector<10x512xf32>
    %149 = arith.addf %142, %148 : vector<10x512xf32>
    %c0_102 = arith.constant 0 : index
    %c127_103 = arith.constant 127 : index
    %150 = vector.load %arg12[%c0_102, %c127_103] : memref<16x768xf32, #tpu.memory_space<vmem>>, vector<14x512xf32>
    %c3_104 = arith.constant 3 : index
    %c0_105 = arith.constant 0 : index
    %151 = vector.load %arg1[%c3_104, %c0_105] : memref<16x512xf32, #tpu.memory_space<vmem>>, vector<1x512xf32>
    %152 = vector.broadcast %151 : vector<1x512xf32> to vector<14x512xf32>
    %153 = arith.mulf %150, %152 : vector<14x512xf32>
    %c0_106 = arith.constant 0 : index
    %c42 = arith.constant 42 : index
    %154 = vector.load %arg8[%c0_106, %c42] : memref<10x126xf32, #tpu.memory_space<vmem>>, vector<10x14xf32>
    %cst_107 = arith.constant dense<0.000000e+00> : vector<10x512xf32>
    %155 = tpu.matmul %154, %153, %cst_107 {dimension_numbers = #tpu.dot_dimension_numbers<[1], [0], [0], [1], [0, 0, 1, 1], [], []>, precision = #tpu.contract_precision<fp32>} : vector<10x14xf32>, vector<14x512xf32>, vector<10x512xf32> -> vector<10x512xf32>
    %156 = arith.addf %149, %155 : vector<10x512xf32>
    %c0_108 = arith.constant 0 : index
    %c56 = arith.constant 56 : index
    %157 = vector.load %arg8[%c0_108, %c56] : memref<10x126xf32, #tpu.memory_space<vmem>>, vector<10x14xf32>
    %cst_109 = arith.constant dense<0.000000e+00> : vector<10x512xf32>
    %158 = tpu.matmul %157, %126, %cst_109 {dimension_numbers = #tpu.dot_dimension_numbers<[1], [0], [0], [1], [0, 0, 1, 1], [], []>, precision = #tpu.contract_precision<fp32>} : vector<10x14xf32>, vector<14x512xf32>, vector<10x512xf32> -> vector<10x512xf32>
    %159 = arith.addf %156, %158 : vector<10x512xf32>
    %c0_110 = arith.constant 0 : index
    %c129_111 = arith.constant 129 : index
    %160 = vector.load %arg12[%c0_110, %c129_111] : memref<16x768xf32, #tpu.memory_space<vmem>>, vector<14x512xf32>
    %c5_112 = arith.constant 5 : index
    %c0_113 = arith.constant 0 : index
    %161 = vector.load %arg1[%c5_112, %c0_113] : memref<16x512xf32, #tpu.memory_space<vmem>>, vector<1x512xf32>
    %162 = vector.broadcast %161 : vector<1x512xf32> to vector<14x512xf32>
    %163 = arith.mulf %160, %162 : vector<14x512xf32>
    %c0_114 = arith.constant 0 : index
    %c70 = arith.constant 70 : index
    %164 = vector.load %arg8[%c0_114, %c70] : memref<10x126xf32, #tpu.memory_space<vmem>>, vector<10x14xf32>
    %cst_115 = arith.constant dense<0.000000e+00> : vector<10x512xf32>
    %165 = tpu.matmul %164, %163, %cst_115 {dimension_numbers = #tpu.dot_dimension_numbers<[1], [0], [0], [1], [0, 0, 1, 1], [], []>, precision = #tpu.contract_precision<fp32>} : vector<10x14xf32>, vector<14x512xf32>, vector<10x512xf32> -> vector<10x512xf32>
    %166 = arith.addf %159, %165 : vector<10x512xf32>
    %c0_116 = arith.constant 0 : index
    %c143_117 = arith.constant 143 : index
    %167 = vector.load %arg12[%c0_116, %c143_117] : memref<16x768xf32, #tpu.memory_space<vmem>>, vector<14x512xf32>
    %c6_118 = arith.constant 6 : index
    %c0_119 = arith.constant 0 : index
    %168 = vector.load %arg1[%c6_118, %c0_119] : memref<16x512xf32, #tpu.memory_space<vmem>>, vector<1x512xf32>
    %169 = vector.broadcast %168 : vector<1x512xf32> to vector<14x512xf32>
    %170 = arith.mulf %167, %169 : vector<14x512xf32>
    %c0_120 = arith.constant 0 : index
    %c84 = arith.constant 84 : index
    %171 = vector.load %arg8[%c0_120, %c84] : memref<10x126xf32, #tpu.memory_space<vmem>>, vector<10x14xf32>
    %cst_121 = arith.constant dense<0.000000e+00> : vector<10x512xf32>
    %172 = tpu.matmul %171, %170, %cst_121 {dimension_numbers = #tpu.dot_dimension_numbers<[1], [0], [0], [1], [0, 0, 1, 1], [], []>, precision = #tpu.contract_precision<fp32>} : vector<10x14xf32>, vector<14x512xf32>, vector<10x512xf32> -> vector<10x512xf32>
    %173 = arith.addf %166, %172 : vector<10x512xf32>
    %c0_122 = arith.constant 0 : index
    %c144_123 = arith.constant 144 : index
    %174 = vector.load %arg12[%c0_122, %c144_123] : memref<16x768xf32, #tpu.memory_space<vmem>>, vector<14x512xf32>
    %c7_124 = arith.constant 7 : index
    %c0_125 = arith.constant 0 : index
    %175 = vector.load %arg1[%c7_124, %c0_125] : memref<16x512xf32, #tpu.memory_space<vmem>>, vector<1x512xf32>
    %176 = vector.broadcast %175 : vector<1x512xf32> to vector<14x512xf32>
    %177 = arith.mulf %174, %176 : vector<14x512xf32>
    %c0_126 = arith.constant 0 : index
    %c98 = arith.constant 98 : index
    %178 = vector.load %arg8[%c0_126, %c98] : memref<10x126xf32, #tpu.memory_space<vmem>>, vector<10x14xf32>
    %cst_127 = arith.constant dense<0.000000e+00> : vector<10x512xf32>
    %179 = tpu.matmul %178, %177, %cst_127 {dimension_numbers = #tpu.dot_dimension_numbers<[1], [0], [0], [1], [0, 0, 1, 1], [], []>, precision = #tpu.contract_precision<fp32>} : vector<10x14xf32>, vector<14x512xf32>, vector<10x512xf32> -> vector<10x512xf32>
    %180 = arith.addf %173, %179 : vector<10x512xf32>
    %c0_128 = arith.constant 0 : index
    %c145_129 = arith.constant 145 : index
    %181 = vector.load %arg12[%c0_128, %c145_129] : memref<16x768xf32, #tpu.memory_space<vmem>>, vector<14x512xf32>
    %c8_130 = arith.constant 8 : index
    %c0_131 = arith.constant 0 : index
    %182 = vector.load %arg1[%c8_130, %c0_131] : memref<16x512xf32, #tpu.memory_space<vmem>>, vector<1x512xf32>
    %183 = vector.broadcast %182 : vector<1x512xf32> to vector<14x512xf32>
    %184 = arith.mulf %181, %183 : vector<14x512xf32>
    %c0_132 = arith.constant 0 : index
    %c112_133 = arith.constant 112 : index
    %185 = vector.load %arg8[%c0_132, %c112_133] : memref<10x126xf32, #tpu.memory_space<vmem>>, vector<10x14xf32>
    %cst_134 = arith.constant dense<0.000000e+00> : vector<10x512xf32>
    %186 = tpu.matmul %185, %184, %cst_134 {dimension_numbers = #tpu.dot_dimension_numbers<[1], [0], [0], [1], [0, 0, 1, 1], [], []>, precision = #tpu.contract_precision<fp32>} : vector<10x14xf32>, vector<14x512xf32>, vector<10x512xf32> -> vector<10x512xf32>
    %187 = arith.addf %180, %186 : vector<10x512xf32>
    %c0_135 = arith.constant 0 : index
    %c0_136 = arith.constant 0 : index
    %188 = vector.load %arg9[%c0_135, %c0_136] : memref<10x1xf32, #tpu.memory_space<vmem>>, vector<10x1xf32>
    %189 = vector.broadcast %188 : vector<10x1xf32> to vector<10x512xf32>
    %190 = arith.addf %187, %189 : vector<10x512xf32>
    %c14_137 = arith.constant 14 : index
    %c0_138 = arith.constant 0 : index
    %191 = vector.load %arg11[%c14_137, %c0_138] : memref<24x512xf32, #tpu.memory_space<vmem>>, vector<10x512xf32>
    tpu.vector_store %arg11[%c14_137, %c0_138], %190 {strides = array<i32>} : memref<24x512xf32, #tpu.memory_space<vmem>>, vector<10x512xf32>,
    %c0_139 = arith.constant 0 : index
    %c0_140 = arith.constant 0 : index
    %192 = vector.load %arg11[%c0_139, %c0_140] : memref<24x512xf32, #tpu.memory_space<vmem>>, vector<24x256xf32>
    %c0_141 = arith.constant 0 : index
    %c0_142 = arith.constant 0 : index
    %c0_143 = arith.constant 0 : index
    %193 = vector.load %arg10[%c0_141, %c0_142, %c0_143] : memref<2x24x256xf32, #tpu.memory_space<vmem>>, vector<1x24x256xf32>
    %194 = vector.shape_cast %193 : vector<1x24x256xf32> to vector<24x256xf32>
    %195 = vector.shape_cast %192 : vector<24x256xf32> to vector<1x24x256xf32>
    tpu.vector_store %arg10[%c0_141, %c0_142, %c0_143], %195 {strides = array<i32>} : memref<2x24x256xf32, #tpu.memory_space<vmem>>, vector<1x24x256xf32>,
    %c0_144 = arith.constant 0 : index
    %c256_145 = arith.constant 256 : index
    %196 = vector.load %arg11[%c0_144, %c256_145] : memref<24x512xf32, #tpu.memory_space<vmem>>, vector<24x256xf32>
    %c1_146 = arith.constant 1 : index
    %c0_147 = arith.constant 0 : index
    %c0_148 = arith.constant 0 : index
    %197 = vector.load %arg10[%c1_146, %c0_147, %c0_148] : memref<2x24x256xf32, #tpu.memory_space<vmem>>, vector<1x24x256xf32>
    %198 = vector.shape_cast %197 : vector<1x24x256xf32> to vector<24x256xf32>
    %199 = vector.shape_cast %196 : vector<24x256xf32> to vector<1x24x256xf32>
    tpu.vector_store %arg10[%c1_146, %c0_147, %c0_148], %199 {strides = array<i32>} : memref<2x24x256xf32, #tpu.memory_space<vmem>>, vector<1x24x256xf32>,
    return
  }
}

</mosaic_0001>

<bundles_post_ra>
// kernel: dense_block_forward.1
= control target key start
LH: loop header
LB: loop body
LE: loop exit
PB: predicated region body
PF: predicated region fallthrough
CT: control target
= control target key end

     0   :  { %vm62_vm0 = vcmask 1043456   ;;  %v15142_v17 = vmov 512.0   ;;  %s15143_s18 = smov 112   ;;  %v15144_v43 = vmov 0   ;;  %v15145_v48 = vmov 0.0   ;;  %s15146_s19 = smov 16   ;;  %s20179_s0 = inlined_call_operand.vmem [shape: f32[2,4,256], index: 0, kind: input, shape index: {}]   ;;  %s20180_s1 = inlined_call_operand.vmem [shape: f32[16,512], index: 1, kind: input, shape index: {}]   ;;  %s20181_s2 = inlined_call_operand.vmem [shape: f32[4,1], index: 2, kind: input, shape index: {}]   ;;  %s20182_s3 = inlined_call_operand.vmem [shape: f32[4,1], index: 3, kind: input, shape index: {}]   ;;  %s20183_s4 = inlined_call_operand.vmem [shape: f32[10,36], index: 4, kind: input, shape index: {}]   ;;  %s20184_s5 = inlined_call_operand.vmem [shape: f32[10,1], index: 5, kind: input, shape index: {}]   ;;  %s20185_s10 = inlined_call_operand.vmem [shape: f32[2,24,256], index: 10, kind: output, shape index: {}]   ;;  %s20186_s6 = inlined_call_operand.vmem [shape: f32[14,1], index: 6, kind: input, shape index: {}]   ;;  %s20187_s8 = inlined_call_operand.vmem [shape: f32[10,126], index: 8, kind: input, shape index: {}]   ;;  %s20188_s7 = inlined_call_operand.vmem [shape: f32[14,1], index: 7, kind: input, shape index: {}]   ;;  %s20189_s9 = inlined_call_operand.vmem [shape: f32[10,1], index: 9, kind: input, shape index: {}]  }
   0x1   :  { %v35_v0 = vld [vmem:[%s20179_s0] sm:$0xff]  ;;  %v15049_v1 = vld [vmem:[%s20179_s0 + $0x8] sm:$0xff]  ;;  %15097 = vrcp.f32 %v15142_v17  ;;  %15094 = vset.pattern.permute.xlu1 %v15144_v43  ;;  %15095 = vset.pattern.permute.xlu2 %v15144_v43  ;;  %54 = vst [vmem:[#allocation3 + $0x40] sm:$0xff] %v15145_v48  ;;  %vm190_vm5 = vcmask 916480   ;;  %s15148_s29 = smov 111   ;;  %s15149_s12 = smov 113  }
   0x2   :  { %37 = vst [vmem:[#allocation1] ss:$2 sm:$0xff] %v35_v0  ;;  %v15050_v20 = vld [vmem:[%s20180_s1 + $0x1] ss:$8 sm:$0xf]  ;;  %15096 = vset.pattern.permute.xlu0 %v15144_v43  ;;  %vm230_vm6 = vcmask 31744  }
   0x3   :  { %v178_v21 = vperm.slane %v15050_v20, 0  ;;  %v180_v46 = vperm.slane %v15050_v20, 2  ;;  %v179_v47 = vperm.slane %v15050_v20, 1  ;;  %55 = vst [vmem:[#allocation3] sm:$0xff] %v15145_v48  ;;  %v181_v57 = vperm.slane %v15050_v20, 3  ;;  %s15150_s13 = smov 17  }
   0x4   :  { %56 = vst [vmem:[#allocation3 + $0x48] sm:$0xff] %v15145_v48  ;;  %v98_v59 = vld [vmem:[%s20181_s2] sm:$0xf]  ;;  %s15147_s2 = smov 124   ;;  %vm225_vm7 = vcmask 130048   ;;  %vm159_vm8 = vcmask 908288  }
   0x5   :  { %182 = vrot.lane.b32.xlu2 %v178_v21, %s15143_s18  ;;  %57 = vst [vmem:[#allocation3 + $0x18] sm:$0xff] %v15145_v48  ;;  %v111_v0 = vld [vmem:[%s20182_s3] sm:$0xf]  ;;  %s15151_s14 = smov 120   ;;  %s15152_s15 = smov 15   ;;  %vm1706_vm9 = vcmask 924672  }
   0x6   :  { %s15153_s17 = smov 127   ;;  %vm966_vm10 = vcmask 138240   ;;  %s15154_s20 = smov 116   ;;  %vm1739_vm11 = vcmask 121856   ;;  %vm2487_vm12 = vcmask 1039360   ;;  %vm2520_vm13 = vcmask 7168  }
   0x7   :  { %v15098_v18 = vpop.eup %15097  ;;  %s15155_s21 = smov 1   ;;  %s15157_s30 = smov 104   ;;  %vm7179_vm14 = vcmask 1045504  }
   0x8   :  { %v73_v19 = vmul.f32 512.0, %v15098_v18  ;;  %vm77_vm1 = vweird.f32 %v15098_v18  ;;  %v15261_v51 = vld [vmem:[#allocation3 + $0x40] sm:$0xf]  ;;  %s15158_s16 = smov 100   ;;  %s15160_s26 = smov 114  }
   0x9   :  { %v38_v2 = vld.sshfl [vmem:[#allocation1] sm:$0xff pattern:$0x75316420]  ;;  %v39_v3 = vld.sshfl [vmem:[#allocation1 + $0x8] sm:$0xff pattern:$0x75316420] }
   0xa   :  { %42 = vst [vmem:[#allocation2 + $0x30] sm:$0xf] %v38_v2  ;;  %v74_v22 = vsub.f32 1.0, %v73_v19  ;;  %v15275_v2 = vld [vmem:[%s20183_s4] sm:$0xff]  ;;  %s15162_s27 = smov 72  }
   0xb   :  { %43 = vst [vmem:[#allocation2] sm:$0xf] %v39_v3 }
   0xc   :  { %47 = vst [vmem:[#allocation1] ss:$2 sm:$0xff] %v15049_v1  ;;  %v75_v23 = vmul.f32 %v15098_v18, %v74_v22 }
   0xd   :  { %184 = vrot.lane.b32.xlu2 %v179_v47, %s15143_s18 }
   0xe   :  { %v76_v24 = vadd.f32 %v15098_v18, %v75_v23 }
  0x10   :  { %v15247_v25 = vsel %vm77_vm1, %v15098_v18, %v76_v24 }
  0x11   :  { %v15227_v4 = vld [vmem:[#allocation2 + $0x30] sm:$0xf]  ;;  %20206 = vst [vmem:[#allocation4_spill] sm:$0xff] %v15247_v25 }
  0x12   :  { %v15229_v5 = vld [vmem:[#allocation2] sm:$0xf]  ;;  %v63_v8 = vsel %vm62_vm0, %v15227_v4, 0.0 }
  0x13   :  { %v48_v6 = vld.sshfl [vmem:[#allocation1] sm:$0xff pattern:$0x75316420]  ;;  %v49_v7 = vld.sshfl [vmem:[#allocation1 + $0x8] sm:$0xff pattern:$0x75316420] }
  0x14   :  { %52 = vst [vmem:[#allocation2 + $0x58] sm:$0xf] %v48_v6  ;;  %v64_v9 = vsel %vm62_vm0, %v15229_v5, 0.0 }
  0x15   :  { %53 = vst [vmem:[#allocation2 + $0x18] sm:$0xf] %v49_v7  ;;  %v65_v10 = vadd.f32 %v64_v9, %v63_v8 }
  0x1b   :  { %v15235_v11 = vld [vmem:[#allocation2 + $0x58] sm:$0xf] }
  0x1c   :  { %v15237_v12 = vld [vmem:[#allocation2 + $0x18] sm:$0xf]  ;;  %v66_v13 = vsel %vm62_vm0, %v15235_v11, 0.0 }
  0x1d   :  { %v67_v14 = vadd.f32 %v66_v13, %v65_v10  ;;  %v68_v15 = vsel %vm62_vm0, %v15237_v12, 0.0 }
  0x1f   :  { %v69_v16 = vadd.f32 %v68_v15, %v67_v14 }
  0x21   :  { %70 = vadd.xlane.f32.xlu0 %v69_v16 }
  0x5f   :  { %v183_v50 = vpop.permute.xlu2 %182 }
  0x60   :  { %v199_v52 = vmul.f32 %v183_v50, %v15261_v51 }
  0x62   :  { %215 = vrot.lane.b32.xlu2 %v199_v52, %s15146_s19 }
  0x67   :  { %v185_v3 = vpop.permute.xlu2 %184 }
  0x68   :  { %v191_v22 = vsel %vm190_vm5, %v183_v50, %v185_v3 }
  0x6a   :  { %188 = vrot.lane.b32.xlu2 %v181_v57, %s15143_s18 }
  0x94   :  { %v71_v26 = vpop.xlane.xlu0 %70 }
  0x95   :  { %v79_v27 = vmul.f32 %v15247_v25, %v71_v26 }
  0x97   :  { %v80_v28 = vsub.f32 %v15227_v4, %v79_v27  ;;  %v81_v29 = vsub.f32 %v15229_v5, %v79_v27  ;;  %v82_v30 = vsub.f32 %v15235_v11, %v79_v27  ;;  %v83_v31 = vsub.f32 %v15237_v12, %v79_v27 }
  0x99   :  { %v84_v32 = vmul.f32 %v80_v28, %v80_v28  ;;  %v85_v33 = vmul.f32 %v81_v29, %v81_v29  ;;  %v86_v34 = vmul.f32 %v82_v30, %v82_v30  ;;  %v87_v35 = vmul.f32 %v83_v31, %v83_v31  ;;  %v145_v31 = vld [vmem:[%s20180_s1] ss:$8 sm:$0xf] }
  0x9b   :  { %v88_v36 = vsel %vm62_vm0, %v84_v32, 0.0  ;;  %v89_v37 = vsel %vm62_vm0, %v85_v33, 0.0  ;;  %v91_v39 = vsel %vm62_vm0, %v86_v34, 0.0  ;;  %v93_v41 = vsel %vm62_vm0, %v87_v35, 0.0  ;;  %v15326_v33 = vld [vmem:[%s20183_s4 + $0x8] sm:$0x3] }
  0x9c   :  { %v90_v38 = vadd.f32 %v89_v37, %v88_v36  ;;  %v148_v34 = vperm.slane %v145_v31, 1  ;;  %v147_v36 = vperm.slane %v145_v31, 0  ;;  %v149_v37 = vperm.slane %v145_v31, 2 }
  0x9e   :  { %v92_v40 = vadd.f32 %v91_v39, %v90_v38  ;;  %v150_v38 = vperm.slane %v145_v31, 3  ;;  %v15339_v39 = vld [vmem:[%s20180_s1 + $0x2] ss:$8 sm:$0xf] }
  0xa0   :  { %v94_v42 = vadd.f32 %v93_v41, %v92_v40  ;;  %v1694_v40 = vperm.slane %v15339_v39, 0  ;;  %v1696_v41 = vperm.slane %v15339_v39, 2 }
  0xa2   :  { %95 = vadd.xlane.f32.xlu0 %v94_v42 }
  0xb6   :  { %186 = vrot.lane.b32.xlu0 %v180_v46, %s15143_s18 }
  0xbc   :  { %v216_v13 = vpop.permute.xlu2 %215 }
  0xc4   :  { %v189_v20 = vpop.permute.xlu2 %188 }
 0x115   :  { %v96_v44 = vpop.xlane.xlu0 %95 }
 0x116   :  { %v97_v45 = vmul.f32 %v96_v44, %v15247_v25 }
 0x118   :  { %v99_v49 = vadd.f32 1e-05, %v97_v45 }
 0x11a   :  { %15099 = vrsqrt.f32 %v99_v49  ;;  %vm106_vm3 = vweird.f32 %v99_v49 }
 0x120   :  { %v15100_v53 = vpop.eup %15099 }
 0x121   :  { %v101_v54 = vmul.f32 %v15100_v53, %v99_v49  ;;  %vm107_vm2 = vweird.f32 %v15100_v53 }
 0x122   :  { %vm108_vm4 = vmor %vm106_vm3, %vm107_vm2 }
 0x123   :  { %v102_v55 = vmul.f32 %v15100_v53, %v101_v54 }
 0x125   :  { %v103_v56 = vmul.f32 0.5, %v102_v55 }
 0x127   :  { %v104_v58 = vsub.f32 1.5, %v103_v56 }
 0x129   :  { %v105_v60 = vmul.f32 %v15100_v53, %v104_v58 }
 0x12b   :  { %v109_v61 = vsel %vm108_vm4, %v15100_v53, %v105_v60 }
 0x12c   :  { %v110_v62 = vmul.f32 %v109_v61, %v98_v59 }
 0x12e   :  { %116 = vperm.xlu1 %15094, %v110_v62   ;;  %v112_v63 = vmul.f32 %v110_v62, %v79_v27 }
 0x130   :  { %v113_v1 = vsub.f32 %v111_v0, %v112_v63 }
 0x136   :  { %125 = vperm.xlu1 %15094, %v113_v1  }
 0x13e   :  { %206 = vrot.lane.b32.xlu1 %v15275_v2, %s15147_s2 }
 0x1a0   :  { %v117_v6 = vpop.permute.xlu1 %116 }
 0x1a1   :  { %v119_v7 = vmul.f32 %v117_v6, %v15227_v4  ;;  %v120_v8 = vmul.f32 %v117_v6, %v15229_v5  ;;  %v121_v9 = vmul.f32 %v117_v6, %v15235_v11  ;;  %v122_v10 = vmul.f32 %v117_v6, %v15237_v12  ;;  %v187_v12 = vpop.permute.xlu0 %186 }
 0x1a2   :  { %v192_v21 = vsel %vm190_vm5, %v185_v3, %v187_v12  ;;  %v193_v23 = vsel %vm190_vm5, %v187_v12, %v189_v20 }
 0x1a8   :  { %v126_v14 = vpop.permute.xlu1 %125 }
 0x1a9   :  { %v15283_v15 = vadd.f32 %v126_v14, %v119_v7  ;;  %v15285_v16 = vadd.f32 %v126_v14, %v120_v8  ;;  %v15287_v17 = vadd.f32 %v126_v14, %v121_v9  ;;  %v15289_v18 = vadd.f32 %v126_v14, %v122_v10 }
 0x1ab   :  { %v20193_v19 = vmax.f32 %v15283_v15, 0.0  ;;  %v20192_v4 = vmax.f32 %v15285_v16, 0.0  ;;  %v20191_v5 = vmax.f32 %v15287_v17, 0.0  ;;  %v20190_v11 = vmax.f32 %v15289_v18, 0.0 }
 0x1ad   :  { %136 = vst [vmem:[#allocation3 + $0x30] sm:$0xf] %v20193_v19 }
 0x1ae   :  { %137 = vst [vmem:[#allocation3 + $0x8] sm:$0xf] %v20192_v4 }
 0x1af   :  { %138 = vst [vmem:[#allocation3 + $0x58] sm:$0xf] %v20191_v5 }
 0x1b0   :  { %139 = vst [vmem:[#allocation3 + $0x38] sm:$0xf] %v20190_v11  ;;  %v207_v42 = vpop.permute.xlu1 %206 }
 0x1b1   :  { %v231_v43 = vsel %vm230_vm6, %v207_v42, 0 }
 0x1b2   :  { %v15346_v44 = vand.u32 4294901760, %v231_v43 }
 0x1b4   :  { %v15306_v24 = vld [vmem:[#allocation3 + $0x30] sm:$0xf]  ;;  %v15349_v45 = vsub.f32 %v231_v43, %v15346_v44 }
 0x1b5   :  { %v200_v26 = vmul.f32 %v191_v22, %v15306_v24  ;;  %v15309_v27 = vld [vmem:[#allocation3 + $0x8] sm:$0xf] }
 0x1b6   :  { %v15311_v28 = vld [vmem:[#allocation3 + $0x58] sm:$0xf]  ;;  %v201_v29 = vmul.f32 %v192_v21, %v15309_v27  ;;  %v15352_v46 = vand.u32 4294901760, %v15349_v45 }
 0x1b7   :  { %217 = vrot.lane.b32.xlu1 %v200_v26, %s15146_s19  ;;  %v202_v30 = vmul.f32 %v193_v23, %v15311_v28  ;;  %v15321_v32 = vld [vmem:[#allocation3 + $0x38] sm:$0xf] }
 0x1b8   :  { %219 = vrot.lane.b32.xlu2 %v201_v29, %s15146_s19  ;;  %v203_v35 = vmul.f32 %v189_v20, %v15321_v32  ;;  %v263_v49 = vsub.f32 %v15349_v45, %v15352_v46 }
 0x1b9   :  { %221 = vrot.lane.b32.xlu0 %v202_v30, %s15146_s19 }
 0x1ba   :  { %v15360_v58 = vand.u32 4294901760, %v263_v49 }
 0x1bf   :  { %208 = vrot.lane.b32.xlu1 %v15326_v33, %s15147_s2  ;;  %s15156_s2 = smov 108  }
 0x1c0   :  { %153 = vrot.lane.b32.xlu2 %v148_v34, %s15148_s29 }
 0x1c1   :  { %223 = vrot.lane.b32.xlu0 %v203_v35, %s15146_s19 }
 0x1c7   :  { %151 = vrot.lane.b32.xlu1 %v147_v36, %s15148_s29 }
 0x1cf   :  { %155 = vrot.lane.b32.xlu1 %v149_v37, %s15148_s29 }
 0x1d7   :  { %157 = vrot.lane.b32.xlu1 %v150_v38, %s15148_s29 }
 0x1df   :  { %1698 = vrot.lane.b32.xlu1 %v1694_v40, %s15149_s12 }
 0x1e7   :  { %1702 = vrot.lane.b32.xlu1 %v1696_v41, %s15149_s12 }
 0x212   :  { %v220_v47 = vpop.permute.xlu2 %219 }
 0x21a   :  { %v154_v20 = vpop.permute.xlu2 %153 }
 0x229   :  { %v218_v48 = vpop.permute.xlu1 %217 }
 0x22a   :  { %v226_v50 = vsel %vm225_vm7, %v216_v13, %v218_v48  ;;  %v227_v52 = vsel %vm225_vm7, %v218_v48, %v220_v47 }
 0x22b   :  { %v235_v53 = vsel %vm62_vm0, %v226_v50, 0  ;;  %v237_v54 = vsel %vm62_vm0, %v227_v52, 0  ;;  %v222_v57 = vpop.permute.xlu0 %221  ;;  %v1695_v52 = vperm.slane %v15339_v39, 1 }
 0x22c   :  { %v258_v55 = vand.u32 4294901760, %v235_v53  ;;  %v435_v56 = vand.u32 4294901760, %v237_v54  ;;  %v228_v61 = vsel %vm225_vm7, %v220_v47, %v222_v57 }
 0x22d   :  { %v239_v7 = vsel %vm62_vm0, %v228_v61, 0  ;;  %v971_v61 = vsel %vm230_vm6, %v15275_v2, 0 }
 0x22e   :  { %v470_v59 = vsub.f32 %v237_v54, %v435_v56  ;;  %259 = vmatpush.msra.mxu0 %v258_v55  ;;  %352 = vmatpush.msra.mxu3 %v258_v55  ;;  %v293_v60 = vsub.f32 %v235_v53, %v258_v55  ;;  %v15373_v14 = vand.u32 4294901760, %v239_v7 }
 0x22f   :  { %265 = vmatmul.f32.vlgmr.msra.gmra.mxu0 %v15360_v58  ;;  %356 = vmatmul.f32.vlgmr.msra.gmra.mxu3 %v15352_v46 }
 0x230   :  { %324 = vmatpush.msra.mxu2 %v293_v60  ;;  %v294_v62 = vand.u32 4294901760, %v293_v60  ;;  %v471_v63 = vand.u32 4294901760, %v470_v59  ;;  %v647_v26 = vsub.f32 %v239_v7, %v15373_v14 }
 0x231   :  { %327 = vmatmul.f32.vlgmr.msra.gmra.mxu2 %v15349_v45  ;;  %v209_v0 = vpop.permute.xlu1 %208 }
 0x232   :  { %v233_v1 = vsel %vm230_vm6, %v209_v0, 0  ;;  %436 = vmatpush.msrb.mxu2 %v435_v56  ;;  %384 = vmatpush.msrb.mxu0 %v294_v62  ;;  %v295_v3 = vsub.f32 %v293_v60, %v294_v62  ;;  %v472_v6 = vsub.f32 %v470_v59, %v471_v63  ;;  %v648_v37 = vand.u32 4294901760, %v647_v26 }
 0x233   :  { %v15368_v8 = vand.u32 4294901760, %v233_v1  ;;  %v224_v21 = vpop.permute.xlu0 %223 }
 0x234   :  { %561 = vmatpush.msra.mxu2 %v471_v63  ;;  %501 = vmatpush.msra.mxu0 %v470_v59  ;;  %v296_v9 = vand.u32 4294901760, %v295_v3  ;;  %v473_v10 = vand.u32 4294901760, %v472_v6  ;;  %v229_v31 = vsel %vm225_vm7, %v222_v57, %v224_v21  ;;  %v649_v42 = vsub.f32 %v647_v26, %v648_v37 }
 0x235   :  { %v15371_v13 = vsub.f32 %v233_v1, %v15368_v8  ;;  %v241_v36 = vsel %vm62_vm0, %v229_v31, 0  ;;  %v1697_v59 = vperm.slane %v15339_v39, 3  ;;  %v15469_v63 = vand.u32 4294901760, %v971_v61 }
 0x236   :  { %297 = vmatpush.msra.mxu1 %v296_v9  ;;  %474 = vmatpush.msrb.mxu3 %v473_v10  ;;  %v789_v38 = vand.u32 4294901760, %v241_v36  ;;  %v650_v48 = vand.u32 4294901760, %v649_v42  ;;  %v973_v1 = vsel %vm230_vm6, %v15326_v33, 0 }
 0x237   :  { %299 = vmatmul.f32.vlgmr.msra.gmra.mxu1 %v15346_v44  ;;  %v15377_v12 = vand.u32 4294901760, %v15371_v13  ;;  %v15472_v0 = vsub.f32 %v971_v61, %v15469_v63  ;;  %v15481_v9 = vand.u32 4294901760, %v973_v1 }
 0x238   :  { %587 = vmatpush.msra.mxu3 %v435_v56  ;;  %410 = vmatpush.msrb.mxu1 %v258_v55  ;;  %v824_v47 = vsub.f32 %v241_v36, %v789_v38 }
 0x239   :  { %332 = vmatmul.f32.gmra.mxu2 %v15371_v13  ;;  %v152_v22 = vpop.permute.xlu1 %151  ;;  %v271_v23 = vsub.f32 %v15371_v13, %v15377_v12  ;;  %362 = vmatmul.f32.gmra.mxu3 %v15377_v12  ;;  %v15478_v7 = vand.u32 4294901760, %v15472_v0 }
 0x23a   :  { %529 = vmatpush.msra.mxu1 %v435_v56  ;;  %v168_v29 = vmul.f32 %v152_v22, %v15261_v51  ;;  %v160_v30 = vsel %vm159_vm8, %v152_v22, %v154_v20  ;;  %v825_v49 = vand.u32 4294901760, %v824_v47 }
 0x23b   :  { %v15387_v34 = vand.u32 4294901760, %v271_v23  ;;  %v169_v35 = vmul.f32 %v160_v30, %v15306_v24 }
 0x23c   :  { %956 = vrot.lane.b32.xlu2 %v168_v29, %s15150_s13  ;;  %v826_v55 = vsub.f32 %v824_v47, %v825_v49 }
 0x23d   :  { %273 = vmatmul.f32.gmra.mxu0 %v15387_v34  ;;  %958 = vrot.lane.b32.xlu0 %v169_v35, %s15150_s13 }
 0x23e   :  { %v827_v56 = vand.u32 4294901760, %v826_v55 }
 0x23f   :  { %303 = vmatmul.f32.gmra.mxu1 %v15368_v8 }
 0x241   :  { %v156_v40 = vpop.permute.xlu1 %155  ;;  %442 = vmatmul.f32.vlgmr.msrb.gmra.mxu2 %v15360_v58  ;;  %476 = vmatmul.f32.vlgmr.msrb.gmra.mxu3 %v15346_v44 }
 0x242   :  { %v161_v41 = vsel %vm159_vm8, %v154_v20, %v156_v40  ;;  %678 = vmatpush.msrb.mxu2 %v647_v26  ;;  %706 = vmatpush.msrb.mxu3 %v15373_v14 }
 0x243   :  { %v170_v43 = vmul.f32 %v161_v41, %v15309_v27 }
 0x245   :  { %386 = vmatmul.f32.vlgmr.msrb.gmra.mxu0 %v15346_v44  ;;  %960 = vrot.lane.b32.xlu2 %v170_v43, %s15150_s13 }
 0x246   :  { %613 = vmatpush.msrb.mxu0 %v15373_v14 }
 0x247   :  { %412 = vmatmul.f32.vlgmr.msrb.gmra.mxu1 %v15346_v44 }
 0x248   :  { %651 = vmatpush.msrb.mxu1 %v650_v48 }
 0x249   :  { %v158_v50 = vpop.permute.xlu1 %157  ;;  %450 = vmatmul.f32.gmra.mxu2 %v15387_v34  ;;  %480 = vmatmul.f32.gmra.mxu3 %v15368_v8 }
 0x24a   :  { %v162_v53 = vsel %vm159_vm8, %v156_v40, %v158_v50  ;;  %v172_v57 = vmul.f32 %v158_v50, %v15321_v32 }
 0x24b   :  { %v171_v54 = vmul.f32 %v162_v53, %v15311_v28 }
 0x24d   :  { %390 = vmatmul.f32.gmra.mxu0 %v15368_v8  ;;  %1700 = vrot.lane.b32.xlu2 %v1695_v52, %s15149_s12 }
 0x24e   :  { %962 = vrot.lane.b32.xlu0 %v171_v54, %s15150_s13 }
 0x24f   :  { %416 = vmatmul.f32.gmra.mxu1 %v15368_v8 }
 0x251   :  { %563 = vmatmul.f32.vlgmr.msra.gmra.mxu2 %v15346_v44  ;;  %589 = vmatmul.f32.vlgmr.msra.gmra.mxu3 %v15346_v44  ;;  %v1699_v39 = vpop.permute.xlu1 %1698 }
 0x252   :  { %790 = vmatpush.msra.mxu2 %v789_v38  ;;  %828 = vmatpush.msra.mxu3 %v827_v56 }
 0x255   :  { %504 = vmatmul.f32.vlgmr.msra.gmra.mxu0 %v15349_v45  ;;  %1720 = vrot.lane.b32.xlu2 %v15275_v2, %s15151_s14 }
 0x256   :  { %738 = vmatpush.msra.mxu0 %v648_v37  ;;  %964 = vrot.lane.b32.xlu0 %v172_v57, %s15150_s13 }
 0x257   :  { %533 = vmatmul.f32.vlgmr.msra.gmra.mxu1 %v15352_v46 }
 0x258   :  { %764 = vmatpush.msra.mxu1 %v15373_v14  ;;  %v15487_v14 = vsub.f32 %v973_v1, %v15481_v9 }
 0x259   :  { %567 = vmatmul.f32.gmra.mxu2 %v15368_v8  ;;  %593 = vmatmul.f32.gmra.mxu3 %v15368_v8  ;;  %v1703_v10 = vpop.permute.xlu1 %1702 }
 0x25d   :  { %509 = vmatmul.f32.gmra.mxu0 %v15371_v13  ;;  %1704 = vrot.lane.b32.xlu2 %v1697_v59, %s15149_s12 }
 0x25f   :  { %539 = vmatmul.f32.gmra.mxu1 %v15377_v12 }
 0x261   :  { %681 = vmatmul.f32.vlgmr.msrb.gmra.mxu2 %v15349_v45  ;;  %710 = vmatmul.f32.vlgmr.msrb.gmra.mxu3 %v15352_v46 }
 0x262   :  { %915 = vmatpush.msrb.mxu2 %v825_v49  ;;  %941 = vmatpush.msrb.mxu3 %v789_v38 }
 0x265   :  { %619 = vmatmul.f32.vlgmr.msrb.gmra.mxu0 %v15360_v58 }
 0x266   :  { %855 = vmatpush.msrb.mxu0 %v824_v47 }
 0x267   :  { %653 = vmatmul.f32.vlgmr.msrb.gmra.mxu1 %v15346_v44 }
 0x268   :  { %883 = vmatpush.msrb.mxu1 %v789_v38 }
 0x269   :  { %686 = vmatmul.f32.gmra.mxu2 %v15371_v13  ;;  %716 = vmatmul.f32.gmra.mxu3 %v15377_v12 }
 0x26d   :  { %627 = vmatmul.f32.gmra.mxu0 %v15387_v34 }
 0x26f   :  { %657 = vmatmul.f32.gmra.mxu1 %v15368_v8 }
 0x271   :  { %796 = vmatmul.f32.vlgmr.msra.gmra.mxu2 %v15360_v58  ;;  %830 = vmatmul.f32.vlgmr.msra.gmra.mxu3 %v15346_v44  ;;  %v1715_v58 = vmul.f32 %v1699_v39, %v15261_v51 }
 0x273   :  { %1729 = vrot.lane.b32.xlu0 %v1715_v58, %s15152_s15 }
 0x275   :  { %740 = vmatmul.f32.vlgmr.msra.gmra.mxu0 %v15346_v44 }
 0x277   :  { %766 = vmatmul.f32.vlgmr.msra.gmra.mxu1 %v15346_v44 }
 0x279   :  { %804 = vmatmul.f32.gmra.mxu2 %v15387_v34  ;;  %834 = vmatmul.f32.gmra.mxu3 %v15368_v8  ;;  %v15501_v34 = vand.u32 4294901760, %v15487_v14 }
 0x27b   :  { %1722 = vrot.lane.b32.xlu0 %v15326_v33, %s15151_s14  ;;  %v1011_v40 = vsub.f32 %v15487_v14, %v15501_v34 }
 0x27d   :  { %744 = vmatmul.f32.gmra.mxu0 %v15368_v8  ;;  %v15512_v53 = vand.u32 4294901760, %v1011_v40 }
 0x27f   :  { %770 = vmatmul.f32.gmra.mxu1 %v15368_v8 }
 0x281   :  { %917 = vmatmul.f32.vlgmr.msrb.gmra.mxu2 %v15346_v44  ;;  %943 = vmatmul.f32.vlgmr.msrb.gmra.mxu3 %v15346_v44  ;;  %v15459_v44 = vld [vmem:[%s20180_s1 + $0x3] ss:$8 sm:$0xf] }
 0x282   :  { %v2476_v47 = vperm.slane %v15459_v44, 1 }
 0x285   :  { %858 = vmatmul.f32.vlgmr.msrb.gmra.mxu0 %v15349_v45  ;;  %v2475_v45 = vperm.slane %v15459_v44, 0 }
 0x287   :  { %887 = vmatmul.f32.vlgmr.msrb.gmra.mxu1 %v15352_v46  ;;  %2479 = vrot.lane.b32.xlu0 %v2475_v45, %s15153_s17  ;;  %v2477_v46 = vperm.slane %v15459_v44, 2 }
 0x289   :  { %921 = vmatmul.f32.gmra.mxu2 %v15368_v8  ;;  %947 = vmatmul.f32.gmra.mxu3 %v15368_v8 }
 0x28d   :  { %863 = vmatmul.f32.gmra.mxu0 %v15371_v13  ;;  %v1003_v13 = vsub.f32 %v15472_v0, %v15478_v7 }
 0x28f   :  { %893 = vmatmul.f32.gmra.mxu1 %v15377_v12  ;;  %2483 = vrot.lane.b32.xlu0 %v2477_v46, %s15153_s17  ;;  %v15495_v26 = vand.u32 4294901760, %v1003_v13  ;;  %v2478_v46 = vperm.slane %v15459_v44, 3 }
 0x296   :  { %v957_v60 = vpop.permute.xlu2 %956 }
 0x29f   :  { %v15467_v62 = vpop.permute.xlu2 %960 }
 0x2a7   :  { %v1701_v3 = vpop.permute.xlu2 %1700 }
 0x2a8   :  { %v1707_v6 = vsel %vm1706_vm9, %v1699_v39, %v1701_v3  ;;  %v1708_v12 = vsel %vm1706_vm9, %v1701_v3, %v1703_v10 }
 0x2a9   :  { %v1716_v8 = vmul.f32 %v1707_v6, %v15306_v24  ;;  %v1717_v31 = vmul.f32 %v1708_v12, %v15309_v27 }
 0x2ab   :  { %1731 = vrot.lane.b32.xlu1 %v1716_v8, %s15152_s15 }
 0x2af   :  { %v959_v20 = vpop.permute.xlu0 %958  ;;  %v15490_v21 = vpop.permute.xlu2 %1720 }
 0x2b0   :  { %v967_v22 = vsel %vm966_vm10, %v957_v60, %v959_v20  ;;  %v968_v23 = vsel %vm966_vm10, %v959_v20, %v15467_v62  ;;  %v15528_v60 = vpop.f32.mrf.mxu0 }
 0x2b1   :  { %v975_v29 = vsel %vm62_vm0, %v967_v22, 0  ;;  %v977_v30 = vsel %vm62_vm0, %v968_v23, 0 }
 0x2b2   :  { %v998_v35 = vand.u32 4294901760, %v975_v29  ;;  %v1175_v36 = vand.u32 4294901760, %v977_v30  ;;  %v15540_v44 = vpop.f32.mrf.mxu3 }
 0x2b3   :  { %1733 = vrot.lane.b32.xlu1 %v1717_v31, %s15152_s15 }
 0x2b4   :  { %v1033_v37 = vsub.f32 %v975_v29, %v998_v35  ;;  %v1210_v38 = vsub.f32 %v977_v30, %v1175_v36  ;;  %999 = vmatpush.msra.mxu0 %v998_v35  ;;  %1092 = vmatpush.msra.mxu3 %v998_v35  ;;  %v15536_v8 = vpop.f32.mrf.mxu1  ;;  %v15546_v22 = vpop.f32.mrf.mxu2 }
 0x2b5   :  { %1005 = vmatmul.f32.vlgmr.msra.gmra.mxu0 %v15495_v26  ;;  %1096 = vmatmul.f32.vlgmr.msra.gmra.mxu3 %v15478_v7 }
 0x2b6   :  { %1064 = vmatpush.msra.mxu2 %v1033_v37  ;;  %v1034_v41 = vand.u32 4294901760, %v1033_v37  ;;  %v1211_v42 = vand.u32 4294901760, %v1210_v38 }
 0x2b7   :  { %1067 = vmatmul.f32.vlgmr.msra.gmra.mxu2 %v15472_v0  ;;  %v1705_v43 = vpop.permute.xlu2 %1704 }
 0x2b8   :  { %1176 = vmatpush.msrb.mxu2 %v1175_v36  ;;  %v1709_v48 = vsel %vm1706_vm9, %v1703_v10, %v1705_v43  ;;  %1124 = vmatpush.msrb.mxu0 %v1034_v41  ;;  %v1035_v49 = vsub.f32 %v1033_v37, %v1034_v41  ;;  %v1212_v52 = vsub.f32 %v1210_v38, %v1211_v42 }
 0x2b9   :  { %v1718_v50 = vmul.f32 %v1709_v48, %v15311_v28  ;;  %v1719_v57 = vmul.f32 %v1705_v43, %v15321_v32 }
 0x2ba   :  { %1301 = vmatpush.msra.mxu2 %v1211_v42  ;;  %1241 = vmatpush.msra.mxu0 %v1210_v38  ;;  %v1036_v54 = vand.u32 4294901760, %v1035_v49  ;;  %v1213_v55 = vand.u32 4294901760, %v1212_v52  ;;  %v15542_v20 = vpop.f32.mrf.mxu0 }
 0x2bb   :  { %2481 = vrot.lane.b32.xlu1 %v2476_v47, %s15153_s17  ;;  %1735 = vrot.lane.b32.xlu2 %v1718_v50, %s15152_s15 }
 0x2bc   :  { %1037 = vmatpush.msra.mxu1 %v1036_v54  ;;  %1214 = vmatpush.msrb.mxu3 %v1213_v55  ;;  %v15549_v31 = vpop.f32.mrf.mxu1  ;;  %v15559_v37 = vpop.f32.mrf.mxu2 }
 0x2bd   :  { %1013 = vmatmul.f32.gmra.mxu0 %v15512_v53  ;;  %1039 = vmatmul.f32.vlgmr.msra.gmra.mxu1 %v15469_v63 }
 0x2be   :  { %1102 = vmatmul.f32.gmra.mxu3 %v15501_v34  ;;  %1150 = vmatpush.msrb.mxu1 %v998_v35  ;;  %v15552_v35 = vpop.f32.mrf.mxu3 }
 0x2bf   :  { %1327 = vmatpush.msra.mxu3 %v1175_v36  ;;  %1072 = vmatmul.f32.gmra.mxu2 %v15487_v14 }
 0x2c0   :  { %1269 = vmatpush.msra.mxu1 %v1175_v36  ;;  %v963_v56 = vpop.permute.xlu0 %962 }
 0x2c1   :  { %v969_v59 = vsel %vm966_vm10, %v15467_v62, %v963_v56 }
 0x2c2   :  { %v979_v39 = vsel %vm62_vm0, %v969_v59, 0  ;;  %v15556_v36 = vpop.f32.mrf.mxu0 }
 0x2c3   :  { %v1352_v58 = vand.u32 4294901760, %v979_v39  ;;  %2501 = vrot.lane.b32.xlu1 %v15275_v2, %s15154_s20  ;;  %1737 = vrot.lane.b32.xlu2 %v1719_v57, %s15152_s15 }
 0x2c4   :  { %v15564_v38 = vpop.f32.mrf.mxu1  ;;  %v15571_v42 = vpop.f32.mrf.mxu2 }
 0x2c5   :  { %v1387_v45 = vsub.f32 %v979_v39, %v1352_v58  ;;  %1126 = vmatmul.f32.vlgmr.msrb.gmra.mxu0 %v15469_v63  ;;  %1043 = vmatmul.f32.gmra.mxu1 %v15481_v9 }
 0x2c6   :  { %1216 = vmatmul.f32.vlgmr.msrb.gmra.mxu3 %v15469_v63  ;;  %1353 = vmatpush.msrb.mxu0 %v1352_v58  ;;  %v15566_v40 = vpop.f32.mrf.mxu3 }
 0x2c7   :  { %1446 = vmatpush.msrb.mxu3 %v1352_v58  ;;  %v1388_v61 = vand.u32 4294901760, %v1387_v45  ;;  %1182 = vmatmul.f32.vlgmr.msrb.gmra.mxu2 %v15495_v26 }
 0x2c8   :  { %v965_v62 = vpop.permute.xlu0 %964  ;;  %1418 = vmatpush.msrb.mxu2 %v1387_v45 }
 0x2c9   :  { %v970_v1 = vsel %vm966_vm10, %v963_v56, %v965_v62  ;;  %v1389_v3 = vsub.f32 %v1387_v45, %v1388_v61 }
 0x2ca   :  { %v981_v6 = vsel %vm62_vm0, %v970_v1, 0  ;;  %v15569_v41 = vpop.f32.mrf.mxu0 }
 0x2cb   :  { %v1529_v10 = vand.u32 4294901760, %v981_v6  ;;  %2485 = vrot.lane.b32.xlu1 %v2478_v46, %s15153_s17  ;;  %v1390_v13 = vand.u32 4294901760, %v1389_v3 }
 0x2cc   :  { %v15577_v43 = vpop.f32.mrf.mxu1  ;;  %v15583_v49 = vpop.f32.mrf.mxu2 }
 0x2cd   :  { %v1564_v12 = vsub.f32 %v981_v6, %v1529_v10  ;;  %1130 = vmatmul.f32.gmra.mxu0 %v15481_v9  ;;  %1152 = vmatmul.f32.vlgmr.msrb.gmra.mxu1 %v15469_v63 }
 0x2ce   :  { %1220 = vmatmul.f32.gmra.mxu3 %v15481_v9  ;;  %1391 = vmatpush.msrb.mxu1 %v1390_v13  ;;  %v15579_v47 = vpop.f32.mrf.mxu3 }
 0x2cf   :  { %v1565_v23 = vand.u32 4294901760, %v1564_v12  ;;  %1190 = vmatmul.f32.gmra.mxu2 %v15512_v53  ;;  %20207 = vst [vmem:[#allocation5_spill] sm:$0xff] %v15579_v47 }
 0x2d1   :  { %v1566_v29 = vsub.f32 %v1564_v12, %v1565_v23 }
 0x2d2   :  { %v15581_v48 = vpop.f32.mrf.mxu0 }
 0x2d3   :  { %v1567_v30 = vand.u32 4294901760, %v1566_v29 }
 0x2d4   :  { %v15589_v50 = vpop.f32.mrf.mxu1  ;;  %v15598_v55 = vpop.f32.mrf.mxu2 }
 0x2d5   :  { %1244 = vmatmul.f32.vlgmr.msra.gmra.mxu0 %v15472_v0  ;;  %1156 = vmatmul.f32.gmra.mxu1 %v15481_v9  ;;  %20210 = vst [vmem:[#allocation8_spill] sm:$0xff] %v15598_v55 }
 0x2d6   :  { %1329 = vmatmul.f32.vlgmr.msra.gmra.mxu3 %v15469_v63  ;;  %1478 = vmatpush.msra.mxu0 %v1388_v61  ;;  %v15591_v52 = vpop.f32.mrf.mxu3 }
 0x2d7   :  { %1568 = vmatpush.msra.mxu3 %v1567_v30  ;;  %1303 = vmatmul.f32.vlgmr.msra.gmra.mxu2 %v15469_v63  ;;  %20208 = vst [vmem:[#allocation6_spill] sm:$0xff] %v15591_v52 }
 0x2d8   :  { %1530 = vmatpush.msra.mxu2 %v1529_v10 }
 0x2da   :  { %v15594_v54 = vpop.f32.mrf.mxu0 }
 0x2db   :  { %20209 = vst [vmem:[#allocation7_spill] sm:$0xff] %v15594_v54 }
 0x2dc   :  { %v15601_v57 = vpop.f32.mrf.mxu1  ;;  %v15611_v45 = vpop.f32.mrf.mxu2 }
 0x2dd   :  { %1249 = vmatmul.f32.gmra.mxu0 %v15487_v14  ;;  %1273 = vmatmul.f32.vlgmr.msra.gmra.mxu1 %v15478_v7  ;;  %20211 = vst [vmem:[#allocation9_spill] sm:$0xff] %v15601_v57 }
 0x2de   :  { %1333 = vmatmul.f32.gmra.mxu3 %v15481_v9  ;;  %1504 = vmatpush.msra.mxu1 %v1352_v58  ;;  %v15604_v59 = vpop.f32.mrf.mxu3  ;;  %20214 = vst [vmem:[#allocation12_spill] sm:$0xff] %v15611_v45 }
 0x2df   :  { %1307 = vmatmul.f32.gmra.mxu2 %v15481_v9  ;;  %20212 = vst [vmem:[#allocation10_spill] sm:$0xff] %v15604_v59 }
 0x2e2   :  { %v15608_v58 = vpop.f32.mrf.mxu0 }
 0x2e3   :  { %20213 = vst [vmem:[#allocation11_spill] sm:$0xff] %v15608_v58 }
 0x2e4   :  { %v15627_v1 = vpop.f32.mrf.mxu2 }
 0x2e5   :  { %1359 = vmatmul.f32.vlgmr.msrb.gmra.mxu0 %v15495_v26  ;;  %1279 = vmatmul.f32.gmra.mxu1 %v15501_v34  ;;  %v1730_v56 = vpop.permute.xlu0 %1729  ;;  %20218 = vst [vmem:[#allocation16_spill] sm:$0xff] %v15627_v1 }
 0x2e6   :  { %1450 = vmatmul.f32.vlgmr.msrb.gmra.mxu3 %v15478_v7  ;;  %1595 = vmatpush.msrb.mxu0 %v1564_v12  ;;  %v15618_v46 = vpop.f32.mrf.mxu3 }
 0x2e7   :  { %1681 = vmatpush.msrb.mxu3 %v1529_v10  ;;  %1421 = vmatmul.f32.vlgmr.msrb.gmra.mxu2 %v15472_v0  ;;  %20216 = vst [vmem:[#allocation14_spill] sm:$0xff] %v15618_v46 }
 0x2e8   :  { %1655 = vmatpush.msrb.mxu2 %v1565_v23 }
 0x2ed   :  { %1367 = vmatmul.f32.gmra.mxu0 %v15512_v53  ;;  %1393 = vmatmul.f32.vlgmr.msrb.gmra.mxu1 %v15469_v63  ;;  %v1723_v39 = vpop.permute.xlu0 %1722 }
 0x2ee   :  { %1456 = vmatmul.f32.gmra.mxu3 %v15501_v34  ;;  %1623 = vmatpush.msrb.mxu1 %v1529_v10  ;;  %v15640_v3 = vpop.f32.mrf.mxu3 }
 0x2ef   :  { %1426 = vmatmul.f32.gmra.mxu2 %v15487_v14  ;;  %20220 = vst [vmem:[#allocation18_spill] sm:$0xff] %v15640_v3 }
 0x2f5   :  { %1480 = vmatmul.f32.vlgmr.msra.gmra.mxu0 %v15469_v63  ;;  %1397 = vmatmul.f32.gmra.mxu1 %v15481_v9 }
 0x2f6   :  { %1570 = vmatmul.f32.vlgmr.msra.gmra.mxu3 %v15469_v63  ;;  %v15665_v29 = vpop.f32.mrf.mxu3 }
 0x2f7   :  { %1536 = vmatmul.f32.vlgmr.msra.gmra.mxu2 %v15495_v26  ;;  %v15616_v26 = vpop.f32.mrf.mxu1  ;;  %20224 = vst [vmem:[#allocation22_spill] sm:$0xff] %v15665_v29 }
 0x2f8   :  { %20215 = vst [vmem:[#allocation13_spill] sm:$0xff] %v15616_v26 }
 0x2f9   :  { %v15621_v61 = vpop.permute.xlu0 %2479 }
 0x2fa   :  { %v2496_v62 = vmul.f32 %v15621_v61, %v15261_v51 }
 0x2fc   :  { %2510 = vrot.lane.b32.xlu2 %v2496_v62, %s15155_s21 }
 0x2fd   :  { %1484 = vmatmul.f32.gmra.mxu0 %v15481_v9  ;;  %1506 = vmatmul.f32.vlgmr.msra.gmra.mxu1 %v15469_v63 }
 0x2fe   :  { %1574 = vmatmul.f32.gmra.mxu3 %v15481_v9 }
 0x2ff   :  { %1544 = vmatmul.f32.gmra.mxu2 %v15512_v53  ;;  %v15625_v53 = vpop.f32.mrf.mxu0  ;;  %v15638_v51 = vpop.f32.mrf.mxu1 }
 0x300   :  { %20217 = vst [vmem:[#allocation15_spill] sm:$0xff] %v15625_v53 }
 0x301   :  { %20219 = vst [vmem:[#allocation17_spill] sm:$0xff] %v15638_v51 }
 0x304   :  { %2503 = vrot.lane.b32.xlu2 %v15326_v33, %s15154_s20 }
 0x305   :  { %1598 = vmatmul.f32.vlgmr.msrb.gmra.mxu0 %v15472_v0  ;;  %1510 = vmatmul.f32.gmra.mxu1 %v15481_v9  ;;  %v1744_v0 = vsel %vm230_vm6, %v15490_v21, 0 }
 0x306   :  { %1683 = vmatmul.f32.vlgmr.msrb.gmra.mxu3 %v15469_v63 }
 0x307   :  { %1657 = vmatmul.f32.vlgmr.msrb.gmra.mxu2 %v15469_v63  ;;  %v15635_v63 = vand.u32 4294901760, %v1744_v0  ;;  %v15647_v21 = vpop.f32.mrf.mxu0  ;;  %v15658_v13 = vpop.f32.mrf.mxu1 }
 0x308   :  { %20221 = vst [vmem:[#allocation19_spill] sm:$0xff] %v15647_v21 }
 0x309   :  { %v15643_v6 = vsub.f32 %v1744_v0, %v15635_v63  ;;  %20223 = vst [vmem:[#allocation21_spill] sm:$0xff] %v15658_v13 }
 0x30d   :  { %1603 = vmatmul.f32.gmra.mxu0 %v15487_v14  ;;  %1627 = vmatmul.f32.vlgmr.msrb.gmra.mxu1 %v15478_v7  ;;  %v1746_v7 = vsel %vm230_vm6, %v1723_v39, 0  ;;  %v15650_v14 = vpop.f32.mrf.mxu2 }
 0x30e   :  { %1687 = vmatmul.f32.gmra.mxu3 %v15481_v9  ;;  %20222 = vst [vmem:[#allocation20_spill] sm:$0xff] %v15650_v14  ;;  %v15656_v10 = vand.u32 4294901760, %v1746_v7 }
 0x30f   :  { %1661 = vmatmul.f32.gmra.mxu2 %v15481_v9  ;;  %v15654_v9 = vand.u32 4294901760, %v15643_v6  ;;  %v15667_v39 = vpop.f32.mrf.mxu0 }
 0x310   :  { %v15661_v12 = vsub.f32 %v1746_v7, %v15656_v10  ;;  %20225 = vst [vmem:[#allocation23_spill] sm:$0xff] %v15667_v39  ;;  %v15685_v39 = vpop.f32.mrf.mxu3 }
 0x311   :  { %v1776_v23 = vsub.f32 %v15643_v6, %v15654_v9  ;;  %20228 = vst [vmem:[#allocation26_spill] sm:$0xff] %v15685_v39 }
 0x312   :  { %v15676_v7 = vand.u32 4294901760, %v15661_v12 }
 0x313   :  { %v15673_v11 = vand.u32 4294901760, %v1776_v23 }
 0x315   :  { %1633 = vmatmul.f32.gmra.mxu1 %v15501_v34  ;;  %v15670_v62 = vpop.f32.mrf.mxu2  ;;  %v1736_v5 = vpop.permute.xlu2 %1735 }
 0x316   :  { %20226 = vst [vmem:[#allocation24_spill] sm:$0xff] %v15670_v62 }
 0x317   :  { %v15693_v21 = vpop.f32.mrf.mxu0 }
 0x318   :  { %20229 = vst [vmem:[#allocation27_spill] sm:$0xff] %v15693_v21 }
 0x31d   :  { %v1732_v30 = vpop.permute.xlu1 %1731  ;;  %v15695_v53 = vpop.f32.mrf.mxu2 }
 0x31e   :  { %v1740_v34 = vsel %vm1739_vm11, %v1730_v56, %v1732_v30  ;;  %v1784_v56 = vsub.f32 %v15661_v12, %v15676_v7  ;;  %20230 = vst [vmem:[#allocation28_spill] sm:$0xff] %v15695_v53  ;;  %v1738_v46 = vpop.permute.xlu2 %1737 }
 0x31f   :  { %v1748_v0 = vsel %vm62_vm0, %v1740_v34, 0  ;;  %v15682_v34 = vpop.f32.mrf.mxu1 }
 0x320   :  { %v1771_v4 = vand.u32 4294901760, %v1748_v0  ;;  %20227 = vst [vmem:[#allocation25_spill] sm:$0xff] %v15682_v34  ;;  %v15691_v14 = vand.u32 4294901760, %v1784_v56 }
 0x322   :  { %v1806_v19 = vsub.f32 %v1748_v0, %v1771_v4  ;;  %1772 = vmatpush.msra.mxu0 %v1771_v4  ;;  %1865 = vmatpush.msra.mxu3 %v1771_v4 }
 0x323   :  { %1778 = vmatmul.f32.vlgmr.msra.gmra.mxu0 %v15673_v11  ;;  %1869 = vmatmul.f32.vlgmr.msra.gmra.mxu3 %v15654_v9 }
 0x324   :  { %1837 = vmatpush.msra.mxu2 %v1806_v19  ;;  %v1807_v25 = vand.u32 4294901760, %v1806_v19 }
 0x325   :  { %v1734_v23 = vpop.permute.xlu1 %1733  ;;  %1840 = vmatmul.f32.vlgmr.msra.gmra.mxu2 %v15643_v6 }
 0x326   :  { %v1741_v0 = vsel %vm1739_vm11, %v1732_v30, %v1734_v23  ;;  %v1742_v29 = vsel %vm1739_vm11, %v1734_v23, %v1736_v5  ;;  %1897 = vmatpush.msrb.mxu0 %v1807_v25  ;;  %v1808_v62 = vsub.f32 %v1806_v19, %v1807_v25  ;;  %v1743_v19 = vsel %vm1739_vm11, %v1736_v5, %v1738_v46  ;;  %v2484_v23 = vpop.permute.xlu0 %2483 }
 0x327   :  { %v1750_v3 = vsel %vm62_vm0, %v1741_v0, 0  ;;  %v1752_v13 = vsel %vm62_vm0, %v1742_v29, 0  ;;  %v1754_v5 = vsel %vm62_vm0, %v1743_v19, 0  ;;  %v15716_v0 = vpop.f32.mrf.mxu2 }
 0x328   :  { %v1948_v34 = vand.u32 4294901760, %v1750_v3  ;;  %v1809_v51 = vand.u32 4294901760, %v1808_v62  ;;  %v15697_v1 = vand.u32 4294901760, %v1752_v13  ;;  %v15707_v62 = vpop.f32.mrf.mxu1  ;;  %20234 = vst [vmem:[#allocation32_spill] sm:$0xff] %v15716_v0 }
 0x329   :  { %20231 = vst [vmem:[#allocation29_spill] sm:$0xff] %v15707_v62 }
 0x32a   :  { %v1983_v39 = vsub.f32 %v1750_v3, %v1948_v34  ;;  %1810 = vmatpush.msra.mxu1 %v1809_v51  ;;  %1949 = vmatpush.msrb.mxu2 %v1948_v34  ;;  %v2160_v3 = vsub.f32 %v1752_v13, %v15697_v1  ;;  %v15714_v13 = vpop.f32.mrf.mxu0 }
 0x32b   :  { %1786 = vmatmul.f32.gmra.mxu0 %v15691_v14  ;;  %1812 = vmatmul.f32.vlgmr.msra.gmra.mxu1 %v15635_v63  ;;  %20233 = vst [vmem:[#allocation31_spill] sm:$0xff] %v15714_v13 }
 0x32c   :  { %1875 = vmatmul.f32.gmra.mxu3 %v15676_v7  ;;  %1923 = vmatpush.msrb.mxu1 %v1771_v4  ;;  %v1984_v25 = vand.u32 4294901760, %v1983_v39  ;;  %v15710_v4 = vpop.f32.mrf.mxu3 }
 0x32d   :  { %2014 = vmatpush.msra.mxu0 %v1983_v39  ;;  %v2482_v29 = vpop.permute.xlu1 %2481  ;;  %1845 = vmatmul.f32.gmra.mxu2 %v15661_v12  ;;  %20232 = vst [vmem:[#allocation30_spill] sm:$0xff] %v15710_v4 }
 0x32e   :  { %2042 = vmatpush.msra.mxu1 %v1948_v34  ;;  %v2488_v51 = vsel %vm2487_vm12, %v15621_v61, %v2482_v29  ;;  %v1985_v30 = vsub.f32 %v1983_v39, %v1984_v25  ;;  %2074 = vmatpush.msra.mxu2 %v1984_v25  ;;  %v2161_v61 = vand.u32 4294901760, %v2160_v3  ;;  %v15718_v39 = vand.u32 4294901760, %v1754_v5 }
 0x32f   :  { %v2497_v56 = vmul.f32 %v2488_v51, %v15306_v24  ;;  %v2489_v24 = vsel %vm2487_vm12, %v2482_v29, %v2484_v23 }
 0x330   :  { %v1986_v46 = vand.u32 4294901760, %v1985_v30  ;;  %v2162_v19 = vsub.f32 %v2160_v3, %v2161_v61  ;;  %v15730_v51 = vsub.f32 %v1754_v5, %v15718_v39  ;;  %v2498_v30 = vmul.f32 %v2489_v24, %v15309_v27 }
 0x331   :  { %2512 = vrot.lane.b32.xlu0 %v2497_v56, %s15155_s21  ;;  %v15733_v56 = vpop.f32.mrf.mxu1 }
 0x332   :  { %1987 = vmatpush.msrb.mxu3 %v1986_v46  ;;  %20235 = vst [vmem:[#allocation33_spill] sm:$0xff] %v15733_v56  ;;  %v2163_v46 = vand.u32 4294901760, %v2162_v19  ;;  %v2338_v4 = vand.u32 4294901760, %v15730_v51 }
 0x333   :  { %1816 = vmatmul.f32.gmra.mxu1 %v15656_v10  ;;  %1899 = vmatmul.f32.vlgmr.msrb.gmra.mxu0 %v15635_v63 }
 0x334   :  { %1989 = vmatmul.f32.vlgmr.msrb.gmra.mxu3 %v15635_v63  ;;  %2126 = vmatpush.msrb.mxu0 %v15697_v1  ;;  %v15736_v29 = vpop.f32.mrf.mxu3 }
 0x335   :  { %2100 = vmatpush.msra.mxu3 %v1948_v34  ;;  %v15725_v25 = vpop.permute.xlu1 %2501  ;;  %1955 = vmatmul.f32.vlgmr.msrb.gmra.mxu2 %v15673_v11  ;;  %20236 = vst [vmem:[#allocation34_spill] sm:$0xff] %v15736_v29  ;;  %v15738_v34 = vpop.f32.mrf.mxu0 }
 0x336   :  { %2191 = vmatpush.msrb.mxu2 %v2160_v3  ;;  %v15744_v3 = vpop.f32.mrf.mxu2 }
 0x337   :  { %2219 = vmatpush.msrb.mxu3 %v15697_v1  ;;  %20237 = vst [vmem:[#allocation35_spill] sm:$0xff] %v15744_v3 }
 0x339   :  { %2514 = vrot.lane.b32.xlu0 %v2498_v30, %s15155_s21  ;;  %v2339_v30 = vsub.f32 %v15730_v51, %v2338_v4 }
 0x33b   :  { %1903 = vmatmul.f32.gmra.mxu0 %v15656_v10  ;;  %1925 = vmatmul.f32.vlgmr.msrb.gmra.mxu1 %v15635_v63 }
 0x33c   :  { %1993 = vmatmul.f32.gmra.mxu3 %v15656_v10  ;;  %2164 = vmatpush.msrb.mxu1 %v2163_v46  ;;  %v15053_v46 = vld [vmem:[%s20180_s1 + $0x5] ss:$8 sm:$0xf] }
 0x33d   :  { %v2486_v27 = vpop.permute.xlu1 %2485  ;;  %1963 = vmatmul.f32.gmra.mxu2 %v15691_v14 }
 0x33e   :  { %v2490_v5 = vsel %vm2487_vm12, %v2484_v23, %v2486_v27  ;;  %v2500_v24 = vmul.f32 %v2486_v27, %v15321_v32  ;;  %v15758_v23 = vpop.f32.mrf.mxu1  ;;  %v15760_v32 = vpop.f32.mrf.mxu3 }
 0x33f   :  { %v2499_v19 = vmul.f32 %v2490_v5, %v15311_v28  ;;  %20238 = vst [vmem:[#allocation36_spill] sm:$0xff] %v15760_v32  ;;  %v2340_v28 = vand.u32 4294901760, %v2339_v30  ;;  %v15764_v27 = vpop.f32.mrf.mxu0  ;;  %v15767_v5 = vpop.f32.mrf.mxu2  ;;  %v3999_v30 = vperm.slane %v15053_v46, 2 }
 0x340   :  { %2518 = vrot.lane.b32.xlu2 %v2500_v24, %s15155_s21  ;;  %v3998_v24 = vperm.slane %v15053_v46, 1 }
 0x341   :  { %3253 = vrot.lane.b32.xlu0 %v15275_v2, %s15143_s18  ;;  %2516 = vrot.lane.b32.xlu1 %v2499_v19, %s15155_s21  ;;  %v3997_v2 = vperm.slane %v15053_v46, 0 }
 0x343   :  { %1929 = vmatmul.f32.gmra.mxu1 %v15656_v10  ;;  %2017 = vmatmul.f32.vlgmr.msra.gmra.mxu0 %v15643_v6 }
 0x344   :  { %2102 = vmatmul.f32.vlgmr.msra.gmra.mxu3 %v15635_v63  ;;  %2251 = vmatpush.msra.mxu0 %v2161_v61 }
 0x345   :  { %2341 = vmatpush.msra.mxu3 %v2340_v28  ;;  %2076 = vmatmul.f32.vlgmr.msra.gmra.mxu2 %v15635_v63 }
 0x346   :  { %2303 = vmatpush.msra.mxu2 %v15718_v39  ;;  %v15777_v61 = vpop.f32.mrf.mxu1  ;;  %v15779_v19 = vpop.f32.mrf.mxu3 }
 0x347   :  { %20239 = vst [vmem:[#allocation37_spill] sm:$0xff] %v15777_v61  ;;  %v15783_v28 = vpop.f32.mrf.mxu0 }
 0x348   :  { %4001 = vrot.lane.b32.xlu2 %v3997_v2, %s15155_s21  ;;  %20240 = vst [vmem:[#allocation38_spill] sm:$0xff] %v15779_v19  ;;  %v15786_v2 = vpop.f32.mrf.mxu2 }
 0x349   :  { %4003 = vrot.lane.b32.xlu0 %v3998_v24, %s15155_s21  ;;  %3255 = vrot.lane.b32.xlu1 %v15326_v33, %s15143_s18  ;;  %20241 = vst [vmem:[#allocation39_spill] sm:$0xff] %v15783_v28  ;;  %v15791_v33 = vld [vmem:[%s20183_s4] sm:$0xff] }
 0x34a   :  { %20242 = vst [vmem:[#allocation40_spill] sm:$0xff] %v15786_v2 }
 0x34b   :  { %2022 = vmatmul.f32.gmra.mxu0 %v15661_v12  ;;  %2046 = vmatmul.f32.vlgmr.msra.gmra.mxu1 %v15654_v9 }
 0x34c   :  { %2106 = vmatmul.f32.gmra.mxu3 %v15656_v10  ;;  %2277 = vmatpush.msra.mxu1 %v15697_v1  ;;  %v4000_v1 = vperm.slane %v15053_v46, 3 }
 0x34d   :  { %2080 = vmatmul.f32.gmra.mxu2 %v15656_v10 }
 0x34e   :  { %v15801_v24 = vpop.f32.mrf.mxu1  ;;  %v15803_v29 = vpop.f32.mrf.mxu3 }
 0x34f   :  { %20243 = vst [vmem:[#allocation41_spill] sm:$0xff] %v15801_v24  ;;  %v15806_v3 = vpop.f32.mrf.mxu0 }
 0x350   :  { %4022 = vrot.lane.b32.xlu2 %v15791_v33, %s15156_s2  ;;  %20244 = vst [vmem:[#allocation42_spill] sm:$0xff] %v15803_v29 }
 0x351   :  { %4005 = vrot.lane.b32.xlu1 %v3999_v30, %s15155_s21  ;;  %20245 = vst [vmem:[#allocation43_spill] sm:$0xff] %v15806_v3  ;;  %v15809_v30 = vpop.f32.mrf.mxu2 }
 0x352   :  { %20246 = vst [vmem:[#allocation44_spill] sm:$0xff] %v15809_v30 }
 0x353   :  { %2052 = vmatmul.f32.gmra.mxu1 %v15676_v7  ;;  %2132 = vmatmul.f32.vlgmr.msrb.gmra.mxu0 %v15673_v11 }
 0x354   :  { %2223 = vmatmul.f32.vlgmr.msrb.gmra.mxu3 %v15654_v9  ;;  %2368 = vmatpush.msrb.mxu0 %v15730_v51 }
 0x355   :  { %2454 = vmatpush.msrb.mxu3 %v15718_v39  ;;  %2194 = vmatmul.f32.vlgmr.msrb.gmra.mxu2 %v15643_v6 }
 0x356   :  { %2428 = vmatpush.msrb.mxu2 %v2338_v4  ;;  %v15816_v51 = vpop.f32.mrf.mxu1  ;;  %v15818_v46 = vpop.f32.mrf.mxu3 }
 0x357   :  { %20247 = vst [vmem:[#allocation45_spill] sm:$0xff] %v15816_v51  ;;  %v15820_v4 = vpop.f32.mrf.mxu0 }
 0x358   :  { %4007 = vrot.lane.b32.xlu2 %v4000_v1, %s15155_s21  ;;  %20248 = vst [vmem:[#allocation46_spill] sm:$0xff] %v15818_v46 }
 0x359   :  { %20249 = vst [vmem:[#allocation47_spill] sm:$0xff] %v15820_v4  ;;  %v15822_v56 = vpop.f32.mrf.mxu2 }
 0x35a   :  { %20250 = vst [vmem:[#allocation48_spill] sm:$0xff] %v15822_v56 }
 0x35b   :  { %2140 = vmatmul.f32.gmra.mxu0 %v15691_v14  ;;  %2166 = vmatmul.f32.vlgmr.msrb.gmra.mxu1 %v15635_v63 }
 0x35c   :  { %2229 = vmatmul.f32.gmra.mxu3 %v15676_v7  ;;  %2396 = vmatpush.msrb.mxu1 %v15718_v39 }
 0x35d   :  { %2199 = vmatmul.f32.gmra.mxu2 %v15661_v12 }
 0x35e   :  { %v15828_v1 = vpop.f32.mrf.mxu1  ;;  %v15830_v39 = vpop.f32.mrf.mxu3 }
 0x35f   :  { %20251 = vst [vmem:[#allocation49_spill] sm:$0xff] %v15828_v1  ;;  %v15834_v13 = vpop.f32.mrf.mxu0 }
 0x360   :  { %20252 = vst [vmem:[#allocation50_spill] sm:$0xff] %v15830_v39 }
 0x361   :  { %20253 = vst [vmem:[#allocation51_spill] sm:$0xff] %v15834_v13  ;;  %v15837_v0 = vpop.f32.mrf.mxu2  ;;  %v15907_v13 = vld [vmem:[#allocation3 + $0x30] sm:$0xf] }
 0x362   :  { %20254 = vst [vmem:[#allocation52_spill] sm:$0xff] %v15837_v0 }
 0x363   :  { %2170 = vmatmul.f32.gmra.mxu1 %v15656_v10  ;;  %2253 = vmatmul.f32.vlgmr.msra.gmra.mxu0 %v15635_v63 }
 0x364   :  { %2343 = vmatmul.f32.vlgmr.msra.gmra.mxu3 %v15635_v63 }
 0x365   :  { %2309 = vmatmul.f32.vlgmr.msra.gmra.mxu2 %v15673_v11 }
 0x366   :  { %v15842_v11 = vpop.f32.mrf.mxu1  ;;  %v15844_v53 = vpop.f32.mrf.mxu3 }
 0x367   :  { %20255 = vst [vmem:[#allocation53_spill] sm:$0xff] %v15842_v11  ;;  %v15847_v62 = vpop.f32.mrf.mxu0 }
 0x368   :  { %20256 = vst [vmem:[#allocation54_spill] sm:$0xff] %v15844_v53 }
 0x369   :  { %20257 = vst [vmem:[#allocation55_spill] sm:$0xff] %v15847_v62  ;;  %v15850_v21 = vpop.f32.mrf.mxu2 }
 0x36a   :  { %20258 = vst [vmem:[#allocation56_spill] sm:$0xff] %v15850_v21 }
 0x36b   :  { %2257 = vmatmul.f32.gmra.mxu0 %v15656_v10  ;;  %2279 = vmatmul.f32.vlgmr.msra.gmra.mxu1 %v15635_v63 }
 0x36c   :  { %2347 = vmatmul.f32.gmra.mxu3 %v15656_v10 }
 0x36d   :  { %2317 = vmatmul.f32.gmra.mxu2 %v15691_v14 }
 0x36e   :  { %v15855_v14 = vpop.f32.mrf.mxu1 }
 0x36f   :  { %20259 = vst [vmem:[#allocation57_spill] sm:$0xff] %v15855_v14  ;;  %v15860_v53 = vpop.f32.mrf.mxu0 }
 0x370   :  { %20261 = vst [vmem:[#allocation59_spill] sm:$0xff] %v15860_v53 }
 0x371   :  { %v15862_v11 = vpop.f32.mrf.mxu2 }
 0x372   :  { %20262 = vst [vmem:[#allocation60_spill] sm:$0xff] %v15862_v11 }
 0x373   :  { %2283 = vmatmul.f32.gmra.mxu1 %v15656_v10  ;;  %2371 = vmatmul.f32.vlgmr.msrb.gmra.mxu0 %v15643_v6  ;;  %v15857_v6 = vpop.f32.mrf.mxu3 }
 0x374   :  { %2456 = vmatmul.f32.vlgmr.msrb.gmra.mxu3 %v15635_v63  ;;  %20260 = vst [vmem:[#allocation58_spill] sm:$0xff] %v15857_v6 }
 0x375   :  { %2430 = vmatmul.f32.vlgmr.msrb.gmra.mxu2 %v15635_v63  ;;  %v2511_v63 = vpop.permute.xlu2 %2510 }
 0x376   :  { %v15865_v62 = vpop.f32.mrf.mxu1 }
 0x377   :  { %20263 = vst [vmem:[#allocation61_spill] sm:$0xff] %v15865_v62 }
 0x379   :  { %v15871_v21 = vpop.f32.mrf.mxu2 }
 0x37a   :  { %20266 = vst [vmem:[#allocation64_spill] sm:$0xff] %v15871_v21 }
 0x37b   :  { %2376 = vmatmul.f32.gmra.mxu0 %v15661_v12  ;;  %2400 = vmatmul.f32.vlgmr.msrb.gmra.mxu1 %v15654_v9  ;;  %v15867_v12 = vpop.f32.mrf.mxu3  ;;  %v15869_v9 = vpop.f32.mrf.mxu0 }
 0x37c   :  { %2460 = vmatmul.f32.gmra.mxu3 %v15656_v10  ;;  %20264 = vst [vmem:[#allocation62_spill] sm:$0xff] %v15867_v12 }
 0x37d   :  { %2434 = vmatmul.f32.gmra.mxu2 %v15656_v10  ;;  %20265 = vst [vmem:[#allocation63_spill] sm:$0xff] %v15869_v9  ;;  %v2504_v14 = vpop.permute.xlu2 %2503  ;;  %v2525_v10 = vsel %vm230_vm6, %v15725_v25, 0 }
 0x37e   :  { %v15873_v39 = vpop.f32.mrf.mxu1  ;;  %v15883_v11 = vand.u32 4294901760, %v2525_v10  ;;  %v2527_v12 = vsel %vm230_vm6, %v2504_v14, 0 }
 0x37f   :  { %20267 = vst [vmem:[#allocation65_spill] sm:$0xff] %v15873_v39 }
 0x380   :  { %v15889_v21 = vsub.f32 %v2525_v10, %v15883_v11 }
 0x383   :  { %2406 = vmatmul.f32.gmra.mxu1 %v15676_v7  ;;  %v15875_v6 = vpop.f32.mrf.mxu3  ;;  %v15879_v53 = vpop.f32.mrf.mxu0 }
 0x384   :  { %20268 = vst [vmem:[#allocation66_spill] sm:$0xff] %v15875_v6  ;;  %v15881_v7 = vpop.f32.mrf.mxu2  ;;  %v15895_v6 = vand.u32 4294901760, %v2527_v12 }
 0x385   :  { %20269 = vst [vmem:[#allocation67_spill] sm:$0xff] %v15879_v53  ;;  %v15900_v53 = vand.u32 4294901760, %v15889_v21 }
 0x386   :  { %20270 = vst [vmem:[#allocation68_spill] sm:$0xff] %v15881_v7  ;;  %v15891_v9 = vpop.f32.mrf.mxu1  ;;  %v15905_v14 = vsub.f32 %v2527_v12, %v15895_v6 }
 0x387   :  { %20271 = vst [vmem:[#allocation69_spill] sm:$0xff] %v15891_v9 }
 0x388   :  { %v15921_v12 = vand.u32 4294901760, %v15905_v14 }
 0x38b   :  { %v15893_v39 = vpop.f32.mrf.mxu3  ;;  %v15897_v25 = vpop.f32.mrf.mxu0 }
 0x38c   :  { %20272 = vst [vmem:[#allocation70_spill] sm:$0xff] %v15893_v39  ;;  %v15902_v7 = vpop.f32.mrf.mxu2 }
 0x38d   :  { %20273 = vst [vmem:[#allocation71_spill] sm:$0xff] %v15897_v25  ;;  %v2557_v25 = vsub.f32 %v15889_v21, %v15900_v53 }
 0x38e   :  { %20274 = vst [vmem:[#allocation72_spill] sm:$0xff] %v15902_v7  ;;  %v15923_v26 = vpop.f32.mrf.mxu1 }
 0x38f   :  { %20276 = vst [vmem:[#allocation74_spill] sm:$0xff] %v15923_v26  ;;  %v15927_v56 = vand.u32 4294901760, %v2557_v25 }
 0x393   :  { %v15915_v0 = vpop.f32.mrf.mxu3  ;;  %v15929_v4 = vpop.f32.mrf.mxu0 }
 0x394   :  { %20275 = vst [vmem:[#allocation73_spill] sm:$0xff] %v15915_v0  ;;  %v15925_v1 = vpop.f32.mrf.mxu2 }
 0x395   :  { %20277 = vst [vmem:[#allocation75_spill] sm:$0xff] %v15925_v1 }
 0x396   :  { %20278 = vst [vmem:[#allocation76_spill] sm:$0xff] %v15929_v4  ;;  %v15941_v4 = vld [vmem:[%s20183_s4 + $0x8] sm:$0x3] }
 0x39a   :  { %v15886_v62 = vpop.permute.xlu2 %2518 }
 0x39b   :  { %v15947_v26 = vpop.f32.mrf.mxu3 }
 0x39c   :  { %20279 = vst [vmem:[#allocation77_spill] sm:$0xff] %v15947_v26  ;;  %v15958_v3 = vpop.f32.mrf.mxu2 }
 0x39d   :  { %20281 = vst [vmem:[#allocation79_spill] sm:$0xff] %v15958_v3 }
 0x3a2   :  { %v15909_v10 = vpop.permute.xlu2 %4001 }
 0x3a3   :  { %v4017_v39 = vmul.f32 %v15909_v10, %v15907_v13  ;;  %v2513_v9 = vpop.permute.xlu0 %2512 }
 0x3a4   :  { %v2521_v46 = vsel %vm2520_vm13, %v2511_v63, %v2513_v9 }
 0x3a5   :  { %v2529_v7 = vsel %vm62_vm0, %v2521_v46, 0  ;;  %4031 = vrot.lane.b32.xlu0 %v4017_v39, %s15153_s17  ;;  %v2565_v46 = vsub.f32 %v15905_v14, %v15921_v12 }
 0x3a6   :  { %v2552_v58 = vand.u32 4294901760, %v2529_v7 }
 0x3a7   :  { %v15945_v1 = vand.u32 4294901760, %v2565_v46 }
 0x3a8   :  { %v2587_v59 = vsub.f32 %v2529_v7, %v2552_v58  ;;  %2553 = vmatpush.msra.mxu0 %v2552_v58  ;;  %2646 = vmatpush.msra.mxu3 %v2552_v58 }
 0x3a9   :  { %2559 = vmatmul.f32.vlgmr.msra.gmra.mxu0 %v15927_v56  ;;  %2650 = vmatmul.f32.vlgmr.msra.gmra.mxu3 %v15900_v53 }
 0x3aa   :  { %2618 = vmatpush.msra.mxu2 %v2587_v59  ;;  %v2588_v39 = vand.u32 4294901760, %v2587_v59  ;;  %v15977_v57 = vpop.permute.xlu2 %4022 }
 0x3ab   :  { %v2515_v63 = vpop.permute.xlu0 %2514  ;;  %2621 = vmatmul.f32.vlgmr.msra.gmra.mxu2 %v15889_v21 }
 0x3ac   :  { %v2522_v25 = vsel %vm2520_vm13, %v2513_v9, %v2515_v63  ;;  %2678 = vmatpush.msrb.mxu0 %v2588_v39  ;;  %v2589_v0 = vsub.f32 %v2587_v59, %v2588_v39  ;;  %v15952_v59 = vld [vmem:[%s20180_s1 + $0x6] ss:$8 sm:$0xf]  ;;  %v15954_v9 = vpop.f32.mrf.mxu1  ;;  %v15956_v39 = vpop.f32.mrf.mxu0 }
 0x3ad   :  { %v2531_v7 = vsel %vm62_vm0, %v2522_v25, 0  ;;  %4024 = vrot.lane.b32.xlu0 %v15941_v4, %s15156_s2  ;;  %20280 = vst [vmem:[#allocation78_spill] sm:$0xff] %v15954_v9  ;;  %s15159_s2 = smov 96  }
 0x3ae   :  { %v2729_v51 = vand.u32 4294901760, %v2531_v7  ;;  %v2590_v29 = vand.u32 4294901760, %v2589_v0  ;;  %v4776_v0 = vperm.slane %v15952_v59, 0 }
 0x3b0   :  { %v2764_v25 = vsub.f32 %v2531_v7, %v2729_v51  ;;  %2591 = vmatpush.msra.mxu1 %v2590_v29  ;;  %2730 = vmatpush.msrb.mxu2 %v2729_v51 }
 0x3b1   :  { %2567 = vmatmul.f32.gmra.mxu0 %v15945_v1  ;;  %2593 = vmatmul.f32.vlgmr.msra.gmra.mxu1 %v15883_v11 }
 0x3b2   :  { %2656 = vmatmul.f32.gmra.mxu3 %v15921_v12  ;;  %2704 = vmatpush.msrb.mxu1 %v2552_v58  ;;  %v2765_v46 = vand.u32 4294901760, %v2764_v25  ;;  %v15972_v58 = vpop.f32.mrf.mxu3 }
 0x3b3   :  { %2795 = vmatpush.msra.mxu0 %v2764_v25  ;;  %v15964_v26 = vpop.permute.xlu0 %3253  ;;  %v2517_v9 = vpop.permute.xlu1 %2516  ;;  %2626 = vmatmul.f32.gmra.mxu2 %v15905_v14 }
 0x3b4   :  { %2823 = vmatpush.msra.mxu1 %v2729_v51  ;;  %v2523_v29 = vsel %vm2520_vm13, %v2515_v63, %v2517_v9  ;;  %v2524_v7 = vsel %vm2520_vm13, %v2517_v9, %v15886_v62  ;;  %v2766_v3 = vsub.f32 %v2764_v25, %v2765_v46  ;;  %2855 = vmatpush.msra.mxu2 %v2765_v46  ;;  %v15979_v63 = vpop.f32.mrf.mxu1  ;;  %v15982_v9 = vpop.f32.mrf.mxu2 }
 0x3b5   :  { %v2533_v45 = vsel %vm62_vm0, %v2523_v29, 0  ;;  %4780 = vrot.lane.b32.xlu0 %v4776_v0, %s15152_s15  ;;  %v2535_v30 = vsel %vm62_vm0, %v2524_v7, 0  ;;  %v4778_v0 = vperm.slane %v15952_v59, 2  ;;  %v15989_v46 = vpop.f32.mrf.mxu0  ;;  %v15999_v7 = vld [vmem:[#allocation3 + $0x8] sm:$0xf] }
 0x3b6   :  { %v15975_v19 = vand.u32 4294901760, %v2533_v45  ;;  %v2767_v52 = vand.u32 4294901760, %v2766_v3  ;;  %v15984_v25 = vand.u32 4294901760, %v2535_v30 }
 0x3b8   :  { %v2941_v62 = vsub.f32 %v2533_v45, %v15975_v19  ;;  %2768 = vmatpush.msrb.mxu3 %v2767_v52  ;;  %v3118_v2 = vsub.f32 %v2535_v30, %v15984_v25 }
 0x3b9   :  { %2597 = vmatmul.f32.gmra.mxu1 %v15895_v6  ;;  %2680 = vmatmul.f32.vlgmr.msrb.gmra.mxu0 %v15883_v11 }
 0x3ba   :  { %2770 = vmatmul.f32.vlgmr.msrb.gmra.mxu3 %v15883_v11  ;;  %2907 = vmatpush.msrb.mxu0 %v15975_v19  ;;  %v2942_v3 = vand.u32 4294901760, %v2941_v62  ;;  %v16005_v54 = vpop.f32.mrf.mxu3  ;;  %v3119_v55 = vand.u32 4294901760, %v3118_v2 }
 0x3bb   :  { %2881 = vmatpush.msra.mxu3 %v2729_v51  ;;  %v4004_v45 = vpop.permute.xlu0 %4003  ;;  %v15993_v52 = vpop.permute.xlu1 %3255  ;;  %2736 = vmatmul.f32.vlgmr.msrb.gmra.mxu2 %v15927_v56  ;;  %20282 = vst [vmem:[#allocation80_spill] sm:$0xff] %v16005_v54  ;;  %v16021_v54 = vld [vmem:[#allocation3 + $0x38] sm:$0xf] }
 0x3bc   :  { %v4009_v29 = vsel %vm2520_vm13, %v15909_v10, %v4004_v45  ;;  %v2943_v24 = vsub.f32 %v2941_v62, %v2942_v3  ;;  %2972 = vmatpush.msrb.mxu2 %v2941_v62  ;;  %v4008_v10 = vpop.permute.xlu2 %4007  ;;  %v16009_v61 = vpop.f32.mrf.mxu1 }
 0x3bd   :  { %3000 = vmatpush.msrb.mxu3 %v15975_v19  ;;  %v4018_v28 = vmul.f32 %v4009_v29, %v15999_v7  ;;  %4784 = vrot.lane.b32.xlu0 %v4778_v0, %s15152_s15  ;;  %v16012_v30 = vpop.f32.mrf.mxu2  ;;  %v16014_v0 = vpop.f32.mrf.mxu0  ;;  %v16019_v29 = vld [vmem:[#allocation3 + $0x58] sm:$0xf] }
 0x3be   :  { %v2944_v51 = vand.u32 4294901760, %v2943_v24  ;;  %20283 = vst [vmem:[#allocation81_spill] sm:$0xff] %v16012_v30  ;;  %v16027_v30 = vld [vmem:[#allocation3 + $0x48] sm:$0xf] }
 0x3bf   :  { %4033 = vrot.lane.b32.xlu1 %v4018_v28, %s15153_s17  ;;  %20284 = vst [vmem:[#allocation82_spill] sm:$0xff] %v16014_v0 }
 0x3c1   :  { %2684 = vmatmul.f32.gmra.mxu0 %v15895_v6  ;;  %2706 = vmatmul.f32.vlgmr.msrb.gmra.mxu1 %v15883_v11 }
 0x3c2   :  { %2774 = vmatmul.f32.gmra.mxu3 %v15895_v6  ;;  %2945 = vmatpush.msrb.mxu1 %v2944_v51  ;;  %v3120_v51 = vsub.f32 %v3118_v2, %v3119_v55 }
 0x3c3   :  { %v4006_v62 = vpop.permute.xlu1 %4005  ;;  %2744 = vmatmul.f32.gmra.mxu2 %v15945_v1 }
 0x3c4   :  { %v4010_v28 = vsel %vm2520_vm13, %v4004_v45, %v4006_v62  ;;  %v4011_v24 = vsel %vm2520_vm13, %v4006_v62, %v4008_v10  ;;  %v3121_v45 = vand.u32 4294901760, %v3120_v51  ;;  %v16031_v62 = vpop.f32.mrf.mxu3 }
 0x3c5   :  { %v4019_v32 = vmul.f32 %v4010_v28, %v16019_v29  ;;  %v4020_v47 = vmul.f32 %v4011_v24, %v16021_v54  ;;  %20285 = vst [vmem:[#allocation83_spill] sm:$0xff] %v16031_v62  ;;  %v4021_v28 = vmul.f32 %v4008_v10, %v16027_v30  ;;  %v4777_v24 = vperm.slane %v15952_v59, 1  ;;  %v16042_v0 = vpop.f32.mrf.mxu0 }
 0x3c6   :  { %20287 = vst [vmem:[#allocation85_spill] sm:$0xff] %v16042_v0 }
 0x3c7   :  { %4035 = vrot.lane.b32.xlu1 %v4019_v32, %s15153_s17  ;;  %4037 = vrot.lane.b32.xlu2 %v4020_v47, %s15153_s17  ;;  %v16036_v32 = vpop.f32.mrf.mxu1  ;;  %v16039_v47 = vpop.f32.mrf.mxu2 }
 0x3c8   :  { %20286 = vst [vmem:[#allocation84_spill] sm:$0xff] %v16039_v47 }
 0x3c9   :  { %2710 = vmatmul.f32.gmra.mxu1 %v15895_v6  ;;  %2798 = vmatmul.f32.vlgmr.msra.gmra.mxu0 %v15889_v21 }
 0x3ca   :  { %2883 = vmatmul.f32.vlgmr.msra.gmra.mxu3 %v15883_v11  ;;  %3032 = vmatpush.msra.mxu0 %v2942_v3 }
 0x3cb   :  { %3122 = vmatpush.msra.mxu3 %v3121_v45  ;;  %2857 = vmatmul.f32.vlgmr.msra.gmra.mxu2 %v15883_v11 }
 0x3cc   :  { %3084 = vmatpush.msra.mxu2 %v15984_v25  ;;  %v16050_v3 = vpop.f32.mrf.mxu3 }
 0x3cd   :  { %20288 = vst [vmem:[#allocation86_spill] sm:$0xff] %v16050_v3  ;;  %v16059_v45 = vpop.f32.mrf.mxu0 }
 0x3ce   :  { %20291 = vst [vmem:[#allocation89_spill] sm:$0xff] %v16059_v45 }
 0x3cf   :  { %4782 = vrot.lane.b32.xlu1 %v4777_v24, %s15152_s15  ;;  %4039 = vrot.lane.b32.xlu2 %v4021_v28, %s15153_s17  ;;  %v16053_v10 = vpop.f32.mrf.mxu1  ;;  %v16055_v51 = vpop.f32.mrf.mxu2  ;;  %v20292_v28 = vmax.f32 %v15283_v15, 0.0 }
 0x3d0   :  { %20289 = vst [vmem:[#allocation87_spill] sm:$0xff] %v16053_v10 }
 0x3d1   :  { %2803 = vmatmul.f32.gmra.mxu0 %v15905_v14  ;;  %2827 = vmatmul.f32.vlgmr.msra.gmra.mxu1 %v15900_v53  ;;  %20290 = vst [vmem:[#allocation88_spill] sm:$0xff] %v16055_v51  ;;  %v3262_v24 = vsel %vm62_vm0, %v20292_v28, 0 }
 0x3d2   :  { %2887 = vmatmul.f32.gmra.mxu3 %v15895_v6  ;;  %3058 = vmatpush.msra.mxu1 %v15975_v19  ;;  %v4779_v19 = vperm.slane %v15952_v59, 3  ;;  %v3288_v45 = vand.u32 4294901760, %v3262_v24 }
 0x3d3   :  { %2861 = vmatmul.f32.gmra.mxu2 %v15895_v6 }
 0x3d4   :  { %v16070_v3 = vpop.f32.mrf.mxu3  ;;  %v3323_v15 = vsub.f32 %v3262_v24, %v3288_v45 }
 0x3d5   :  { %20293 = vst [vmem:[#allocation90_spill] sm:$0xff] %v16070_v3 }
 0x3d6   :  { %v3324_v28 = vand.u32 4294901760, %v3323_v15 }
 0x3d7   :  { %4801 = vrot.lane.b32.xlu1 %v15791_v33, %s15157_s30  ;;  %v16073_v51 = vpop.f32.mrf.mxu1  ;;  %v16075_v10 = vpop.f32.mrf.mxu2 }
 0x3d8   :  { %20294 = vst [vmem:[#allocation91_spill] sm:$0xff] %v16073_v51  ;;  %v3325_v24 = vsub.f32 %v3323_v15, %v3324_v28 }
 0x3d9   :  { %2833 = vmatmul.f32.gmra.mxu1 %v15921_v12  ;;  %2913 = vmatmul.f32.vlgmr.msrb.gmra.mxu0 %v15927_v56  ;;  %20295 = vst [vmem:[#allocation92_spill] sm:$0xff] %v16075_v10 }
 0x3da   :  { %3004 = vmatmul.f32.vlgmr.msrb.gmra.mxu3 %v15900_v53  ;;  %3149 = vmatpush.msrb.mxu0 %v3118_v2  ;;  %v16079_v2 = vpop.f32.mrf.mxu0 }
 0x3db   :  { %3235 = vmatpush.msrb.mxu3 %v15984_v25  ;;  %2975 = vmatmul.f32.vlgmr.msrb.gmra.mxu2 %v15889_v21  ;;  %20296 = vst [vmem:[#allocation93_spill] sm:$0xff] %v16079_v2 }
 0x3dc   :  { %3209 = vmatpush.msrb.mxu2 %v3119_v55  ;;  %v20297_v55 = vmax.f32 %v15285_v16, 0.0 }
 0x3de   :  { %v3265_v59 = vsel %vm62_vm0, %v20297_v55, 0 }
 0x3df   :  { %4786 = vrot.lane.b32.xlu1 %v4779_v19, %s15152_s15  ;;  %v16087_v19 = vpop.f32.mrf.mxu3  ;;  %v16089_v3 = vand.u32 4294901760, %v3265_v59  ;;  %v16093_v2 = vpop.f32.mrf.mxu1 }
 0x3e0   :  { %20298 = vst [vmem:[#allocation94_spill] sm:$0xff] %v16087_v19  ;;  %v3326_v19 = vand.u32 4294901760, %v3325_v24 }
 0x3e1   :  { %2921 = vmatmul.f32.gmra.mxu0 %v15945_v1  ;;  %2947 = vmatmul.f32.vlgmr.msrb.gmra.mxu1 %v15883_v11  ;;  %20299 = vst [vmem:[#allocation95_spill] sm:$0xff] %v16093_v2  ;;  %v3500_v55 = vsub.f32 %v3265_v59, %v16089_v3 }
 0x3e2   :  { %3010 = vmatmul.f32.gmra.mxu3 %v15921_v12  ;;  %3177 = vmatpush.msrb.mxu1 %v15984_v25  ;;  %v16096_v25 = vpop.f32.mrf.mxu2  ;;  %v16098_v16 = vpop.f32.mrf.mxu0 }
 0x3e3   :  { %2980 = vmatmul.f32.gmra.mxu2 %v15905_v14  ;;  %20300 = vst [vmem:[#allocation96_spill] sm:$0xff] %v16096_v25  ;;  %v3501_v2 = vand.u32 4294901760, %v3500_v55 }
 0x3e4   :  { %20301 = vst [vmem:[#allocation97_spill] sm:$0xff] %v16098_v16  ;;  %v3257_v16 = vsel %vm230_vm6, %v15964_v26, 0 }
 0x3e5   :  { %v16116_v24 = vand.u32 4294901760, %v3257_v16 }
 0x3e7   :  { %v16104_v10 = vpop.f32.mrf.mxu3  ;;  %v16109_v25 = vpop.f32.mrf.mxu1  ;;  %v16122_v26 = vsub.f32 %v3257_v16, %v16116_v24 }
 0x3e8   :  { %20302 = vst [vmem:[#allocation98_spill] sm:$0xff] %v16104_v10 }
 0x3e9   :  { %2951 = vmatmul.f32.gmra.mxu1 %v15895_v6  ;;  %3034 = vmatmul.f32.vlgmr.msra.gmra.mxu0 %v15883_v11  ;;  %20303 = vst [vmem:[#allocation99_spill] sm:$0xff] %v16109_v25 }
 0x3ea   :  { %3124 = vmatmul.f32.vlgmr.msra.gmra.mxu3 %v15883_v11  ;;  %3289 = vmatpush.msra.mxu0 %v3288_v45  ;;  %v16114_v59 = vpop.f32.mrf.mxu0 }
 0x3eb   :  { %3382 = vmatpush.msra.mxu3 %v3288_v45  ;;  %3090 = vmatmul.f32.vlgmr.msra.gmra.mxu2 %v15927_v56  ;;  %v16112_v56 = vpop.f32.mrf.mxu2  ;;  %20305 = vst [vmem:[#allocation101_spill] sm:$0xff] %v16114_v59 }
 0x3ec   :  { %3354 = vmatpush.msra.mxu2 %v3323_v15  ;;  %20304 = vst [vmem:[#allocation100_spill] sm:$0xff] %v16112_v56  ;;  %v3502_v15 = vsub.f32 %v3500_v55, %v3501_v2 }
 0x3ee   :  { %v3503_v10 = vand.u32 4294901760, %v3502_v15 }
 0x3ef   :  { %v16130_v59 = vpop.f32.mrf.mxu1 }
 0x3f0   :  { %20307 = vst [vmem:[#allocation103_spill] sm:$0xff] %v16130_v59 }
 0x3f1   :  { %3038 = vmatmul.f32.gmra.mxu0 %v15895_v6  ;;  %3060 = vmatmul.f32.vlgmr.msra.gmra.mxu1 %v15883_v11 }
 0x3f2   :  { %3128 = vmatmul.f32.gmra.mxu3 %v15895_v6  ;;  %3327 = vmatpush.msra.mxu1 %v3326_v19  ;;  %v16126_v19 = vpop.f32.mrf.mxu3  ;;  %v16139_v16 = vpop.f32.mrf.mxu0 }
 0x3f3   :  { %3098 = vmatmul.f32.gmra.mxu2 %v15945_v1  ;;  %v3259_v1 = vsel %vm230_vm6, %v15993_v52, 0  ;;  %20306 = vst [vmem:[#allocation102_spill] sm:$0xff] %v16126_v19 }
 0x3f4   :  { %v16135_v15 = vand.u32 4294901760, %v3259_v1  ;;  %20309 = vst [vmem:[#allocation105_spill] sm:$0xff] %v16139_v16 }
 0x3f9   :  { %3064 = vmatmul.f32.gmra.mxu1 %v15895_v6  ;;  %3152 = vmatmul.f32.vlgmr.msrb.gmra.mxu0 %v15889_v21  ;;  %v16133_v21 = vand.u32 4294901760, %v16122_v26 }
 0x3fa   :  { %3237 = vmatmul.f32.vlgmr.msrb.gmra.mxu3 %v15883_v11  ;;  %3414 = vmatpush.msrb.mxu0 %v3324_v28  ;;  %v16137_v28 = vpop.f32.mrf.mxu2 }
 0x3fb   :  { %3504 = vmatpush.msrb.mxu3 %v3503_v10  ;;  %3211 = vmatmul.f32.vlgmr.msrb.gmra.mxu2 %v15883_v11  ;;  %20308 = vst [vmem:[#allocation104_spill] sm:$0xff] %v16137_v28  ;;  %v16145_v11 = vsub.f32 %v3259_v1, %v16135_v15  ;;  %v3293_v52 = vsub.f32 %v16122_v26, %v16133_v21  ;;  %v16150_v10 = vpop.f32.mrf.mxu3  ;;  %v20314_v1 = vmax.f32 %v15287_v17, 0.0 }
 0x3fc   :  { %3466 = vmatpush.msrb.mxu2 %v16089_v3  ;;  %20310 = vst [vmem:[#allocation106_spill] sm:$0xff] %v16150_v10 }
 0x3fd   :  { %v16152_v19 = vand.u32 4294901760, %v3293_v52  ;;  %v16155_v28 = vand.u32 4294901760, %v16145_v11  ;;  %v3268_v52 = vsel %vm62_vm0, %v20314_v1, 0  ;;  %v20319_v1 = vmax.f32 %v15289_v18, 0.0 }
 0x401   :  { %3157 = vmatmul.f32.gmra.mxu0 %v15905_v14  ;;  %3181 = vmatmul.f32.vlgmr.msrb.gmra.mxu1 %v15900_v53  ;;  %v16157_v14 = vpop.f32.mrf.mxu1 }
 0x402   :  { %3241 = vmatmul.f32.gmra.mxu3 %v15895_v6  ;;  %3440 = vmatpush.msrb.mxu1 %v3288_v45  ;;  %20311 = vst [vmem:[#allocation107_spill] sm:$0xff] %v16157_v14  ;;  %v16159_v53 = vpop.f32.mrf.mxu2  ;;  %v16163_v45 = vpop.f32.mrf.mxu0 }
 0x403   :  { %3215 = vmatmul.f32.gmra.mxu2 %v15895_v6  ;;  %20312 = vst [vmem:[#allocation108_spill] sm:$0xff] %v16159_v53  ;;  %v3301_v6 = vsub.f32 %v16145_v11, %v16155_v28  ;;  %v16175_v10 = vpop.f32.mrf.mxu3  ;;  %v3642_v53 = vand.u32 4294901760, %v3268_v52 }
 0x404   :  { %20313 = vst [vmem:[#allocation109_spill] sm:$0xff] %v16163_v45 }
 0x405   :  { %20315 = vst [vmem:[#allocation110_spill] sm:$0xff] %v16175_v10  ;;  %v3271_v10 = vsel %vm62_vm0, %v20319_v1, 0 }
 0x406   :  { %v16193_v16 = vand.u32 4294901760, %v3271_v10 }
 0x408   :  { %v3854_v1 = vsub.f32 %v3271_v10, %v16193_v16 }
 0x409   :  { %3187 = vmatmul.f32.gmra.mxu1 %v15921_v12  ;;  %3295 = vmatmul.f32.vlgmr.msra.gmra.mxu0 %v16152_v19  ;;  %v16173_v12 = vand.u32 4294901760, %v3301_v6  ;;  %v3677_v6 = vsub.f32 %v3268_v52, %v3642_v53 }
 0x40a   :  { %3386 = vmatmul.f32.vlgmr.msra.gmra.mxu3 %v16133_v21  ;;  %3531 = vmatpush.msra.mxu0 %v3500_v55  ;;  %v16179_v55 = vpop.f32.mrf.mxu1  ;;  %v16185_v17 = vpop.f32.mrf.mxu0 }
 0x40b   :  { %3617 = vmatpush.msra.mxu3 %v16089_v3  ;;  %3357 = vmatmul.f32.vlgmr.msra.gmra.mxu2 %v16122_v26  ;;  %20316 = vst [vmem:[#allocation111_spill] sm:$0xff] %v16179_v55  ;;  %v3678_v14 = vand.u32 4294901760, %v3677_v6 }
 0x40c   :  { %3591 = vmatpush.msra.mxu2 %v3501_v2  ;;  %v16183_v2 = vpop.f32.mrf.mxu2  ;;  %20318 = vst [vmem:[#allocation113_spill] sm:$0xff] %v16185_v17 }
 0x40d   :  { %20317 = vst [vmem:[#allocation112_spill] sm:$0xff] %v16183_v2  ;;  %v3679_v18 = vsub.f32 %v3677_v6, %v3678_v14 }
 0x40f   :  { %v3680_v59 = vand.u32 4294901760, %v3679_v18 }
 0x411   :  { %3303 = vmatmul.f32.gmra.mxu0 %v16173_v12  ;;  %3329 = vmatmul.f32.vlgmr.msra.gmra.mxu1 %v16116_v24 }
 0x412   :  { %3392 = vmatmul.f32.gmra.mxu3 %v16155_v28  ;;  %3559 = vmatpush.msra.mxu1 %v16089_v3  ;;  %v16197_v3 = vpop.f32.mrf.mxu3  ;;  %v16200_v52 = vpop.f32.mrf.mxu1 }
 0x413   :  { %3362 = vmatmul.f32.gmra.mxu2 %v16145_v11  ;;  %20320 = vst [vmem:[#allocation114_spill] sm:$0xff] %v16197_v3  ;;  %v16206_v17 = vpop.f32.mrf.mxu0  ;;  %v3855_v3 = vand.u32 4294901760, %v3854_v1 }
 0x414   :  { %20321 = vst [vmem:[#allocation115_spill] sm:$0xff] %v16200_v52  ;;  %v16204_v2 = vpop.f32.mrf.mxu2 }
 0x415   :  { %20322 = vst [vmem:[#allocation116_spill] sm:$0xff] %v16204_v2  ;;  %v3856_v10 = vsub.f32 %v3854_v1, %v3855_v3 }
 0x416   :  { %20323 = vst [vmem:[#allocation117_spill] sm:$0xff] %v16206_v17 }
 0x417   :  { %v16191_v45 = vpop.permute.xlu0 %4031  ;;  %v3857_v25 = vand.u32 4294901760, %v3856_v10 }
 0x419   :  { %3333 = vmatmul.f32.gmra.mxu1 %v16135_v15  ;;  %3416 = vmatmul.f32.vlgmr.msrb.gmra.mxu0 %v16116_v24 }
 0x41a   :  { %3506 = vmatmul.f32.vlgmr.msrb.gmra.mxu3 %v16116_v24  ;;  %3643 = vmatpush.msrb.mxu0 %v3642_v53  ;;  %v16213_v52 = vpop.f32.mrf.mxu3  ;;  %v16216_v2 = vpop.f32.mrf.mxu1 }
 0x41b   :  { %3736 = vmatpush.msrb.mxu3 %v3642_v53  ;;  %3472 = vmatmul.f32.vlgmr.msrb.gmra.mxu2 %v16152_v19  ;;  %20324 = vst [vmem:[#allocation118_spill] sm:$0xff] %v16213_v52 }
 0x41c   :  { %3708 = vmatpush.msrb.mxu2 %v3677_v6  ;;  %20325 = vst [vmem:[#allocation119_spill] sm:$0xff] %v16216_v2  ;;  %v16218_v17 = vpop.f32.mrf.mxu2 }
 0x41d   :  { %20326 = vst [vmem:[#allocation120_spill] sm:$0xff] %v16218_v17 }
 0x41f   :  { %v16208_v55 = vpop.permute.xlu0 %4024 }
 0x421   :  { %3420 = vmatmul.f32.gmra.mxu0 %v16135_v15  ;;  %3442 = vmatmul.f32.vlgmr.msrb.gmra.mxu1 %v16116_v24 }
 0x422   :  { %3510 = vmatmul.f32.gmra.mxu3 %v16135_v15  ;;  %3681 = vmatpush.msrb.mxu1 %v3680_v59 }
 0x423   :  { %3480 = vmatmul.f32.gmra.mxu2 %v16173_v12 }
 0x426   :  { %v2560_v6 = vpop.f32.mrf.mxu0 }
 0x427   :  { %v4781_v56 = vpop.permute.xlu0 %4780 }
 0x428   :  { %v4796_v18 = vmul.f32 %v4781_v56, %v15907_v13 }
 0x429   :  { %3446 = vmatmul.f32.gmra.mxu1 %v16135_v15  ;;  %3534 = vmatmul.f32.vlgmr.msra.gmra.mxu0 %v16122_v26 }
 0x42a   :  { %3619 = vmatmul.f32.vlgmr.msra.gmra.mxu3 %v16116_v24  ;;  %3768 = vmatpush.msra.mxu0 %v3678_v14  ;;  %v16238_v14 = vld [vmem:[%s20180_s1 + $0x7] ss:$8 sm:$0xf] }
 0x42b   :  { %3858 = vmatpush.msra.mxu3 %v3857_v25  ;;  %4810 = vrot.lane.b32.xlu2 %v4796_v18, %s15149_s12 }
 0x42c   :  { %3593 = vmatmul.f32.vlgmr.msra.gmra.mxu2 %v16116_v24  ;;  %v2651_v59 = vpop.f32.mrf.mxu3 }
 0x42d   :  { %3820 = vmatpush.msra.mxu2 %v16193_v16 }
 0x42e   :  { %v2568_v52 = vpop.f32.mrf.mxu0  ;;  %v2594_v17 = vpop.f32.mrf.mxu1 }
 0x42f   :  { %v2595_v2 = vadd.f32 %v2594_v17, %v2560_v6  ;;  %v2622_v13 = vpop.f32.mrf.mxu2 }
 0x431   :  { %v2623_v51 = vadd.f32 %v2622_v13, %v2595_v2  ;;  %3539 = vmatmul.f32.gmra.mxu0 %v16145_v11  ;;  %3563 = vmatmul.f32.vlgmr.msra.gmra.mxu1 %v16133_v21  ;;  %v4034_v10 = vpop.permute.xlu1 %4033 }
 0x432   :  { %3623 = vmatmul.f32.gmra.mxu3 %v16135_v15  ;;  %3794 = vmatpush.msra.mxu1 %v3642_v53  ;;  %v5555_v53 = vperm.slane %v16238_v14, 0 }
 0x433   :  { %4803 = vrot.lane.b32.xlu2 %v15941_v4, %s15157_s30  ;;  %v16232_v25 = vadd.f32 %v2651_v59, %v2623_v51  ;;  %v4041_v51 = vsel %vm2487_vm12, %v16191_v45, %v4034_v10  ;;  %s15163_s30 = smov 58  }
 0x434   :  { %3597 = vmatmul.f32.gmra.mxu2 %v16135_v15  ;;  %v4049_v59 = vsel %vm62_vm0, %v4041_v51, 0 }
 0x435   :  { %20327 = vst [vmem:[#allocation121_spill] sm:$0xff] %v16232_v25  ;;  %v2657_v2 = vpop.f32.mrf.mxu3  ;;  %v16260_v47 = vand.u32 4294901760, %v4049_v59 }
 0x436   :  { %v2598_v17 = vpop.f32.mrf.mxu1  ;;  %v16240_v6 = vpop.f32.mrf.mxu0 }
 0x437   :  { %20328 = vst [vmem:[#allocation122_spill] sm:$0xff] %v16240_v6  ;;  %v2599_v18 = vadd.f32 %v2598_v17, %v2568_v52  ;;  %v2627_v13 = vpop.f32.mrf.mxu2  ;;  %v16271_v51 = vsub.f32 %v4049_v59, %v16260_v47 }
 0x439   :  { %v2628_v62 = vadd.f32 %v2627_v13, %v2599_v18  ;;  %3569 = vmatmul.f32.gmra.mxu1 %v16155_v28  ;;  %3649 = vmatmul.f32.vlgmr.msrb.gmra.mxu0 %v16152_v19  ;;  %v16245_v4 = vpop.permute.xlu1 %4035 }
 0x43a   :  { %3740 = vmatmul.f32.vlgmr.msrb.gmra.mxu3 %v16133_v21  ;;  %3885 = vmatpush.msrb.mxu0 %v3854_v1 }
 0x43b   :  { %3971 = vmatpush.msrb.mxu3 %v16193_v16  ;;  %5559 = vrot.lane.b32.xlu2 %v5555_v53, %s15146_s19  ;;  %v16252_v52 = vadd.f32 %v2657_v2, %v2628_v62  ;;  %v4042_v2 = vsel %vm2487_vm12, %v4034_v10, %v16245_v4 }
 0x43c   :  { %3711 = vmatmul.f32.vlgmr.msrb.gmra.mxu2 %v16122_v26 }
 0x43d   :  { %20329 = vst [vmem:[#allocation123_spill] sm:$0xff] %v16252_v52  ;;  %3945 = vmatpush.msrb.mxu2 %v3855_v3  ;;  %v2771_v17 = vpop.f32.mrf.mxu3 }
 0x43e   :  { %v16256_v18 = vpop.f32.mrf.mxu0  ;;  %v16258_v13 = vpop.f32.mrf.mxu1 }
 0x43f   :  { %20330 = vst [vmem:[#allocation124_spill] sm:$0xff] %v16256_v18  ;;  %v2737_v45 = vpop.f32.mrf.mxu2  ;;  %v4051_v18 = vsel %vm62_vm0, %v4042_v2, 0 }
 0x440   :  { %20331 = vst [vmem:[#allocation125_spill] sm:$0xff] %v16258_v13  ;;  %v2772_v1 = vadd.f32 %v2771_v17, %v2737_v45  ;;  %v4785_v17 = vpop.permute.xlu0 %4784 }
 0x441   :  { %3657 = vmatmul.f32.gmra.mxu0 %v16173_v12  ;;  %3683 = vmatmul.f32.vlgmr.msrb.gmra.mxu1 %v16116_v24  ;;  %v4783_v62 = vpop.permute.xlu1 %4782 }
 0x442   :  { %3746 = vmatmul.f32.gmra.mxu3 %v16155_v28  ;;  %3913 = vmatpush.msrb.mxu1 %v16193_v16  ;;  %v4788_v3 = vsel %vm1739_vm11, %v4781_v56, %v4783_v62  ;;  %v4789_v0 = vsel %vm1739_vm11, %v4783_v62, %v4785_v17 }
 0x443   :  { %v4797_v53 = vmul.f32 %v4788_v3, %v15999_v7  ;;  %v4108_v7 = vand.u32 4294901760, %v16271_v51  ;;  %v16280_v3 = vand.u32 4294901760, %v4051_v18  ;;  %v4798_v2 = vmul.f32 %v4789_v0, %v16019_v29 }
 0x444   :  { %3716 = vmatmul.f32.gmra.mxu2 %v16145_v11 }
 0x445   :  { %v2775_v45 = vpop.f32.mrf.mxu3  ;;  %4812 = vrot.lane.b32.xlu0 %v4797_v53, %s15149_s12  ;;  %v4109_v62 = vsub.f32 %v16271_v51, %v4108_v7  ;;  %v16293_v53 = vsub.f32 %v4051_v18, %v16280_v3  ;;  %v5556_v18 = vperm.slane %v16238_v14, 1 }
 0x446   :  { %v16276_v52 = vpop.f32.mrf.mxu1  ;;  %v2799_v16 = vpop.f32.mrf.mxu0 }
 0x447   :  { %20332 = vst [vmem:[#allocation126_spill] sm:$0xff] %v16276_v52  ;;  %v2745_v56 = vpop.f32.mrf.mxu2  ;;  %v4110_v0 = vand.u32 4294901760, %v4109_v62 }
 0x448   :  { %v2776_v10 = vadd.f32 %v2775_v45, %v2745_v56  ;;  %v2800_v45 = vadd.f32 %v2799_v16, %v2772_v1  ;;  %v4285_v1 = vand.u32 4294901760, %v16293_v53 }
 0x449   :  { %3687 = vmatmul.f32.gmra.mxu1 %v16135_v15  ;;  %3770 = vmatmul.f32.vlgmr.msra.gmra.mxu0 %v16116_v24  ;;  %v16284_v59 = vpop.permute.xlu1 %4801 }
 0x44a   :  { %20333 = vst [vmem:[#allocation127_spill] sm:$0xff] %v16284_v59  ;;  %3860 = vmatmul.f32.vlgmr.msra.gmra.mxu3 %v16116_v24  ;;  %4073 = vmatpush.msra.mxu0 %v16260_v47  ;;  %v5557_v59 = vperm.slane %v16238_v14, 2 }
 0x44b   :  { %4166 = vmatpush.msra.mxu3 %v16260_v47 }
 0x44c   :  { %3826 = vmatmul.f32.vlgmr.msra.gmra.mxu2 %v16152_v19  ;;  %5563 = vrot.lane.b32.xlu2 %v5557_v59, %s15146_s19 }
 0x44d   :  { %4138 = vmatpush.msra.mxu2 %v16271_v51  ;;  %v2884_v56 = vpop.f32.mrf.mxu3  ;;  %4814 = vrot.lane.b32.xlu0 %v4798_v2, %s15149_s12  ;;  %v4286_v2 = vsub.f32 %v16293_v53, %v4285_v1 }
 0x44e   :  { %v2804_v52 = vpop.f32.mrf.mxu0  ;;  %v2828_v13 = vpop.f32.mrf.mxu1 }
 0x44f   :  { %v2829_v6 = vadd.f32 %v2828_v13, %v2800_v45  ;;  %v2858_v25 = vpop.f32.mrf.mxu2 }
 0x451   :  { %v2859_v29 = vadd.f32 %v2858_v25, %v2829_v6  ;;  %3774 = vmatmul.f32.gmra.mxu0 %v16135_v15  ;;  %3796 = vmatmul.f32.vlgmr.msra.gmra.mxu1 %v16116_v24  ;;  %v4787_v19 = vpop.permute.xlu1 %4786  ;;  %v4045_v25 = vsel %vm230_vm6, %v15977_v57, 0  ;;  %v2805_v6 = vadd.f32 %v2804_v52, %v2776_v10  ;;  %v4287_v57 = vand.u32 4294901760, %v4286_v2 }
 0x452   :  { %3864 = vmatmul.f32.gmra.mxu3 %v16135_v15  ;;  %4111 = vmatpush.msra.mxu1 %v4110_v0  ;;  %v4790_v51 = vsel %vm1739_vm11, %v4785_v17, %v4787_v19  ;;  %v16316_v45 = vand.u32 4294901760, %v4045_v25 }
 0x453   :  { %v16305_v13 = vadd.f32 %v2884_v56, %v2859_v29  ;;  %v4799_v16 = vmul.f32 %v4790_v51, %v16021_v54  ;;  %v4047_v29 = vsel %vm230_vm6, %v16208_v55, 0 }
 0x454   :  { %3834 = vmatmul.f32.gmra.mxu2 %v16173_v12  ;;  %v4800_v12 = vmul.f32 %v4787_v19, %v16027_v30  ;;  %v16323_v52 = vsub.f32 %v4045_v25, %v16316_v45 }
 0x455   :  { %v2888_v59 = vpop.f32.mrf.mxu3  ;;  %5561 = vrot.lane.b32.xlu0 %v5556_v18, %s15146_s19  ;;  %4816 = vrot.lane.b32.xlu1 %v4799_v16, %s15149_s12  ;;  %v16337_v18 = vand.u32 4294901760, %v4047_v29 }
 0x456   :  { %v2834_v17 = vpop.f32.mrf.mxu1  ;;  %v2914_v62 = vpop.f32.mrf.mxu0  ;;  %v16335_v19 = vand.u32 4294901760, %v16323_v52 }
 0x457   :  { %v2835_v54 = vadd.f32 %v2834_v17, %v2805_v6  ;;  %v2862_v56 = vpop.f32.mrf.mxu2 }
 0x458   :  { %v4077_v6 = vsub.f32 %v16323_v52, %v16335_v19 }
 0x459   :  { %v2863_v0 = vadd.f32 %v2862_v56, %v2835_v54  ;;  %3800 = vmatmul.f32.gmra.mxu1 %v16135_v15  ;;  %3888 = vmatmul.f32.vlgmr.msrb.gmra.mxu0 %v16122_v26 }
 0x45a   :  { %3973 = vmatmul.f32.vlgmr.msrb.gmra.mxu3 %v16116_v24  ;;  %4198 = vmatpush.msrb.mxu0 %v4108_v7 }
 0x45b   :  { %v16325_v10 = vadd.f32 %v2888_v59, %v2863_v0  ;;  %4288 = vmatpush.msrb.mxu3 %v4287_v57  ;;  %v4038_v59 = vpop.permute.xlu2 %4037 }
 0x45c   :  { %3947 = vmatmul.f32.vlgmr.msrb.gmra.mxu2 %v16116_v24  ;;  %v5558_v24 = vperm.slane %v16238_v14, 3 }
 0x45d   :  { %4250 = vmatpush.msrb.mxu2 %v16280_v3  ;;  %v3005_v26 = vpop.f32.mrf.mxu3  ;;  %5580 = vrot.lane.b32.xlu0 %v15791_v33, %s15158_s16  ;;  %v16345_v33 = vsub.f32 %v4047_v29, %v16337_v18 }
 0x45e   :  { %4818 = vrot.lane.b32.xlu1 %v4800_v12, %s15149_s12  ;;  %v2922_v30 = vpop.f32.mrf.mxu0  ;;  %v2948_v7 = vpop.f32.mrf.mxu1 }
 0x45f   :  { %v2949_v51 = vadd.f32 %v2948_v7, %v2914_v62  ;;  %v2976_v55 = vpop.f32.mrf.mxu2  ;;  %v16358_v62 = vand.u32 4294901760, %v16345_v33 }
 0x461   :  { %v2977_v16 = vadd.f32 %v2976_v55, %v2949_v51  ;;  %3893 = vmatmul.f32.gmra.mxu0 %v16145_v11  ;;  %3917 = vmatmul.f32.vlgmr.msrb.gmra.mxu1 %v16133_v21  ;;  %v4085_v0 = vsub.f32 %v16345_v33, %v16358_v62 }
 0x462   :  { %3977 = vmatmul.f32.gmra.mxu3 %v16135_v15  ;;  %4224 = vmatpush.msrb.mxu1 %v16260_v47  ;;  %v16355_v47 = vand.u32 4294901760, %v4077_v6 }
 0x463   :  { %v16347_v25 = vadd.f32 %v3005_v26, %v2977_v16  ;;  %v16379_v26 = vand.u32 4294901760, %v4085_v0 }
 0x464   :  { %3951 = vmatmul.f32.gmra.mxu2 %v16135_v15  ;;  %v4043_v15 = vsel %vm2487_vm12, %v16245_v4, %v4038_v59 }
 0x465   :  { %v3011_v11 = vpop.f32.mrf.mxu3  ;;  %5565 = vrot.lane.b32.xlu0 %v5558_v24, %s15146_s19 }
 0x466   :  { %v2952_v21 = vpop.f32.mrf.mxu1  ;;  %v16353_v14 = vpop.f32.mrf.mxu0 }
 0x467   :  { %v2953_v2 = vadd.f32 %v2952_v21, %v2922_v30  ;;  %v2981_v17 = vpop.f32.mrf.mxu2  ;;  %v4040_v30 = vpop.permute.xlu2 %4039 }
 0x469   :  { %v2982_v54 = vadd.f32 %v2981_v17, %v2953_v2  ;;  %3923 = vmatmul.f32.gmra.mxu1 %v16155_v28  ;;  %4079 = vmatmul.f32.vlgmr.msra.gmra.mxu0 %v16355_v47  ;;  %v4053_v28 = vsel %vm62_vm0, %v4043_v15, 0 }
 0x46a   :  { %4170 = vmatmul.f32.vlgmr.msra.gmra.mxu3 %v16335_v19  ;;  %4315 = vmatpush.msra.mxu0 %v16293_v53  ;;  %v16381_v7 = vand.u32 4294901760, %v4053_v28  ;;  %v4044_v53 = vsel %vm2487_vm12, %v4038_v59, %v4040_v30 }
 0x46b   :  { %4401 = vmatpush.msra.mxu3 %v16280_v3  ;;  %v16367_v56 = vadd.f32 %v3011_v11, %v2982_v54  ;;  %v4055_v16 = vsel %vm62_vm0, %v4044_v53, 0 }
 0x46c   :  { %4141 = vmatmul.f32.vlgmr.msra.gmra.mxu2 %v16323_v52  ;;  %v16393_v17 = vand.u32 4294901760, %v4055_v16 }
 0x46d   :  { %4375 = vmatpush.msra.mxu2 %v4285_v1  ;;  %v3125_v57 = vpop.f32.mrf.mxu3  ;;  %v4461_v1 = vsub.f32 %v4053_v28, %v16381_v7 }
 0x46e   :  { %v16375_v4 = vpop.f32.mrf.mxu0  ;;  %v16377_v12 = vpop.f32.mrf.mxu1  ;;  %v16404_v54 = vsub.f32 %v4055_v16, %v16393_v17 }
 0x46f   :  { %v3091_v29 = vpop.f32.mrf.mxu2  ;;  %v4462_v2 = vand.u32 4294901760, %v4461_v1 }
 0x470   :  { %v3126_v51 = vadd.f32 %v3125_v57, %v3091_v29 }
 0x471   :  { %4087 = vmatmul.f32.gmra.mxu0 %v16379_v26  ;;  %4113 = vmatmul.f32.vlgmr.msra.gmra.mxu1 %v16316_v45  ;;  %v4463_v59 = vsub.f32 %v4461_v1, %v4462_v2 }
 0x472   :  { %4176 = vmatmul.f32.gmra.mxu3 %v16358_v62  ;;  %4343 = vmatpush.msra.mxu1 %v16280_v3  ;;  %v301_v3 = vadd.f32 %v15536_v8, %v15528_v60  ;;  %v305_v8 = vadd.f32 %v15549_v31, %v15542_v20 }
 0x474   :  { %4146 = vmatmul.f32.gmra.mxu2 %v16345_v33  ;;  %v329_v53 = vadd.f32 %v15546_v22, %v301_v3  ;;  %v334_v20 = vadd.f32 %v15559_v37, %v305_v8 }
 0x475   :  { %v3129_v55 = vpop.f32.mrf.mxu3 }
 0x476   :  { %v16391_v24 = vpop.f32.mrf.mxu1  ;;  %v3153_v6 = vpop.f32.mrf.mxu0 }
 0x477   :  { %20334 = vst [vmem:[#allocation128_spill] sm:$0xff] %v16391_v24  ;;  %v3099_v11 = vpop.f32.mrf.mxu2  ;;  %v3154_v15 = vadd.f32 %v3153_v6, %v3126_v51  ;;  %v358_v51 = vadd.f32 %v15540_v44, %v329_v53 }
 0x478   :  { %v3130_v21 = vadd.f32 %v3129_v55, %v3099_v11  ;;  %v4464_v55 = vand.u32 4294901760, %v4463_v59  ;;  %v4639_v11 = vand.u32 4294901760, %v16404_v54 }
 0x479   :  { %4117 = vmatmul.f32.gmra.mxu1 %v16337_v18  ;;  %4200 = vmatmul.f32.vlgmr.msrb.gmra.mxu0 %v16316_v45  ;;  %v388_v3 = vadd.f32 %v15556_v36, %v358_v51  ;;  %v1814_v36 = vadd.f32 %v15979_v63, %v15956_v39 }
 0x47a   :  { %4290 = vmatmul.f32.vlgmr.msrb.gmra.mxu3 %v16316_v45  ;;  %4427 = vmatpush.msrb.mxu0 %v16381_v7  ;;  %v4640_v6 = vsub.f32 %v16404_v54, %v4639_v11 }
 0x47b   :  { %4520 = vmatpush.msrb.mxu3 %v16381_v7 }
 0x47c   :  { %4256 = vmatmul.f32.vlgmr.msrb.gmra.mxu2 %v16355_v47  ;;  %v4641_v44 = vand.u32 4294901760, %v4640_v6 }
 0x47d   :  { %4492 = vmatpush.msrb.mxu2 %v4461_v1  ;;  %v3238_v0 = vpop.f32.mrf.mxu3 }
 0x47e   :  { %v3158_v28 = vpop.f32.mrf.mxu0  ;;  %v3182_v57 = vpop.f32.mrf.mxu1 }
 0x47f   :  { %v3183_v29 = vadd.f32 %v3182_v57, %v3154_v15  ;;  %v3212_v30 = vpop.f32.mrf.mxu2  ;;  %v3159_v22 = vadd.f32 %v3158_v28, %v3130_v21  ;;  %v414_v21 = vadd.f32 %v15564_v38, %v388_v3  ;;  %v364_v57 = vadd.f32 %v15552_v35, %v334_v20  ;;  %v20336_v3 = vld [vmem:[#allocation36_spill] sm:$0xff] }
 0x480   :  { %v478_v38 = vadd.f32 %v15566_v40, %v15571_v42  ;;  %v1842_v35 = vadd.f32 %v15982_v9, %v1814_v36  ;;  %v1818_v9 = vadd.f32 %v16009_v61, %v15989_v46  ;;  %v20338_v61 = vld [vmem:[#allocation82_spill] sm:$0xff] }
 0x481   :  { %v3213_v24 = vadd.f32 %v3212_v30, %v3183_v29  ;;  %4204 = vmatmul.f32.gmra.mxu0 %v16337_v18  ;;  %4226 = vmatmul.f32.vlgmr.msrb.gmra.mxu1 %v16316_v45  ;;  %v1007_v37 = vadd.f32 %v15738_v34, %v414_v21  ;;  %v20340_v21 = vld [vmem:[#allocation7_spill] sm:$0xff] }
 0x482   :  { %4294 = vmatmul.f32.gmra.mxu3 %v16337_v18  ;;  %4465 = vmatpush.msrb.mxu1 %v4464_v55  ;;  %v506_v8 = vadd.f32 %v15581_v48, %v478_v38 }
 0x483   :  { %v16411_v60 = vadd.f32 %v3238_v0, %v3213_v24  ;;  %v1041_v39 = vadd.f32 %v15758_v23, %v1007_v37  ;;  %v20342_v37 = vld [vmem:[#allocation81_spill] sm:$0xff] }
 0x484   :  { %4264 = vmatmul.f32.gmra.mxu2 %v16379_v26  ;;  %v535_v23 = vadd.f32 %v15589_v50, %v506_v8 }
 0x485   :  { %v3242_v1 = vpop.f32.mrf.mxu3  ;;  %v16417_v16 = vpop.permute.xlu2 %4810  ;;  %v1069_v40 = vadd.f32 %v15767_v5, %v1041_v39  ;;  %v20335_v5 = vld [vmem:[#allocation5_spill] sm:$0xff]  ;;  %v20344_v39 = vld [vmem:[#allocation122_spill] sm:$0xff] }
 0x486   :  { %v3188_v59 = vpop.f32.mrf.mxu1  ;;  %v3296_v24 = vpop.f32.mrf.mxu0  ;;  %v482_v6 = vadd.f32 %v20335_v5, %v15583_v49  ;;  %v20341_v49 = vld [vmem:[#allocation39_spill] sm:$0xff] }
 0x487   :  { %v3189_v15 = vadd.f32 %v3188_v59, %v3159_v22  ;;  %v3216_v0 = vpop.f32.mrf.mxu2  ;;  %v20337_v59 = vld [vmem:[#allocation37_spill] sm:$0xff] }
 0x488   :  { %v511_v36 = vadd.f32 %v20340_v21, %v482_v6 }
 0x489   :  { %v3217_v31 = vadd.f32 %v3216_v0, %v3189_v15  ;;  %4230 = vmatmul.f32.gmra.mxu1 %v16337_v18  ;;  %4318 = vmatmul.f32.vlgmr.msra.gmra.mxu0 %v16323_v52 }
 0x48a   :  { %4403 = vmatmul.f32.vlgmr.msra.gmra.mxu3 %v16316_v45  ;;  %4552 = vmatpush.msra.mxu0 %v4462_v2  ;;  %v392_v2 = vadd.f32 %v15569_v41, %v364_v57  ;;  %v1871_v41 = vadd.f32 %v15972_v58, %v1842_v35 }
 0x48b   :  { %v16430_v28 = vadd.f32 %v3242_v1, %v3217_v31  ;;  %4642 = vmatpush.msra.mxu3 %v4641_v44  ;;  %v20339_v31 = vld [vmem:[#allocation8_spill] sm:$0xff] }
 0x48c   :  { %4377 = vmatmul.f32.vlgmr.msra.gmra.mxu2 %v16316_v45  ;;  %v418_v22 = vadd.f32 %v15577_v43, %v392_v2  ;;  %v1901_v46 = vadd.f32 %v20338_v61, %v1871_v41  ;;  %v565_v44 = vadd.f32 %v20339_v31, %v535_v23  ;;  %v20343_v2 = vld [vmem:[#allocation121_spill] sm:$0xff]  ;;  %v20349_v23 = vld [vmem:[#allocation6_spill] sm:$0xff]  ;;  %v20352_v61 = vld [vmem:[#allocation44_spill] sm:$0xff] }
 0x48d   :  { %4604 = vmatpush.msra.mxu2 %v16393_v17  ;;  %v3387_v29 = vpop.f32.mrf.mxu3  ;;  %v16436_v30 = vpop.permute.xlu2 %4803 }
 0x48e   :  { %v3304_v63 = vpop.f32.mrf.mxu0  ;;  %v3330_v53 = vpop.f32.mrf.mxu1  ;;  %v1015_v48 = vadd.f32 %v15764_v27, %v418_v22  ;;  %v1927_v38 = vadd.f32 %v16036_v32, %v1901_v46  ;;  %v20353_v46 = vld [vmem:[#allocation85_spill] sm:$0xff] }
 0x48f   :  { %v3331_v55 = vadd.f32 %v3330_v53, %v3296_v24  ;;  %v3358_v34 = vpop.f32.mrf.mxu2  ;;  %v16462_v24 = vld [vmem:[#allocation3 + $0x30] sm:$0xf]  ;;  %v2682_v53 = vadd.f32 %v20344_v39, %v20343_v2  ;;  %v20359_v2 = vld [vmem:[#allocation123_spill] sm:$0xff]  ;;  %v20360_v39 = vld [vmem:[#allocation124_spill] sm:$0xff] }
 0x490   :  { %v1045_v58 = vadd.f32 %v20337_v59, %v1015_v48  ;;  %v591_v48 = vadd.f32 %v20349_v23, %v565_v44  ;;  %v20351_v59 = vld [vmem:[#allocation38_spill] sm:$0xff]  ;;  %v20354_v44 = vld [vmem:[#allocation12_spill] sm:$0xff] }
 0x491   :  { %v3359_v51 = vadd.f32 %v3358_v34, %v3331_v55  ;;  %4323 = vmatmul.f32.gmra.mxu0 %v16345_v33  ;;  %4347 = vmatmul.f32.vlgmr.msra.gmra.mxu1 %v16335_v19  ;;  %v20346_v34 = vld [vmem:[#allocation41_spill] sm:$0xff] }
 0x492   :  { %4407 = vmatmul.f32.gmra.mxu3 %v16337_v18  ;;  %4578 = vmatpush.msra.mxu1 %v16381_v7  ;;  %v1098_v7 = vadd.f32 %v20336_v3, %v1069_v40  ;;  %v20348_v40 = vld [vmem:[#allocation9_spill] sm:$0xff] }
 0x493   :  { %v3388_v42 = vadd.f32 %v3387_v29, %v3359_v51  ;;  %v1847_v29 = vadd.f32 %v20342_v37, %v1818_v9  ;;  %v20347_v51 = vld [vmem:[#allocation125_spill] sm:$0xff]  ;;  %v541_v41 = vadd.f32 %v20348_v40, %v511_v36  ;;  %v20350_v9 = vld [vmem:[#allocation80_spill] sm:$0xff] }
 0x494   :  { %4381 = vmatmul.f32.gmra.mxu2 %v16337_v18  ;;  %v1128_v57 = vadd.f32 %v20341_v49, %v1098_v7  ;;  %v2708_v22 = vadd.f32 %v20347_v51, %v2682_v53  ;;  %v20355_v49 = vld [vmem:[#allocation43_spill] sm:$0xff]  ;;  %v16499_v37 = vld [vmem:[%s20183_s4 + $0x8] sm:$0x3]  ;;  %v2686_v53 = vadd.f32 %v20360_v39, %v20359_v2  ;;  %v20375_v39 = vld [vmem:[#allocation46_spill] sm:$0xff] }
 0x495   :  { %v3393_v1 = vpop.f32.mrf.mxu3  ;;  %v16456_v43 = vpop.permute.xlu2 %5559  ;;  %v1877_v5 = vadd.f32 %v20350_v9, %v1847_v29  ;;  %v569_v36 = vadd.f32 %v20354_v44, %v541_v41  ;;  %v20358_v29 = vld [vmem:[#allocation87_spill] sm:$0xff]  ;;  %v20364_v41 = vld [vmem:[#allocation126_spill] sm:$0xff] }
 0x496   :  { %v5575_v50 = vmul.f32 %v16462_v24, %v16456_v43  ;;  %v3334_v27 = vpop.f32.mrf.mxu1  ;;  %v3417_v15 = vpop.f32.mrf.mxu0  ;;  %v1154_v8 = vadd.f32 %v20346_v34, %v1128_v57  ;;  %v2712_v23 = vadd.f32 %v20364_v41, %v2686_v53 }
 0x497   :  { %v3335_v0 = vadd.f32 %v3334_v27, %v3304_v63  ;;  %v3363_v20 = vpop.f32.mrf.mxu2  ;;  %v20345_v63 = vld [vmem:[#allocation40_spill] sm:$0xff]  ;;  %v3418_v3 = vadd.f32 %v3417_v15, %v3388_v42  ;;  %v20357_v15 = vld [vmem:[#allocation83_spill] sm:$0xff] }
 0x498   :  { %5589 = vrot.lane.b32.xlu1 %v5575_v50, %s15143_s18  ;;  %v1074_v55 = vadd.f32 %v20345_v63, %v1045_v58  ;;  %v2464_v6 = vadd.f32 %v1927_v38, %v1154_v8  ;;  %v20356_v42 = vld [vmem:[#allocation84_spill] sm:$0xff]  ;;  %v20362_v8 = vld [vmem:[#allocation45_spill] sm:$0xff] }
 0x499   :  { %v3364_v35 = vadd.f32 %v3363_v20, %v3335_v0  ;;  %4353 = vmatmul.f32.gmra.mxu1 %v16358_v62  ;;  %4433 = vmatmul.f32.vlgmr.msrb.gmra.mxu0 %v16355_v47  ;;  %v1905_v0 = vadd.f32 %v20353_v46, %v1877_v5  ;;  %v16513_v63 = vld [vmem:[%s20180_s1 + $0x20] ss:$8 sm:$0xf] }
 0x49a   :  { %4524 = vmatmul.f32.vlgmr.msrb.gmra.mxu3 %v16335_v19  ;;  %4669 = vmatpush.msrb.mxu0 %v16404_v54  ;;  %v1104_v58 = vadd.f32 %v20351_v59, %v1074_v55  ;;  %v3245_v20 = vadd.f32 %v2708_v22, %v2464_v6  ;;  %v1991_v54 = vadd.f32 %v20357_v15, %v20356_v42  ;;  %v20361_v55 = vld [vmem:[#allocation42_spill] sm:$0xff]  ;;  %v20363_v22 = vld [vmem:[#allocation89_spill] sm:$0xff]  ;;  %v6334_v5 = vperm.slane %v16513_v63, 0  ;;  %v20366_v6 = vld [vmem:[#allocation47_spill] sm:$0xff] }
 0x49b   :  { %4755 = vmatpush.msrb.mxu3 %v16393_v17  ;;  %v3394_v32 = vadd.f32 %v3393_v1, %v3364_v35  ;;  %v1184_v1 = vadd.f32 %v20352_v61, %v591_v48  ;;  %v1931_v38 = vadd.f32 %v20358_v29, %v1905_v0  ;;  %v20365_v48 = vld [vmem:[#allocation10_spill] sm:$0xff]  ;;  %v20367_v59 = vld [vmem:[#allocation91_spill] sm:$0xff]  ;;  %v20368_v46 = vld [vmem:[#allocation48_spill] sm:$0xff]  ;;  %v6336_v41 = vperm.slane %v16513_v63, 2 }
 0x49c   :  { %4495 = vmatmul.f32.vlgmr.msrb.gmra.mxu2 %v16323_v52  ;;  %v1132_v57 = vadd.f32 %v20355_v49, %v1104_v58  ;;  %v2019_v40 = vadd.f32 %v20363_v22, %v1991_v54  ;;  %v595_v9 = vadd.f32 %v20365_v48, %v569_v36  ;;  %v20370_v49 = vld [vmem:[#allocation11_spill] sm:$0xff]  ;;  %v20372_v54 = vld [vmem:[#allocation88_spill] sm:$0xff]  ;;  %v20373_v29 = vld [vmem:[#allocation86_spill] sm:$0xff] }
 0x49d   :  { %4729 = vmatpush.msrb.mxu2 %v4639_v11  ;;  %v3507_v7 = vpop.f32.mrf.mxu3  ;;  %v1218_v34 = vadd.f32 %v20361_v55, %v1184_v1  ;;  %v20376_v55 = vld [vmem:[#allocation52_spill] sm:$0xff] }
 0x49e   :  { %v3421_v50 = vpop.f32.mrf.mxu0  ;;  %v3443_v27 = vpop.f32.mrf.mxu1  ;;  %v1158_v51 = vadd.f32 %v20362_v8, %v1132_v57  ;;  %v2048_v58 = vadd.f32 %v20367_v59, %v2019_v40  ;;  %v1192_v0 = vadd.f32 %v20368_v46, %v595_v9  ;;  %v20371_v57 = vld [vmem:[#allocation13_spill] sm:$0xff]  ;;  %v20378_v22 = vld [vmem:[#allocation16_spill] sm:$0xff]  ;;  %v20380_v9 = vld [vmem:[#allocation90_spill] sm:$0xff] }
 0x49f   :  { %v3444_v31 = vadd.f32 %v3443_v27, %v3418_v3  ;;  %v3473_v21 = vpop.f32.mrf.mxu2  ;;  %v1246_v3 = vadd.f32 %v20366_v6, %v1218_v34  ;;  %v655_v42 = vadd.f32 %v20371_v57, %v20370_v49  ;;  %v20377_v8 = vld [vmem:[#allocation93_spill] sm:$0xff]  ;;  %v20381_v6 = vld [vmem:[#allocation95_spill] sm:$0xff] }
 0x4a0   :  { %v3508_v11 = vadd.f32 %v3507_v7, %v3473_v21  ;;  %5582 = vrot.lane.b32.xlu1 %v16499_v37, %s15158_s16  ;;  %v2468_v7 = vadd.f32 %v1931_v38, %v1158_v51  ;;  %v1995_v38 = vadd.f32 %v20373_v29, %v20372_v54  ;;  %v1222_v53 = vadd.f32 %v20375_v39, %v1192_v0  ;;  %v20383_v46 = vld [vmem:[#allocation53_spill] sm:$0xff] }
 0x4a1   :  { %v16506_v35 = vadd.f32 %v3444_v31, %v3245_v20  ;;  %4441 = vmatmul.f32.gmra.mxu0 %v16379_v26  ;;  %4467 = vmatmul.f32.vlgmr.msrb.gmra.mxu1 %v16316_v45  ;;  %v20369_v20 = vld [vmem:[#allocation49_spill] sm:$0xff]  ;;  %v683_v40 = vadd.f32 %v20378_v22, %v655_v42  ;;  %v20387_v42 = vld [vmem:[#allocation96_spill] sm:$0xff] }
 0x4a2   :  { %4530 = vmatmul.f32.gmra.mxu3 %v16358_v62  ;;  %4697 = vmatpush.msrb.mxu1 %v16393_v17  ;;  %v3422_v17 = vadd.f32 %v3421_v50, %v3394_v32  ;;  %v1275_v31 = vadd.f32 %v20369_v20, %v1246_v3  ;;  %v3249_v21 = vadd.f32 %v2712_v23, %v2468_v7  ;;  %v20374_v32 = vld [vmem:[#allocation92_spill] sm:$0xff]  ;;  %v20379_v23 = vld [vmem:[#allocation51_spill] sm:$0xff] }
 0x4a3   :  { %v2078_v50 = vadd.f32 %v20374_v32, %v2048_v58  ;;  %v2024_v51 = vadd.f32 %v20377_v8, %v1995_v38  ;;  %v1251_v48 = vadd.f32 %v20379_v23, %v1222_v53  ;;  %v20389_v38 = vld [vmem:[#allocation56_spill] sm:$0xff]  ;;  %v20390_v53 = vld [vmem:[#allocation127_spill] sm:$0xff] }
 0x4a4   :  { %4500 = vmatmul.f32.gmra.mxu2 %v16345_v33  ;;  %v1305_v34 = vadd.f32 %v20376_v55, %v1275_v31  ;;  %v4824_v55 = vsel %vm230_vm6, %v20390_v53, 0 }
 0x4a5   :  { %v3511_v27 = vpop.f32.mrf.mxu3  ;;  %v2054_v3 = vadd.f32 %v20381_v6, %v2024_v51  ;;  %v1281_v0 = vadd.f32 %v20383_v46, %v1251_v48  ;;  %v20392_v51 = vld [vmem:[#allocation94_spill] sm:$0xff]  ;;  %v20393_v48 = vld [vmem:[#allocation21_spill] sm:$0xff] }
 0x4a6   :  { %v3447_v61 = vpop.f32.mrf.mxu1  ;;  %v3535_v1 = vpop.f32.mrf.mxu0 }
 0x4a7   :  { %v3448_v44 = vadd.f32 %v3447_v61, %v3422_v17  ;;  %v3481_v36 = vpop.f32.mrf.mxu2  ;;  %v3536_v7 = vadd.f32 %v3535_v1, %v3508_v11  ;;  %v2082_v54 = vadd.f32 %v20387_v42, %v2054_v3  ;;  %v20388_v1 = vld [vmem:[#allocation19_spill] sm:$0xff]  ;;  %v1309_v32 = vadd.f32 %v20389_v38, %v1281_v0  ;;  %v20394_v3 = vld [vmem:[#allocation54_spill] sm:$0xff] }
 0x4a8   :  { %v3512_v15 = vadd.f32 %v3511_v27, %v3481_v36  ;;  %6338 = vrot.lane.b32.xlu1 %v6334_v5, %s15150_s13  ;;  %v2104_v5 = vadd.f32 %v20380_v9, %v2078_v50  ;;  %v20382_v27 = vld [vmem:[#allocation50_spill] sm:$0xff]  ;;  %v20386_v36 = vld [vmem:[#allocation17_spill] sm:$0xff]  ;;  %v20400_v42 = vld [vmem:[#allocation23_spill] sm:$0xff] }
 0x4a9   :  { %v16534_v2 = vadd.f32 %v3448_v44, %v3249_v21  ;;  %4471 = vmatmul.f32.gmra.mxu1 %v16337_v18  ;;  %4554 = vmatmul.f32.vlgmr.msra.gmra.mxu0 %v16316_v45  ;;  %v1331_v61 = vadd.f32 %v20382_v27, %v1305_v34  ;;  %v20384_v21 = vld [vmem:[#allocation14_spill] sm:$0xff]  ;;  %v20385_v44 = vld [vmem:[#allocation15_spill] sm:$0xff]  ;;  %v20391_v34 = vld [vmem:[#allocation20_spill] sm:$0xff]  ;;  %v2108_v22 = vadd.f32 %v20392_v51, %v2082_v54 }
 0x4aa   :  { %4644 = vmatmul.f32.vlgmr.msra.gmra.mxu3 %v16316_v45  ;;  %v659_v49 = vadd.f32 %v20386_v36, %v20385_v44  ;;  %v20399_v36 = vld [vmem:[#allocation57_spill] sm:$0xff]  ;;  %v20402_v38 = vld [vmem:[#allocation99_spill] sm:$0xff] }
 0x4ab   :  { %v2465_v57 = vadd.f32 %v2104_v5, %v1331_v61 }
 0x4ac   :  { %4610 = vmatmul.f32.vlgmr.msra.gmra.mxu2 %v16355_v47  ;;  %v712_v47 = vadd.f32 %v20384_v21, %v683_v40  ;;  %v688_v8 = vadd.f32 %v20391_v34, %v659_v49  ;;  %v20397_v21 = vld [vmem:[#allocation24_spill] sm:$0xff] }
 0x4ad   :  { %v3620_v59 = vpop.f32.mrf.mxu3  ;;  %v3246_v50 = vadd.f32 %v16305_v13, %v2465_v57  ;;  %v1335_v13 = vadd.f32 %v20394_v3, %v1309_v32 }
 0x4ae   :  { %v3540_v58 = vpop.f32.mrf.mxu0  ;;  %v3564_v17 = vpop.f32.mrf.mxu1  ;;  %v742_v29 = vadd.f32 %v20388_v1, %v712_v47  ;;  %v20398_v47 = vld [vmem:[#allocation22_spill] sm:$0xff] }
 0x4af   :  { %v3565_v20 = vadd.f32 %v3564_v17, %v3536_v7  ;;  %v3594_v31 = vpop.f32.mrf.mxu2  ;;  %v3541_v40 = vadd.f32 %v3540_v58, %v3512_v15  ;;  %v16570_v7 = vand.u32 4294901760, %v4824_v55  ;;  %v20396_v15 = vld [vmem:[#allocation18_spill] sm:$0xff]  ;;  %v2469_v0 = vadd.f32 %v2108_v22, %v1335_v13  ;;  %v20406_v13 = vld [vmem:[#allocation100_spill] sm:$0xff] }
 0x4b0   :  { %6342 = vrot.lane.b32.xlu1 %v6336_v41, %s15150_s13  ;;  %v768_v9 = vadd.f32 %v20393_v48, %v742_v29  ;;  %v718_v58 = vadd.f32 %v20396_v15, %v688_v8  ;;  %v832_v44 = vadd.f32 %v20398_v47, %v20397_v21  ;;  %v20401_v29 = vld [vmem:[#allocation97_spill] sm:$0xff]  ;;  %v20408_v15 = vld [vmem:[#allocation59_spill] sm:$0xff]  ;;  %v20411_v47 = vld [vmem:[#allocation58_spill] sm:$0xff] }
 0x4b1   :  { %v3595_v11 = vadd.f32 %v3594_v31, %v3565_v20  ;;  %4558 = vmatmul.f32.gmra.mxu0 %v16337_v18  ;;  %4580 = vmatmul.f32.vlgmr.msra.gmra.mxu1 %v16316_v45  ;;  %v16585_v54 = vsub.f32 %v4824_v55, %v16570_v7  ;;  %v2168_v32 = vadd.f32 %v20402_v38, %v20401_v29  ;;  %v20404_v55 = vld [vmem:[#allocation60_spill] sm:$0xff]  ;;  %v20415_v38 = vld [vmem:[#allocation98_spill] sm:$0xff] }
 0x4b2   :  { %4648 = vmatmul.f32.gmra.mxu3 %v16337_v18 }
 0x4b3   :  { %v3621_v39 = vadd.f32 %v3620_v59, %v3595_v11  ;;  %v3250_v11 = vadd.f32 %v16325_v10, %v2469_v0 }
 0x4b4   :  { %4618 = vmatmul.f32.gmra.mxu2 %v16379_v26  ;;  %v20395_v26 = vld [vmem:[#allocation55_spill] sm:$0xff] }
 0x4b5   :  { %v16566_v41 = vadd.f32 %v3621_v39, %v3246_v50  ;;  %v3624_v23 = vpop.f32.mrf.mxu3  ;;  %v1361_v61 = vadd.f32 %v20395_v26, %v768_v9  ;;  %v20403_v39 = vld [vmem:[#allocation27_spill] sm:$0xff] }
 0x4b6   :  { %v3570_v5 = vpop.f32.mrf.mxu1  ;;  %v3650_v6 = vpop.f32.mrf.mxu0  ;;  %v860_v53 = vadd.f32 %v20403_v39, %v832_v44  ;;  %v20416_v39 = vld [vmem:[#allocation32_spill] sm:$0xff] }
 0x4b7   :  { %v3571_v59 = vadd.f32 %v3570_v5, %v3541_v40  ;;  %v3598_v17 = vpop.f32.mrf.mxu2  ;;  %v4813_v27 = vpop.permute.xlu0 %4812  ;;  %v1395_v49 = vadd.f32 %v20399_v36, %v1361_v61  ;;  %v20407_v61 = vld [vmem:[#allocation29_spill] sm:$0xff] }
 0x4b8   :  { %v4820_v46 = vsel %vm1706_vm9, %v16417_v16, %v4813_v27  ;;  %v746_v16 = vadd.f32 %v20400_v42, %v718_v58 }
 0x4b9   :  { %v3599_v20 = vadd.f32 %v3598_v17, %v3571_v59  ;;  %v4828_v31 = vsel %vm62_vm0, %v4820_v46, 0  ;;  %4584 = vmatmul.f32.gmra.mxu1 %v16337_v18  ;;  %4672 = vmatmul.f32.vlgmr.msrb.gmra.mxu0 %v16323_v52  ;;  %v4826_v52 = vsel %vm230_vm6, %v16436_v30, 0  ;;  %v1423_v51 = vadd.f32 %v20404_v55, %v1395_v49  ;;  %v20412_v49 = vld [vmem:[#allocation61_spill] sm:$0xff] }
 0x4ba   :  { %v4851_v57 = vand.u32 4294901760, %v4828_v31  ;;  %4757 = vmatmul.f32.vlgmr.msrb.gmra.mxu3 %v16316_v45  ;;  %v16599_v30 = vand.u32 4294901760, %v16585_v54  ;;  %v16601_v9 = vand.u32 4294901760, %v4826_v52  ;;  %v2196_v59 = vadd.f32 %v20406_v13, %v2168_v32  ;;  %v20420_v13 = vld [vmem:[#allocation64_spill] sm:$0xff] }
 0x4bb   :  { %v3625_v1 = vadd.f32 %v3624_v23, %v3599_v20  ;;  %v20405_v23 = vld [vmem:[#allocation25_spill] sm:$0xff]  ;;  %v889_v46 = vadd.f32 %v20407_v61, %v860_v53  ;;  %v1452_v44 = vadd.f32 %v20411_v47, %v1423_v51  ;;  %v20418_v51 = vld [vmem:[#allocation63_spill] sm:$0xff] }
 0x4bc   :  { %v4886_v50 = vsub.f32 %v4828_v31, %v4851_v57  ;;  %4731 = vmatmul.f32.vlgmr.msrb.gmra.mxu2 %v16316_v45  ;;  %4852 = vmatpush.msra.mxu0 %v4851_v57  ;;  %v772_v48 = vadd.f32 %v20405_v23, %v746_v16  ;;  %v20410_v31 = vld [vmem:[#allocation26_spill] sm:$0xff]  ;;  %v16618_v16 = vsub.f32 %v4826_v52, %v16601_v9  ;;  %v20417_v52 = vld [vmem:[#allocation31_spill] sm:$0xff]  ;;  %v16646_v47 = vld [vmem:[#allocation3 + $0x8] sm:$0xf] }
 0x4bd   :  { %v16594_v34 = vadd.f32 %v3625_v1, %v3250_v11  ;;  %v3741_v8 = vpop.f32.mrf.mxu3  ;;  %4945 = vmatpush.msra.mxu3 %v4851_v57  ;;  %v20414_v1 = vld [vmem:[#allocation103_spill] sm:$0xff]  ;;  %v2225_v32 = vadd.f32 %v20415_v38, %v2196_v59  ;;  %v919_v53 = vadd.f32 %v20416_v39, %v889_v46 }
 0x4be   :  { %v3658_v10 = vpop.f32.mrf.mxu0  ;;  %v3684_v22 = vpop.f32.mrf.mxu1  ;;  %4917 = vmatpush.msra.mxu2 %v4886_v50  ;;  %v4887_v40 = vand.u32 4294901760, %v4886_v50  ;;  %v1369_v58 = vadd.f32 %v20408_v15, %v772_v48  ;;  %v16636_v46 = vand.u32 4294901760, %v16618_v16 }
 0x4bf   :  { %v3685_v45 = vadd.f32 %v3684_v22, %v3650_v6  ;;  %v3712_v5 = vpop.f32.mrf.mxu2  ;;  %v4815_v3 = vpop.permute.xlu0 %4814  ;;  %v20409_v6 = vld [vmem:[#allocation28_spill] sm:$0xff]  ;;  %v1482_v22 = vadd.f32 %v20418_v51, %v1452_v44 }
 0x4c0   :  { %v4821_v17 = vsel %vm1706_vm9, %v4813_v27, %v4815_v3  ;;  %4977 = vmatpush.msrb.mxu0 %v4887_v40  ;;  %v4888_v26 = vsub.f32 %v4886_v50, %v4887_v40  ;;  %v836_v21 = vadd.f32 %v20410_v31, %v20409_v6  ;;  %v1399_v42 = vadd.f32 %v20412_v49, %v1369_v58  ;;  %v20419_v40 = vld [vmem:[#allocation105_spill] sm:$0xff]  ;;  %v20422_v58 = vld [vmem:[#allocation107_spill] sm:$0xff] }
 0x4c1   :  { %v3713_v0 = vadd.f32 %v3712_v5, %v3685_v45  ;;  %v4830_v20 = vsel %vm62_vm0, %v4821_v17, 0  ;;  %4677 = vmatmul.f32.gmra.mxu0 %v16345_v33  ;;  %4701 = vmatmul.f32.vlgmr.msrb.gmra.mxu1 %v16335_v19  ;;  %v4856_v33 = vsub.f32 %v16585_v54, %v16599_v30  ;;  %v20413_v19 = vld [vmem:[#allocation101_spill] sm:$0xff]  ;;  %v2255_v23 = vadd.f32 %v20419_v40, %v2225_v32  ;;  %v20426_v32 = vld [vmem:[#allocation102_spill] sm:$0xff]  ;;  %v20429_v40 = vld [vmem:[#allocation68_spill] sm:$0xff] }
 0x4c2   :  { %v16613_v36 = vand.u32 4294901760, %v4830_v20  ;;  %4761 = vmatmul.f32.gmra.mxu3 %v16337_v18  ;;  %v4889_v27 = vand.u32 4294901760, %v4888_v26  ;;  %v2172_v29 = vadd.f32 %v20414_v1, %v20413_v19  ;;  %v1428_v59 = vadd.f32 %v20420_v13, %v1399_v42 }
 0x4c3   :  { %v3742_v11 = vadd.f32 %v3741_v8, %v3713_v0  ;;  %v865_v8 = vadd.f32 %v20417_v52, %v836_v21  ;;  %v16633_v61 = vand.u32 4294901760, %v4856_v33  ;;  %v2281_v0 = vadd.f32 %v20422_v58, %v2255_v23  ;;  %v20424_v33 = vld [vmem:[#allocation65_spill] sm:$0xff] }
 0x4c4   :  { %v5063_v50 = vsub.f32 %v4830_v20, %v16613_v36  ;;  %4735 = vmatmul.f32.gmra.mxu2 %v16337_v18  ;;  %4890 = vmatpush.msra.mxu1 %v4889_v27  ;;  %v3036_v21 = vadd.f32 %v16353_v14, %v16347_v25  ;;  %v20423_v27 = vld [vmem:[#allocation33_spill] sm:$0xff]  ;;  %v1508_v19 = vadd.f32 %v20424_v33, %v1482_v22  ;;  %v16654_v14 = vpop.permute.xlu2 %5563 }
 0x4c5   :  { %v3747_v55 = vpop.f32.mrf.mxu3  ;;  %5029 = vmatpush.msrb.mxu2 %v16613_v36  ;;  %v895_v49 = vadd.f32 %v20423_v27, %v865_v8  ;;  %v4864_v1 = vsub.f32 %v16618_v16, %v16636_v46 }
 0x4c6   :  { %5003 = vmatpush.msrb.mxu1 %v4851_v57  ;;  %v3688_v48 = vpop.f32.mrf.mxu1  ;;  %v3771_v45 = vpop.f32.mrf.mxu0  ;;  %v5064_v5 = vand.u32 4294901760, %v5063_v50  ;;  %v20421_v57 = vld [vmem:[#allocation104_spill] sm:$0xff]  ;;  %v3062_v25 = vadd.f32 %v16377_v12, %v3036_v21  ;;  %v2466_v52 = vadd.f32 %v2281_v0, %v1508_v19  ;;  %v20434_v21 = vld [vmem:[#allocation111_spill] sm:$0xff]  ;;  %v20435_v19 = vld [vmem:[#allocation66_spill] sm:$0xff] }
 0x4c7   :  { %v3689_v17 = vadd.f32 %v3688_v48, %v3658_v10  ;;  %v3717_v18 = vpop.f32.mrf.mxu2  ;;  %v5562_v26 = vpop.permute.xlu0 %5561  ;;  %v2201_v15 = vadd.f32 %v20421_v57, %v2172_v29  ;;  %v20425_v29 = vld [vmem:[#allocation30_spill] sm:$0xff]  ;;  %v3772_v8 = vadd.f32 %v3771_v45, %v3742_v11  ;;  %v16673_v58 = vand.u32 4294901760, %v4864_v1  ;;  %v20432_v0 = vld [vmem:[#allocation108_spill] sm:$0xff]  ;;  %v20436_v1 = vld [vmem:[#allocation69_spill] sm:$0xff] }
 0x4c8   :  { %v5567_v20 = vsel %vm225_vm7, %v16456_v43, %v5562_v26  ;;  %v4817_v6 = vpop.permute.xlu1 %4816  ;;  %v5065_v31 = vsub.f32 %v5063_v50, %v5064_v5  ;;  %v945_v38 = vadd.f32 %v20425_v29, %v919_v53  ;;  %v20430_v53 = vld [vmem:[#allocation109_spill] sm:$0xff]  ;;  %v5568_v13 = vsel %vm225_vm7, %v5562_v26, %v16654_v14 }
 0x4c9   :  { %v3718_v10 = vadd.f32 %v3717_v18, %v3689_v17  ;;  %4707 = vmatmul.f32.gmra.mxu1 %v16358_v62  ;;  %4858 = vmatmul.f32.vlgmr.msra.gmra.mxu0 %v16633_v61  ;;  %v5576_v44 = vmul.f32 %v16646_v47, %v5567_v20  ;;  %v4822_v42 = vsel %vm1706_vm9, %v4815_v3, %v4817_v6  ;;  %v20433_v20 = vld [vmem:[#allocation106_spill] sm:$0xff] }
 0x4ca   :  { %4949 = vmatmul.f32.vlgmr.msra.gmra.mxu3 %v16599_v30  ;;  %5094 = vmatpush.msra.mxu0 %v5063_v50  ;;  %v5066_v43 = vand.u32 4294901760, %v5065_v31  ;;  %v2231_v3 = vadd.f32 %v20426_v32, %v2201_v15  ;;  %v20427_v50 = vld [vmem:[#allocation62_spill] sm:$0xff]  ;;  %v4832_v12 = vsel %vm62_vm0, %v4822_v42, 0  ;;  %v1538_v23 = vadd.f32 %v20429_v40, %v945_v38  ;;  %v20437_v38 = vld [vmem:[#allocation113_spill] sm:$0xff] }
 0x4cb   :  { %5591 = vrot.lane.b32.xlu2 %v5576_v44, %s15143_s18  ;;  %v3748_v62 = vadd.f32 %v3747_v55, %v3718_v10  ;;  %v1458_v39 = vadd.f32 %v20427_v50, %v1428_v59  ;;  %v20428_v55 = vld [vmem:[#allocation35_spill] sm:$0xff]  ;;  %v3247_v11 = vadd.f32 %v3062_v25, %v2466_v52  ;;  %v2345_v31 = vadd.f32 %v20433_v20, %v20432_v0  ;;  %v20439_v50 = vld [vmem:[#allocation34_spill] sm:$0xff] }
 0x4cc   :  { %4920 = vmatmul.f32.vlgmr.msra.gmra.mxu2 %v16585_v54  ;;  %5067 = vmatpush.msrb.mxu3 %v5066_v43  ;;  %v923_v22 = vadd.f32 %v20428_v55, %v895_v49  ;;  %v2259_v48 = vadd.f32 %v20430_v53, %v2231_v3  ;;  %v20431_v59 = vld [vmem:[#allocation67_spill] sm:$0xff]  ;;  %v16678_v44 = vand.u32 4294901760, %v4832_v12  ;;  %v3040_v49 = vadd.f32 %v16375_v4, %v16367_v56  ;;  %v20438_v4 = vld [vmem:[#allocation128_spill] sm:$0xff] }
 0x4cd   :  { %5154 = vmatpush.msra.mxu2 %v5064_v5  ;;  %v3861_v51 = vpop.f32.mrf.mxu3  ;;  %v1486_v57 = vadd.f32 %v20431_v59, %v1458_v39  ;;  %v16686_v43 = vld [vmem:[#allocation3 + $0x58] sm:$0xf]  ;;  %v1572_v25 = vadd.f32 %v20435_v19, %v1538_v23  ;;  %v2373_v56 = vadd.f32 %v20437_v38, %v2345_v31 }
 0x4ce   :  { %5180 = vmatpush.msra.mxu3 %v16613_v36  ;;  %v3775_v17 = vpop.f32.mrf.mxu0  ;;  %v3797_v18 = vpop.f32.mrf.mxu1  ;;  %v2285_v10 = vadd.f32 %v20434_v21, %v2259_v48  ;;  %v5577_v33 = vmul.f32 %v16686_v43, %v5568_v13  ;;  %v3066_v32 = vadd.f32 %v20438_v4, %v3040_v49  ;;  %v949_v39 = vadd.f32 %v20439_v50, %v923_v22  ;;  %v20441_v55 = vld [vmem:[#allocation115_spill] sm:$0xff]  ;;  %v20442_v48 = vld [vmem:[#allocation72_spill] sm:$0xff]  ;;  %v20449_v4 = vld [vmem:[#allocation117_spill] sm:$0xff] }
 0x4cf   :  { %v3798_v45 = vadd.f32 %v3797_v18, %v3772_v8  ;;  %v3827_v15 = vpop.f32.mrf.mxu2  ;;  %v16671_v5 = vpop.permute.xlu0 %5580  ;;  %v1512_v29 = vadd.f32 %v20436_v1, %v1486_v57  ;;  %v16699_v52 = vsub.f32 %v4832_v12, %v16678_v44  ;;  %v20440_v8 = vld [vmem:[#allocation71_spill] sm:$0xff]  ;;  %v2402_v40 = vadd.f32 %v20441_v55, %v2373_v56  ;;  %v20443_v57 = vld [vmem:[#allocation74_spill] sm:$0xff] }
 0x4d0   :  { %v3862_v27 = vadd.f32 %v3861_v51, %v3827_v15  ;;  %v4819_v26 = vpop.permute.xlu1 %4818  ;;  %v1600_v51 = vadd.f32 %v20440_v8, %v1572_v25  ;;  %v3776_v23 = vadd.f32 %v3775_v17, %v3748_v62  ;;  %v1546_v13 = vadd.f32 %v20442_v48, %v949_v39  ;;  %v20445_v12 = vld [vmem:[#allocation110_spill] sm:$0xff]  ;;  %v16720_v25 = vld [vmem:[#allocation3 + $0x38] sm:$0xf] }
 0x4d1   :  { %v16682_v42 = vadd.f32 %v3798_v45, %v3247_v11  ;;  %4866 = vmatmul.f32.gmra.mxu0 %v16673_v58  ;;  %4892 = vmatmul.f32.vlgmr.msra.gmra.mxu1 %v16570_v7  ;;  %v4823_v3 = vsel %vm1706_vm9, %v4817_v6, %v4819_v26  ;;  %v20444_v11 = vld [vmem:[#allocation112_spill] sm:$0xff]  ;;  %v6335_v17 = vperm.slane %v16513_v63, 1  ;;  %v20448_v38 = vld [vmem:[#allocation75_spill] sm:$0xff]  ;;  %v20451_v8 = vld [vmem:[#allocation114_spill] sm:$0xff] }
 0x4d2   :  { %4955 = vmatmul.f32.gmra.mxu3 %v16636_v46  ;;  %5122 = vmatpush.msra.mxu1 %v16613_v36  ;;  %v2470_v36 = vadd.f32 %v2285_v10, %v1512_v29  ;;  %v4834_v6 = vsel %vm62_vm0, %v4823_v3, 0  ;;  %v1629_v22 = vadd.f32 %v20443_v57, %v1600_v51  ;;  %v2349_v45 = vadd.f32 %v20445_v12, %v20444_v11  ;;  %v20446_v26 = vld [vmem:[#allocation116_spill] sm:$0xff]  ;;  %v20447_v29 = vld [vmem:[#allocation70_spill] sm:$0xff]  ;;  %v16744_v12 = vld [vmem:[#allocation3 + $0x48] sm:$0xf] }
 0x4d3   :  { %5593 = vrot.lane.b32.xlu2 %v5577_v33, %s15143_s18  ;;  %v5241_v10 = vand.u32 4294901760, %v16699_v52  ;;  %v2432_v49 = vadd.f32 %v20446_v26, %v2402_v40  ;;  %v16714_v33 = vand.u32 4294901760, %v4834_v6  ;;  %v20450_v3 = vld [vmem:[#allocation76_spill] sm:$0xff]  ;;  %v20456_v26 = vld [vmem:[#allocation79_spill] sm:$0xff] }
 0x4d4   :  { %4925 = vmatmul.f32.gmra.mxu2 %v16618_v16  ;;  %v3251_v15 = vadd.f32 %v3066_v32, %v2470_v36  ;;  %v1659_v56 = vadd.f32 %v20448_v38, %v1629_v22  ;;  %v2378_v32 = vadd.f32 %v20449_v4, %v2349_v45  ;;  %v20452_v36 = vld [vmem:[#allocation119_spill] sm:$0xff]  ;;  %v20454_v22 = vld [vmem:[#allocation78_spill] sm:$0xff] }
 0x4d5   :  { %v3865_v53 = vpop.f32.mrf.mxu3  ;;  %v5242_v39 = vsub.f32 %v16699_v52, %v5241_v10  ;;  %v2458_v51 = vadd.f32 %v20451_v8, %v2432_v49  ;;  %v16739_v40 = vsub.f32 %v4834_v6, %v16714_v33  ;;  %v20455_v6 = vld [vmem:[#allocation120_spill] sm:$0xff] }
 0x4d6   :  { %v3801_v18 = vpop.f32.mrf.mxu1  ;;  %v3889_v59 = vpop.f32.mrf.mxu0  ;;  %v2408_v55 = vadd.f32 %v20452_v36, %v2378_v32 }
 0x4d7   :  { %v3802_v0 = vadd.f32 %v3801_v18, %v3776_v23  ;;  %v3835_v20 = vpop.f32.mrf.mxu2  ;;  %v5566_v31 = vpop.permute.xlu0 %5565  ;;  %v3890_v23 = vadd.f32 %v3889_v59, %v3862_v27  ;;  %v20453_v18 = vld [vmem:[#allocation73_spill] sm:$0xff]  ;;  %v5418_v27 = vand.u32 4294901760, %v16739_v40 }
 0x4d8   :  { %v3866_v21 = vadd.f32 %v3865_v53, %v3835_v20  ;;  %v5569_v62 = vsel %vm225_vm7, %v16654_v14, %v5566_v31  ;;  %v1576_v14 = vadd.f32 %v20447_v29, %v1546_v13  ;;  %v1685_v57 = vadd.f32 %v20453_v18, %v1659_v56  ;;  %v15113_v29 = vld [vmem:[%s20183_s4] sm:$0xff]  ;;  %s15161_s4 = smov 86  }
 0x4d9   :  { %v16716_v19 = vadd.f32 %v3802_v0, %v3251_v15  ;;  %4896 = vmatmul.f32.gmra.mxu1 %v16601_v9  ;;  %4979 = vmatmul.f32.vlgmr.msrb.gmra.mxu0 %v16570_v7  ;;  %v5578_v1 = vmul.f32 %v16720_v25, %v5569_v62  ;;  %v5579_v45 = vmul.f32 %v16744_v12, %v5566_v31  ;;  %v5243_v20 = vand.u32 4294901760, %v5242_v39  ;;  %v20458_v39 = vld [vmem:[#allocation77_spill] sm:$0xff] }
 0x4da   :  { %5069 = vmatmul.f32.vlgmr.msrb.gmra.mxu3 %v16570_v7  ;;  %5206 = vmatpush.msrb.mxu0 %v16678_v44  ;;  %v1605_v50 = vadd.f32 %v20450_v3, %v1576_v14  ;;  %v2467_v62 = vadd.f32 %v2458_v51, %v1685_v57  ;;  %v20457_v14 = vld [vmem:[#allocation118_spill] sm:$0xff] }
 0x4db   :  { %5299 = vmatpush.msrb.mxu3 %v16678_v44  ;;  %5595 = vrot.lane.b32.xlu0 %v5578_v1, %s15143_s18 }
 0x4dc   :  { %5035 = vmatmul.f32.vlgmr.msrb.gmra.mxu2 %v16633_v61  ;;  %6340 = vrot.lane.b32.xlu2 %v6335_v17, %s15150_s13  ;;  %v1635_v11 = vadd.f32 %v20454_v22, %v1605_v50  ;;  %v2436_v17 = vadd.f32 %v20455_v6, %v2408_v55  ;;  %v3248_v31 = vadd.f32 %v16411_v60, %v2467_v62  ;;  %v6337_v55 = vperm.slane %v16513_v63, 3 }
 0x4dd   :  { %5271 = vmatpush.msrb.mxu2 %v16699_v52  ;;  %v3974_v53 = vpop.f32.mrf.mxu3  ;;  %v5419_v60 = vsub.f32 %v16739_v40, %v5418_v27 }
 0x4de   :  { %v3894_v48 = vpop.f32.mrf.mxu0  ;;  %v3918_v13 = vpop.f32.mrf.mxu1  ;;  %v1663_v49 = vadd.f32 %v20456_v26, %v1635_v11  ;;  %v2462_v38 = vadd.f32 %v20457_v14, %v2436_v17 }
 0x4df   :  { %v3919_v15 = vadd.f32 %v3918_v13, %v3890_v23  ;;  %v3948_v0 = vpop.f32.mrf.mxu2  ;;  %v3895_v56 = vadd.f32 %v3894_v48, %v3866_v21  ;;  %v5420_v21 = vand.u32 4294901760, %v5419_v60 }
 0x4e0   :  { %v1689_v8 = vadd.f32 %v20458_v39, %v1663_v49 }
 0x4e1   :  { %v3949_v59 = vadd.f32 %v3948_v0, %v3919_v15  ;;  %4983 = vmatmul.f32.gmra.mxu0 %v16601_v9  ;;  %5005 = vmatmul.f32.vlgmr.msrb.gmra.mxu1 %v16570_v7 }
 0x4e2   :  { %5073 = vmatmul.f32.gmra.mxu3 %v16601_v9  ;;  %5244 = vmatpush.msrb.mxu1 %v5243_v20  ;;  %v2471_v23 = vadd.f32 %v2462_v38, %v1689_v8 }
 0x4e3   :  { %v3975_v1 = vadd.f32 %v3974_v53, %v3949_v59  ;;  %5597 = vrot.lane.b32.xlu0 %v5579_v45, %s15143_s18 }
 0x4e4   :  { %5043 = vmatmul.f32.gmra.mxu2 %v16673_v58  ;;  %6359 = vrot.lane.b32.xlu2 %v15113_v29, %s15159_s2  ;;  %v3252_v48 = vadd.f32 %v16430_v28, %v2471_v23 }
 0x4e5   :  { %v16761_v4 = vadd.f32 %v3975_v1, %v3248_v31  ;;  %v3978_v32 = vpop.f32.mrf.mxu3 }
 0x4e6   :  { %v3924_v3 = vpop.f32.mrf.mxu1  ;;  %v4080_v50 = vpop.f32.mrf.mxu0 }
 0x4e7   :  { %v3925_v51 = vadd.f32 %v3924_v3, %v3895_v56  ;;  %v3952_v36 = vpop.f32.mrf.mxu2 }
 0x4e9   :  { %v3953_v53 = vadd.f32 %v3952_v36, %v3925_v51  ;;  %5009 = vmatmul.f32.gmra.mxu1 %v16601_v9  ;;  %5097 = vmatmul.f32.vlgmr.msra.gmra.mxu0 %v16585_v54 }
 0x4ea   :  { %5182 = vmatmul.f32.vlgmr.msra.gmra.mxu3 %v16570_v7  ;;  %5331 = vmatpush.msra.mxu0 %v5241_v10 }
 0x4eb   :  { %v3979_v13 = vadd.f32 %v3978_v32, %v3953_v53  ;;  %5421 = vmatpush.msra.mxu3 %v5420_v21 }
 0x4ec   :  { %5156 = vmatmul.f32.vlgmr.msra.gmra.mxu2 %v16570_v7  ;;  %6344 = vrot.lane.b32.xlu2 %v6337_v55, %s15150_s13 }
 0x4ed   :  { %v16776_v63 = vadd.f32 %v3979_v13, %v3252_v48  ;;  %5383 = vmatpush.msra.mxu2 %v16714_v33  ;;  %v4171_v18 = vpop.f32.mrf.mxu3  ;;  %v5603_v13 = vsel %vm230_vm6, %v16671_v5, 0 }
 0x4ee   :  { %v4088_v57 = vpop.f32.mrf.mxu0  ;;  %v4114_v22 = vpop.f32.mrf.mxu1 }
 0x4ef   :  { %v4115_v11 = vadd.f32 %v4114_v22, %v4080_v50  ;;  %v4142_v45 = vpop.f32.mrf.mxu2 }
 0x4f1   :  { %v4143_v15 = vadd.f32 %v4142_v45, %v4115_v11  ;;  %5102 = vmatmul.f32.gmra.mxu0 %v16618_v16  ;;  %5126 = vmatmul.f32.vlgmr.msra.gmra.mxu1 %v16599_v30  ;;  %v16816_v45 = vand.u32 4294901760, %v5603_v13 }
 0x4f2   :  { %5186 = vmatmul.f32.gmra.mxu3 %v16601_v9  ;;  %5357 = vmatpush.msra.mxu1 %v16678_v44 }
 0x4f3   :  { %v4172_v28 = vadd.f32 %v4171_v18, %v4143_v15 }
 0x4f4   :  { %5160 = vmatmul.f32.gmra.mxu2 %v16601_v9 }
 0x4f5   :  { %v4177_v52 = vpop.f32.mrf.mxu3 }
 0x4f6   :  { %v4118_v10 = vpop.f32.mrf.mxu1  ;;  %v4201_v0 = vpop.f32.mrf.mxu0 }
 0x4f7   :  { %v4119_v20 = vadd.f32 %v4118_v10, %v4088_v57  ;;  %v4147_v62 = vpop.f32.mrf.mxu2  ;;  %v4202_v17 = vadd.f32 %v4201_v0, %v4172_v28 }
 0x4f9   :  { %v4148_v6 = vadd.f32 %v4147_v62, %v4119_v20  ;;  %5132 = vmatmul.f32.gmra.mxu1 %v16636_v46  ;;  %5212 = vmatmul.f32.vlgmr.msrb.gmra.mxu0 %v16633_v61 }
 0x4fa   :  { %5303 = vmatmul.f32.vlgmr.msrb.gmra.mxu3 %v16599_v30  ;;  %5448 = vmatpush.msrb.mxu0 %v16739_v40 }
 0x4fb   :  { %5534 = vmatpush.msrb.mxu3 %v16714_v33  ;;  %v4178_v44 = vadd.f32 %v4177_v52, %v4148_v6  ;;  %v16828_v52 = vsub.f32 %v5603_v13, %v16816_v45 }
 0x4fc   :  { %5274 = vmatmul.f32.vlgmr.msrb.gmra.mxu2 %v16585_v54 }
 0x4fd   :  { %5508 = vmatpush.msrb.mxu2 %v5418_v27  ;;  %v4291_v59 = vpop.f32.mrf.mxu3 }
 0x4fe   :  { %v4205_v26 = vpop.f32.mrf.mxu0  ;;  %v4227_v49 = vpop.f32.mrf.mxu1 }
 0x4ff   :  { %v4228_v31 = vadd.f32 %v4227_v49, %v4202_v17  ;;  %v4257_v1 = vpop.f32.mrf.mxu2  ;;  %v4206_v40 = vadd.f32 %v4205_v26, %v4178_v44 }
 0x500   :  { %v4292_v29 = vadd.f32 %v4291_v59, %v4257_v1 }
 0x501   :  { %v16793_v14 = vadd.f32 %v4228_v31, %v16506_v35  ;;  %5220 = vmatmul.f32.gmra.mxu0 %v16673_v58  ;;  %5246 = vmatmul.f32.vlgmr.msrb.gmra.mxu1 %v16570_v7 }
 0x502   :  { %5309 = vmatmul.f32.gmra.mxu3 %v16636_v46  ;;  %5476 = vmatpush.msrb.mxu1 %v16714_v33 }
 0x504   :  { %5279 = vmatmul.f32.gmra.mxu2 %v16618_v16 }
 0x505   :  { %v4295_v27 = vpop.f32.mrf.mxu3 }
 0x506   :  { %v4231_v38 = vpop.f32.mrf.mxu1  ;;  %v4319_v56 = vpop.f32.mrf.mxu0 }
 0x507   :  { %v4232_v32 = vadd.f32 %v4231_v38, %v4206_v40  ;;  %v4265_v60 = vpop.f32.mrf.mxu2  ;;  %v4320_v33 = vadd.f32 %v4319_v56, %v4292_v29 }
 0x508   :  { %v4296_v3 = vadd.f32 %v4295_v27, %v4265_v60 }
 0x509   :  { %v16801_v35 = vadd.f32 %v4232_v32, %v16534_v2  ;;  %5250 = vmatmul.f32.gmra.mxu1 %v16601_v9  ;;  %5333 = vmatmul.f32.vlgmr.msra.gmra.mxu0 %v16570_v7 }
 0x50a   :  { %5423 = vmatmul.f32.vlgmr.msra.gmra.mxu3 %v16570_v7  ;;  %v5590_v50 = vpop.permute.xlu1 %5589 }
 0x50c   :  { %5389 = vmatmul.f32.vlgmr.msra.gmra.mxu2 %v16633_v61 }
 0x50d   :  { %v4404_v39 = vpop.f32.mrf.mxu3 }
 0x50e   :  { %v4324_v8 = vpop.f32.mrf.mxu0  ;;  %v4348_v51 = vpop.f32.mrf.mxu1 }
 0x50f   :  { %v4349_v36 = vadd.f32 %v4348_v51, %v4320_v33  ;;  %v4378_v55 = vpop.f32.mrf.mxu2  ;;  %v4325_v21 = vadd.f32 %v4324_v8, %v4296_v3 }
 0x511   :  { %v4379_v23 = vadd.f32 %v4378_v55, %v4349_v36  ;;  %5337 = vmatmul.f32.gmra.mxu0 %v16601_v9  ;;  %5359 = vmatmul.f32.vlgmr.msra.gmra.mxu1 %v16570_v7 }
 0x512   :  { %5427 = vmatmul.f32.gmra.mxu3 %v16601_v9  ;;  %v5583_v2 = vpop.permute.xlu1 %5582 }
 0x513   :  { %v4405_v53 = vadd.f32 %v4404_v39, %v4379_v23  ;;  %v5605_v5 = vsel %vm230_vm6, %v5583_v2, 0 }
 0x514   :  { %5397 = vmatmul.f32.gmra.mxu2 %v16673_v58  ;;  %v16834_v62 = vand.u32 4294901760, %v5605_v5 }
 0x515   :  { %v16812_v61 = vadd.f32 %v4405_v53, %v16566_v41  ;;  %v4408_v48 = vpop.f32.mrf.mxu3 }
 0x516   :  { %v4354_v18 = vpop.f32.mrf.mxu1  ;;  %v4434_v57 = vpop.f32.mrf.mxu0 }
 0x517   :  { %v4355_v22 = vadd.f32 %v4354_v18, %v4325_v21  ;;  %v4382_v11 = vpop.f32.mrf.mxu2 }
 0x519   :  { %v4383_v15 = vadd.f32 %v4382_v11, %v4355_v22  ;;  %5363 = vmatmul.f32.gmra.mxu1 %v16601_v9  ;;  %5451 = vmatmul.f32.vlgmr.msrb.gmra.mxu0 %v16585_v54 }
 0x51a   :  { %5536 = vmatmul.f32.vlgmr.msrb.gmra.mxu3 %v16570_v7  ;;  %v16821_v58 = vpop.permute.xlu1 %6338 }
 0x51b   :  { %v4409_v41 = vadd.f32 %v4408_v48, %v4383_v15  ;;  %v6354_v28 = vmul.f32 %v16462_v24, %v16821_v58  ;;  %v16837_v24 = vand.u32 4294901760, %v16828_v52 }
 0x51c   :  { %5510 = vmatmul.f32.vlgmr.msrb.gmra.mxu2 %v16570_v7  ;;  %v16843_v7 = vsub.f32 %v5605_v5, %v16834_v62 }
 0x51d   :  { %v16831_v10 = vadd.f32 %v4409_v41, %v16594_v34  ;;  %v4525_v0 = vpop.f32.mrf.mxu3  ;;  %6368 = vrot.lane.b32.xlu0 %v6354_v28, %s15148_s29  ;;  %v5635_v49 = vsub.f32 %v16828_v52, %v16837_v24 }
 0x51e   :  { %v4442_v54 = vpop.f32.mrf.mxu0  ;;  %v4468_v20 = vpop.f32.mrf.mxu1  ;;  %v16853_v27 = vand.u32 4294901760, %v16843_v7 }
 0x51f   :  { %20459 = vst [vmem:[#allocation5_spill] sm:$0xff] %v16831_v10  ;;  %v4469_v6 = vadd.f32 %v4468_v20, %v4434_v57  ;;  %v4496_v44 = vpop.f32.mrf.mxu2  ;;  %v16856_v56 = vand.u32 4294901760, %v5635_v49 }
 0x520   :  { %v5643_v60 = vsub.f32 %v16843_v7, %v16853_v27 }
 0x521   :  { %v4497_v17 = vadd.f32 %v4496_v44, %v4469_v6  ;;  %5456 = vmatmul.f32.gmra.mxu0 %v16618_v16  ;;  %5480 = vmatmul.f32.vlgmr.msrb.gmra.mxu1 %v16599_v30 }
 0x522   :  { %5540 = vmatmul.f32.gmra.mxu3 %v16601_v9  ;;  %v16868_v53 = vand.u32 4294901760, %v5643_v60 }
 0x523   :  { %v4526_v34 = vadd.f32 %v4525_v0, %v4497_v17 }
 0x524   :  { %5514 = vmatmul.f32.gmra.mxu2 %v16601_v9 }
 0x525   :  { %v4531_v59 = vpop.f32.mrf.mxu3  ;;  %v5592_v26 = vpop.permute.xlu2 %5591  ;;  %6361 = vrot.lane.b32.xlu0 %v16499_v37, %s15159_s2 }
 0x526   :  { %v5599_v16 = vsel %vm190_vm5, %v5590_v50, %v5592_v26  ;;  %v4472_v31 = vpop.f32.mrf.mxu1  ;;  %v4555_v30 = vpop.f32.mrf.mxu0 }
 0x527   :  { %v5607_v1 = vsel %vm62_vm0, %v5599_v16, 0  ;;  %v4473_v29 = vadd.f32 %v4472_v31, %v4442_v54  ;;  %v4501_v40 = vpop.f32.mrf.mxu2  ;;  %v4556_v50 = vadd.f32 %v4555_v30, %v4526_v34 }
 0x528   :  { %v5630_v9 = vand.u32 4294901760, %v5607_v1 }
 0x529   :  { %v4502_v38 = vadd.f32 %v4501_v40, %v4473_v29  ;;  %5486 = vmatmul.f32.gmra.mxu1 %v16636_v46 }
 0x52a   :  { %v5665_v32 = vsub.f32 %v5607_v1, %v5630_v9  ;;  %5631 = vmatpush.msra.mxu0 %v5630_v9  ;;  %5724 = vmatpush.msra.mxu3 %v5630_v9 }
 0x52b   :  { %5637 = vmatmul.f32.vlgmr.msra.gmra.mxu0 %v16856_v56  ;;  %5728 = vmatmul.f32.vlgmr.msra.gmra.mxu3 %v16837_v24  ;;  %v4532_v37 = vadd.f32 %v4531_v59, %v4502_v38  ;;  %v6343_v59 = vpop.permute.xlu1 %6342 }
 0x52c   :  { %5696 = vmatpush.msra.mxu2 %v5665_v32  ;;  %v5666_v3 = vand.u32 4294901760, %v5665_v32 }
 0x52d   :  { %v4645_v33 = vpop.f32.mrf.mxu3  ;;  %5699 = vmatmul.f32.vlgmr.msra.gmra.mxu2 %v16828_v52  ;;  %v16863_v46 = vpop.permute.xlu2 %5593 }
 0x52e   :  { %v5600_v39 = vsel %vm190_vm5, %v5592_v26, %v16863_v46  ;;  %v4559_v8 = vpop.f32.mrf.mxu0  ;;  %v4581_v51 = vpop.f32.mrf.mxu1  ;;  %5756 = vmatpush.msrb.mxu0 %v5666_v3  ;;  %v5667_v36 = vsub.f32 %v5665_v32, %v5666_v3 }
 0x52f   :  { %v5609_v55 = vsel %vm62_vm0, %v5600_v39, 0  ;;  %v4582_v23 = vadd.f32 %v4581_v51, %v4556_v50  ;;  %v4611_v2 = vpop.f32.mrf.mxu2  ;;  %v4560_v11 = vadd.f32 %v4559_v8, %v4532_v37  ;;  %v7110_v8 = vld [vmem:[%s20184_s5] sm:$0xff] }
 0x530   :  { %v5807_v21 = vand.u32 4294901760, %v5609_v55  ;;  %v4646_v48 = vadd.f32 %v4645_v33, %v4611_v2  ;;  %v5668_v13 = vand.u32 4294901760, %v5667_v36 }
 0x531   :  { %v16871_v18 = vadd.f32 %v4582_v23, %v16682_v42 }
 0x532   :  { %v5842_v57 = vsub.f32 %v5609_v55, %v5807_v21  ;;  %5669 = vmatpush.msra.mxu1 %v5668_v13  ;;  %5808 = vmatpush.msrb.mxu2 %v5807_v21 }
 0x533   :  { %20460 = vst [vmem:[#allocation36_spill] sm:$0xff] %v16871_v18  ;;  %5645 = vmatmul.f32.gmra.mxu0 %v16868_v53  ;;  %5671 = vmatmul.f32.vlgmr.msra.gmra.mxu1 %v16816_v45 }
 0x534   :  { %5734 = vmatmul.f32.gmra.mxu3 %v16853_v27  ;;  %5782 = vmatpush.msrb.mxu1 %v5630_v9  ;;  %v5843_v22 = vand.u32 4294901760, %v5842_v57 }
 0x535   :  { %v4649_v15 = vpop.f32.mrf.mxu3  ;;  %5873 = vmatpush.msra.mxu0 %v5842_v57  ;;  %5704 = vmatmul.f32.gmra.mxu2 %v16843_v7 }
 0x536   :  { %5901 = vmatpush.msra.mxu1 %v5807_v21  ;;  %v6341_v41 = vpop.permute.xlu2 %6340  ;;  %v4585_v42 = vpop.f32.mrf.mxu1  ;;  %v5844_v28 = vsub.f32 %v5842_v57, %v5843_v22  ;;  %5933 = vmatpush.msra.mxu2 %v5843_v22 }
 0x537   :  { %v6346_v5 = vsel %vm966_vm10, %v16821_v58, %v6341_v41  ;;  %v4586_v0 = vadd.f32 %v4585_v42, %v4560_v11  ;;  %v4619_v54 = vpop.f32.mrf.mxu2  ;;  %v4673_v20 = vpop.f32.mrf.mxu0  ;;  %v6347_v58 = vsel %vm966_vm10, %v6341_v41, %v6343_v59 }
 0x538   :  { %v4650_v6 = vadd.f32 %v4649_v15, %v4619_v54  ;;  %v6355_v44 = vmul.f32 %v16646_v47, %v6346_v5  ;;  %v5845_v17 = vand.u32 4294901760, %v5844_v28  ;;  %v4674_v26 = vadd.f32 %v4673_v20, %v4646_v48 }
 0x539   :  { %v16881_v34 = vadd.f32 %v4586_v0, %v16716_v19  ;;  %v6356_v1 = vmul.f32 %v16686_v43, %v6347_v58 }
 0x53a   :  { %6370 = vrot.lane.b32.xlu1 %v6355_v44, %s15148_s29  ;;  %5846 = vmatpush.msrb.mxu3 %v5845_v17 }
 0x53b   :  { %20461 = vst [vmem:[#allocation37_spill] sm:$0xff] %v16881_v34  ;;  %5675 = vmatmul.f32.gmra.mxu1 %v16834_v62  ;;  %5758 = vmatmul.f32.vlgmr.msrb.gmra.mxu0 %v16816_v45 }
 0x53c   :  { %5848 = vmatmul.f32.vlgmr.msrb.gmra.mxu3 %v16816_v45 }
 0x53d   :  { %5959 = vmatpush.msra.mxu3 %v5807_v21  ;;  %v4758_v49 = vpop.f32.mrf.mxu3  ;;  %5814 = vmatmul.f32.vlgmr.msrb.gmra.mxu2 %v16856_v56 }
 0x53e   :  { %v16889_v47 = vpop.permute.xlu2 %6359  ;;  %v4702_v19 = vpop.f32.mrf.mxu1 }
 0x53f   :  { %v4678_v16 = vpop.f32.mrf.mxu0  ;;  %v4703_v31 = vadd.f32 %v4702_v19, %v4674_v26  ;;  %v4732_v30 = vpop.f32.mrf.mxu2 }
 0x540   :  { %v4679_v9 = vadd.f32 %v4678_v16, %v4650_v6 }
 0x541   :  { %v4733_v29 = vadd.f32 %v4732_v30, %v4703_v31 }
 0x542   :  { %6372 = vrot.lane.b32.xlu1 %v6356_v1, %s15148_s29 }
 0x543   :  { %v4759_v40 = vadd.f32 %v4758_v49, %v4733_v29  ;;  %5762 = vmatmul.f32.gmra.mxu0 %v16834_v62  ;;  %5784 = vmatmul.f32.vlgmr.msrb.gmra.mxu1 %v16816_v45 }
 0x544   :  { %5852 = vmatmul.f32.gmra.mxu3 %v16834_v62 }
 0x545   :  { %v16897_v38 = vadd.f32 %v4759_v40, %v16761_v4  ;;  %v4762_v32 = vpop.f32.mrf.mxu3  ;;  %5822 = vmatmul.f32.gmra.mxu2 %v16868_v53 }
 0x546   :  { %v6345_v37 = vpop.permute.xlu2 %6344  ;;  %v4708_v60 = vpop.f32.mrf.mxu1 }
 0x547   :  { %20462 = vst [vmem:[#allocation82_spill] sm:$0xff] %v16897_v38  ;;  %v6348_v43 = vsel %vm966_vm10, %v6343_v59, %v6345_v37  ;;  %v6358_v3 = vmul.f32 %v16744_v12, %v6345_v37  ;;  %v4709_v50 = vadd.f32 %v4708_v60, %v4679_v9  ;;  %v4736_v33 = vpop.f32.mrf.mxu2  ;;  %v16902_v39 = vpop.f32.mrf.mxu0 }
 0x548   :  { %v6357_v4 = vmul.f32 %v16720_v25, %v6348_v43 }
 0x549   :  { %v4737_v51 = vadd.f32 %v4736_v33, %v4709_v50  ;;  %6376 = vrot.lane.b32.xlu0 %v6358_v3, %s15148_s29 }
 0x54a   :  { %7114 = vperm.xlu1 %15094, %v7110_v8   ;;  %6374 = vrot.lane.b32.xlu2 %v6357_v4, %s15148_s29 }
 0x54b   :  { %v4763_v36 = vadd.f32 %v4762_v32, %v4737_v51  ;;  %5788 = vmatmul.f32.gmra.mxu1 %v16834_v62  ;;  %5876 = vmatmul.f32.vlgmr.msra.gmra.mxu0 %v16828_v52 }
 0x54c   :  { %5961 = vmatmul.f32.vlgmr.msra.gmra.mxu3 %v16816_v45 }
 0x54d   :  { %v16914_v12 = vadd.f32 %v4763_v36, %v16776_v63  ;;  %v16916_v55 = vpop.f32.mrf.mxu3  ;;  %v5596_v23 = vpop.permute.xlu0 %5595  ;;  %5935 = vmatmul.f32.vlgmr.msra.gmra.mxu2 %v16816_v45  ;;  %v6382_v36 = vsel %vm230_vm6, %v16889_v47, 0 }
 0x54e   :  { %v5601_v25 = vsel %vm190_vm5, %v16863_v46, %v5596_v23  ;;  %v16921_v2 = vpop.f32.mrf.mxu1 }
 0x54f   :  { %20463 = vst [vmem:[#allocation8_spill] sm:$0xff] %v16914_v12  ;;  %v5611_v21 = vsel %vm62_vm0, %v5601_v25, 0  ;;  %v16924_v48 = vpop.f32.mrf.mxu0  ;;  %v16926_v13 = vpop.f32.mrf.mxu2 }
 0x550   :  { %v5984_v57 = vand.u32 4294901760, %v5611_v21 }
 0x552   :  { %v6019_v22 = vsub.f32 %v5611_v21, %v5984_v57  ;;  %5985 = vmatpush.msrb.mxu0 %v5984_v57  ;;  %6078 = vmatpush.msrb.mxu3 %v5984_v57 }
 0x553   :  { %5881 = vmatmul.f32.gmra.mxu0 %v16843_v7  ;;  %5905 = vmatmul.f32.vlgmr.msra.gmra.mxu1 %v16837_v24 }
 0x554   :  { %5965 = vmatmul.f32.gmra.mxu3 %v16834_v62  ;;  %6050 = vmatpush.msrb.mxu2 %v6019_v22  ;;  %v6020_v63 = vand.u32 4294901760, %v6019_v22 }
 0x555   :  { %v16931_v46 = vpop.f32.mrf.mxu3  ;;  %v5598_v11 = vpop.permute.xlu0 %5597  ;;  %5939 = vmatmul.f32.gmra.mxu2 %v16834_v62 }
 0x556   :  { %v5602_v15 = vsel %vm190_vm5, %v5596_v23, %v5598_v11  ;;  %v16935_v41 = vpop.f32.mrf.mxu1  ;;  %6110 = vmatpush.msra.mxu0 %v6020_v63  ;;  %v6021_v42 = vsub.f32 %v6019_v22, %v6020_v63 }
 0x557   :  { %v5613_v28 = vsel %vm62_vm0, %v5602_v15, 0  ;;  %v16938_v5 = vpop.f32.mrf.mxu2  ;;  %v16940_v0 = vpop.f32.mrf.mxu0 }
 0x558   :  { %v6161_v54 = vand.u32 4294901760, %v5613_v28  ;;  %v6022_v20 = vand.u32 4294901760, %v6021_v42 }
 0x55a   :  { %v6196_v6 = vsub.f32 %v5613_v28, %v6161_v54  ;;  %6023 = vmatpush.msrb.mxu1 %v6022_v20  ;;  %6162 = vmatpush.msra.mxu2 %v6161_v54 }
 0x55b   :  { %5911 = vmatmul.f32.gmra.mxu1 %v16853_v27  ;;  %5991 = vmatmul.f32.vlgmr.msrb.gmra.mxu0 %v16856_v56 }
 0x55c   :  { %6082 = vmatmul.f32.vlgmr.msrb.gmra.mxu3 %v16837_v24  ;;  %6136 = vmatpush.msra.mxu1 %v5984_v57  ;;  %v6197_v44 = vand.u32 4294901760, %v6196_v6 }
 0x55d   :  { %v16945_v17 = vpop.f32.mrf.mxu3  ;;  %6227 = vmatpush.msrb.mxu0 %v6196_v6  ;;  %6053 = vmatmul.f32.vlgmr.msrb.gmra.mxu2 %v16828_v52 }
 0x55e   :  { %v6198_v59 = vsub.f32 %v6196_v6, %v6197_v44  ;;  %6287 = vmatpush.msrb.mxu2 %v6197_v44  ;;  %v16950_v26 = vpop.f32.mrf.mxu1 }
 0x55f   :  { %v16948_v58 = vpop.f32.mrf.mxu2  ;;  %v16952_v19 = vpop.f32.mrf.mxu0 }
 0x560   :  { %v6199_v49 = vand.u32 4294901760, %v6198_v59 }
 0x562   :  { %6200 = vmatpush.msra.mxu3 %v6199_v49 }
 0x563   :  { %5999 = vmatmul.f32.gmra.mxu0 %v16868_v53  ;;  %6025 = vmatmul.f32.vlgmr.msrb.gmra.mxu1 %v16816_v45 }
 0x564   :  { %6088 = vmatmul.f32.gmra.mxu3 %v16853_v27  ;;  %6255 = vmatpush.msrb.mxu1 %v6161_v54 }
 0x565   :  { %6313 = vmatpush.msrb.mxu3 %v6161_v54  ;;  %6058 = vmatmul.f32.gmra.mxu2 %v16843_v7  ;;  %v16958_v16 = vpop.f32.mrf.mxu3 }
 0x566   :  { %v16962_v30 = vpop.f32.mrf.mxu1 }
 0x567   :  { %v16960_v31 = vpop.f32.mrf.mxu2  ;;  %v16964_v1 = vpop.f32.mrf.mxu0 }
 0x56b   :  { %6029 = vmatmul.f32.gmra.mxu1 %v16834_v62  ;;  %6112 = vmatmul.f32.vlgmr.msra.gmra.mxu0 %v16816_v45 }
 0x56c   :  { %6202 = vmatmul.f32.vlgmr.msra.gmra.mxu3 %v16816_v45 }
 0x56d   :  { %6168 = vmatmul.f32.vlgmr.msra.gmra.mxu2 %v16856_v56  ;;  %v16970_v29 = vpop.f32.mrf.mxu3 }
 0x56e   :  { %v16976_v9 = vpop.f32.mrf.mxu1 }
 0x56f   :  { %v16972_v40 = vpop.f32.mrf.mxu2  ;;  %v16979_v32 = vpop.f32.mrf.mxu0 }
 0x573   :  { %6116 = vmatmul.f32.gmra.mxu0 %v16834_v62  ;;  %6138 = vmatmul.f32.vlgmr.msra.gmra.mxu1 %v16816_v45 }
 0x574   :  { %6206 = vmatmul.f32.gmra.mxu3 %v16834_v62 }
 0x575   :  { %6176 = vmatmul.f32.gmra.mxu2 %v16868_v53  ;;  %v16982_v37 = vpop.f32.mrf.mxu3 }
 0x576   :  { %20464 = vst [vmem:[#allocation7_spill] sm:$0xff] %v16982_v37  ;;  %v16989_v60 = vpop.f32.mrf.mxu1 }
 0x577   :  { %v16987_v56 = vpop.f32.mrf.mxu2  ;;  %v16992_v43 = vpop.f32.mrf.mxu0 }
 0x578   :  { %20465 = vst [vmem:[#allocation39_spill] sm:$0xff] %v16992_v43 }
 0x57b   :  { %6142 = vmatmul.f32.gmra.mxu1 %v16834_v62  ;;  %6230 = vmatmul.f32.vlgmr.msrb.gmra.mxu0 %v16828_v52 }
 0x57c   :  { %6315 = vmatmul.f32.vlgmr.msrb.gmra.mxu3 %v16816_v45 }
 0x57d   :  { %6289 = vmatmul.f32.vlgmr.msrb.gmra.mxu2 %v16816_v45  ;;  %v16997_v53 = vpop.f32.mrf.mxu3 }
 0x57e   :  { %20466 = vst [vmem:[#allocation81_spill] sm:$0xff] %v16997_v53  ;;  %v17002_v3 = vpop.f32.mrf.mxu1 }
 0x57f   :  { %v17000_v52 = vpop.f32.mrf.mxu2  ;;  %20468 = vst [vmem:[#allocation122_spill] sm:$0xff] %v17002_v3  ;;  %v17004_v50 = vpop.f32.mrf.mxu0 }
 0x580   :  { %20467 = vst [vmem:[#allocation121_spill] sm:$0xff] %v17000_v52 }
 0x581   :  { %20469 = vst [vmem:[#allocation40_spill] sm:$0xff] %v17004_v50 }
 0x583   :  { %6235 = vmatmul.f32.gmra.mxu0 %v16843_v7  ;;  %6259 = vmatmul.f32.vlgmr.msrb.gmra.mxu1 %v16837_v24 }
 0x584   :  { %6319 = vmatmul.f32.gmra.mxu3 %v16834_v62 }
 0x585   :  { %6293 = vmatmul.f32.gmra.mxu2 %v16834_v62  ;;  %v17007_v45 = vpop.f32.mrf.mxu3 }
 0x586   :  { %20470 = vst [vmem:[#allocation41_spill] sm:$0xff] %v17007_v45  ;;  %v17011_v7 = vpop.f32.mrf.mxu1 }
 0x587   :  { %v17009_v33 = vpop.f32.mrf.mxu2  ;;  %20472 = vst [vmem:[#allocation9_spill] sm:$0xff] %v17011_v7  ;;  %v17013_v24 = vpop.f32.mrf.mxu0 }
 0x588   :  { %20471 = vst [vmem:[#allocation125_spill] sm:$0xff] %v17009_v33 }
 0x589   :  { %20473 = vst [vmem:[#allocation6_spill] sm:$0xff] %v17013_v24 }
 0x58b   :  { %6265 = vmatmul.f32.gmra.mxu1 %v16853_v27  ;;  %v17025_v27 = vand.u32 4294901760, %v6382_v36 }
 0x58d   :  { %v17015_v4 = vpop.f32.mrf.mxu3  ;;  %v17031_v22 = vsub.f32 %v6382_v36, %v17025_v27 }
 0x58e   :  { %20474 = vst [vmem:[#allocation80_spill] sm:$0xff] %v17015_v4  ;;  %v17019_v51 = vpop.f32.mrf.mxu1 }
 0x58f   :  { %v6369_v8 = vpop.permute.xlu0 %6368  ;;  %v17017_v62 = vpop.f32.mrf.mxu2  ;;  %20476 = vst [vmem:[#allocation44_spill] sm:$0xff] %v17019_v51  ;;  %v17042_v47 = vand.u32 4294901760, %v17031_v22 }
 0x590   :  { %20475 = vst [vmem:[#allocation38_spill] sm:$0xff] %v17017_v62  ;;  %v17023_v23 = vpop.f32.mrf.mxu0 }
 0x591   :  { %20477 = vst [vmem:[#allocation85_spill] sm:$0xff] %v17023_v23  ;;  %v6414_v20 = vsub.f32 %v17031_v22, %v17042_v47 }
 0x595   :  { %v17027_v21 = vpop.f32.mrf.mxu3 }
 0x596   :  { %20478 = vst [vmem:[#allocation12_spill] sm:$0xff] %v17027_v21  ;;  %v17035_v11 = vpop.f32.mrf.mxu1 }
 0x597   :  { %v6362_v25 = vpop.permute.xlu0 %6361  ;;  %v17033_v63 = vpop.f32.mrf.mxu2  ;;  %20480 = vst [vmem:[#allocation84_spill] sm:$0xff] %v17035_v11 }
 0x598   :  { %v6384_v57 = vsel %vm230_vm6, %v6362_v25, 0  ;;  %20479 = vst [vmem:[#allocation43_spill] sm:$0xff] %v17033_v63  ;;  %v17039_v42 = vpop.f32.mrf.mxu0  ;;  %vm7431_vm6 = vcmask 113664  }
 0x599   :  { %v17037_v15 = vand.u32 4294901760, %v6384_v57  ;;  %20481 = vst [vmem:[#allocation83_spill] sm:$0xff] %v17039_v42 }
 0x59b   :  { %v17045_v28 = vsub.f32 %v6384_v57, %v17037_v15  ;;  %v17060_v57 = vand.u32 4294901760, %v6414_v20 }
 0x59d   :  { %v17049_v6 = vpop.f32.mrf.mxu3  ;;  %v17054_v49 = vand.u32 4294901760, %v17045_v28 }
 0x59e   :  { %20482 = vst [vmem:[#allocation87_spill] sm:$0xff] %v17049_v6  ;;  %v17058_v12 = vpop.f32.mrf.mxu1 }
 0x59f   :  { %v17056_v36 = vpop.f32.mrf.mxu2  ;;  %20484 = vst [vmem:[#allocation124_spill] sm:$0xff] %v17058_v12 }
 0x5a0   :  { %20483 = vst [vmem:[#allocation123_spill] sm:$0xff] %v17056_v36  ;;  %v17062_v38 = vpop.f32.mrf.mxu0 }
 0x5a1   :  { %20485 = vst [vmem:[#allocation42_spill] sm:$0xff] %v17062_v38 }
 0x5a4   :  { %v6375_v6 = vpop.permute.xlu2 %6374 }
 0x5a5   :  { %v17074_v12 = vpop.f32.mrf.mxu3 }
 0x5a6   :  { %20486 = vst [vmem:[#allocation45_spill] sm:$0xff] %v17074_v12 }
 0x5a7   :  { %v17077_v62 = vpop.f32.mrf.mxu2 }
 0x5a8   :  { %20487 = vst [vmem:[#allocation89_spill] sm:$0xff] %v17077_v62  ;;  %v17079_v23 = vpop.f32.mrf.mxu0 }
 0x5ac   :  { %v6371_v54 = vpop.permute.xlu1 %6370 }
 0x5ad   :  { %v6378_v44 = vsel %vm159_vm8, %v6369_v8, %v6371_v54  ;;  %v6422_v8 = vsub.f32 %v17045_v28, %v17054_v49 }
 0x5ae   :  { %v6386_v59 = vsel %vm62_vm0, %v6378_v44, 0 }
 0x5af   :  { %v6409_v25 = vand.u32 4294901760, %v6386_v59  ;;  %v17072_v34 = vand.u32 4294901760, %v6422_v8 }
 0x5b0   :  { %v17091_v12 = vpop.f32.mrf.mxu2 }
 0x5b1   :  { %v6444_v21 = vsub.f32 %v6386_v59, %v6409_v25  ;;  %6410 = vmatpush.msra.mxu0 %v6409_v25  ;;  %6503 = vmatpush.msra.mxu3 %v6409_v25 }
 0x5b2   :  { %6416 = vmatmul.f32.vlgmr.msra.gmra.mxu0 %v17060_v57  ;;  %6507 = vmatmul.f32.vlgmr.msra.gmra.mxu3 %v17042_v47 }
 0x5b3   :  { %6475 = vmatpush.msra.mxu2 %v6444_v21  ;;  %v6445_v44 = vand.u32 4294901760, %v6444_v21 }
 0x5b4   :  { %v6373_v36 = vpop.permute.xlu1 %6372  ;;  %6478 = vmatmul.f32.vlgmr.msra.gmra.mxu2 %v17031_v22 }
 0x5b5   :  { %v6379_v20 = vsel %vm159_vm8, %v6371_v54, %v6373_v36  ;;  %v6380_v38 = vsel %vm159_vm8, %v6373_v36, %v6375_v6  ;;  %6535 = vmatpush.msrb.mxu0 %v6445_v44  ;;  %v6446_v59 = vsub.f32 %v6444_v21, %v6445_v44  ;;  %v17081_v54 = vpop.f32.mrf.mxu1  ;;  %v17088_v44 = vpop.f32.mrf.mxu3 }
 0x5b6   :  { %v6388_v63 = vsel %vm62_vm0, %v6379_v20, 0  ;;  %v6390_v42 = vsel %vm62_vm0, %v6380_v38, 0  ;;  %20488 = vst [vmem:[#allocation126_spill] sm:$0xff] %v17081_v54 }
 0x5b7   :  { %v6586_v11 = vand.u32 4294901760, %v6388_v63  ;;  %v6447_v4 = vand.u32 4294901760, %v6446_v59  ;;  %v6763_v36 = vand.u32 4294901760, %v6390_v42 }
 0x5b9   :  { %v6621_v18 = vsub.f32 %v6388_v63, %v6586_v11  ;;  %6448 = vmatpush.msra.mxu1 %v6447_v4  ;;  %6587 = vmatpush.msrb.mxu2 %v6586_v11  ;;  %v6798_v63 = vsub.f32 %v6390_v42, %v6763_v36 }
 0x5ba   :  { %6424 = vmatmul.f32.gmra.mxu0 %v17072_v34  ;;  %6450 = vmatmul.f32.vlgmr.msra.gmra.mxu1 %v17025_v27 }
 0x5bb   :  { %6513 = vmatmul.f32.gmra.mxu3 %v17054_v49  ;;  %v6377_v21 = vpop.permute.xlu0 %6376  ;;  %v6622_v38 = vand.u32 4294901760, %v6621_v18  ;;  %6561 = vmatpush.msrb.mxu1 %v6409_v25  ;;  %v6799_v25 = vand.u32 4294901760, %v6798_v63 }
 0x5bc   :  { %6652 = vmatpush.msra.mxu0 %v6621_v18  ;;  %v6381_v8 = vsel %vm159_vm8, %v6375_v6, %v6377_v21  ;;  %6483 = vmatmul.f32.gmra.mxu2 %v17045_v28  ;;  %v17096_v6 = vpop.f32.mrf.mxu0 }
 0x5bd   :  { %6680 = vmatpush.msra.mxu1 %v6586_v11  ;;  %v6623_v4 = vsub.f32 %v6621_v18, %v6622_v38  ;;  %6712 = vmatpush.msra.mxu2 %v6622_v38  ;;  %v6392_v20 = vsel %vm62_vm0, %v6381_v8, 0  ;;  %v17093_v62 = vpop.f32.mrf.mxu1  ;;  %v6800_v42 = vsub.f32 %v6798_v63, %v6799_v25  ;;  %v17101_v21 = vpop.f32.mrf.mxu3 }
 0x5be   :  { %v6940_v54 = vand.u32 4294901760, %v6392_v20 }
 0x5bf   :  { %v6624_v59 = vand.u32 4294901760, %v6623_v4  ;;  %v6801_v8 = vand.u32 4294901760, %v6800_v42 }
 0x5c0   :  { %v6975_v18 = vsub.f32 %v6392_v20, %v6940_v54 }
 0x5c1   :  { %6625 = vmatpush.msrb.mxu3 %v6624_v59 }
 0x5c2   :  { %6537 = vmatmul.f32.vlgmr.msrb.gmra.mxu0 %v17025_v27  ;;  %6454 = vmatmul.f32.gmra.mxu1 %v17037_v15  ;;  %v6976_v38 = vand.u32 4294901760, %v6975_v18 }
 0x5c3   :  { %6738 = vmatpush.msra.mxu3 %v6586_v11  ;;  %6764 = vmatpush.msrb.mxu0 %v6763_v36  ;;  %v17104_v11 = vpop.f32.mrf.mxu2 }
 0x5c4   :  { %6627 = vmatmul.f32.vlgmr.msrb.gmra.mxu3 %v17025_v27  ;;  %6593 = vmatmul.f32.vlgmr.msrb.gmra.mxu2 %v17060_v57  ;;  %v17110_v59 = vpop.f32.mrf.mxu0 }
 0x5c5   :  { %6857 = vmatpush.msrb.mxu3 %v6763_v36  ;;  %6829 = vmatpush.msrb.mxu2 %v6798_v63  ;;  %v17108_v4 = vpop.f32.mrf.mxu1  ;;  %v6977_v63 = vsub.f32 %v6975_v18, %v6976_v38  ;;  %v17114_v45 = vpop.f32.mrf.mxu3 }
 0x5c7   :  { %v6978_v20 = vand.u32 4294901760, %v6977_v63  ;;  %v7111_v63 = vld [vmem:[%s20184_s5 + $0x8] sm:$0x3] }
 0x5c8   :  { %7119 = vperm.xlu2 %15095, %v7111_v63  }
 0x5ca   :  { %6541 = vmatmul.f32.gmra.mxu0 %v17037_v15  ;;  %6563 = vmatmul.f32.vlgmr.msrb.gmra.mxu1 %v17025_v27 }
 0x5cb   :  { %6802 = vmatpush.msrb.mxu1 %v6801_v8  ;;  %v17118_v42 = vpop.f32.mrf.mxu2 }
 0x5cc   :  { %6631 = vmatmul.f32.gmra.mxu3 %v17037_v15  ;;  %6601 = vmatmul.f32.gmra.mxu2 %v17072_v34  ;;  %v17123_v51 = vpop.f32.mrf.mxu0 }
 0x5cd   :  { %v17121_v8 = vpop.f32.mrf.mxu1 }
 0x5d2   :  { %6655 = vmatmul.f32.vlgmr.msra.gmra.mxu0 %v17031_v22  ;;  %6567 = vmatmul.f32.gmra.mxu1 %v17037_v15 }
 0x5d3   :  { %6889 = vmatpush.msra.mxu0 %v6799_v25  ;;  %v17131_v25 = vpop.f32.mrf.mxu3 }
 0x5d4   :  { %6740 = vmatmul.f32.vlgmr.msra.gmra.mxu3 %v17025_v27  ;;  %6714 = vmatmul.f32.vlgmr.msra.gmra.mxu2 %v17025_v27  ;;  %v17138_v24 = vpop.f32.mrf.mxu0 }
 0x5d5   :  { %6979 = vmatpush.msra.mxu3 %v6978_v20  ;;  %6941 = vmatpush.msra.mxu2 %v6940_v54  ;;  %v17134_v20 = vpop.f32.mrf.mxu2  ;;  %v17136_v33 = vpop.f32.mrf.mxu1 }
 0x5da   :  { %6660 = vmatmul.f32.gmra.mxu0 %v17045_v28  ;;  %6684 = vmatmul.f32.vlgmr.msra.gmra.mxu1 %v17042_v47 }
 0x5db   :  { %6915 = vmatpush.msra.mxu1 %v6763_v36  ;;  %v17144_v36 = vpop.f32.mrf.mxu3 }
 0x5dc   :  { %6744 = vmatmul.f32.gmra.mxu3 %v17037_v15  ;;  %6718 = vmatmul.f32.gmra.mxu2 %v17037_v15  ;;  %v17151_v7 = vpop.f32.mrf.mxu0 }
 0x5dd   :  { %v17146_v63 = vpop.f32.mrf.mxu2  ;;  %v17148_v53 = vpop.f32.mrf.mxu1 }
 0x5e2   :  { %6770 = vmatmul.f32.vlgmr.msrb.gmra.mxu0 %v17060_v57  ;;  %6690 = vmatmul.f32.gmra.mxu1 %v17054_v49 }
 0x5e3   :  { %7006 = vmatpush.msrb.mxu0 %v6975_v18  ;;  %v17156_v18 = vpop.f32.mrf.mxu3 }
 0x5e4   :  { %6861 = vmatmul.f32.vlgmr.msrb.gmra.mxu3 %v17042_v47  ;;  %6832 = vmatmul.f32.vlgmr.msrb.gmra.mxu2 %v17031_v22  ;;  %20489 = vst [vmem:[#allocation10_spill] sm:$0xff] %v17156_v18  ;;  %v17165_v52 = vpop.f32.mrf.mxu0 }
 0x5e5   :  { %7092 = vmatpush.msrb.mxu3 %v6940_v54  ;;  %7066 = vmatpush.msrb.mxu2 %v6976_v38  ;;  %v17159_v38 = vpop.f32.mrf.mxu2  ;;  %v17163_v50 = vpop.f32.mrf.mxu1  ;;  %20491 = vst [vmem:[#allocation91_spill] sm:$0xff] %v17165_v52 }
 0x5e6   :  { %20490 = vst [vmem:[#allocation47_spill] sm:$0xff] %v17159_v38  ;;  %v5677_v38 = vadd.f32 %v17108_v4, %v17096_v6 }
 0x5ea   :  { %6778 = vmatmul.f32.gmra.mxu0 %v17072_v34  ;;  %6804 = vmatmul.f32.vlgmr.msrb.gmra.mxu1 %v17025_v27 }
 0x5eb   :  { %7034 = vmatpush.msrb.mxu1 %v6940_v54  ;;  %v17169_v54 = vpop.f32.mrf.mxu3 }
 0x5ec   :  { %6867 = vmatmul.f32.gmra.mxu3 %v17054_v49  ;;  %6837 = vmatmul.f32.gmra.mxu2 %v17045_v28  ;;  %20492 = vst [vmem:[#allocation48_spill] sm:$0xff] %v17169_v54  ;;  %v17178_v10 = vpop.f32.mrf.mxu0 }
 0x5ed   :  { %v17173_v3 = vpop.f32.mrf.mxu2  ;;  %v17176_v43 = vpop.f32.mrf.mxu1  ;;  %20495 = vst [vmem:[#allocation13_spill] sm:$0xff] %v17178_v10 }
 0x5ee   :  { %20493 = vst [vmem:[#allocation49_spill] sm:$0xff] %v17173_v3 }
 0x5ef   :  { %20494 = vst [vmem:[#allocation11_spill] sm:$0xff] %v17176_v43 }
 0x5f2   :  { %6891 = vmatmul.f32.vlgmr.msra.gmra.mxu0 %v17025_v27  ;;  %6808 = vmatmul.f32.gmra.mxu1 %v17037_v15 }
 0x5f4   :  { %6981 = vmatmul.f32.vlgmr.msra.gmra.mxu3 %v17025_v27  ;;  %6947 = vmatmul.f32.vlgmr.msra.gmra.mxu2 %v17060_v57  ;;  %v17183_v57 = vpop.f32.mrf.mxu3  ;;  %v17190_v3 = vpop.f32.mrf.mxu0 }
 0x5f5   :  { %20496 = vst [vmem:[#allocation88_spill] sm:$0xff] %v17183_v57  ;;  %v17186_v54 = vpop.f32.mrf.mxu2  ;;  %v17188_v52 = vpop.f32.mrf.mxu1 }
 0x5f6   :  { %20497 = vst [vmem:[#allocation86_spill] sm:$0xff] %v17186_v54 }
 0x5f7   :  { %20498 = vst [vmem:[#allocation92_spill] sm:$0xff] %v17188_v52 }
 0x5f8   :  { %20499 = vst [vmem:[#allocation46_spill] sm:$0xff] %v17190_v3 }
 0x5fa   :  { %6895 = vmatmul.f32.gmra.mxu0 %v17037_v15  ;;  %6917 = vmatmul.f32.vlgmr.msra.gmra.mxu1 %v17025_v27 }
 0x5fc   :  { %6985 = vmatmul.f32.gmra.mxu3 %v17037_v15  ;;  %6955 = vmatmul.f32.gmra.mxu2 %v17072_v34  ;;  %v17196_v34 = vpop.f32.mrf.mxu3 }
 0x5fd   :  { %20500 = vst [vmem:[#allocation52_spill] sm:$0xff] %v17196_v34  ;;  %v17200_v57 = vpop.f32.mrf.mxu1 }
 0x5fe   :  { %20502 = vst [vmem:[#allocation16_spill] sm:$0xff] %v17200_v57 }
 0x602   :  { %7009 = vmatmul.f32.vlgmr.msrb.gmra.mxu0 %v17031_v22  ;;  %6921 = vmatmul.f32.gmra.mxu1 %v17037_v15  ;;  %v17198_v22 = vpop.f32.mrf.mxu2 }
 0x603   :  { %20501 = vst [vmem:[#allocation93_spill] sm:$0xff] %v17198_v22 }
 0x604   :  { %7094 = vmatmul.f32.vlgmr.msrb.gmra.mxu3 %v17025_v27  ;;  %7068 = vmatmul.f32.vlgmr.msrb.gmra.mxu2 %v17025_v27  ;;  %v17202_v27 = vpop.f32.mrf.mxu0  ;;  %v17205_v54 = vpop.f32.mrf.mxu3 }
 0x605   :  { %20503 = vst [vmem:[#allocation51_spill] sm:$0xff] %v17202_v27 }
 0x606   :  { %20504 = vst [vmem:[#allocation90_spill] sm:$0xff] %v17205_v54 }
 0x60a   :  { %7014 = vmatmul.f32.gmra.mxu0 %v17045_v28  ;;  %7038 = vmatmul.f32.vlgmr.msrb.gmra.mxu1 %v17042_v47  ;;  %v17207_v3 = vpop.f32.mrf.mxu2  ;;  %v17209_v28 = vpop.f32.mrf.mxu1 }
 0x60b   :  { %20505 = vst [vmem:[#allocation95_spill] sm:$0xff] %v17207_v3 }
 0x60c   :  { %7098 = vmatmul.f32.gmra.mxu3 %v17037_v15  ;;  %7072 = vmatmul.f32.gmra.mxu2 %v17037_v15  ;;  %20506 = vst [vmem:[#allocation50_spill] sm:$0xff] %v17209_v28  ;;  %v17211_v47 = vpop.f32.mrf.mxu0  ;;  %v17213_v52 = vpop.f32.mrf.mxu3  ;;  %v4894_v28 = vadd.f32 %v16921_v2, %v16902_v39 }
 0x60d   :  { %20507 = vst [vmem:[#allocation53_spill] sm:$0xff] %v17211_v47 }
 0x60e   :  { %20508 = vst [vmem:[#allocation14_spill] sm:$0xff] %v17213_v52 }
 0x612   :  { %7044 = vmatmul.f32.gmra.mxu1 %v17054_v49  ;;  %v17215_v15 = vpop.f32.mrf.mxu2  ;;  %v17217_v34 = vpop.f32.mrf.mxu1 }
 0x613   :  { %20509 = vst [vmem:[#allocation15_spill] sm:$0xff] %v17215_v15  ;;  %v5673_v15 = vadd.f32 %v17093_v62, %v17079_v23 }
 0x614   :  { %20510 = vst [vmem:[#allocation17_spill] sm:$0xff] %v17217_v34  ;;  %v17219_v22 = vpop.f32.mrf.mxu0  ;;  %v17221_v57 = vpop.f32.mrf.mxu3  ;;  %v4922_v34 = vadd.f32 %v16926_v13, %v4894_v28 }
 0x615   :  { %20511 = vst [vmem:[#allocation96_spill] sm:$0xff] %v17219_v22  ;;  %v5701_v22 = vadd.f32 %v17091_v12, %v5673_v15 }
 0x616   :  { %20512 = vst [vmem:[#allocation19_spill] sm:$0xff] %v17221_v57 }
 0x617   :  { %v5730_v62 = vadd.f32 %v17088_v44, %v5701_v22 }
 0x61a   :  { %v17223_v27 = vpop.f32.mrf.mxu2  ;;  %v17225_v54 = vpop.f32.mrf.mxu1 }
 0x61b   :  { %20513 = vst [vmem:[#allocation56_spill] sm:$0xff] %v17223_v27  ;;  %v4898_v27 = vadd.f32 %v16935_v41, %v16924_v48  ;;  %v5760_v48 = vadd.f32 %v17110_v59, %v5730_v62  ;;  %v5706_v41 = vadd.f32 %v17104_v11, %v5677_v38 }
 0x61c   :  { %20514 = vst [vmem:[#allocation127_spill] sm:$0xff] %v17225_v54  ;;  %v4951_v54 = vadd.f32 %v16916_v55, %v4922_v34 }
 0x61d   :  { %v4927_v12 = vadd.f32 %v16938_v5, %v4898_v27  ;;  %v5786_v55 = vadd.f32 %v17121_v8, %v5760_v48 }
 0x61e   :  { %v4981_v2 = vadd.f32 %v16940_v0, %v4951_v54 }
 0x61f   :  { %v4957_v0 = vadd.f32 %v16931_v46, %v4927_v12 }
 0x62f   :  { %v6417_v49 = vpop.f32.mrf.mxu0 }
 0x635   :  { %v6508_v3 = vpop.f32.mrf.mxu3 }
 0x637   :  { %v6425_v47 = vpop.f32.mrf.mxu0  ;;  %v6479_v10 = vpop.f32.mrf.mxu2 }
 0x638   :  { %v6451_v52 = vpop.f32.mrf.mxu1 }
 0x639   :  { %v6452_v57 = vadd.f32 %v6451_v52, %v6417_v49  ;;  %v5007_v52 = vadd.f32 %v16950_v26, %v4981_v2  ;;  %v5736_v26 = vadd.f32 %v17101_v21, %v5706_v41  ;;  %v5854_v2 = vadd.f32 %v17131_v25, %v17134_v20 }
 0x63b   :  { %v6480_v13 = vadd.f32 %v6479_v10, %v6452_v57  ;;  %v5544_v6 = vadd.f32 %v5007_v52, %v16793_v14  ;;  %v4985_v10 = vadd.f32 %v16952_v19, %v4957_v0  ;;  %v5764_v46 = vadd.f32 %v17123_v51, %v5736_v26 }
 0x63c   :  { %v5850_v19 = vadd.f32 %v17114_v45, %v17118_v42  ;;  %v17267_v42 = vpop.permute.xlu2 %7119 }
 0x63d   :  { %v6509_v34 = vadd.f32 %v6508_v3, %v6480_v13  ;;  %v6323_v59 = vadd.f32 %v5786_v55, %v5544_v6  ;;  %v5011_v3 = vadd.f32 %v16962_v30, %v4985_v10  ;;  %v5790_v21 = vadd.f32 %v17136_v33, %v5764_v46 }
 0x63e   :  { %v6514_v43 = vpop.f32.mrf.mxu3  ;;  %v5878_v30 = vadd.f32 %v17138_v24, %v5850_v19 }
 0x63f   :  { %v6538_v18 = vpop.f32.mrf.mxu0  ;;  %v6484_v39 = vpop.f32.mrf.mxu2 }
 0x640   :  { %v6455_v37 = vpop.f32.mrf.mxu1  ;;  %v6539_v4 = vadd.f32 %v6538_v18, %v6509_v34  ;;  %v17254_v18 = vpop.permute.xlu1 %7114  ;;  %v5907_v45 = vadd.f32 %v17148_v53, %v5878_v30 }
 0x641   :  { %v6456_v23 = vadd.f32 %v6455_v37, %v6425_v47  ;;  %v5071_v37 = vadd.f32 %v16945_v17, %v16948_v58  ;;  %v5548_v58 = vadd.f32 %v5011_v3, %v16801_v35 }
 0x642   :  { %v5937_v62 = vadd.f32 %v17146_v63, %v5907_v45  ;;  %v20523_v45 = vld [vmem:[#allocation121_spill] sm:$0xff] }
 0x643   :  { %v6485_v22 = vadd.f32 %v6484_v39, %v6456_v23  ;;  %v5099_v14 = vadd.f32 %v16964_v1, %v5071_v37  ;;  %v6327_v39 = vadd.f32 %v5790_v21, %v5548_v58 }
 0x644   :  { %v5963_v25 = vadd.f32 %v17144_v36, %v5937_v62 }
 0x645   :  { %v6515_v38 = vadd.f32 %v6514_v43, %v6485_v22  ;;  %v5128_v28 = vadd.f32 %v16976_v9, %v5099_v14  ;;  %v5075_v43 = vadd.f32 %v16958_v16, %v16960_v31  ;;  %v5883_v31 = vadd.f32 %v17151_v7, %v5854_v2 }
 0x647   :  { %v6628_v54 = vpop.f32.mrf.mxu3  ;;  %v6542_v44 = vpop.f32.mrf.mxu0  ;;  %v5158_v9 = vadd.f32 %v16972_v40, %v5128_v28  ;;  %v5104_v24 = vadd.f32 %v16979_v32, %v5075_v43  ;;  %v5913_v20 = vadd.f32 %v17163_v50, %v5883_v31  ;;  %v20520_v28 = vld [vmem:[#allocation122_spill] sm:$0xff] }
 0x648   :  { %v6564_v5 = vpop.f32.mrf.mxu1  ;;  %v6594_v57 = vpop.f32.mrf.mxu2  ;;  %v6543_v51 = vadd.f32 %v6542_v44, %v6515_v38  ;;  %v20516_v44 = vld [vmem:[#allocation7_spill] sm:$0xff] }
 0x649   :  { %v6565_v11 = vadd.f32 %v6564_v5, %v6539_v4  ;;  %v6629_v13 = vadd.f32 %v6628_v54, %v6594_v57  ;;  %v5184_v12 = vadd.f32 %v16970_v29, %v5158_v9  ;;  %v5134_v16 = vadd.f32 %v16989_v60, %v5104_v24  ;;  %v20515_v54 = vld [vmem:[#allocation47_spill] sm:$0xff] }
 0x64a   :  { %v5941_v6 = vadd.f32 %v20515_v54, %v5913_v20  ;;  %v20530_v20 = vld [vmem:[#allocation92_spill] sm:$0xff] }
 0x64b   :  { %v7102_v8 = vadd.f32 %v6565_v11, %v6323_v59  ;;  %v5545_v7 = vadd.f32 %v5184_v12, %v16812_v61  ;;  %v5162_v63 = vadd.f32 %v16987_v56, %v5134_v16  ;;  %v20517_v11 = vld [vmem:[#allocation10_spill] sm:$0xff]  ;;  %v20518_v56 = vld [vmem:[#allocation5_spill] sm:$0xff]  ;;  %v20533_v54 = vld [vmem:[#allocation44_spill] sm:$0xff] }
 0x64c   :  { %v5967_v37 = vadd.f32 %v20517_v11, %v5941_v6  ;;  %v20527_v16 = vld [vmem:[#allocation81_spill] sm:$0xff] }
 0x64d   :  { %v7122_v27 = vadd.f32 %v17254_v18, %v7102_v8  ;;  %v6324_v0 = vadd.f32 %v5963_v25, %v5545_v7  ;;  %v5188_v10 = vadd.f32 %v20516_v44, %v5162_v63  ;;  %v20529_v25 = vld [vmem:[#allocation13_spill] sm:$0xff] }
 0x64f   :  { %v6632_v17 = vpop.f32.mrf.mxu3  ;;  %v7138_v47 = vrot.slane %v7122_v27, 4  ;;  %v6656_v1 = vpop.f32.mrf.mxu0  ;;  %v5549_v46 = vadd.f32 %v5188_v10, %v20518_v56  ;;  %v20519_v27 = vld [vmem:[#allocation39_spill] sm:$0xff]  ;;  %v20536_v10 = vld [vmem:[#allocation16_spill] sm:$0xff] }
 0x650   :  { %v6568_v15 = vpop.f32.mrf.mxu1  ;;  %v6602_v49 = vpop.f32.mrf.mxu2  ;;  %v6657_v40 = vadd.f32 %v6656_v1, %v6629_v13  ;;  %v20521_v1 = vld [vmem:[#allocation91_spill] sm:$0xff]  ;;  %v20525_v13 = vld [vmem:[#allocation40_spill] sm:$0xff] }
 0x651   :  { %7158 = vst [vmem:[#allocation2 + $0x30] sm:$0xf0] %v7138_v47  ;;  %v6569_v33 = vadd.f32 %v6568_v15, %v6543_v51  ;;  %v6633_v36 = vadd.f32 %v6632_v17, %v6602_v49  ;;  %v6328_v19 = vadd.f32 %v5967_v37, %v5549_v46  ;;  %v5248_v17 = vadd.f32 %v20520_v28, %v20519_v27  ;;  %v20522_v15 = vld [vmem:[#allocation11_spill] sm:$0xff]  ;;  %v20538_v37 = vld [vmem:[#allocation36_spill] sm:$0xff]  ;;  %v20539_v46 = vld [vmem:[#allocation85_spill] sm:$0xff] }
 0x652   :  { %v6027_v49 = vadd.f32 %v20522_v15, %v20521_v1  ;;  %v20544_v15 = vld [vmem:[#allocation51_spill] sm:$0xff] }
 0x653   :  { %v7106_v35 = vadd.f32 %v6569_v33, %v6327_v39  ;;  %v5276_v33 = vadd.f32 %v20523_v45, %v5248_v17  ;;  %v20545_v45 = vld [vmem:[#allocation83_spill] sm:$0xff] }
 0x655   :  { %v7126_v53 = vadd.f32 %v17267_v42, %v7106_v35  ;;  %v20524_v35 = vld [vmem:[#allocation49_spill] sm:$0xff]  ;;  %v5305_v31 = vadd.f32 %v20527_v16, %v5276_v33 }
 0x656   :  { %v6055_v24 = vadd.f32 %v20524_v35, %v6027_v49  ;;  %v20547_v35 = vld [vmem:[#allocation52_spill] sm:$0xff] }
 0x657   :  { %v6741_v52 = vpop.f32.mrf.mxu3  ;;  %v7142_v48 = vrot.slane %v7126_v53, 4  ;;  %v6661_v41 = vpop.f32.mrf.mxu0  ;;  %v20526_v53 = vld [vmem:[#allocation9_spill] sm:$0xff] }
 0x658   :  { %v17277_v55 = vld [vmem:[#allocation2 + $0x30] sm:$0xff]  ;;  %v6685_v32 = vpop.f32.mrf.mxu1  ;;  %v6715_v23 = vpop.f32.mrf.mxu2  ;;  %v6662_v5 = vadd.f32 %v6661_v41, %v6633_v36  ;;  %v5252_v12 = vadd.f32 %v20526_v53, %v20525_v13 }
 0x659   :  { %15026 = vst [vmem:[%s20185_s10] sm:$0xff] %v17277_v55  ;;  %v7143_v29 = vsel %vm62_vm0, %v7138_v47, %v7142_v48  ;;  %v6686_v60 = vadd.f32 %v6685_v32, %v6657_v40  ;;  %v20528_v32 = vld [vmem:[#allocation6_spill] sm:$0xff] }
 0x65a   :  { %7162 = vst [vmem:[#allocation2 + $0x50] sm:$0x3f] %v7143_v29  ;;  %v6031_v29 = vadd.f32 %v20530_v20, %v20529_v25  ;;  %v20534_v36 = vld [vmem:[#allocation46_spill] sm:$0xff] }
 0x65b   :  { %v6716_v34 = vadd.f32 %v6715_v23, %v6686_v60  ;;  %v5335_v23 = vadd.f32 %v20528_v32, %v5305_v31  ;;  %v20531_v60 = vld [vmem:[#allocation48_spill] sm:$0xff]  ;;  %v20550_v31 = vld [vmem:[#allocation37_spill] sm:$0xff] }
 0x65c   :  { %v6084_v7 = vadd.f32 %v20531_v60, %v6055_v24 }
 0x65d   :  { %v6742_v4 = vadd.f32 %v6741_v52, %v6716_v34  ;;  %v20532_v34 = vld [vmem:[#allocation125_spill] sm:$0xff]  ;;  %v5361_v6 = vadd.f32 %v20533_v54, %v5335_v23 }
 0x65f   :  { %v6745_v50 = vpop.f32.mrf.mxu3  ;;  %v7103_v57 = vadd.f32 %v6742_v4, %v6324_v0  ;;  %v6771_v26 = vpop.f32.mrf.mxu0  ;;  %v5281_v0 = vadd.f32 %v20532_v34, %v5252_v12  ;;  %v6114_v4 = vadd.f32 %v20534_v36, %v6084_v7  ;;  %v20549_v12 = vld [vmem:[#allocation124_spill] sm:$0xff]  ;;  %v20552_v7 = vld [vmem:[#allocation17_spill] sm:$0xff] }
 0x660   :  { %v6691_v59 = vpop.f32.mrf.mxu1  ;;  %v6719_v22 = vpop.f32.mrf.mxu2 }
 0x661   :  { %v7123_v61 = vadd.f32 %v17254_v18, %v7103_v57  ;;  %v6692_v3 = vadd.f32 %v6691_v59, %v6662_v5  ;;  %v6140_v5 = vadd.f32 %v20536_v10, %v6114_v4  ;;  %v20537_v59 = vld [vmem:[#allocation41_spill] sm:$0xff] }
 0x663   :  { %v7139_v8 = vrot.slane %v7123_v61, 4  ;;  %v6720_v14 = vadd.f32 %v6719_v22, %v6692_v3  ;;  %v5311_v22 = vadd.f32 %v20537_v59, %v5281_v0  ;;  %v5546_v61 = vadd.f32 %v5361_v6, %v20538_v37  ;;  %v20553_v0 = vld [vmem:[#allocation43_spill] sm:$0xff] }
 0x664   :  { %v20555_v6 = vld [vmem:[#allocation123_spill] sm:$0xff] }
 0x665   :  { %7159 = vst [vmem:[#allocation2] sm:$0xf0] %v7139_v8  ;;  %v6746_v21 = vadd.f32 %v6745_v50, %v6720_v14  ;;  %v20535_v50 = vld [vmem:[#allocation86_spill] sm:$0xff]  ;;  %v6325_v28 = vadd.f32 %v6140_v5, %v5546_v61  ;;  %v20557_v5 = vld [vmem:[#allocation95_spill] sm:$0xff] }
 0x666   :  { %v6060_v44 = vadd.f32 %v20535_v50, %v6031_v29  ;;  %v20559_v59 = vld [vmem:[#allocation15_spill] sm:$0xff] }
 0x667   :  { %v6862_v38 = vpop.f32.mrf.mxu3  ;;  %v7107_v58 = vadd.f32 %v6746_v21, %v6328_v19  ;;  %v6779_v30 = vpop.f32.mrf.mxu0  ;;  %v20540_v21 = vld [vmem:[#allocation88_spill] sm:$0xff] }
 0x668   :  { %v6805_v51 = vpop.f32.mrf.mxu1  ;;  %v6833_v47 = vpop.f32.mrf.mxu2  ;;  %v6090_v27 = vadd.f32 %v20540_v21, %v6060_v44  ;;  %v20556_v44 = vld [vmem:[#allocation42_spill] sm:$0xff] }
 0x669   :  { %v7127_v39 = vadd.f32 %v17267_v42, %v7107_v58  ;;  %v6806_v62 = vadd.f32 %v6805_v51, %v6771_v26  ;;  %v20541_v51 = vld [vmem:[#allocation38_spill] sm:$0xff] }
 0x66a   :  { %v6118_v49 = vadd.f32 %v20544_v15, %v6090_v27 }
 0x66b   :  { %v7144_v43 = vrot.slane %v7127_v39, 4  ;;  %v6834_v63 = vadd.f32 %v6833_v47, %v6806_v62  ;;  %v20542_v47 = vld [vmem:[#allocation80_spill] sm:$0xff] }
 0x66c   :  { %v17299_v9 = vld [vmem:[#allocation2] sm:$0xff] }
 0x66d   :  { %15027 = vst [vmem:[%s20185_s10 + $0x8] sm:$0xff] %v17299_v9  ;;  %v7145_v2 = vsel %vm62_vm0, %v7139_v8, %v7144_v43  ;;  %v6863_v26 = vadd.f32 %v6862_v38, %v6834_v63  ;;  %v5339_v8 = vadd.f32 %v20539_v46, %v5311_v22  ;;  %v20543_v38 = vld [vmem:[#allocation84_spill] sm:$0xff]  ;;  %v20546_v43 = vld [vmem:[#allocation93_spill] sm:$0xff]  ;;  %v20561_v46 = vld [vmem:[#allocation126_spill] sm:$0xff] }
 0x66e   :  { %7163 = vst [vmem:[#allocation2 + $0x20] sm:$0x3f] %v7145_v2  ;;  %v6204_v24 = vadd.f32 %v20547_v35, %v20546_v43  ;;  %v20548_v2 = vld [vmem:[#allocation50_spill] sm:$0xff] }
 0x66f   :  { %v6868_v52 = vpop.f32.mrf.mxu3  ;;  %v6892_v40 = vpop.f32.mrf.mxu0  ;;  %v5365_v1 = vadd.f32 %v20543_v38, %v5339_v8  ;;  %v6144_v62 = vadd.f32 %v20548_v2, %v6118_v49  ;;  %v20564_v38 = vld [vmem:[#allocation127_spill] sm:$0xff]  ;;  %v20565_v49 = vld [vmem:[#allocation82_spill] sm:$0xff]  ;;  %v20567_v2 = vld [vmem:[#allocation56_spill] sm:$0xff] }
 0x670   :  { %v6809_v48 = vpop.f32.mrf.mxu1  ;;  %v6838_v41 = vpop.f32.mrf.mxu2  ;;  %v6893_v3 = vadd.f32 %v6892_v40, %v6863_v26 }
 0x671   :  { %v6810_v57 = vadd.f32 %v6809_v48, %v6779_v30  ;;  %v5425_v30 = vadd.f32 %v20542_v47, %v20541_v51  ;;  %v5550_v40 = vadd.f32 %v5365_v1, %v20550_v31  ;;  %v20551_v48 = vld [vmem:[#allocation53_spill] sm:$0xff]  ;;  %v20563_v47 = vld [vmem:[#allocation14_spill] sm:$0xff] }
 0x673   :  { %v6839_v17 = vadd.f32 %v6838_v41, %v6810_v57  ;;  %v5453_v33 = vadd.f32 %v20545_v45, %v5425_v30  ;;  %v6232_v41 = vadd.f32 %v20551_v48, %v6204_v24  ;;  %v6329_v60 = vadd.f32 %v6144_v62, %v5550_v40  ;;  %v20558_v57 = vld [vmem:[#allocation90_spill] sm:$0xff]  ;;  %v20566_v45 = vld [vmem:[#allocation89_spill] sm:$0xff] }
 0x674   :  { %v6208_v26 = vadd.f32 %v20558_v57, %v20557_v5 }
 0x675   :  { %v6869_v13 = vadd.f32 %v6868_v52, %v6839_v17  ;;  %v5482_v16 = vadd.f32 %v20549_v12, %v5453_v33  ;;  %v6261_v63 = vadd.f32 %v20552_v7, %v6232_v41  ;;  %v20554_v52 = vld [vmem:[#allocation12_spill] sm:$0xff]  ;;  %v20568_v12 = vld [vmem:[#allocation45_spill] sm:$0xff]  ;;  %v20569_v41 = vld [vmem:[#allocation19_spill] sm:$0xff] }
 0x676   :  { %v5429_v54 = vadd.f32 %v20554_v52, %v20553_v0  ;;  %v20570_v7 = vld [vmem:[#allocation8_spill] sm:$0xff] }
 0x677   :  { %v6982_v11 = vpop.f32.mrf.mxu3  ;;  %v6896_v56 = vpop.f32.mrf.mxu0  ;;  %v5512_v36 = vadd.f32 %v20555_v6, %v5482_v16  ;;  %v6291_v22 = vadd.f32 %v20559_v59, %v6261_v63  ;;  %v17375_v5 = vld [vmem:[#allocation2 + $0x20] sm:$0x3f] }
 0x678   :  { %v6918_v14 = vpop.f32.mrf.mxu1  ;;  %v6948_v19 = vpop.f32.mrf.mxu2  ;;  %v6897_v32 = vadd.f32 %v6896_v56, %v6869_v13  ;;  %v5458_v10 = vadd.f32 %v20556_v44, %v5429_v54 }
 0x679   :  { %v6919_v58 = vadd.f32 %v6918_v14, %v6893_v3  ;;  %v6983_v37 = vadd.f32 %v6982_v11, %v6948_v19  ;;  %v20560_v3 = vld [vmem:[#allocation87_spill] sm:$0xff]  ;;  %v20562_v14 = vld [vmem:[#allocation96_spill] sm:$0xff]  ;;  %v6317_v30 = vadd.f32 %v20563_v47, %v6291_v22 }
 0x67a   :  { %v5538_v56 = vadd.f32 %v20560_v3, %v5512_v36  ;;  %v5488_v8 = vadd.f32 %v20561_v46, %v5458_v10  ;;  %v6237_v21 = vadd.f32 %v20562_v14, %v6208_v26  ;;  %v7174_v36 = vadd.f32 %v17299_v9, %v17277_v55  ;;  %v20571_v14 = vld [vmem:[#allocation4_spill] sm:$0xff] }
 0x67b   :  { %v7104_v39 = vadd.f32 %v6919_v58, %v6325_v28  ;;  %v7181_v26 = vsel %vm7179_vm14, %v17375_v5, 0.0 }
 0x67c   :  { %v6267_v1 = vadd.f32 %v20564_v38, %v6237_v21  ;;  %v5516_v33 = vadd.f32 %v20566_v45, %v5488_v8 }
 0x67d   :  { %v7124_v53 = vadd.f32 %v17254_v18, %v7104_v39  ;;  %v5547_v39 = vadd.f32 %v5538_v56, %v20565_v49 }
 0x67e   :  { %v6295_v62 = vadd.f32 %v20567_v2, %v6267_v1  ;;  %v5542_v16 = vadd.f32 %v20568_v12, %v5516_v33 }
 0x67f   :  { %v7140_v23 = vrot.slane %v7124_v53, 4  ;;  %v6986_v25 = vpop.f32.mrf.mxu3  ;;  %v7010_v4 = vpop.f32.mrf.mxu0  ;;  %v6326_v24 = vadd.f32 %v6317_v30, %v5547_v39 }
 0x680   :  { %v6922_v20 = vpop.f32.mrf.mxu1  ;;  %v6956_v29 = vpop.f32.mrf.mxu2  ;;  %v7011_v28 = vadd.f32 %v7010_v4, %v6983_v37  ;;  %v5551_v63 = vadd.f32 %v5542_v16, %v20570_v7 }
 0x681   :  { %7160 = vst [vmem:[#allocation2 + $0x58] sm:$0xf0] %v7140_v23  ;;  %v6923_v34 = vadd.f32 %v6922_v20, %v6897_v32  ;;  %v6987_v13 = vadd.f32 %v6986_v25, %v6956_v29  ;;  %v6321_v32 = vadd.f32 %v20569_v41, %v6295_v62 }
 0x683   :  { %v7108_v50 = vadd.f32 %v6923_v34, %v6329_v60  ;;  %v6330_v54 = vadd.f32 %v6321_v32, %v5551_v63 }
 0x685   :  { %v7128_v61 = vadd.f32 %v17267_v42, %v7108_v50 }
 0x687   :  { %v7146_v27 = vrot.slane %v7128_v61, 4  ;;  %v7095_v15 = vpop.f32.mrf.mxu3  ;;  %v7015_v35 = vpop.f32.mrf.mxu0 }
 0x688   :  { %v17347_v17 = vld [vmem:[#allocation2 + $0x58] sm:$0xff]  ;;  %v7039_v58 = vpop.f32.mrf.mxu1  ;;  %v7069_v51 = vpop.f32.mrf.mxu2  ;;  %v7016_v31 = vadd.f32 %v7015_v35, %v6987_v13 }
 0x689   :  { %15064 = vst [vmem:[%s20185_s10 + $0x30] sm:$0xff] %v17347_v17  ;;  %v7147_v11 = vsel %vm62_vm0, %v7140_v23, %v7146_v27  ;;  %v7040_v19 = vadd.f32 %v7039_v58, %v7011_v28  ;;  %v7175_v50 = vadd.f32 %v17347_v17, %v7174_v36 }
 0x68a   :  { %7164 = vst [vmem:[#allocation2 + $0x8] sm:$0x3f] %v7147_v11 }
 0x68b   :  { %v7070_v43 = vadd.f32 %v7069_v51, %v7040_v19 }
 0x68d   :  { %v7096_v53 = vadd.f32 %v7095_v15, %v7070_v43 }
 0x68f   :  { %v7105_v40 = vadd.f32 %v7096_v53, %v6326_v24  ;;  %v7099_v52 = vpop.f32.mrf.mxu3 }
 0x690   :  { %v7045_v48 = vpop.f32.mrf.mxu1  ;;  %v7073_v60 = vpop.f32.mrf.mxu2 }
 0x691   :  { %v7125_v23 = vadd.f32 %v17254_v18, %v7105_v40  ;;  %v7046_v20 = vadd.f32 %v7045_v48, %v7016_v31  ;;  %v17379_v57 = vld [vmem:[#allocation2 + $0x8] sm:$0x3f] }
 0x692   :  { %v7183_v22 = vsel %vm7179_vm14, %v17379_v57, 0.0 }
 0x693   :  { %v7141_v34 = vrot.slane %v7125_v23, 4  ;;  %v7074_v0 = vadd.f32 %v7073_v60, %v7046_v20 }
 0x695   :  { %7161 = vst [vmem:[#allocation2 + $0x18] sm:$0xf0] %v7141_v34  ;;  %v7100_v25 = vadd.f32 %v7099_v52, %v7074_v0 }
 0x697   :  { %v7109_v29 = vadd.f32 %v7100_v25, %v6330_v54 }
 0x699   :  { %v7129_v6 = vadd.f32 %v17267_v42, %v7109_v29  ;;  %v17377_v42 = vld [vmem:[#allocation2 + $0x50] sm:$0x3f]  ;;  %v7223_v29 = vld [vmem:[%s20186_s6] sm:$0xff] }
 0x69a   :  { %v7180_v59 = vsel %vm7179_vm14, %v17377_v42, 0.0 }
 0x69b   :  { %v7148_v4 = vrot.slane %v7129_v6, 4  ;;  %v7182_v37 = vadd.f32 %v7181_v26, %v7180_v59 }
 0x69c   :  { %v17367_v18 = vld [vmem:[#allocation2 + $0x18] sm:$0xff] }
 0x69d   :  { %15065 = vst [vmem:[%s20185_s10 + $0x38] sm:$0xff] %v17367_v18  ;;  %v7149_v44 = vsel %vm62_vm0, %v7141_v34, %v7148_v4  ;;  %v7176_v10 = vadd.f32 %v17367_v18, %v7175_v50  ;;  %v7184_v3 = vadd.f32 %v7183_v22, %v7182_v37  ;;  %v17419_v22 = vld [vmem:[%s20187_s8] sm:$0xff]  ;;  %v7224_v37 = vld [vmem:[%s20186_s6 + $0x8] sm:$0x3f] }
 0x69e   :  { %7165 = vst [vmem:[#allocation2 + $0x38] sm:$0x3f] %v7149_v44 }
 0x69f   :  { %7177 = vadd.xlane.f32.xlu1 %v7176_v10 }
 0x6a5   :  { %v17387_v61 = vld [vmem:[#allocation2 + $0x38] sm:$0x3f] }
 0x6a6   :  { %v7185_v56 = vsel %vm7179_vm14, %v17387_v61, 0.0 }
 0x6a7   :  { %v7186_v46 = vadd.f32 %v7185_v56, %v7184_v3 }
 0x6a9   :  { %7187 = vadd.xlane.f32.xlu0 %v7186_v46 }
 0x712   :  { %v7178_v8 = vpop.xlane.xlu1 %7177 }
 0x713   :  { %v17392_v21 = vmul.f32 %v7178_v8, %v20571_v14  ;;  %v15057_v8 = vld [vmem:[%s20180_s1 + $0x1] ss:$8 sm:$0xf] }
 0x715   :  { %v7191_v27 = vsub.f32 %v17277_v55, %v17392_v21  ;;  %v7192_v28 = vsub.f32 %v17299_v9, %v17392_v21  ;;  %v7193_v58 = vsub.f32 %v17347_v17, %v17392_v21  ;;  %v7194_v51 = vsub.f32 %v17367_v18, %v17392_v21 }
 0x717   :  { %v7199_v47 = vmul.f32 %v7191_v27, %v7191_v27  ;;  %v7200_v30 = vmul.f32 %v7192_v28, %v7192_v28  ;;  %v7201_v38 = vmul.f32 %v7193_v58, %v7193_v58  ;;  %v7202_v11 = vmul.f32 %v7194_v51, %v7194_v51 }
 0x718   :  { %v7356_v28 = vperm.slane %v15057_v8, 3 }
 0x719   :  { %v7207_v1 = vadd.f32 %v7200_v30, %v7199_v47  ;;  %v7249_v47 = vld [vmem:[%s20188_s7] sm:$0xff] }
 0x71b   :  { %v7208_v19 = vadd.f32 %v7207_v1, %v7201_v38  ;;  %v7353_v38 = vperm.slane %v15057_v8, 0  ;;  %v7354_v1 = vperm.slane %v15057_v8, 1 }
 0x71c   :  { %v7188_v15 = vpop.xlane.xlu0 %7187 }
 0x71d   :  { %v7190_v49 = vmul.f32 %v7188_v15, %v20571_v14  ;;  %v7209_v39 = vadd.f32 %v7208_v19, %v7202_v11  ;;  %v7355_v11 = vperm.slane %v15057_v8, 2 }
 0x71f   :  { %7210 = vadd.xlane.f32.xlu0 %v7209_v39  ;;  %v7195_v45 = vsub.f32 %v17377_v42, %v7190_v49  ;;  %v7196_v33 = vsub.f32 %v17375_v5, %v7190_v49  ;;  %v7197_v43 = vsub.f32 %v17379_v57, %v7190_v49  ;;  %v7198_v35 = vsub.f32 %v17387_v61, %v7190_v49 }
 0x721   :  { %v7203_v24 = vmul.f32 %v7195_v45, %v7195_v45  ;;  %v7204_v2 = vmul.f32 %v7196_v33, %v7196_v33  ;;  %v7205_v62 = vmul.f32 %v7197_v43, %v7197_v43  ;;  %v7206_v13 = vmul.f32 %v7198_v35, %v7198_v35 }
 0x723   :  { %v7212_v53 = vsel %vm7179_vm14, %v7203_v24, 0.0  ;;  %v7213_v12 = vsel %vm7179_vm14, %v7204_v2, 0.0  ;;  %v7215_v31 = vsel %vm7179_vm14, %v7205_v62, 0.0  ;;  %v7217_v48 = vsel %vm7179_vm14, %v7206_v13, 0.0 }
 0x724   :  { %v7214_v16 = vadd.f32 %v7213_v12, %v7212_v53 }
 0x726   :  { %v7216_v40 = vadd.f32 %v7215_v31, %v7214_v16 }
 0x728   :  { %v7218_v41 = vadd.f32 %v7217_v48, %v7216_v40 }
 0x72a   :  { %7219 = vadd.xlane.f32.xlu2 %v7218_v41 }
 0x792   :  { %v7211_v32 = vpop.xlane.xlu0 %7210 }
 0x793   :  { %v7221_v23 = vmul.f32 %v7211_v32, %v20571_v14 }
 0x795   :  { %v7225_v20 = vadd.f32 1e-05, %v7221_v23 }
 0x797   :  { %15101 = vrsqrt.f32 %v7225_v20  ;;  %vm7233_vm0 = vweird.f32 %v7225_v20 }
 0x79d   :  { %v15102_v60 = vpop.eup %15101  ;;  %v7220_v7 = vpop.xlane.xlu2 %7219 }
 0x79e   :  { %v7228_v63 = vmul.f32 %v15102_v60, %v7225_v20  ;;  %v7222_v34 = vmul.f32 %v7220_v7, %v20571_v14  ;;  %vm7234_vm15 = vweird.f32 %v15102_v60  ;;  %v7250_v14 = vld [vmem:[%s20188_s7 + $0x8] sm:$0x3f]  ;;  %s15164_s7 = smov 44  }
 0x79f   :  { %vm7235_vm1 = vmor %vm7233_vm0, %vm7234_vm15 }
 0x7a0   :  { %v7229_v0 = vmul.f32 %v15102_v60, %v7228_v63  ;;  %v7226_v52 = vadd.f32 1e-05, %v7222_v34 }
 0x7a2   :  { %v7230_v54 = vmul.f32 0.5, %v7229_v0  ;;  %15103 = vrsqrt.f32 %v7226_v52  ;;  %vm7243_vm3 = vweird.f32 %v7226_v52 }
 0x7a4   :  { %v7231_v25 = vsub.f32 1.5, %v7230_v54 }
 0x7a6   :  { %v7232_v6 = vmul.f32 %v15102_v60, %v7231_v25 }
 0x7a8   :  { %v15104_v36 = vpop.eup %15103  ;;  %v7236_v4 = vsel %vm7235_vm1, %v15102_v60, %v7232_v6 }
 0x7a9   :  { %v7238_v50 = vmul.f32 %v15104_v36, %v7226_v52  ;;  %v7247_v44 = vmul.f32 %v7236_v4, %v7223_v29  ;;  %vm7244_vm2 = vweird.f32 %v15104_v36  ;;  %v17489_v52 = vld [vmem:[#allocation3 + $0x40] sm:$0xff] }
 0x7aa   :  { %vm7245_vm4 = vmor %vm7243_vm3, %vm7244_vm2  ;;  %v17500_v4 = vld [vmem:[%s20180_s1] ss:$8 sm:$0xf] }
 0x7ab   :  { %v7239_v10 = vmul.f32 %v15104_v36, %v7238_v50  ;;  %7257 = vperm.xlu0 %15096, %v7247_v44   ;;  %v7251_v51 = vmul.f32 %v7247_v44, %v17392_v21  ;;  %v17506_v50 = vld [vmem:[%s20187_s8 + $0x8] sm:$0x3]  ;;  %v7319_v44 = vperm.slane %v17500_v4, 0 }
 0x7ad   :  { %v7240_v26 = vmul.f32 0.5, %v7239_v10  ;;  %v7253_v30 = vsub.f32 %v7249_v47, %v7251_v51 }
 0x7af   :  { %v7241_v59 = vsub.f32 1.5, %v7240_v26 }
 0x7b1   :  { %v7242_v3 = vmul.f32 %v15104_v36, %v7241_v59 }
 0x7b3   :  { %7385 = vrot.lane.b32.xlu0 %v17419_v22, %s15160_s26  ;;  %v7246_v56 = vsel %vm7245_vm4, %v15104_v36, %v7242_v3 }
 0x7b4   :  { %v7248_v46 = vmul.f32 %v7246_v56, %v7224_v37 }
 0x7b6   :  { %7262 = vperm.xlu2 %15095, %v7248_v46   ;;  %v7252_v27 = vmul.f32 %v7248_v46, %v7190_v49 }
 0x7b8   :  { %v7254_v58 = vsub.f32 %v7250_v14, %v7252_v27  ;;  %v7320_v14 = vperm.slane %v17500_v4, 1 }
 0x7ba   :  { %7280 = vperm.xlu1 %15094, %v7254_v58   ;;  %v7321_v58 = vperm.slane %v17500_v4, 2 }
 0x7bb   :  { %7363 = vrot.lane.b32.xlu0 %v7356_v28, %s15143_s18 }
 0x7be   :  { %7275 = vperm.xlu2 %15095, %v7253_v30  }
 0x7c2   :  { %7357 = vrot.lane.b32.xlu1 %v7353_v38, %s15143_s18 }
 0x7c6   :  { %7359 = vrot.lane.b32.xlu2 %v7354_v1, %s15143_s18 }
 0x7ca   :  { %7361 = vrot.lane.b32.xlu1 %v7355_v11, %s15143_s18 }
 0x810   :  { %v7263_v19 = vpop.permute.xlu2 %7262 }
 0x818   :  { %v7276_v33 = vpop.permute.xlu2 %7275 }
 0x81d   :  { %v7258_v21 = vpop.permute.xlu0 %7257 }
 0x81e   :  { %v7265_v15 = vmul.f32 %v17277_v55, %v7258_v21  ;;  %v7266_v49 = vmul.f32 %v17299_v9, %v7258_v21  ;;  %v7267_v39 = vmul.f32 %v17347_v17, %v7258_v21  ;;  %v7268_v45 = vmul.f32 %v17367_v18, %v7258_v21 }
 0x81f   :  { %v7269_v55 = vmul.f32 %v7263_v19, %v17377_v42  ;;  %v7270_v9 = vmul.f32 %v7263_v19, %v17375_v5  ;;  %v7271_v17 = vmul.f32 %v7263_v19, %v17379_v57  ;;  %v7272_v18 = vmul.f32 %v7263_v19, %v17387_v61  ;;  %v17476_v57 = vld [vmem:[#allocation3] sm:$0x3f] }
 0x820   :  { %v7283_v43 = vadd.f32 %v7276_v33, %v7265_v15  ;;  %v7284_v35 = vadd.f32 %v7276_v33, %v7266_v49  ;;  %v7285_v24 = vadd.f32 %v7276_v33, %v7267_v39  ;;  %v7286_v2 = vadd.f32 %v7276_v33, %v7268_v45  ;;  %v7360_v60 = vpop.permute.xlu2 %7359 }
 0x822   :  { %v17444_v62 = vmax.f32 %v7283_v43, 0.0  ;;  %v17446_v13 = vmax.f32 %v7284_v35, 0.0  ;;  %v17448_v53 = vmax.f32 %v7285_v24, 0.0  ;;  %v17450_v12 = vmax.f32 %v7286_v2, 0.0 }
 0x824   :  { %7299 = vst [vmem:[#allocation3 + $0x30] sm:$0xff] %v17444_v62 }
 0x825   :  { %7300 = vst [vmem:[#allocation3 + $0x8] sm:$0xff] %v17446_v13  ;;  %v7386_v6 = vpop.permute.xlu0 %7385 }
 0x826   :  { %7301 = vst [vmem:[#allocation3 + $0x58] sm:$0xff] %v17448_v53  ;;  %v7432_v38 = vsel %vm7431_vm6, %v7386_v6, 0 }
 0x827   :  { %7302 = vst [vmem:[#allocation3 + $0x38] sm:$0xff] %v17450_v12  ;;  %v17534_v1 = vand.u32 4294901760, %v7432_v38 }
 0x829   :  { %v17539_v19 = vsub.f32 %v7432_v38, %v17534_v1 }
 0x82b   :  { %v17547_v33 = vand.u32 4294901760, %v17539_v19 }
 0x82c   :  { %v7281_v16 = vpop.permute.xlu1 %7280 }
 0x82d   :  { %v17460_v31 = vadd.f32 %v7281_v16, %v7269_v55  ;;  %v17462_v40 = vadd.f32 %v7281_v16, %v7270_v9  ;;  %v17464_v48 = vadd.f32 %v7281_v16, %v7271_v17  ;;  %v17466_v41 = vadd.f32 %v7281_v16, %v7272_v18  ;;  %v7364_v26 = vpop.permute.xlu0 %7363 }
 0x82e   :  { %v7377_v46 = vmul.f32 %v7364_v26, %v17450_v12  ;;  %v7465_v9 = vsub.f32 %v17539_v19, %v17547_v33 }
 0x82f   :  { %v20199_v32 = vmax.f32 %v17460_v31, 0.0  ;;  %v20198_v23 = vmax.f32 %v17462_v40, 0.0  ;;  %v20197_v42 = vmax.f32 %v17464_v48, 0.0  ;;  %v20196_v5 = vmax.f32 %v17466_v41, 0.0 }
 0x831   :  { %7303 = vst [vmem:[#allocation3 + $0x20] sm:$0x3f] %v20199_v32 }
 0x832   :  { %7304 = vst [vmem:[#allocation3 + $0x10] sm:$0x3f] %v20198_v23  ;;  %v15116_v23 = vld [vmem:[#allocation3] sm:$0x3f] }
 0x833   :  { %7305 = vst [vmem:[#allocation3 + $0x50] sm:$0x3f] %v20197_v42 }
 0x834   :  { %7306 = vst [vmem:[#allocation3 + $0x28] sm:$0x3f] %v20196_v5  ;;  %v7358_v61 = vpop.permute.xlu1 %7357 }
 0x835   :  { %v7378_v20 = vmul.f32 %v7358_v61, %v17476_v57  ;;  %v7365_v63 = vsel %vm190_vm5, %v7358_v61, %v7360_v60  ;;  %v7373_v54 = vmul.f32 %v17489_v52, %v7358_v61 }
 0x836   :  { %v7374_v36 = vmul.f32 %v7365_v63, %v17444_v62 }
 0x837   :  { %7409 = vrot.lane.b32.xlu2 %v7378_v20, %s15146_s19 }
 0x838   :  { %v17484_v7 = vld [vmem:[#allocation3 + $0x20] sm:$0x3f] }
 0x839   :  { %v7379_v34 = vmul.f32 %v7365_v63, %v17484_v7  ;;  %v17511_v10 = vld [vmem:[#allocation3 + $0x10] sm:$0x3f]  ;;  %v17560_v63 = vand.u32 4294901760, %v7465_v9 }
 0x83a   :  { %v17517_v3 = vld [vmem:[#allocation3 + $0x50] sm:$0x3f] }
 0x83b   :  { %7411 = vrot.lane.b32.xlu1 %v7379_v34, %s15146_s19  ;;  %v17526_v27 = vld [vmem:[#allocation3 + $0x28] sm:$0x3f] }
 0x83c   :  { %v7362_v0 = vpop.permute.xlu1 %7361  ;;  %v7382_v28 = vmul.f32 %v7364_v26, %v17526_v27 }
 0x83d   :  { %v7366_v25 = vsel %vm190_vm5, %v7360_v60, %v7362_v0  ;;  %v7367_v37 = vsel %vm190_vm5, %v7362_v0, %v7364_v26 }
 0x83e   :  { %v7375_v29 = vmul.f32 %v7366_v25, %v17446_v13  ;;  %v7380_v59 = vmul.f32 %v7366_v25, %v17511_v10  ;;  %v7381_v56 = vmul.f32 %v7367_v37, %v17517_v3  ;;  %v7376_v8 = vmul.f32 %v7367_v37, %v17448_v53 }
 0x83f   :  { %7399 = vrot.lane.b32.xlu2 %v7373_v54, %s15146_s19 }
 0x840   :  { %7403 = vrot.lane.b32.xlu0 %v7375_v29, %s15146_s19 }
 0x843   :  { %7401 = vrot.lane.b32.xlu1 %v7374_v36, %s15146_s19 }
 0x847   :  { %7387 = vrot.lane.b32.xlu2 %v17506_v50, %s15160_s26 }
 0x848   :  { %7323 = vrot.lane.b32.xlu0 %v7319_v44, %s15148_s29 }
 0x84b   :  { %7413 = vrot.lane.b32.xlu1 %v7380_v59, %s15146_s19 }
 0x84f   :  { %7415 = vrot.lane.b32.xlu2 %v7381_v56, %s15146_s19 }
 0x850   :  { %7407 = vrot.lane.b32.xlu0 %v7377_v46, %s15146_s19 }
 0x853   :  { %7405 = vrot.lane.b32.xlu1 %v7376_v8, %s15146_s19 }
 0x857   :  { %7325 = vrot.lane.b32.xlu2 %v7320_v14, %s15148_s29 }
 0x85b   :  { %7417 = vrot.lane.b32.xlu1 %v7382_v28, %s15146_s19 }
 0x85f   :  { %7327 = vrot.lane.b32.xlu2 %v7321_v58, %s15148_s29 }
 0x891   :  { %v7410_v51 = vpop.permute.xlu2 %7409 }
 0x899   :  { %v7400_v47 = vpop.permute.xlu2 %7399 }
 0x8a1   :  { %v7388_v30 = vpop.permute.xlu2 %7387 }
 0x8a2   :  { %v7434_v21 = vsel %vm7431_vm6, %v7388_v30, 0 }
 0x8a3   :  { %v17543_v39 = vand.u32 4294901760, %v7434_v21 }
 0x8a5   :  { %v17552_v2 = vsub.f32 %v7434_v21, %v17543_v39 }
 0x8a7   :  { %v17558_v20 = vand.u32 4294901760, %v17552_v2 }
 0x8a9   :  { %v17536_v11 = vpop.permute.xlu2 %7415  ;;  %v7473_v36 = vsub.f32 %v17552_v2, %v17558_v20 }
 0x8ab   :  { %v17586_v21 = vand.u32 4294901760, %v7473_v36 }
 0x8ad   :  { %v7412_v15 = vpop.permute.xlu1 %7411 }
 0x8ae   :  { %v7423_v49 = vsel %vm225_vm7, %v7410_v51, %v7412_v15 }
 0x8af   :  { %v7436_v45 = vsel %vm7179_vm14, %v7423_v49, 0 }
 0x8b0   :  { %v7458_v43 = vand.u32 4294901760, %v7436_v45 }
 0x8b1   :  { %v7326_v17 = vpop.permute.xlu2 %7325 }
 0x8b2   :  { %v7494_v35 = vsub.f32 %v7436_v45, %v7458_v43  ;;  %v17549_v24 = vpop.permute.xlu0 %7403  ;;  %7459 = vmatpush.msra.mxu0 %v7458_v43  ;;  %7560 = vmatpush.msra.mxu3 %v7458_v43 }
 0x8b4   :  { %v7495_v55 = vand.u32 4294901760, %v7494_v35  ;;  %7530 = vmatpush.msra.mxu2 %v7494_v35 }
 0x8b5   :  { %v7402_v18 = vpop.permute.xlu1 %7401 }
 0x8b6   :  { %v7419_v16 = vsel %vm225_vm7, %v7400_v47, %v7402_v18  ;;  %v7496_v61 = vsub.f32 %v7494_v35, %v7495_v55  ;;  %v7420_v0 = vsel %vm225_vm7, %v7402_v18, %v17549_v24 }
 0x8b7   :  { %v7460_v60 = vand.u32 4294901760, %v7419_v16  ;;  %v17570_v44 = vand.u32 4294901760, %v7420_v0 }
 0x8b8   :  { %v7497_v34 = vand.u32 4294901760, %v7496_v61 }
 0x8b9   :  { %v7500_v54 = vsub.f32 %v7419_v16, %v7460_v60  ;;  %7461 = vmatpush.msra.mxu0 %v7460_v60  ;;  %7562 = vmatpush.msra.mxu3 %v7460_v60  ;;  %v17580_v28 = vpop.permute.xlu2 %7327  ;;  %v7690_v47 = vsub.f32 %v7420_v0, %v17570_v44  ;;  %v7322_v16 = vperm.slane %v17500_v4, 3 }
 0x8ba   :  { %v7324_v25 = vpop.permute.xlu0 %7323  ;;  %7467 = vmatmul.f32.vlgmr.msra.gmra.mxu0 %v17560_v63  ;;  %7498 = vmatpush.msra.mxu1 %v7497_v34 }
 0x8bb   :  { %v7331_v29 = vsel %vm159_vm8, %v7324_v25, %v7326_v17  ;;  %v7339_v6 = vmul.f32 %v17489_v52, %v7324_v25  ;;  %7566 = vmatmul.f32.vlgmr.msra.gmra.mxu3 %v17547_v33  ;;  %v7344_v26 = vmul.f32 %v7324_v25, %v17476_v57  ;;  %7593 = vmatpush.msrb.mxu0 %v7495_v55  ;;  %v7501_v59 = vand.u32 4294901760, %v7500_v54 }
 0x8bc   :  { %7533 = vmatpush.msra.mxu2 %v7500_v54  ;;  %v7345_v37 = vmul.f32 %v7331_v29, %v17484_v7  ;;  %v7691_v55 = vand.u32 4294901760, %v7690_v47  ;;  %v7340_v18 = vmul.f32 %v7331_v29, %v17444_v62 }
 0x8bd   :  { %7536 = vmatmul.f32.vlgmr.msra.gmra.mxu2 %v17539_v19  ;;  %8214 = vrot.lane.b32.xlu2 %v7339_v6, %s15150_s13  ;;  %v7414_v56 = vpop.permute.xlu1 %7413  ;;  %v7502_v14 = vsub.f32 %v7500_v54, %v7501_v59 }
 0x8be   :  { %8224 = vrot.lane.b32.xlu1 %v7344_v26, %s15150_s13  ;;  %v7424_v46 = vsel %vm225_vm7, %v7412_v15, %v7414_v56  ;;  %v7425_v8 = vsel %vm225_vm7, %v7414_v56, %v17536_v11  ;;  %7597 = vmatpush.msrb.mxu0 %v7501_v59  ;;  %v7332_v15 = vsel %vm159_vm8, %v7326_v17, %v17580_v28 }
 0x8bf   :  { %v7438_v58 = vsel %vm7179_vm14, %v7424_v46, 0  ;;  %v7440_v51 = vsel %vm7179_vm14, %v7425_v8, 0  ;;  %8226 = vrot.lane.b32.xlu0 %v7345_v37, %s15150_s13  ;;  %v7503_v38 = vand.u32 4294901760, %v7502_v14  ;;  %v7346_v9 = vmul.f32 %v7332_v15, %v17511_v10 }
 0x8c0   :  { %v7648_v30 = vand.u32 4294901760, %v7438_v58  ;;  %v17590_v45 = vand.u32 4294901760, %v7440_v51  ;;  %v7692_v25 = vsub.f32 %v7690_v47, %v7691_v55  ;;  %v7341_v59 = vmul.f32 %v7332_v15, %v17446_v13 }
 0x8c1   :  { %7504 = vmatpush.msra.mxu1 %v7503_v38 }
 0x8c2   :  { %v7684_v49 = vsub.f32 %v7438_v58, %v7648_v30  ;;  %7475 = vmatmul.f32.gmra.mxu0 %v17586_v21  ;;  %7506 = vmatmul.f32.vlgmr.msra.gmra.mxu1 %v17534_v1  ;;  %v7874_v61 = vsub.f32 %v7440_v51, %v17590_v45  ;;  %v7693_v29 = vand.u32 4294901760, %v7692_v25 }
 0x8c3   :  { %7572 = vmatmul.f32.gmra.mxu3 %v17558_v20  ;;  %7622 = vmatpush.msrb.mxu1 %v7458_v43 }
 0x8c4   :  { %7649 = vmatpush.msrb.mxu2 %v7648_v30  ;;  %v7685_v35 = vand.u32 4294901760, %v7684_v49  ;;  %7720 = vmatpush.msra.mxu0 %v7684_v49 }
 0x8c5   :  { %7541 = vmatmul.f32.gmra.mxu2 %v17552_v2  ;;  %v7406_v17 = vpop.permute.xlu1 %7405  ;;  %7624 = vmatpush.msrb.mxu1 %v7460_v60  ;;  %v7875_v60 = vand.u32 4294901760, %v7874_v61 }
 0x8c6   :  { %7651 = vmatpush.msrb.mxu2 %v17570_v44  ;;  %v7421_v43 = vsel %vm225_vm7, %v17549_v24, %v7406_v17  ;;  %v7686_v34 = vsub.f32 %v7684_v49, %v7685_v35  ;;  %8216 = vrot.lane.b32.xlu1 %v7340_v18, %s15150_s13  ;;  %v7408_v24 = vpop.permute.xlu0 %7407 }
 0x8c7   :  { %v17603_v0 = vand.u32 4294901760, %v7421_v43  ;;  %7750 = vmatpush.msra.mxu1 %v7648_v30  ;;  %8228 = vrot.lane.b32.xlu2 %v7346_v9, %s15150_s13  ;;  %v7422_v36 = vsel %vm225_vm7, %v7406_v17, %v7408_v24  ;;  %v7876_v56 = vsub.f32 %v7874_v61, %v7875_v60 }
 0x8c8   :  { %7723 = vmatpush.msra.mxu0 %v7690_v47  ;;  %v7687_v54 = vand.u32 4294901760, %v7686_v34  ;;  %7783 = vmatpush.msra.mxu2 %v7685_v35  ;;  %v8030_v8 = vand.u32 4294901760, %v7422_v36 }
 0x8c9   :  { %v7880_v4 = vsub.f32 %v7421_v43, %v17603_v0  ;;  %7329 = vrot.lane.b32.xlu0 %v7322_v16, %s15148_s29  ;;  %7752 = vmatpush.msra.mxu1 %v17570_v44  ;;  %v7877_v47 = vand.u32 4294901760, %v7876_v56 }
 0x8ca   :  { %7599 = vmatmul.f32.vlgmr.msrb.gmra.mxu0 %v17534_v1  ;;  %7787 = vmatpush.msra.mxu2 %v7691_v55 }
 0x8cb   :  { %7510 = vmatmul.f32.gmra.mxu1 %v17543_v39  ;;  %7688 = vmatpush.msrb.mxu3 %v7687_v54  ;;  %v7881_v6 = vand.u32 4294901760, %v7880_v4 }
 0x8cc   :  { %7839 = vmatpush.msrb.mxu0 %v17590_v45 }
 0x8cd   :  { %7657 = vmatmul.f32.vlgmr.msrb.gmra.mxu2 %v17560_v63  ;;  %v7418_v26 = vpop.permute.xlu1 %7417  ;;  %7694 = vmatpush.msrb.mxu3 %v7693_v29  ;;  %v7882_v58 = vsub.f32 %v7880_v4, %v7881_v6 }
 0x8ce   :  { %7841 = vmatpush.msrb.mxu0 %v17603_v0  ;;  %v7426_v37 = vsel %vm225_vm7, %v17536_v11, %v7418_v26  ;;  %7910 = vmatpush.msrb.mxu2 %v7874_v61  ;;  %v8070_v11 = vsub.f32 %v7422_v36, %v8030_v8 }
 0x8cf   :  { %v7442_v46 = vsel %vm7179_vm14, %v7426_v37, 0  ;;  %7696 = vmatmul.f32.vlgmr.msrb.gmra.mxu3 %v17534_v1  ;;  %8218 = vrot.lane.b32.xlu1 %v7341_v59, %s15150_s13  ;;  %v7883_v38 = vand.u32 4294901760, %v7882_v58 }
 0x8d0   :  { %v8028_v14 = vand.u32 4294901760, %v7442_v46  ;;  %7812 = vmatpush.msra.mxu3 %v7648_v30  ;;  %7913 = vmatpush.msrb.mxu2 %v7880_v4  ;;  %v8071_v15 = vand.u32 4294901760, %v8070_v11 }
 0x8d2   :  { %v8064_v51 = vsub.f32 %v7442_v46, %v8028_v14  ;;  %7814 = vmatpush.msra.mxu3 %v17570_v44  ;;  %7603 = vmatmul.f32.gmra.mxu0 %v17543_v39  ;;  %v8072_v49 = vsub.f32 %v8070_v11, %v8071_v15 }
 0x8d3   :  { %7626 = vmatmul.f32.vlgmr.msrb.gmra.mxu1 %v17534_v1 }
 0x8d4   :  { %7940 = vmatpush.msrb.mxu3 %v17590_v45  ;;  %7878 = vmatpush.msrb.mxu1 %v7877_v47  ;;  %v8065_v30 = vand.u32 4294901760, %v8064_v51  ;;  %v8073_v55 = vand.u32 4294901760, %v8072_v49 }
 0x8d5   :  { %7665 = vmatmul.f32.gmra.mxu2 %v17586_v21 }
 0x8d6   :  { %7942 = vmatpush.msrb.mxu3 %v17603_v0  ;;  %7884 = vmatpush.msrb.mxu1 %v7883_v38  ;;  %v8066_v44 = vsub.f32 %v8064_v51, %v8065_v30 }
 0x8d7   :  { %7700 = vmatmul.f32.gmra.mxu3 %v17543_v39 }
 0x8d8   :  { %v8067_v35 = vand.u32 4294901760, %v8066_v44 }
 0x8da   :  { %7726 = vmatmul.f32.vlgmr.msra.gmra.mxu0 %v17539_v19 }
 0x8db   :  { %7630 = vmatmul.f32.gmra.mxu1 %v17543_v39  ;;  %7973 = vmatpush.msra.mxu0 %v7875_v60 }
 0x8dd   :  { %7789 = vmatmul.f32.vlgmr.msra.gmra.mxu2 %v17534_v1  ;;  %7977 = vmatpush.msra.mxu0 %v7881_v6 }
 0x8de   :  { %8029 = vmatpush.msra.mxu2 %v8028_v14 }
 0x8df   :  { %7816 = vmatmul.f32.vlgmr.msra.gmra.mxu3 %v17534_v1 }
 0x8e0   :  { %8068 = vmatpush.msra.mxu3 %v8067_v35  ;;  %8031 = vmatpush.msra.mxu2 %v8030_v8 }
 0x8e2   :  { %8074 = vmatpush.msra.mxu3 %v8073_v55  ;;  %7731 = vmatmul.f32.gmra.mxu0 %v17552_v2 }
 0x8e3   :  { %7756 = vmatmul.f32.vlgmr.msra.gmra.mxu1 %v17547_v33 }
 0x8e4   :  { %8002 = vmatpush.msra.mxu1 %v17590_v45  ;;  %v8248_v45 = vsel %vm7431_vm6, %v17506_v50, 0 }
 0x8e5   :  { %7793 = vmatmul.f32.gmra.mxu2 %v17543_v39  ;;  %v17688_v61 = vand.u32 4294901760, %v8248_v45 }
 0x8e6   :  { %8004 = vmatpush.msra.mxu1 %v17603_v0 }
 0x8e7   :  { %7820 = vmatmul.f32.gmra.mxu3 %v17543_v39  ;;  %v17698_v24 = vsub.f32 %v8248_v45, %v17688_v61 }
 0x8e9   :  { %v17704_v46 = vand.u32 4294901760, %v17698_v24 }
 0x8ea   :  { %7847 = vmatmul.f32.vlgmr.msrb.gmra.mxu0 %v17560_v63 }
 0x8eb   :  { %7762 = vmatmul.f32.gmra.mxu1 %v17558_v20  ;;  %8100 = vmatpush.msrb.mxu0 %v8064_v51  ;;  %v8287_v44 = vsub.f32 %v17698_v24, %v17704_v46 }
 0x8ed   :  { %7916 = vmatmul.f32.vlgmr.msrb.gmra.mxu2 %v17539_v19  ;;  %8103 = vmatpush.msrb.mxu0 %v8070_v11  ;;  %v17720_v55 = vand.u32 4294901760, %v8287_v44 }
 0x8ee   :  { %8163 = vmatpush.msrb.mxu2 %v8065_v30 }
 0x8ef   :  { %7946 = vmatmul.f32.vlgmr.msrb.gmra.mxu3 %v17547_v33 }
 0x8f0   :  { %8192 = vmatpush.msrb.mxu3 %v8028_v14  ;;  %8167 = vmatpush.msrb.mxu2 %v8071_v15 }
 0x8f2   :  { %8194 = vmatpush.msrb.mxu3 %v8030_v8  ;;  %7855 = vmatmul.f32.gmra.mxu0 %v17586_v21 }
 0x8f3   :  { %7886 = vmatmul.f32.vlgmr.msrb.gmra.mxu1 %v17534_v1 }
 0x8f4   :  { %8130 = vmatpush.msrb.mxu1 %v8028_v14 }
 0x8f5   :  { %7921 = vmatmul.f32.gmra.mxu2 %v17552_v2 }
 0x8f6   :  { %8132 = vmatpush.msrb.mxu1 %v8030_v8 }
 0x8f7   :  { %7952 = vmatmul.f32.gmra.mxu3 %v17558_v20 }
 0x8fa   :  { %7979 = vmatmul.f32.vlgmr.msra.gmra.mxu0 %v17534_v1 }
 0x8fb   :  { %7890 = vmatmul.f32.gmra.mxu1 %v17543_v39 }
 0x8fd   :  { %8037 = vmatmul.f32.vlgmr.msra.gmra.mxu2 %v17560_v63  ;;  %v17664_v63 = vld [vmem:[%s20180_s1 + $0x2] ss:$8 sm:$0xf] }
 0x8ff   :  { %8076 = vmatmul.f32.vlgmr.msra.gmra.mxu3 %v17534_v1 }
 0x902   :  { %7983 = vmatmul.f32.gmra.mxu0 %v17543_v39 }
 0x903   :  { %8006 = vmatmul.f32.vlgmr.msra.gmra.mxu1 %v17534_v1 }
 0x905   :  { %8045 = vmatmul.f32.gmra.mxu2 %v17586_v21  ;;  %v9020_v21 = vperm.slane %v17664_v63, 0 }
 0x907   :  { %8080 = vmatmul.f32.gmra.mxu3 %v17543_v39  ;;  %9024 = vrot.lane.b32.xlu1 %v9020_v21, %s15149_s12 }
 0x90a   :  { %8106 = vmatmul.f32.vlgmr.msrb.gmra.mxu0 %v17539_v19 }
 0x90b   :  { %8010 = vmatmul.f32.gmra.mxu1 %v17543_v39 }
 0x90d   :  { %8169 = vmatmul.f32.vlgmr.msrb.gmra.mxu2 %v17534_v1 }
 0x90f   :  { %8196 = vmatmul.f32.vlgmr.msrb.gmra.mxu3 %v17534_v1  ;;  %v8246_v1 = vsel %vm7431_vm6, %v17419_v22, 0 }
 0x912   :  { %8111 = vmatmul.f32.gmra.mxu0 %v17552_v2 }
 0x913   :  { %8136 = vmatmul.f32.vlgmr.msrb.gmra.mxu1 %v17547_v33  ;;  %v17673_v33 = vand.u32 4294901760, %v8246_v1 }
 0x915   :  { %8173 = vmatmul.f32.gmra.mxu2 %v17543_v39  ;;  %v17676_v2 = vsub.f32 %v8246_v1, %v17673_v33 }
 0x917   :  { %8200 = vmatmul.f32.gmra.mxu3 %v17543_v39  ;;  %v8215_v19 = vpop.permute.xlu2 %8214  ;;  %v17683_v39 = vand.u32 4294901760, %v17676_v2 }
 0x919   :  { %v8279_v25 = vsub.f32 %v17676_v2, %v17683_v39 }
 0x91b   :  { %8142 = vmatmul.f32.gmra.mxu1 %v17558_v20  ;;  %v17700_v26 = vand.u32 4294901760, %v8279_v25 }
 0x921   :  { %v17680_v17 = vpop.permute.xlu2 %8228 }
 0x930   :  { %v8225_v9 = vpop.permute.xlu1 %8224 }
 0x931   :  { %v8227_v18 = vpop.permute.xlu0 %8226 }
 0x932   :  { %v8238_v20 = vsel %vm966_vm10, %v8225_v9, %v8227_v18  ;;  %v8239_v16 = vsel %vm966_vm10, %v8227_v18, %v17680_v17 }
 0x933   :  { %v8250_v43 = vsel %vm7179_vm14, %v8238_v20, 0  ;;  %v8252_v34 = vsel %vm7179_vm14, %v8239_v16, 0 }
 0x934   :  { %v8272_v0 = vand.u32 4294901760, %v8250_v43  ;;  %v17692_v54 = vand.u32 4294901760, %v8252_v34 }
 0x936   :  { %v8308_v4 = vsub.f32 %v8250_v43, %v8272_v0  ;;  %v8498_v60 = vsub.f32 %v8252_v34, %v17692_v54  ;;  %8273 = vmatpush.msra.mxu0 %v8272_v0  ;;  %8374 = vmatpush.msra.mxu3 %v8272_v0  ;;  %v9022_v43 = vperm.slane %v17664_v63, 2 }
 0x938   :  { %v8499_v29 = vand.u32 4294901760, %v8498_v60  ;;  %8344 = vmatpush.msra.mxu2 %v8308_v4  ;;  %v8309_v6 = vand.u32 4294901760, %v8308_v4  ;;  %v8217_v36 = vpop.permute.xlu1 %8216 }
 0x939   :  { %v8234_v59 = vsel %vm966_vm10, %v8215_v19, %v8217_v36  ;;  %v9021_v19 = vperm.slane %v17664_v63, 1 }
 0x93a   :  { %v8310_v37 = vsub.f32 %v8308_v4, %v8309_v6  ;;  %v8500_v56 = vsub.f32 %v8498_v60, %v8499_v29  ;;  %v8274_v8 = vand.u32 4294901760, %v8234_v59 }
 0x93b   :  { %v7330_v14 = vpop.permute.xlu0 %7329 }
 0x93c   :  { %v7333_v58 = vsel %vm159_vm8, %v17580_v28, %v7330_v14  ;;  %v7343_v51 = vmul.f32 %v7330_v14, %v17450_v12  ;;  %v8311_v47 = vand.u32 4294901760, %v8310_v37  ;;  %v8314_v11 = vsub.f32 %v8234_v59, %v8274_v8  ;;  %8275 = vmatpush.msra.mxu0 %v8274_v8  ;;  %8376 = vmatpush.msra.mxu3 %v8274_v8 }
 0x93d   :  { %v7347_v38 = vmul.f32 %v7333_v58, %v17517_v3  ;;  %v7342_v30 = vmul.f32 %v7333_v58, %v17448_v53  ;;  %v8501_v15 = vand.u32 4294901760, %v8500_v56  ;;  %8281 = vmatmul.f32.vlgmr.msra.gmra.mxu0 %v17700_v26  ;;  %8380 = vmatmul.f32.vlgmr.msra.gmra.mxu3 %v17683_v39  ;;  %v7348_v9 = vmul.f32 %v7330_v14, %v17526_v27 }
 0x93e   :  { %8222 = vrot.lane.b32.xlu1 %v7343_v51, %s15150_s13  ;;  %v8315_v28 = vand.u32 4294901760, %v8314_v11  ;;  %8407 = vmatpush.msrb.mxu0 %v8309_v6 }
 0x93f   :  { %8230 = vrot.lane.b32.xlu0 %v7347_v38, %s15150_s13  ;;  %8220 = vrot.lane.b32.xlu2 %v7342_v30, %s15150_s13 }
 0x940   :  { %8312 = vmatpush.msra.mxu1 %v8311_v47  ;;  %8347 = vmatpush.msra.mxu2 %v8314_v11  ;;  %v8316_v49 = vsub.f32 %v8314_v11, %v8315_v28 }
 0x941   :  { %8502 = vmatpush.msrb.mxu3 %v8501_v15  ;;  %8350 = vmatmul.f32.vlgmr.msra.gmra.mxu2 %v17676_v2  ;;  %v17718_v35 = vpop.permute.xlu1 %8218 }
 0x942   :  { %8411 = vmatpush.msrb.mxu0 %v8315_v28  ;;  %8463 = vmatpush.msrb.mxu2 %v17692_v54  ;;  %v8235_v21 = vsel %vm966_vm10, %v8217_v36, %v17718_v35  ;;  %v8317_v1 = vand.u32 4294901760, %v8316_v49 }
 0x943   :  { %v8464_v45 = vand.u32 4294901760, %v8235_v21 }
 0x944   :  { %8534 = vmatpush.msra.mxu0 %v8498_v60  ;;  %8318 = vmatpush.msra.mxu1 %v8317_v1 }
 0x945   :  { %v8504_v18 = vsub.f32 %v8235_v21, %v8464_v45  ;;  %8465 = vmatpush.msrb.mxu2 %v8464_v45  ;;  %8289 = vmatmul.f32.gmra.mxu0 %v17720_v55 }
 0x946   :  { %8320 = vmatmul.f32.vlgmr.msra.gmra.mxu1 %v17673_v33  ;;  %8386 = vmatmul.f32.gmra.mxu3 %v17704_v46 }
 0x947   :  { %9026 = vrot.lane.b32.xlu0 %v9021_v19, %s15149_s12  ;;  %8232 = vrot.lane.b32.xlu2 %v7348_v9, %s15150_s13  ;;  %v8505_v20 = vand.u32 4294901760, %v8504_v18 }
 0x948   :  { %8597 = vmatpush.msra.mxu2 %v8499_v29  ;;  %8436 = vmatpush.msrb.mxu1 %v8272_v0  ;;  %v9023_v0 = vperm.slane %v17664_v63, 3 }
 0x949   :  { %8537 = vmatpush.msra.mxu0 %v8504_v18  ;;  %8355 = vmatmul.f32.gmra.mxu2 %v17698_v24  ;;  %v8506_v16 = vsub.f32 %v8504_v18, %v8505_v20 }
 0x94a   :  { %8438 = vmatpush.msrb.mxu1 %v8274_v8  ;;  %8601 = vmatpush.msra.mxu2 %v8505_v20 }
 0x94b   :  { %v8507_v34 = vand.u32 4294901760, %v8506_v16 }
 0x94c   :  { %8564 = vmatpush.msra.mxu1 %v17692_v54 }
 0x94d   :  { %8508 = vmatpush.msrb.mxu3 %v8507_v34  ;;  %8413 = vmatmul.f32.vlgmr.msrb.gmra.mxu0 %v17673_v33 }
 0x94e   :  { %8566 = vmatpush.msra.mxu1 %v8464_v45  ;;  %8510 = vmatmul.f32.vlgmr.msrb.gmra.mxu3 %v17673_v33 }
 0x94f   :  { %9028 = vrot.lane.b32.xlu0 %v9022_v43, %s15149_s12  ;;  %8324 = vmatmul.f32.gmra.mxu1 %v17688_v61 }
 0x950   :  { %8626 = vmatpush.msra.mxu3 %v17692_v54 }
 0x951   :  { %8471 = vmatmul.f32.vlgmr.msrb.gmra.mxu2 %v17700_v26 }
 0x952   :  { %8628 = vmatpush.msra.mxu3 %v8464_v45 }
 0x955   :  { %8417 = vmatmul.f32.gmra.mxu0 %v17688_v61 }
 0x956   :  { %8514 = vmatmul.f32.gmra.mxu3 %v17688_v61 }
 0x957   :  { %9050 = vrot.lane.b32.xlu0 %v17419_v22, %s15158_s16  ;;  %8440 = vmatmul.f32.vlgmr.msrb.gmra.mxu1 %v17673_v33 }
 0x959   :  { %8479 = vmatmul.f32.gmra.mxu2 %v17720_v55 }
 0x95d   :  { %8540 = vmatmul.f32.vlgmr.msra.gmra.mxu0 %v17676_v2 }
 0x95e   :  { %8630 = vmatmul.f32.vlgmr.msra.gmra.mxu3 %v17673_v33 }
 0x95f   :  { %9030 = vrot.lane.b32.xlu0 %v9023_v0, %s15149_s12  ;;  %8444 = vmatmul.f32.gmra.mxu1 %v17688_v61 }
 0x961   :  { %8603 = vmatmul.f32.vlgmr.msra.gmra.mxu2 %v17673_v33 }
 0x965   :  { %8545 = vmatmul.f32.gmra.mxu0 %v17698_v24 }
 0x966   :  { %8634 = vmatmul.f32.gmra.mxu3 %v17688_v61 }
 0x967   :  { %8570 = vmatmul.f32.vlgmr.msra.gmra.mxu1 %v17683_v39 }
 0x969   :  { %8607 = vmatmul.f32.gmra.mxu2 %v17688_v61 }
 0x96f   :  { %8576 = vmatmul.f32.gmra.mxu1 %v17704_v46 }
 0x979   :  { %v9025_v22 = vpop.permute.xlu1 %9024 }
 0x97a   :  { %v9045_v63 = vmul.f32 %v9025_v22, %v17476_v57  ;;  %v9040_v54 = vmul.f32 %v17489_v52, %v9025_v22 }
 0x97c   :  { %9074 = vrot.lane.b32.xlu2 %v9045_v63, %s15152_s15 }
 0x984   :  { %9064 = vrot.lane.b32.xlu2 %v9040_v54, %s15152_s15 }
 0x98c   :  { %9052 = vrot.lane.b32.xlu2 %v17506_v50, %s15158_s16 }
 0x999   :  { %v8221_v25 = vpop.permute.xlu2 %8220 }
 0x99a   :  { %v8236_v4 = vsel %vm966_vm10, %v17718_v35, %v8221_v25 }
 0x99b   :  { %v17767_v60 = vand.u32 4294901760, %v8236_v4 }
 0x99d   :  { %v8694_v6 = vsub.f32 %v8236_v4, %v17767_v60 }
 0x99f   :  { %v8695_v47 = vand.u32 4294901760, %v8694_v6 }
 0x9a1   :  { %v8233_v36 = vpop.permute.xlu2 %8232  ;;  %v8696_v28 = vsub.f32 %v8694_v6, %v8695_v47 }
 0x9a3   :  { %v8697_v18 = vand.u32 4294901760, %v8696_v28 }
 0x9b0   :  { %v8223_v29 = vpop.permute.xlu1 %8222 }
 0x9b1   :  { %v8237_v57 = vsel %vm966_vm10, %v8221_v25, %v8223_v29  ;;  %v8231_v59 = vpop.permute.xlu0 %8230 }
 0x9b2   :  { %v8844_v37 = vand.u32 4294901760, %v8237_v57  ;;  %v8240_v52 = vsel %vm966_vm10, %v17680_v17, %v8231_v59  ;;  %v8241_v56 = vsel %vm966_vm10, %v8231_v59, %v8233_v36 }
 0x9b3   :  { %v8254_v50 = vsel %vm7179_vm14, %v8240_v52, 0  ;;  %v8256_v8 = vsel %vm7179_vm14, %v8241_v56, 0 }
 0x9b4   :  { %v8884_v14 = vsub.f32 %v8237_v57, %v8844_v37  ;;  %v8652_v58 = vand.u32 4294901760, %v8254_v50  ;;  %v8842_v51 = vand.u32 4294901760, %v8256_v8 }
 0x9b6   :  { %v8688_v11 = vsub.f32 %v8254_v50, %v8652_v58  ;;  %v8878_v38 = vsub.f32 %v8256_v8, %v8842_v51  ;;  %8653 = vmatpush.msrb.mxu0 %v8652_v58  ;;  %8754 = vmatpush.msrb.mxu3 %v8652_v58  ;;  %v8885_v30 = vand.u32 4294901760, %v8884_v14 }
 0x9b8   :  { %v8879_v15 = vand.u32 4294901760, %v8878_v38  ;;  %8655 = vmatpush.msrb.mxu0 %v17767_v60  ;;  %8724 = vmatpush.msrb.mxu2 %v8688_v11  ;;  %v8689_v17 = vand.u32 4294901760, %v8688_v11  ;;  %v8886_v19 = vsub.f32 %v8884_v14, %v8885_v30 }
 0x9b9   :  { %8756 = vmatpush.msrb.mxu3 %v17767_v60  ;;  %v9027_v44 = vpop.permute.xlu0 %9026  ;;  %8661 = vmatmul.f32.vlgmr.msrb.gmra.mxu0 %v17700_v26 }
 0x9ba   :  { %v9032_v49 = vsel %vm1706_vm9, %v9025_v22, %v9027_v44  ;;  %8727 = vmatpush.msrb.mxu2 %v8694_v6  ;;  %8787 = vmatpush.msra.mxu0 %v8689_v17  ;;  %v8690_v35 = vsub.f32 %v8688_v11, %v8689_v17  ;;  %v8880_v21 = vsub.f32 %v8878_v38, %v8879_v15  ;;  %v8887_v20 = vand.u32 4294901760, %v8886_v19 }
 0x9bb   :  { %v9046_v1 = vmul.f32 %v9032_v49, %v17484_v7  ;;  %8730 = vmatmul.f32.vlgmr.msrb.gmra.mxu2 %v17676_v2  ;;  %8760 = vmatmul.f32.vlgmr.msrb.gmra.mxu3 %v17683_v39  ;;  %v9041_v34 = vmul.f32 %v9032_v49, %v17444_v62 }
 0x9bc   :  { %8843 = vmatpush.msra.mxu2 %v8842_v51  ;;  %8791 = vmatpush.msra.mxu0 %v8695_v47  ;;  %v8691_v45 = vand.u32 4294901760, %v8690_v35  ;;  %v8881_v9 = vand.u32 4294901760, %v8880_v21 }
 0x9bd   :  { %9076 = vrot.lane.b32.xlu1 %v9046_v1, %s15152_s15 }
 0x9be   :  { %8914 = vmatpush.msrb.mxu0 %v8878_v38  ;;  %8845 = vmatpush.msra.mxu2 %v8844_v37 }
 0x9bf   :  { %8692 = vmatpush.msrb.mxu1 %v8691_v45  ;;  %8882 = vmatpush.msra.mxu3 %v8881_v9 }
 0x9c0   :  { %8977 = vmatpush.msrb.mxu2 %v8879_v15  ;;  %8917 = vmatpush.msrb.mxu0 %v8884_v14 }
 0x9c1   :  { %8698 = vmatpush.msrb.mxu1 %v8697_v18  ;;  %8888 = vmatpush.msra.mxu3 %v8887_v20  ;;  %v9029_v7 = vpop.permute.xlu0 %9028 }
 0x9c2   :  { %8981 = vmatpush.msrb.mxu2 %v8885_v30  ;;  %v9033_v16 = vsel %vm1706_vm9, %v9027_v44, %v9029_v7  ;;  %8669 = vmatmul.f32.gmra.mxu0 %v17720_v55 }
 0x9c3   :  { %8700 = vmatmul.f32.vlgmr.msrb.gmra.mxu1 %v17673_v33  ;;  %v9042_v43 = vmul.f32 %v9033_v16, %v17446_v13  ;;  %9006 = vmatpush.msrb.mxu3 %v8842_v51  ;;  %v15059_v13 = vld [vmem:[%s20180_s1 + $0x3] ss:$8 sm:$0xf]  ;;  %v9047_v22 = vmul.f32 %v9033_v16, %v17511_v10 }
 0x9c4   :  { %8816 = vmatpush.msra.mxu1 %v8652_v58  ;;  %8735 = vmatmul.f32.gmra.mxu2 %v17698_v24  ;;  %v9878_v62 = vperm.slane %v15059_v13, 0  ;;  %v9879_v10 = vperm.slane %v15059_v13, 1 }
 0x9c5   :  { %8766 = vmatmul.f32.gmra.mxu3 %v17704_v46  ;;  %9068 = vrot.lane.b32.xlu0 %v9042_v43, %s15152_s15 }
 0x9c6   :  { %8818 = vmatpush.msra.mxu1 %v17767_v60  ;;  %9008 = vmatpush.msrb.mxu3 %v8844_v37 }
 0x9c7   :  { %9066 = vrot.lane.b32.xlu1 %v9041_v34, %s15152_s15 }
 0x9c8   :  { %8944 = vmatpush.msrb.mxu1 %v8842_v51 }
 0x9c9   :  { %v17797_v0 = vpop.permute.xlu0 %9050 }
 0x9ca   :  { %8946 = vmatpush.msrb.mxu1 %v8844_v37  ;;  %8793 = vmatmul.f32.vlgmr.msra.gmra.mxu0 %v17673_v33  ;;  %v9096_v49 = vsel %vm7431_vm6, %v17797_v0, 0 }
 0x9cb   :  { %8704 = vmatmul.f32.gmra.mxu1 %v17688_v61  ;;  %v17894_v21 = vand.u32 4294901760, %v9096_v49 }
 0x9cc   :  { %8851 = vmatmul.f32.vlgmr.msra.gmra.mxu2 %v17700_v26 }
 0x9cd   :  { %8890 = vmatmul.f32.vlgmr.msra.gmra.mxu3 %v17673_v33  ;;  %9882 = vrot.lane.b32.xlu0 %v9878_v62, %s15153_s17  ;;  %v17903_v18 = vsub.f32 %v9096_v49, %v17894_v21 }
 0x9cf   :  { %9078 = vrot.lane.b32.xlu1 %v9047_v22, %s15152_s15 }
 0x9d1   :  { %v9031_v63 = vpop.permute.xlu0 %9030 }
 0x9d2   :  { %v9034_v54 = vsel %vm1706_vm9, %v9029_v7, %v9031_v63  ;;  %v9044_v25 = vmul.f32 %v9031_v63, %v17450_v12  ;;  %8797 = vmatmul.f32.gmra.mxu0 %v17688_v61  ;;  %v9880_v12 = vperm.slane %v15059_v13, 2 }
 0x9d3   :  { %v9043_v4 = vmul.f32 %v9034_v54, %v17448_v53  ;;  %v9048_v60 = vmul.f32 %v9034_v54, %v17517_v3  ;;  %8820 = vmatmul.f32.vlgmr.msra.gmra.mxu1 %v17673_v33  ;;  %v9049_v53 = vmul.f32 %v9031_v63, %v17526_v27  ;;  %v17829_v3 = vpop.f32.mrf.mxu0  ;;  %v17837_v27 = vld [vmem:[%s20187_s8] sm:$0xff] }
 0x9d4   :  { %8859 = vmatmul.f32.gmra.mxu2 %v17720_v55 }
 0x9d5   :  { %8894 = vmatmul.f32.gmra.mxu3 %v17688_v61  ;;  %9080 = vrot.lane.b32.xlu2 %v9048_v60, %s15152_s15 }
 0x9d6   :  { %9072 = vrot.lane.b32.xlu0 %v9044_v25, %s15152_s15  ;;  %v9075_v50 = vpop.permute.xlu2 %9074 }
 0x9d7   :  { %9070 = vrot.lane.b32.xlu1 %v9043_v4, %s15152_s15 }
 0x9da   :  { %8920 = vmatmul.f32.vlgmr.msrb.gmra.mxu0 %v17676_v2  ;;  %v17841_v2 = vpop.f32.mrf.mxu2 }
 0x9db   :  { %8824 = vmatmul.f32.gmra.mxu1 %v17688_v61 }
 0x9dc   :  { %8983 = vmatmul.f32.vlgmr.msrb.gmra.mxu2 %v17673_v33 }
 0x9dd   :  { %9010 = vmatmul.f32.vlgmr.msrb.gmra.mxu3 %v17673_v33  ;;  %9884 = vrot.lane.b32.xlu2 %v9879_v10, %s15153_s17  ;;  %v17831_v33 = vpop.f32.mrf.mxu1 }
 0x9de   :  { %v9065_v47 = vpop.permute.xlu2 %9064 }
 0x9df   :  { %9082 = vrot.lane.b32.xlu1 %v9049_v53, %s15152_s15 }
 0x9e2   :  { %8925 = vmatmul.f32.gmra.mxu0 %v17698_v24  ;;  %v17845_v24 = vpop.f32.mrf.mxu0 }
 0x9e3   :  { %8950 = vmatmul.f32.vlgmr.msrb.gmra.mxu1 %v17683_v39  ;;  %v9881_v39 = vperm.slane %v15059_v13, 3  ;;  %v17913_v13 = vand.u32 4294901760, %v17903_v18 }
 0x9e4   :  { %8987 = vmatmul.f32.gmra.mxu2 %v17688_v61 }
 0x9e5   :  { %9014 = vmatmul.f32.gmra.mxu3 %v17688_v61  ;;  %9886 = vrot.lane.b32.xlu2 %v9880_v12, %s15153_s17  ;;  %v17843_v61 = vpop.f32.mrf.mxu3  ;;  %v17847_v26 = vpop.f32.mrf.mxu1  ;;  %v9129_v10 = vsub.f32 %v17903_v18, %v17913_v13 }
 0x9e6   :  { %v9053_v17 = vpop.permute.xlu2 %9052 }
 0x9e7   :  { %v9098_v16 = vsel %vm7431_vm6, %v9053_v17, 0 }
 0x9e8   :  { %v17915_v0 = vand.u32 4294901760, %v9098_v16 }
 0x9ea   :  { %v17854_v29 = vpop.f32.mrf.mxu0  ;;  %v17925_v4 = vsub.f32 %v9098_v16, %v17915_v0  ;;  %v17941_v16 = vand.u32 4294901760, %v9129_v10 }
 0x9eb   :  { %8956 = vmatmul.f32.gmra.mxu1 %v17704_v46  ;;  %v17850_v46 = vpop.f32.mrf.mxu2 }
 0x9ed   :  { %9908 = vrot.lane.b32.xlu2 %v17837_v27, %s15161_s4  ;;  %v17852_v55 = vpop.f32.mrf.mxu3  ;;  %v17856_v6 = vpop.f32.mrf.mxu1 }
 0x9f2   :  { %v17862_v59 = vpop.f32.mrf.mxu0 }
 0x9f3   :  { %v17858_v36 = vpop.f32.mrf.mxu2 }
 0x9f5   :  { %9888 = vrot.lane.b32.xlu2 %v9881_v39, %s15153_s17  ;;  %v17860_v57 = vpop.f32.mrf.mxu3  ;;  %v17864_v37 = vpop.f32.mrf.mxu1 }
 0x9f6   :  { %20572 = vst [vmem:[#allocation20_spill] sm:$0xff] %v17860_v57 }
 0x9f7   :  { %20573 = vst [vmem:[#allocation94_spill] sm:$0xff] %v17864_v37 }
 0x9fa   :  { %v17870_v8 = vpop.f32.mrf.mxu0 }
 0x9fb   :  { %v17866_v52 = vpop.f32.mrf.mxu2  ;;  %20576 = vst [vmem:[#allocation55_spill] sm:$0xff] %v17870_v8 }
 0x9fc   :  { %20574 = vst [vmem:[#allocation21_spill] sm:$0xff] %v17866_v52 }
 0x9fd   :  { %v17868_v56 = vpop.f32.mrf.mxu3  ;;  %v17872_v14 = vpop.f32.mrf.mxu1 }
 0x9fe   :  { %20575 = vst [vmem:[#allocation54_spill] sm:$0xff] %v17868_v56 }
 0x9ff   :  { %20577 = vst [vmem:[#allocation18_spill] sm:$0xff] %v17872_v14 }
 0xa02   :  { %v17878_v11 = vpop.f32.mrf.mxu0 }
 0xa03   :  { %v17874_v58 = vpop.f32.mrf.mxu2  ;;  %20580 = vst [vmem:[#allocation57_spill] sm:$0xff] %v17878_v11 }
 0xa04   :  { %20578 = vst [vmem:[#allocation24_spill] sm:$0xff] %v17874_v58 }
 0xa05   :  { %v17876_v51 = vpop.f32.mrf.mxu3  ;;  %v17880_v38 = vpop.f32.mrf.mxu1 }
 0xa06   :  { %20579 = vst [vmem:[#allocation22_spill] sm:$0xff] %v17876_v51 }
 0xa07   :  { %20581 = vst [vmem:[#allocation23_spill] sm:$0xff] %v17880_v38 }
 0xa0a   :  { %v17886_v44 = vpop.f32.mrf.mxu0 }
 0xa0b   :  { %v17882_v30 = vpop.f32.mrf.mxu2  ;;  %20584 = vst [vmem:[#allocation27_spill] sm:$0xff] %v17886_v44 }
 0xa0c   :  { %20582 = vst [vmem:[#allocation97_spill] sm:$0xff] %v17882_v30 }
 0xa0d   :  { %v17884_v15 = vpop.f32.mrf.mxu3  ;;  %v17888_v28 = vpop.f32.mrf.mxu1 }
 0xa0e   :  { %20583 = vst [vmem:[#allocation99_spill] sm:$0xff] %v17884_v15 }
 0xa0f   :  { %20585 = vst [vmem:[#allocation60_spill] sm:$0xff] %v17888_v28 }
 0xa12   :  { %v17900_v9 = vpop.f32.mrf.mxu0 }
 0xa13   :  { %v17892_v35 = vpop.f32.mrf.mxu2  ;;  %20588 = vst [vmem:[#allocation29_spill] sm:$0xff] %v17900_v9 }
 0xa14   :  { %20586 = vst [vmem:[#allocation25_spill] sm:$0xff] %v17892_v35 }
 0xa15   :  { %v17896_v1 = vpop.f32.mrf.mxu3  ;;  %v17906_v7 = vpop.f32.mrf.mxu1 }
 0xa16   :  { %20587 = vst [vmem:[#allocation100_spill] sm:$0xff] %v17896_v1  ;;  %v17970_v1 = vld [vmem:[#allocation3 + $0x8] sm:$0xff] }
 0xa17   :  { %20589 = vst [vmem:[#allocation59_spill] sm:$0xff] %v17906_v7 }
 0xa1a   :  { %v17931_v39 = vpop.f32.mrf.mxu0 }
 0xa1b   :  { %v17920_v22 = vpop.f32.mrf.mxu2  ;;  %20592 = vst [vmem:[#allocation58_spill] sm:$0xff] %v17931_v39 }
 0xa1c   :  { %20590 = vst [vmem:[#allocation28_spill] sm:$0xff] %v17920_v22 }
 0xa1d   :  { %v17922_v54 = vpop.f32.mrf.mxu3  ;;  %v17934_v49 = vpop.f32.mrf.mxu1 }
 0xa1e   :  { %20591 = vst [vmem:[#allocation26_spill] sm:$0xff] %v17922_v54 }
 0xa1f   :  { %20593 = vst [vmem:[#allocation61_spill] sm:$0xff] %v17934_v49 }
 0xa25   :  { %v17959_v42 = vpop.f32.mrf.mxu3  ;;  %v17982_v35 = vpop.f32.mrf.mxu1 }
 0xa26   :  { %20595 = vst [vmem:[#allocation103_spill] sm:$0xff] %v17959_v42  ;;  %v17975_v42 = vpop.f32.mrf.mxu0 }
 0xa27   :  { %20596 = vst [vmem:[#allocation98_spill] sm:$0xff] %v17975_v42 }
 0xa28   :  { %20597 = vst [vmem:[#allocation32_spill] sm:$0xff] %v17982_v35 }
 0xa2f   :  { %v9077_v19 = vpop.permute.xlu1 %9076  ;;  %v17898_v45 = vpop.permute.xlu2 %9080 }
 0xa30   :  { %v9088_v20 = vsel %vm1739_vm11, %v9075_v50, %v9077_v19 }
 0xa31   :  { %v9100_v43 = vsel %vm7179_vm14, %v9088_v20, 0 }
 0xa32   :  { %v17910_v34 = vand.u32 4294901760, %v9100_v43 }
 0xa34   :  { %v9158_v62 = vsub.f32 %v9100_v43, %v17910_v34  ;;  %9123 = vmatpush.msra.mxu0 %v17910_v34  ;;  %9224 = vmatpush.msra.mxu3 %v17910_v34  ;;  %v17939_v43 = vand.u32 4294901760, %v17925_v4 }
 0xa36   :  { %v9159_v63 = vand.u32 4294901760, %v9158_v62  ;;  %9194 = vmatpush.msra.mxu2 %v9158_v62 }
 0xa37   :  { %v9885_v25 = vpop.permute.xlu2 %9884  ;;  %v17927_v60 = vpop.permute.xlu0 %9068 }
 0xa38   :  { %v9160_v53 = vsub.f32 %v9158_v62, %v9159_v63 }
 0xa39   :  { %v9067_v12 = vpop.permute.xlu1 %9066 }
 0xa3a   :  { %v9084_v50 = vsel %vm1739_vm11, %v9065_v47, %v9067_v12  ;;  %v9161_v17 = vand.u32 4294901760, %v9160_v53  ;;  %v9085_v5 = vsel %vm1739_vm11, %v9067_v12, %v17927_v60  ;;  %v17950_v47 = vpop.f32.mrf.mxu2 }
 0xa3b   :  { %v17936_v20 = vand.u32 4294901760, %v9084_v50  ;;  %20594 = vst [vmem:[#allocation101_spill] sm:$0xff] %v17950_v47  ;;  %v17952_v53 = vand.u32 4294901760, %v9085_v5 }
 0xa3c   :  { %9162 = vmatpush.msra.mxu1 %v9161_v17 }
 0xa3d   :  { %v9164_v62 = vsub.f32 %v9084_v50, %v17936_v20  ;;  %9125 = vmatpush.msra.mxu0 %v17936_v20  ;;  %9226 = vmatpush.msra.mxu3 %v17936_v20  ;;  %v9137_v50 = vsub.f32 %v17925_v4, %v17939_v43  ;;  %v9354_v7 = vsub.f32 %v9085_v5, %v17952_v53 }
 0xa3e   :  { %9131 = vmatmul.f32.vlgmr.msra.gmra.mxu0 %v17941_v16  ;;  %9230 = vmatmul.f32.vlgmr.msra.gmra.mxu3 %v17913_v13 }
 0xa3f   :  { %9257 = vmatpush.msrb.mxu0 %v9159_v63  ;;  %9197 = vmatpush.msra.mxu2 %v9164_v62  ;;  %v9165_v10 = vand.u32 4294901760, %v9164_v62  ;;  %v9883_v12 = vpop.permute.xlu0 %9882  ;;  %v17955_v17 = vpop.permute.xlu2 %9886 }
 0xa40   :  { %9200 = vmatmul.f32.vlgmr.msra.gmra.mxu2 %v17903_v18  ;;  %v9903_v32 = vmul.f32 %v15116_v23, %v9883_v12  ;;  %v17963_v63 = vsel %vm2487_vm12, %v9885_v25, %v17955_v17  ;;  %v9890_v47 = vsel %vm2487_vm12, %v9883_v12, %v9885_v25 }
 0xa41   :  { %v9079_v54 = vpop.permute.xlu1 %9078  ;;  %9261 = vmatpush.msrb.mxu0 %v9165_v10  ;;  %v9900_v23 = vmul.f32 %v17970_v1, %v17963_v63  ;;  %v9166_v25 = vsub.f32 %v9164_v62, %v9165_v10  ;;  %v9355_v62 = vand.u32 4294901760, %v9354_v7  ;;  %v17994_v10 = vld [vmem:[#allocation3 + $0x40] sm:$0xff] }
 0xa42   :  { %v9089_v49 = vsel %vm1739_vm11, %v9077_v19, %v9079_v54  ;;  %v9090_v22 = vsel %vm1739_vm11, %v9079_v54, %v17898_v45  ;;  %9932 = vrot.lane.b32.xlu1 %v9903_v32, %s15155_s21  ;;  %v17980_v19 = vand.u32 4294901760, %v9137_v50 }
 0xa43   :  { %v9102_v39 = vsel %vm7179_vm14, %v9089_v49, 0  ;;  %v9104_v54 = vsel %vm7179_vm14, %v9090_v22, 0  ;;  %v15118_v49 = vld [vmem:[#allocation3 + $0x20] sm:$0x3f]  ;;  %9926 = vrot.lane.b32.xlu2 %v9900_v23, %s15155_s21  ;;  %v9167_v32 = vand.u32 4294901760, %v9166_v25 }
 0xa44   :  { %v17978_v9 = vand.u32 4294901760, %v9102_v39  ;;  %v9904_v28 = vmul.f32 %v15118_v49, %v9890_v47  ;;  %v17991_v5 = vand.u32 4294901760, %v9104_v54  ;;  %v18006_v49 = vpop.f32.mrf.mxu3 }
 0xa45   :  { %9168 = vmatpush.msra.mxu1 %v9167_v32  ;;  %20599 = vst [vmem:[#allocation63_spill] sm:$0xff] %v18006_v49  ;;  %v18019_v49 = vpop.f32.mrf.mxu0 }
 0xa46   :  { %v9348_v44 = vsub.f32 %v9102_v39, %v17978_v9  ;;  %9139 = vmatmul.f32.gmra.mxu0 %v17980_v19  ;;  %9236 = vmatmul.f32.gmra.mxu3 %v17939_v43  ;;  %v9898_v39 = vmul.f32 %v17994_v10, %v9883_v12  ;;  %v18012_v35 = vsub.f32 %v9104_v54, %v17991_v5  ;;  %v18025_v54 = vpop.f32.mrf.mxu1 }
 0xa47   :  { %9934 = vrot.lane.b32.xlu0 %v9904_v28, %s15155_s21  ;;  %9313 = vmatpush.msrb.mxu2 %v17978_v9  ;;  %v17999_v23 = vpop.permute.xlu2 %9908  ;;  %v18001_v28 = vpop.f32.mrf.mxu2  ;;  %20600 = vst [vmem:[#allocation105_spill] sm:$0xff] %v18019_v49 }
 0xa48   :  { %9205 = vmatmul.f32.gmra.mxu2 %v17925_v4  ;;  %v9349_v22 = vand.u32 4294901760, %v9348_v44  ;;  %9170 = vmatmul.f32.vlgmr.msra.gmra.mxu1 %v17894_v21  ;;  %20598 = vst [vmem:[#allocation31_spill] sm:$0xff] %v18001_v28  ;;  %v9356_v28 = vsub.f32 %v9354_v7, %v9355_v62  ;;  %v9073_v15 = vpop.permute.xlu0 %9072 }
 0xa49   :  { %9315 = vmatpush.msrb.mxu2 %v17952_v53  ;;  %v9071_v50 = vpop.permute.xlu1 %9070  ;;  %9286 = vmatpush.msrb.mxu1 %v17910_v34  ;;  %v18015_v34 = vld [vmem:[#allocation3 + $0x30] sm:$0xff]  ;;  %20601 = vst [vmem:[#allocation64_spill] sm:$0xff] %v18025_v54 }
 0xa4a   :  { %9384 = vmatpush.msra.mxu0 %v9348_v44  ;;  %v9086_v25 = vsel %vm1739_vm11, %v17927_v60, %v9071_v50  ;;  %9922 = vrot.lane.b32.xlu1 %v9898_v39, %s15155_s21  ;;  %v9350_v12 = vsub.f32 %v9348_v44, %v9349_v22  ;;  %v9899_v42 = vmul.f32 %v18015_v34, %v9890_v47 }
 0xa4b   :  { %v18008_v32 = vand.u32 4294901760, %v9086_v25  ;;  %9447 = vmatpush.msra.mxu2 %v9349_v22  ;;  %9288 = vmatpush.msrb.mxu1 %v17936_v20  ;;  %v9357_v20 = vand.u32 4294901760, %v9356_v28  ;;  %v9087_v47 = vsel %vm1739_vm11, %v9071_v50, %v9073_v15  ;;  %v15121_v15 = vld [vmem:[#allocation3 + $0x28] sm:$0x3f] }
 0xa4c   :  { %9387 = vmatpush.msra.mxu0 %v9354_v7  ;;  %v9351_v60 = vand.u32 4294901760, %v9350_v12  ;;  %v9539_v7 = vand.u32 4294901760, %v18012_v35  ;;  %v18046_v12 = vand.u32 4294901760, %v9087_v47 }
 0xa4d   :  { %9414 = vmatpush.msra.mxu1 %v17978_v9  ;;  %9451 = vmatpush.msra.mxu2 %v9355_v62  ;;  %v18022_v44 = vsub.f32 %v9086_v25, %v18008_v32 }
 0xa4e   :  { %9263 = vmatmul.f32.vlgmr.msrb.gmra.mxu0 %v17894_v21  ;;  %9352 = vmatpush.msrb.mxu3 %v9351_v60 }
 0xa4f   :  { %9416 = vmatpush.msra.mxu1 %v17952_v53  ;;  %9924 = vrot.lane.b32.xlu0 %v9899_v42, %s15155_s21  ;;  %v18034_v62 = vpop.permute.xlu2 %9888  ;;  %v9545_v39 = vand.u32 4294901760, %v18022_v44  ;;  %v18044_v25 = vpop.f32.mrf.mxu2 }
 0xa50   :  { %9503 = vmatpush.msrb.mxu0 %v17991_v5  ;;  %9174 = vmatmul.f32.gmra.mxu1 %v17915_v0  ;;  %v9907_v50 = vmul.f32 %v15121_v15, %v18034_v62  ;;  %20602 = vst [vmem:[#allocation104_spill] sm:$0xff] %v18044_v25 }
 0xa51   :  { %9321 = vmatmul.f32.vlgmr.msrb.gmra.mxu2 %v17941_v16  ;;  %v9083_v22 = vpop.permute.xlu1 %9082  ;;  %9358 = vmatpush.msrb.mxu3 %v9357_v20  ;;  %v9540_v20 = vsub.f32 %v18012_v35, %v9539_v7  ;;  %v9546_v25 = vsub.f32 %v18022_v44, %v9545_v39 }
 0xa52   :  { %9505 = vmatpush.msrb.mxu0 %v18008_v32  ;;  %v9091_v42 = vsel %vm1739_vm11, %v17898_v45, %v9083_v22  ;;  %9574 = vmatpush.msrb.mxu2 %v18012_v35  ;;  %v18054_v45 = vld [vmem:[%s20187_s8 + $0x8] sm:$0x3]  ;;  %v18059_v22 = vpop.f32.mrf.mxu3  ;;  %v9892_v35 = vsel %vm2487_vm12, %v17955_v17, %v18034_v62 }
 0xa53   :  { %v9106_v28 = vsel %vm7179_vm14, %v9091_v42, 0  ;;  %9360 = vmatmul.f32.vlgmr.msrb.gmra.mxu3 %v17894_v21  ;;  %9910 = vrot.lane.b32.xlu1 %v18054_v45, %s15161_s4  ;;  %20603 = vst [vmem:[#allocation107_spill] sm:$0xff] %v18059_v22  ;;  %v15123_v42 = vld [vmem:[#allocation3 + $0x10] sm:$0x3f] }
 0xa54   :  { %v18048_v60 = vand.u32 4294901760, %v9106_v28  ;;  %9476 = vmatpush.msra.mxu3 %v17978_v9  ;;  %v9905_v15 = vmul.f32 %v15123_v42, %v17963_v63  ;;  %9577 = vmatpush.msrb.mxu2 %v18022_v44  ;;  %v18075_v63 = vpop.f32.mrf.mxu0  ;;  %v18080_v42 = vpop.f32.mrf.mxu1  ;;  %v15124_v44 = vld [vmem:[#allocation3 + $0x50] sm:$0x3f] }
 0xa55   :  { %9940 = vrot.lane.b32.xlu2 %v9907_v50, %s15155_s21  ;;  %20604 = vst [vmem:[#allocation33_spill] sm:$0xff] %v18075_v63  ;;  %v18078_v50 = vsub.f32 %v9087_v47, %v18046_v12  ;;  %v9906_v17 = vmul.f32 %v15124_v44, %v9892_v35  ;;  %v15060_v44 = vld [vmem:[%s20180_s1 + $0x5] ss:$8 sm:$0xf] }
 0xa56   :  { %v18065_v9 = vsub.f32 %v9106_v28, %v18048_v60  ;;  %9478 = vmatpush.msra.mxu3 %v17952_v53  ;;  %9267 = vmatmul.f32.gmra.mxu0 %v17915_v0  ;;  %v9541_v28 = vand.u32 4294901760, %v9540_v20  ;;  %20605 = vst [vmem:[#allocation65_spill] sm:$0xff] %v18080_v42  ;;  %v18089_v20 = vld [vmem:[#allocation3 + $0x58] sm:$0xff]  ;;  %v11536_v22 = vperm.slane %v15060_v44, 2 }
 0xa57   :  { %9936 = vrot.lane.b32.xlu0 %v9905_v15, %s15155_s21  ;;  %v9547_v15 = vand.u32 4294901760, %v9546_v25  ;;  %v9735_v47 = vand.u32 4294901760, %v18078_v50  ;;  %v9901_v42 = vmul.f32 %v18089_v20, %v9892_v35  ;;  %v18093_v53 = vpop.f32.mrf.mxu2 }
 0xa58   :  { %9604 = vmatpush.msrb.mxu3 %v17991_v5  ;;  %9290 = vmatmul.f32.vlgmr.msrb.gmra.mxu1 %v17894_v21  ;;  %20606 = vst [vmem:[#allocation30_spill] sm:$0xff] %v18093_v53  ;;  %v20607_v25 = vand.u32 4294901760, %v18065_v9 }
 0xa59   :  { %9542 = vmatpush.msrb.mxu1 %v9541_v28  ;;  %9329 = vmatmul.f32.gmra.mxu2 %v17980_v19 }
 0xa5a   :  { %9606 = vmatpush.msrb.mxu3 %v18008_v32  ;;  %v9730_v28 = vsub.f32 %v18065_v9, %v20607_v25  ;;  %v18111_v25 = vld [vmem:[#allocation3 + $0x38] sm:$0xff] }
 0xa5b   :  { %9364 = vmatmul.f32.gmra.mxu3 %v17915_v0  ;;  %9548 = vmatpush.msrb.mxu1 %v9547_v15  ;;  %v9736_v15 = vsub.f32 %v18078_v50, %v9735_v47  ;;  %v9902_v63 = vmul.f32 %v18111_v25, %v18034_v62 }
 0xa5c   :  { %9938 = vrot.lane.b32.xlu1 %v9906_v17, %s15155_s21  ;;  %v18102_v17 = vpop.f32.mrf.mxu3  ;;  %v18105_v35 = vpop.f32.mrf.mxu0 }
 0xa5d   :  { %10736 = vrot.lane.b32.xlu2 %v18054_v45, %s15162_s27  ;;  %20608 = vst [vmem:[#allocation102_spill] sm:$0xff] %v18102_v17  ;;  %v18108_v53 = vpop.f32.mrf.mxu1  ;;  %v9731_v17 = vand.u32 4294901760, %v9730_v28 }
 0xa5e   :  { %9390 = vmatmul.f32.vlgmr.msra.gmra.mxu0 %v17903_v18 }
 0xa5f   :  { %9928 = vrot.lane.b32.xlu0 %v9901_v42, %s15155_s21  ;;  %9637 = vmatpush.msra.mxu0 %v9539_v7  ;;  %v9737_v7 = vand.u32 4294901760, %v9736_v15  ;;  %v11534_v42 = vperm.slane %v15060_v44, 0  ;;  %v20615_v15 = vand.u32 4294901760, %v18065_v9 }
 0xa60   :  { %9294 = vmatmul.f32.gmra.mxu1 %v17915_v0 }
 0xa61   :  { %9641 = vmatpush.msra.mxu0 %v9545_v39  ;;  %9453 = vmatmul.f32.vlgmr.msra.gmra.mxu2 %v17894_v21  ;;  %v18121_v39 = vpop.f32.mrf.mxu2 }
 0xa62   :  { %9693 = vmatpush.msra.mxu2 %v18048_v60  ;;  %20609 = vst [vmem:[#allocation62_spill] sm:$0xff] %v18121_v39 }
 0xa63   :  { %9480 = vmatmul.f32.vlgmr.msra.gmra.mxu3 %v17894_v21 }
 0xa64   :  { %9732 = vmatpush.msra.mxu3 %v9731_v17  ;;  %9930 = vrot.lane.b32.xlu1 %v9902_v63, %s15155_s21  ;;  %v18124_v62 = vpop.f32.mrf.mxu3  ;;  %v18128_v28 = vpop.f32.mrf.mxu0 }
 0xa65   :  { %9695 = vmatpush.msra.mxu2 %v18046_v12  ;;  %11542 = vrot.lane.b32.xlu2 %v11536_v22, %s15155_s21  ;;  %20610 = vst [vmem:[#allocation35_spill] sm:$0xff] %v18124_v62  ;;  %v18132_v63 = vpop.f32.mrf.mxu1  ;;  %v11535_v22 = vperm.slane %v15060_v44, 1 }
 0xa66   :  { %9738 = vmatpush.msra.mxu3 %v9737_v7  ;;  %9395 = vmatmul.f32.gmra.mxu0 %v17925_v4  ;;  %20611 = vst [vmem:[#allocation68_spill] sm:$0xff] %v18128_v28  ;;  %v18394_v28 = vld [vmem:[#allocation3 + $0x30] sm:$0xff] }
 0xa67   :  { %10734 = vrot.lane.b32.xlu0 %v17837_v27, %s15162_s27  ;;  %20612 = vst [vmem:[#allocation109_spill] sm:$0xff] %v18132_v63 }
 0xa68   :  { %9420 = vmatmul.f32.vlgmr.msra.gmra.mxu1 %v17913_v13 }
 0xa69   :  { %9666 = vmatpush.msra.mxu1 %v17991_v5  ;;  %9457 = vmatmul.f32.gmra.mxu2 %v17915_v0  ;;  %v18142_v5 = vpop.f32.mrf.mxu2 }
 0xa6a   :  { %20613 = vst [vmem:[#allocation67_spill] sm:$0xff] %v18142_v5 }
 0xa6b   :  { %9484 = vmatmul.f32.gmra.mxu3 %v17915_v0  ;;  %9668 = vmatpush.msra.mxu1 %v18008_v32  ;;  %v11537_v32 = vperm.slane %v15060_v44, 3 }
 0xa6c   :  { %11538 = vrot.lane.b32.xlu1 %v11534_v42, %s15155_s21  ;;  %v18144_v17 = vpop.f32.mrf.mxu3 }
 0xa6d   :  { %11564 = vrot.lane.b32.xlu2 %v17837_v27, %s15163_s30  ;;  %20614 = vst [vmem:[#allocation108_spill] sm:$0xff] %v18144_v17  ;;  %v18152_v27 = vpop.f32.mrf.mxu0  ;;  %v18155_v7 = vpop.f32.mrf.mxu1 }
 0xa6e   :  { %9511 = vmatmul.f32.vlgmr.msrb.gmra.mxu0 %v17941_v16  ;;  %20616 = vst [vmem:[#allocation106_spill] sm:$0xff] %v18152_v27 }
 0xa6f   :  { %11540 = vrot.lane.b32.xlu0 %v11535_v22, %s15155_s21  ;;  %9764 = vmatpush.msrb.mxu0 %v18065_v9  ;;  %20617 = vst [vmem:[#allocation111_spill] sm:$0xff] %v18155_v7 }
 0xa70   :  { %9426 = vmatmul.f32.gmra.mxu1 %v17939_v43 }
 0xa71   :  { %9767 = vmatpush.msrb.mxu0 %v18078_v50  ;;  %9580 = vmatmul.f32.vlgmr.msrb.gmra.mxu2 %v17903_v18  ;;  %v18161_v50 = vpop.f32.mrf.mxu2 }
 0xa72   :  { %9827 = vmatpush.msrb.mxu2 %v20615_v15  ;;  %20618 = vst [vmem:[#allocation66_spill] sm:$0xff] %v18161_v50 }
 0xa73   :  { %9610 = vmatmul.f32.vlgmr.msrb.gmra.mxu3 %v17913_v13 }
 0xa74   :  { %9856 = vmatpush.msrb.mxu3 %v18048_v60  ;;  %9831 = vmatpush.msrb.mxu2 %v9735_v47  ;;  %v18165_v9 = vpop.f32.mrf.mxu3 }
 0xa75   :  { %11544 = vrot.lane.b32.xlu2 %v11537_v32, %s15155_s21  ;;  %20619 = vst [vmem:[#allocation69_spill] sm:$0xff] %v18165_v9  ;;  %v18169_v47 = vpop.f32.mrf.mxu0  ;;  %v18172_v44 = vpop.f32.mrf.mxu1 }
 0xa76   :  { %9858 = vmatpush.msrb.mxu3 %v18046_v12  ;;  %9519 = vmatmul.f32.gmra.mxu0 %v17980_v19  ;;  %20620 = vst [vmem:[#allocation113_spill] sm:$0xff] %v18169_v47 }
 0xa77   :  { %20621 = vst [vmem:[#allocation128_spill] sm:$0xff] %v18172_v44 }
 0xa78   :  { %9550 = vmatmul.f32.vlgmr.msrb.gmra.mxu1 %v17894_v21 }
 0xa79   :  { %9794 = vmatpush.msrb.mxu1 %v18048_v60  ;;  %9585 = vmatmul.f32.gmra.mxu2 %v17925_v4  ;;  %v18177_v60 = vpop.f32.mrf.mxu2 }
 0xa7a   :  { %20622 = vst [vmem:[#allocation34_spill] sm:$0xff] %v18177_v60 }
 0xa7b   :  { %9616 = vmatmul.f32.gmra.mxu3 %v17939_v43  ;;  %9796 = vmatpush.msrb.mxu1 %v18046_v12 }
 0xa7c   :  { %v18179_v42 = vpop.f32.mrf.mxu3 }
 0xa7d   :  { %20623 = vst [vmem:[#allocation71_spill] sm:$0xff] %v18179_v42  ;;  %v18182_v22 = vpop.f32.mrf.mxu0  ;;  %v18184_v12 = vpop.f32.mrf.mxu1 }
 0xa7e   :  { %9643 = vmatmul.f32.vlgmr.msra.gmra.mxu0 %v17894_v21  ;;  %20624 = vst [vmem:[#allocation115_spill] sm:$0xff] %v18182_v22 }
 0xa7f   :  { %20625 = vst [vmem:[#allocation72_spill] sm:$0xff] %v18184_v12 }
 0xa80   :  { %9554 = vmatmul.f32.gmra.mxu1 %v17915_v0 }
 0xa81   :  { %9701 = vmatmul.f32.vlgmr.msra.gmra.mxu2 %v17941_v16  ;;  %v18189_v32 = vpop.f32.mrf.mxu2 }
 0xa82   :  { %20626 = vst [vmem:[#allocation74_spill] sm:$0xff] %v18189_v32 }
 0xa83   :  { %9740 = vmatmul.f32.vlgmr.msra.gmra.mxu3 %v17894_v21 }
 0xa84   :  { %v18191_v16 = vpop.f32.mrf.mxu3 }
 0xa85   :  { %20627 = vst [vmem:[#allocation112_spill] sm:$0xff] %v18191_v16  ;;  %v18195_v15 = vpop.f32.mrf.mxu0  ;;  %v18198_v54 = vpop.f32.mrf.mxu1 }
 0xa86   :  { %9647 = vmatmul.f32.gmra.mxu0 %v17915_v0  ;;  %20628 = vst [vmem:[#allocation110_spill] sm:$0xff] %v18195_v15 }
 0xa87   :  { %20629 = vst [vmem:[#allocation116_spill] sm:$0xff] %v18198_v54 }
 0xa88   :  { %9670 = vmatmul.f32.vlgmr.msra.gmra.mxu1 %v17894_v21 }
 0xa89   :  { %9709 = vmatmul.f32.gmra.mxu2 %v17980_v19  ;;  %v18201_v49 = vpop.f32.mrf.mxu2 }
 0xa8a   :  { %20630 = vst [vmem:[#allocation70_spill] sm:$0xff] %v18201_v49 }
 0xa8b   :  { %9744 = vmatmul.f32.gmra.mxu3 %v17915_v0 }
 0xa8c   :  { %v18204_v19 = vpop.f32.mrf.mxu3 }
 0xa8d   :  { %20631 = vst [vmem:[#allocation75_spill] sm:$0xff] %v18204_v19  ;;  %v18207_v16 = vpop.f32.mrf.mxu0 }
 0xa8e   :  { %9770 = vmatmul.f32.vlgmr.msrb.gmra.mxu0 %v17903_v18  ;;  %20632 = vst [vmem:[#allocation117_spill] sm:$0xff] %v18207_v16  ;;  %v18210_v18 = vpop.f32.mrf.mxu1 }
 0xa8f   :  { %20633 = vst [vmem:[#allocation76_spill] sm:$0xff] %v18210_v18 }
 0xa90   :  { %9674 = vmatmul.f32.gmra.mxu1 %v17915_v0 }
 0xa91   :  { %9833 = vmatmul.f32.vlgmr.msrb.gmra.mxu2 %v17894_v21  ;;  %v18213_v15 = vpop.f32.mrf.mxu2 }
 0xa92   :  { %20634 = vst [vmem:[#allocation114_spill] sm:$0xff] %v18213_v15 }
 0xa93   :  { %9860 = vmatmul.f32.vlgmr.msrb.gmra.mxu3 %v17894_v21 }
 0xa94   :  { %v18215_v54 = vpop.f32.mrf.mxu3 }
 0xa95   :  { %20635 = vst [vmem:[#allocation119_spill] sm:$0xff] %v18215_v54  ;;  %v18218_v21 = vpop.f32.mrf.mxu0 }
 0xa96   :  { %9775 = vmatmul.f32.gmra.mxu0 %v17925_v4  ;;  %20636 = vst [vmem:[#allocation73_spill] sm:$0xff] %v18218_v21  ;;  %v18220_v4 = vpop.f32.mrf.mxu1 }
 0xa97   :  { %20637 = vst [vmem:[#allocation78_spill] sm:$0xff] %v18220_v4 }
 0xa98   :  { %9800 = vmatmul.f32.vlgmr.msrb.gmra.mxu1 %v17913_v13 }
 0xa99   :  { %9837 = vmatmul.f32.gmra.mxu2 %v17915_v0  ;;  %v18222_v19 = vpop.f32.mrf.mxu2 }
 0xa9a   :  { %20638 = vst [vmem:[#allocation120_spill] sm:$0xff] %v18222_v19 }
 0xa9b   :  { %9864 = vmatmul.f32.gmra.mxu3 %v17915_v0  ;;  %v9954_v0 = vsel %vm7431_vm6, %v17999_v23, 0 }
 0xa9c   :  { %v18224_v13 = vpop.f32.mrf.mxu3 }
 0xa9d   :  { %20639 = vst [vmem:[#allocation79_spill] sm:$0xff] %v18224_v13  ;;  %v18226_v16 = vpop.f32.mrf.mxu0 }
 0xa9e   :  { %20640 = vst [vmem:[#allocation118_spill] sm:$0xff] %v18226_v16  ;;  %v18228_v49 = vpop.f32.mrf.mxu1 }
 0xa9f   :  { %20641 = vst [vmem:[#allocation77_spill] sm:$0xff] %v18228_v49 }
 0xaa0   :  { %9806 = vmatmul.f32.gmra.mxu1 %v17939_v43  ;;  %v18236_v43 = vand.u32 4294901760, %v9954_v0 }
 0xaa1   :  { %v18232_v15 = vpop.f32.mrf.mxu2 }
 0xaa2   :  { %20642 = vst [vmem:[#allocation47_spill] sm:$0xff] %v18232_v15  ;;  %v18239_v4 = vsub.f32 %v9954_v0, %v18236_v43 }
 0xaa4   :  { %v18234_v54 = vpop.f32.mrf.mxu3  ;;  %v18248_v23 = vand.u32 4294901760, %v18239_v4 }
 0xaa5   :  { %20643 = vst [vmem:[#allocation7_spill] sm:$0xff] %v18234_v54  ;;  %v18241_v19 = vpop.f32.mrf.mxu0 }
 0xaa6   :  { %20644 = vst [vmem:[#allocation10_spill] sm:$0xff] %v18241_v19  ;;  %v18243_v13 = vpop.f32.mrf.mxu1 }
 0xaa7   :  { %20645 = vst [vmem:[#allocation5_spill] sm:$0xff] %v18243_v13  ;;  %v9987_v13 = vsub.f32 %v18239_v4, %v18248_v23 }
 0xaa9   :  { %v18250_v15 = vpop.f32.mrf.mxu2 }
 0xaaa   :  { %20646 = vst [vmem:[#allocation39_spill] sm:$0xff] %v18250_v15 }
 0xaac   :  { %v18252_v32 = vpop.f32.mrf.mxu3 }
 0xaad   :  { %20647 = vst [vmem:[#allocation122_spill] sm:$0xff] %v18252_v32  ;;  %v18256_v12 = vpop.f32.mrf.mxu0 }
 0xaae   :  { %20648 = vst [vmem:[#allocation91_spill] sm:$0xff] %v18256_v12  ;;  %v18259_v15 = vpop.f32.mrf.mxu1 }
 0xaaf   :  { %20649 = vst [vmem:[#allocation11_spill] sm:$0xff] %v18259_v15 }
 0xab1   :  { %v18261_v32 = vpop.f32.mrf.mxu2 }
 0xab2   :  { %20650 = vst [vmem:[#allocation121_spill] sm:$0xff] %v18261_v32 }
 0xab4   :  { %v9933_v21 = vpop.permute.xlu1 %9932  ;;  %v18265_v47 = vpop.f32.mrf.mxu3 }
 0xab5   :  { %20651 = vst [vmem:[#allocation49_spill] sm:$0xff] %v18265_v47  ;;  %v18281_v12 = vpop.f32.mrf.mxu0 }
 0xab6   :  { %20652 = vst [vmem:[#allocation40_spill] sm:$0xff] %v18281_v12  ;;  %v18287_v7 = vpop.f32.mrf.mxu1 }
 0xab7   :  { %20653 = vst [vmem:[#allocation9_spill] sm:$0xff] %v18287_v7 }
 0xab9   :  { %v9935_v16 = vpop.permute.xlu0 %9934 }
 0xaba   :  { %v9946_v49 = vsel %vm2520_vm13, %v9933_v21, %v9935_v16 }
 0xabb   :  { %v9958_v18 = vsel %vm7179_vm14, %v9946_v49, 0  ;;  %v9927_v49 = vpop.permute.xlu2 %9926 }
 0xabc   :  { %v9980_v54 = vand.u32 4294901760, %v9958_v18  ;;  %v9923_v42 = vpop.permute.xlu1 %9922 }
 0xabd   :  { %v18313_v5 = vpop.f32.mrf.mxu0 }
 0xabe   :  { %v10016_v0 = vsub.f32 %v9958_v18, %v9980_v54  ;;  %9981 = vmatpush.msra.mxu0 %v9980_v54  ;;  %10082 = vmatpush.msra.mxu3 %v9980_v54  ;;  %v18263_v18 = vand.u32 4294901760, %v9987_v13 }
 0xac0   :  { %v10017_v19 = vand.u32 4294901760, %v10016_v0  ;;  %10052 = vmatpush.msra.mxu2 %v10016_v0 }
 0xac1   :  { %v9925_v21 = vpop.permute.xlu0 %9924 }
 0xac2   :  { %v9942_v60 = vsel %vm2520_vm13, %v9923_v42, %v9925_v21  ;;  %v10018_v22 = vsub.f32 %v10016_v0, %v10017_v19  ;;  %v9943_v30 = vsel %vm2520_vm13, %v9925_v21, %v9927_v49 }
 0xac3   :  { %v9982_v44 = vand.u32 4294901760, %v9942_v60  ;;  %v18271_v13 = vand.u32 4294901760, %v9943_v30  ;;  %v9941_v47 = vpop.permute.xlu2 %9940 }
 0xac4   :  { %v10019_v9 = vand.u32 4294901760, %v10018_v22 }
 0xac5   :  { %v10022_v50 = vsub.f32 %v9942_v60, %v9982_v44  ;;  %9983 = vmatpush.msra.mxu0 %v9982_v44  ;;  %10084 = vmatpush.msra.mxu3 %v9982_v44  ;;  %v9911_v42 = vpop.permute.xlu1 %9910  ;;  %v10212_v17 = vsub.f32 %v9943_v30, %v18271_v13  ;;  %v18317_v27 = vpop.f32.mrf.mxu1 }
 0xac6   :  { %9989 = vmatmul.f32.vlgmr.msra.gmra.mxu0 %v18263_v18  ;;  %10020 = vmatpush.msra.mxu1 %v10019_v9  ;;  %v9956_v0 = vsel %vm7431_vm6, %v9911_v42, 0 }
 0xac7   :  { %10088 = vmatmul.f32.vlgmr.msra.gmra.mxu3 %v18248_v23  ;;  %10115 = vmatpush.msrb.mxu0 %v10017_v19  ;;  %v10023_v32 = vand.u32 4294901760, %v10022_v50  ;;  %v18273_v22 = vand.u32 4294901760, %v9956_v0 }
 0xac8   :  { %10055 = vmatpush.msra.mxu2 %v10022_v50 }
 0xac9   :  { %10058 = vmatmul.f32.vlgmr.msra.gmra.mxu2 %v18239_v4  ;;  %10119 = vmatpush.msrb.mxu0 %v10023_v32  ;;  %v9937_v60 = vpop.permute.xlu0 %9936  ;;  %v10024_v21 = vsub.f32 %v10022_v50, %v10023_v32  ;;  %v18277_v9 = vsub.f32 %v9956_v0, %v18273_v22  ;;  %v18289_v50 = vpop.f32.mrf.mxu2 }
 0xaca   :  { %v9947_v15 = vsel %vm2520_vm13, %v9935_v16, %v9937_v60  ;;  %20654 = vst [vmem:[#allocation81_spill] sm:$0xff] %v18289_v50 }
 0xacb   :  { %v9960_v19 = vsel %vm7179_vm14, %v9947_v15, 0  ;;  %v10025_v42 = vand.u32 4294901760, %v10024_v21  ;;  %v18285_v51 = vand.u32 4294901760, %v18277_v9  ;;  %v18292_v15 = vpop.f32.mrf.mxu3  ;;  %v18311_v12 = vpop.permute.xlu2 %10736 }
 0xacc   :  { %v10170_v38 = vand.u32 4294901760, %v9960_v19  ;;  %20655 = vst [vmem:[#allocation6_spill] sm:$0xff] %v18292_v15 }
 0xacd   :  { %10026 = vmatpush.msra.mxu1 %v10025_v42  ;;  %v9995_v30 = vsub.f32 %v18277_v9, %v18285_v51 }
 0xace   :  { %v10206_v32 = vsub.f32 %v9960_v19, %v10170_v38  ;;  %10028 = vmatmul.f32.vlgmr.msra.gmra.mxu1 %v18236_v43  ;;  %10171 = vmatpush.msrb.mxu2 %v10170_v38  ;;  %v9939_v16 = vpop.permute.xlu1 %9938  ;;  %v10213_v19 = vand.u32 4294901760, %v10212_v17 }
 0xacf   :  { %10144 = vmatpush.msrb.mxu1 %v9980_v54  ;;  %v9948_v0 = vsel %vm2520_vm13, %v9937_v60, %v9939_v16  ;;  %10094 = vmatmul.f32.gmra.mxu3 %v18285_v51 }
 0xad0   :  { %10242 = vmatpush.msra.mxu0 %v10206_v32  ;;  %v9962_v21 = vsel %vm7179_vm14, %v9948_v0, 0  ;;  %10173 = vmatpush.msrb.mxu2 %v18271_v13  ;;  %v10207_v60 = vand.u32 4294901760, %v10206_v32  ;;  %v18309_v0 = vand.u32 4294901760, %v9995_v30 }
 0xad1   :  { %10063 = vmatmul.f32.gmra.mxu2 %v18277_v9  ;;  %10146 = vmatpush.msrb.mxu1 %v9982_v44  ;;  %v18301_v42 = vand.u32 4294901760, %v9962_v21  ;;  %v9929_v15 = vpop.permute.xlu0 %9928  ;;  %v9949_v44 = vsel %vm2520_vm13, %v9939_v16, %v9941_v47  ;;  %v18324_v30 = vpop.f32.mrf.mxu2 }
 0xad2   :  { %v9944_v54 = vsel %vm2520_vm13, %v9927_v49, %v9929_v15  ;;  %10245 = vmatpush.msra.mxu0 %v10212_v17  ;;  %10305 = vmatpush.msra.mxu2 %v10207_v60  ;;  %v10208_v11 = vsub.f32 %v10206_v32, %v10207_v60  ;;  %v10214_v49 = vsub.f32 %v10212_v17, %v10213_v19  ;;  %v9964_v32 = vsel %vm7179_vm14, %v9949_v44, 0 }
 0xad3   :  { %10272 = vmatpush.msra.mxu1 %v10170_v38  ;;  %v18305_v50 = vsub.f32 %v9962_v21, %v18301_v42  ;;  %v18307_v7 = vand.u32 4294901760, %v9944_v54  ;;  %9997 = vmatmul.f32.gmra.mxu0 %v18309_v0  ;;  %20656 = vst [vmem:[#allocation13_spill] sm:$0xff] %v18324_v30  ;;  %v18327_v16 = vpop.f32.mrf.mxu3  ;;  %v18415_v30 = vld [vmem:[#allocation3 + $0x8] sm:$0xff] }
 0xad4   :  { %10309 = vmatpush.msra.mxu2 %v10213_v19  ;;  %v10209_v47 = vand.u32 4294901760, %v10208_v11  ;;  %20657 = vst [vmem:[#allocation92_spill] sm:$0xff] %v18327_v16  ;;  %v10215_v60 = vand.u32 4294901760, %v10214_v49  ;;  %v18338_v11 = vand.u32 4294901760, %v9964_v32 }
 0xad5   :  { %10274 = vmatpush.msra.mxu1 %v18271_v13  ;;  %v20201_v21 = vand.u32 4294901760, %v18305_v50  ;;  %v18321_v58 = vsub.f32 %v9944_v54, %v18307_v7 }
 0xad6   :  { %10032 = vmatmul.f32.gmra.mxu1 %v18273_v22  ;;  %v9931_v17 = vpop.permute.xlu1 %9930  ;;  %10210 = vmatpush.msrb.mxu3 %v10209_v47  ;;  %v18349_v47 = vpop.permute.xlu2 %11542 }
 0xad7   :  { %v10398_v54 = vsub.f32 %v18305_v50, %v20201_v21  ;;  %v20200_v56 = vand.u32 4294901760, %v18321_v58  ;;  %v9945_v52 = vsel %vm2520_vm13, %v9929_v15, %v9931_v17  ;;  %v18351_v17 = vpop.f32.mrf.mxu0 }
 0xad8   :  { %10216 = vmatpush.msrb.mxu3 %v10215_v60  ;;  %v18342_v44 = vand.u32 4294901760, %v9945_v52  ;;  %20658 = vst [vmem:[#allocation48_spill] sm:$0xff] %v18351_v17  ;;  %v18354_v60 = vsub.f32 %v9964_v32, %v18338_v11 }
 0xad9   :  { %10179 = vmatmul.f32.vlgmr.msrb.gmra.mxu2 %v18263_v18  ;;  %v18336_v19 = vpop.permute.xlu0 %10734  ;;  %10218 = vmatmul.f32.vlgmr.msrb.gmra.mxu3 %v18236_v43  ;;  %v10399_v49 = vand.u32 4294901760, %v10398_v54  ;;  %v10404_v15 = vsub.f32 %v18321_v58, %v20200_v56  ;;  %v18362_v54 = vld [vmem:[#allocation3 + $0x20] sm:$0x3f]  ;;  %v18364_v21 = vpop.f32.mrf.mxu2 }
 0xada   :  { %10432 = vmatpush.msrb.mxu2 %v18305_v50  ;;  %10334 = vmatpush.msra.mxu3 %v10170_v38  ;;  %v18358_v38 = vpop.f32.mrf.mxu1  ;;  %20660 = vst [vmem:[#allocation44_spill] sm:$0xff] %v18364_v21  ;;  %v18367_v62 = vsub.f32 %v9945_v52, %v18342_v44  ;;  %v18376_v21 = vld [vmem:[#allocation3 + $0x58] sm:$0xff]  ;;  %v18378_v52 = vld [vmem:[#allocation3 + $0x10] sm:$0x3f] }
 0xadb   :  { %10121 = vmatmul.f32.vlgmr.msrb.gmra.mxu0 %v18236_v43  ;;  %20659 = vst [vmem:[#allocation125_spill] sm:$0xff] %v18358_v38  ;;  %v10405_v32 = vand.u32 4294901760, %v10404_v15  ;;  %v18371_v63 = vpop.f32.mrf.mxu3 }
 0xadc   :  { %10435 = vmatpush.msrb.mxu2 %v18321_v58  ;;  %10336 = vmatpush.msra.mxu3 %v18271_v13  ;;  %20661 = vst [vmem:[#allocation46_spill] sm:$0xff] %v18371_v63  ;;  %v10593_v38 = vand.u32 4294901760, %v18367_v62 }
 0xadd   :  { %10361 = vmatpush.msrb.mxu0 %v18301_v42 }
 0xade   :  { %10462 = vmatpush.msrb.mxu3 %v18301_v42  ;;  %10148 = vmatmul.f32.vlgmr.msrb.gmra.mxu1 %v18236_v43  ;;  %v11539_v56 = vpop.permute.xlu1 %11538  ;;  %v10594_v8 = vsub.f32 %v18367_v62, %v10593_v38 }
 0xadf   :  { %10363 = vmatpush.msrb.mxu0 %v18307_v7  ;;  %10400 = vmatpush.msrb.mxu1 %v10399_v49  ;;  %v11559_v13 = vmul.f32 %v11539_v56, %v18362_v54  ;;  %v18399_v14 = vpop.f32.mrf.mxu0  ;;  %v11554_v39 = vmul.f32 %v11539_v56, %v18394_v28 }
 0xae0   :  { %10464 = vmatpush.msrb.mxu3 %v18307_v7  ;;  %20663 = vst [vmem:[#allocation86_spill] sm:$0xff] %v18399_v14 }
 0xae1   :  { %10187 = vmatmul.f32.gmra.mxu2 %v18309_v0  ;;  %v11541_v16 = vpop.permute.xlu0 %11540  ;;  %10406 = vmatpush.msrb.mxu1 %v10405_v32  ;;  %v20662_v32 = vand.u32 4294901760, %v18354_v60  ;;  %v18413_v37 = vpop.f32.mrf.mxu2 }
 0xae2   :  { %v11546_v17 = vsel %vm2520_vm13, %v11539_v56, %v11541_v16  ;;  %v11547_v49 = vsel %vm2520_vm13, %v11541_v16, %v18349_v47  ;;  %11588 = vrot.lane.b32.xlu1 %v11559_v13, %s15153_s17  ;;  %10222 = vmatmul.f32.gmra.mxu3 %v18273_v22  ;;  %v18397_v13 = vpop.permute.xlu2 %11564  ;;  %20665 = vst [vmem:[#allocation41_spill] sm:$0xff] %v18413_v37  ;;  %v20666_v37 = vand.u32 4294901760, %v18305_v50 }
 0xae3   :  { %v11556_v15 = vmul.f32 %v11547_v49, %v18376_v21  ;;  %v11560_v63 = vmul.f32 %v11546_v17, %v18378_v52  ;;  %10125 = vmatmul.f32.gmra.mxu0 %v18273_v22  ;;  %v10588_v16 = vsub.f32 %v18354_v60, %v20662_v32  ;;  %v18410_v32 = vpop.f32.mrf.mxu3  ;;  %v11555_v14 = vmul.f32 %v11546_v17, %v18415_v30 }
 0xae4   :  { %20664 = vst [vmem:[#allocation16_spill] sm:$0xff] %v18410_v32  ;;  %v10595_v32 = vand.u32 4294901760, %v10594_v8 }
 0xae5   :  { %11590 = vrot.lane.b32.xlu0 %v11560_v63, %s15153_s17  ;;  %11582 = vrot.lane.b32.xlu2 %v11556_v15, %s15153_s17  ;;  %v18406_v63 = vld [vmem:[%s20180_s1 + $0x6] ss:$8 sm:$0xf]  ;;  %v18408_v15 = vpop.f32.mrf.mxu1  ;;  %v10589_v56 = vand.u32 4294901760, %v10588_v16  ;;  %v18435_v16 = vld [vmem:[#allocation3 + $0x50] sm:$0x3f] }
 0xae6   :  { %10152 = vmatmul.f32.gmra.mxu1 %v18273_v22  ;;  %v12392_v57 = vperm.slane %v18406_v63, 0 }
 0xae7   :  { %v18433_v17 = vpop.f32.mrf.mxu0 }
 0xae9   :  { %10311 = vmatmul.f32.vlgmr.msra.gmra.mxu2 %v18236_v43  ;;  %v18447_v50 = vpop.f32.mrf.mxu2 }
 0xaea   :  { %10551 = vmatpush.msra.mxu2 %v18338_v11  ;;  %11578 = vrot.lane.b32.xlu1 %v11554_v39, %s15153_s17  ;;  %v20667_v39 = vand.u32 4294901760, %v18321_v58  ;;  %v11545_v8 = vpop.permute.xlu2 %11544  ;;  %v11561_v58 = vmul.f32 %v11547_v49, %v18435_v16  ;;  %20670 = vst [vmem:[#allocation88_spill] sm:$0xff] %v18447_v50  ;;  %v20671_v49 = vand.u32 4294901760, %v18354_v60 }
 0xaeb   :  { %10338 = vmatmul.f32.vlgmr.msra.gmra.mxu3 %v18236_v43  ;;  %10248 = vmatmul.f32.vlgmr.msra.gmra.mxu0 %v18239_v4 }
 0xaec   :  { %10590 = vmatpush.msra.mxu3 %v10589_v56  ;;  %10553 = vmatpush.msra.mxu2 %v18342_v44 }
 0xaed   :  { %11580 = vrot.lane.b32.xlu0 %v11555_v14, %s15153_s17  ;;  %10495 = vmatpush.msra.mxu0 %v20666_v37  ;;  %v18441_v37 = vpop.f32.mrf.mxu1  ;;  %v18443_v14 = vpop.f32.mrf.mxu3 }
 0xaee   :  { %10596 = vmatpush.msra.mxu3 %v10595_v32  ;;  %12396 = vrot.lane.b32.xlu2 %v12392_v57, %s15152_s15  ;;  %v11558_v57 = vmul.f32 %v17994_v10, %v11545_v8  ;;  %20668 = vst [vmem:[#allocation36_spill] sm:$0xff] %v18441_v37 }
 0xaef   :  { %10278 = vmatmul.f32.vlgmr.msra.gmra.mxu1 %v18248_v23  ;;  %10499 = vmatpush.msra.mxu0 %v20667_v39  ;;  %20669 = vst [vmem:[#allocation85_spill] sm:$0xff] %v18443_v14  ;;  %v18469_v39 = vpop.f32.mrf.mxu0 }
 0xaf0   :  { %10524 = vmatpush.msra.mxu1 %v18301_v42  ;;  %v11548_v42 = vsel %vm2520_vm13, %v18349_v47, %v11545_v8  ;;  %v20672_v47 = vmax.f32 %v17460_v31, 0.0  ;;  %20673 = vst [vmem:[#allocation38_spill] sm:$0xff] %v18469_v39 }
 0xaf1   :  { %10315 = vmatmul.f32.gmra.mxu2 %v18273_v22 }
 0xaf2   :  { %10526 = vmatpush.msra.mxu1 %v18307_v7  ;;  %11566 = vrot.lane.b32.xlu1 %v18054_v45, %s15163_s30  ;;  %v18453_v45 = vld [vmem:[#allocation3 + $0x28] sm:$0x3f]  ;;  %v18459_v7 = vld [vmem:[#allocation3 + $0x38] sm:$0xff]  ;;  %v10743_v32 = vsel %vm7179_vm14, %v20672_v47, 0 }
 0xaf3   :  { %10342 = vmatmul.f32.gmra.mxu3 %v18273_v22  ;;  %10253 = vmatmul.f32.gmra.mxu0 %v18277_v9  ;;  %v11562_v10 = vmul.f32 %v11548_v42, %v18453_v45  ;;  %v11557_v56 = vmul.f32 %v11548_v42, %v18459_v7  ;;  %v18478_v31 = vand.u32 4294901760, %v10743_v32  ;;  %v12393_v42 = vperm.slane %v18406_v63, 1 }
 0xaf5   :  { %11592 = vrot.lane.b32.xlu0 %v11561_v58, %s15153_s17  ;;  %v18474_v58 = vpop.f32.mrf.mxu3 }
 0xaf6   :  { %11586 = vrot.lane.b32.xlu2 %v11558_v57, %s15153_s17  ;;  %v18472_v57 = vpop.f32.mrf.mxu1  ;;  %20675 = vst [vmem:[#allocation84_spill] sm:$0xff] %v18474_v58 }
 0xaf7   :  { %10284 = vmatmul.f32.gmra.mxu1 %v18285_v51  ;;  %20674 = vst [vmem:[#allocation80_spill] sm:$0xff] %v18472_v57 }
 0xaf9   :  { %10438 = vmatmul.f32.vlgmr.msrb.gmra.mxu2 %v18239_v4 }
 0xafa   :  { %10685 = vmatpush.msrb.mxu2 %v20671_v49  ;;  %11594 = vrot.lane.b32.xlu1 %v11562_v10, %s15153_s17  ;;  %v18480_v10 = vpop.f32.mrf.mxu2  ;;  %v18491_v49 = vand.u32 4294901760, %v18015_v34 }
 0xafb   :  { %10468 = vmatmul.f32.vlgmr.msrb.gmra.mxu3 %v18248_v23  ;;  %10369 = vmatmul.f32.vlgmr.msrb.gmra.mxu0 %v18263_v18  ;;  %20676 = vst [vmem:[#allocation51_spill] sm:$0xff] %v18480_v10 }
 0xafc   :  { %10714 = vmatpush.msrb.mxu3 %v18338_v11  ;;  %10689 = vmatpush.msrb.mxu2 %v10593_v38  ;;  %v18486_v38 = vld [vmem:[#allocation3 + $0x18] sm:$0x3f] }
 0xafd   :  { %11584 = vrot.lane.b32.xlu0 %v11557_v56, %s15153_s17  ;;  %10622 = vmatpush.msrb.mxu0 %v18354_v60  ;;  %v18497_v60 = vsub.f32 %v10743_v32, %v18478_v31  ;;  %v11563_v47 = vmul.f32 %v11545_v8, %v18486_v38  ;;  %v20678_v32 = vmax.f32 %v17462_v40, 0.0  ;;  %v18516_v58 = vpop.f32.mrf.mxu3 }
 0xafe   :  { %10716 = vmatpush.msrb.mxu3 %v18342_v44  ;;  %20680 = vst [vmem:[#allocation52_spill] sm:$0xff] %v18516_v58  ;;  %v18533_v58 = vand.u32 4294901760, %v17970_v1 }
 0xaff   :  { %10408 = vmatmul.f32.vlgmr.msrb.gmra.mxu1 %v18236_v43  ;;  %10625 = vmatpush.msrb.mxu0 %v18367_v62  ;;  %v18503_v62 = vsub.f32 %v18015_v34, %v18491_v49  ;;  %v10805_v56 = vand.u32 4294901760, %v18497_v60  ;;  %v10746_v8 = vsel %vm7179_vm14, %v20678_v32, 0 }
 0xb00   :  { %10652 = vmatpush.msrb.mxu1 %v18338_v11  ;;  %v18507_v11 = vpop.f32.mrf.mxu0 }
 0xb01   :  { %10443 = vmatmul.f32.gmra.mxu2 %v18277_v9  ;;  %20677 = vst [vmem:[#allocation83_spill] sm:$0xff] %v18507_v11  ;;  %v10806_v40 = vsub.f32 %v18497_v60, %v10805_v56  ;;  %v18526_v11 = vand.u32 4294901760, %v10746_v8 }
 0xb02   :  { %10654 = vmatpush.msrb.mxu1 %v18342_v44  ;;  %12398 = vrot.lane.b32.xlu1 %v12393_v42, %s15152_s15  ;;  %v12394_v44 = vperm.slane %v18406_v63, 2  ;;  %v18514_v42 = vpop.f32.mrf.mxu1  ;;  %v18519_v34 = vpop.f32.mrf.mxu2 }
 0xb03   :  { %10474 = vmatmul.f32.gmra.mxu3 %v18285_v51  ;;  %10377 = vmatmul.f32.gmra.mxu0 %v18309_v0  ;;  %20679 = vst [vmem:[#allocation93_spill] sm:$0xff] %v18514_v42 }
 0xb04   :  { %20681 = vst [vmem:[#allocation50_spill] sm:$0xff] %v18519_v34  ;;  %v18547_v34 = vsub.f32 %v17970_v1, %v18533_v58 }
 0xb05   :  { %11596 = vrot.lane.b32.xlu0 %v11563_v47, %s15153_s17  ;;  %v10811_v47 = vand.u32 4294901760, %v18503_v62  ;;  %v18551_v10 = vpop.f32.mrf.mxu3 }
 0xb06   :  { %20684 = vst [vmem:[#allocation53_spill] sm:$0xff] %v18551_v10 }
 0xb07   :  { %10412 = vmatmul.f32.gmra.mxu1 %v18273_v22  ;;  %v10812_v32 = vsub.f32 %v18503_v62, %v10811_v47 }
 0xb09   :  { %10559 = vmatmul.f32.vlgmr.msra.gmra.mxu2 %v18263_v18  ;;  %v10807_v18 = vand.u32 4294901760, %v10806_v40  ;;  %v18559_v40 = vld [vmem:[%s20187_s8] sm:$0xff] }
 0xb0a   :  { %10840 = vmatpush.msra.mxu2 %v18497_v60  ;;  %12400 = vrot.lane.b32.xlu1 %v12394_v44, %s15152_s15  ;;  %v18539_v60 = vsub.f32 %v10746_v8, %v18526_v11  ;;  %v18542_v44 = vpop.f32.mrf.mxu0  ;;  %v18549_v42 = vpop.f32.mrf.mxu1 }
 0xb0b   :  { %10598 = vmatmul.f32.vlgmr.msra.gmra.mxu3 %v18236_v43  ;;  %10501 = vmatmul.f32.vlgmr.msra.gmra.mxu0 %v18236_v43  ;;  %20682 = vst [vmem:[#allocation124_spill] sm:$0xff] %v18542_v44  ;;  %v18554_v8 = vpop.f32.mrf.mxu2 }
 0xb0c   :  { %10870 = vmatpush.msra.mxu3 %v18478_v31  ;;  %10843 = vmatpush.msra.mxu2 %v18503_v62  ;;  %v10813_v62 = vand.u32 4294901760, %v10812_v32  ;;  %20683 = vst [vmem:[#allocation37_spill] sm:$0xff] %v18549_v42  ;;  %v10995_v1 = vand.u32 4294901760, %v18539_v60  ;;  %v11001_v32 = vand.u32 4294901760, %v18547_v34 }
 0xb0d   :  { %10769 = vmatpush.msra.mxu0 %v18478_v31  ;;  %20685 = vst [vmem:[#allocation17_spill] sm:$0xff] %v18554_v8 }
 0xb0e   :  { %10872 = vmatpush.msra.mxu3 %v18491_v49  ;;  %v11002_v10 = vsub.f32 %v18547_v34, %v11001_v32 }
 0xb0f   :  { %10528 = vmatmul.f32.vlgmr.msra.gmra.mxu1 %v18236_v43  ;;  %10771 = vmatpush.msra.mxu0 %v18491_v49 }
 0xb10   :  { %10808 = vmatpush.msra.mxu1 %v10807_v18  ;;  %v12395_v18 = vperm.slane %v18406_v63, 3  ;;  %v18582_v63 = vpop.f32.mrf.mxu3  ;;  %v11003_v50 = vand.u32 4294901760, %v11002_v10 }
 0xb11   :  { %10567 = vmatmul.f32.gmra.mxu2 %v18309_v0  ;;  %v10996_v0 = vsub.f32 %v18539_v60, %v10995_v1  ;;  %20688 = vst [vmem:[#allocation123_spill] sm:$0xff] %v18582_v63 }
 0xb12   :  { %10814 = vmatpush.msra.mxu1 %v10813_v62  ;;  %12422 = vrot.lane.b32.xlu1 %v18559_v40, %s15164_s7  ;;  %v10738_v62 = vsel %vm7431_vm6, %v18336_v19, 0  ;;  %v18574_v8 = vpop.f32.mrf.mxu0  ;;  %v18580_v14 = vpop.f32.mrf.mxu1 }
 0xb13   :  { %10602 = vmatmul.f32.gmra.mxu3 %v18273_v22  ;;  %10505 = vmatmul.f32.gmra.mxu0 %v18273_v22  ;;  %20686 = vst [vmem:[#allocation43_spill] sm:$0xff] %v18574_v8  ;;  %v10997_v42 = vand.u32 4294901760, %v10996_v0  ;;  %v18578_v44 = vand.u32 4294901760, %v10738_v62  ;;  %v18585_v19 = vpop.f32.mrf.mxu2 }
 0xb14   :  { %20687 = vst [vmem:[#allocation12_spill] sm:$0xff] %v18580_v14 }
 0xb15   :  { %20689 = vst [vmem:[#allocation42_spill] sm:$0xff] %v18585_v19  ;;  %v18590_v0 = vsub.f32 %v10738_v62, %v18578_v44 }
 0xb17   :  { %10532 = vmatmul.f32.gmra.mxu1 %v18273_v22 }
 0xb18   :  { %v18608_v10 = vpop.f32.mrf.mxu3 }
 0xb19   :  { %10691 = vmatmul.f32.vlgmr.msrb.gmra.mxu2 %v18236_v43  ;;  %20692 = vst [vmem:[#allocation15_spill] sm:$0xff] %v18608_v10 }
 0xb1a   :  { %10959 = vmatpush.msrb.mxu2 %v18526_v11  ;;  %12402 = vrot.lane.b32.xlu1 %v12395_v18, %s15152_s15  ;;  %v10740_v18 = vsel %vm7431_vm6, %v18311_v12, 0 }
 0xb1b   :  { %10718 = vmatmul.f32.vlgmr.msrb.gmra.mxu3 %v18236_v43  ;;  %10628 = vmatmul.f32.vlgmr.msrb.gmra.mxu0 %v18239_v4  ;;  %v18598_v43 = vand.u32 4294901760, %v10740_v18  ;;  %v18602_v4 = vand.u32 4294901760, %v18590_v0  ;;  %v18611_v12 = vpop.f32.mrf.mxu2 }
 0xb1c   :  { %10998 = vmatpush.msrb.mxu3 %v10997_v42  ;;  %10961 = vmatpush.msrb.mxu2 %v18533_v58  ;;  %20693 = vst [vmem:[#allocation87_spill] sm:$0xff] %v18611_v12 }
 0xb1d   :  { %10903 = vmatpush.msrb.mxu0 %v10805_v56 }
 0xb1e   :  { %11004 = vmatpush.msrb.mxu3 %v11003_v50  ;;  %v18604_v50 = vpop.f32.mrf.mxu0 }
 0xb1f   :  { %10658 = vmatmul.f32.vlgmr.msrb.gmra.mxu1 %v18248_v23  ;;  %10907 = vmatpush.msrb.mxu0 %v10811_v47  ;;  %20690 = vst [vmem:[#allocation95_spill] sm:$0xff] %v18604_v50  ;;  %v18606_v23 = vpop.f32.mrf.mxu1 }
 0xb20   :  { %10932 = vmatpush.msrb.mxu1 %v18478_v31  ;;  %20691 = vst [vmem:[#allocation90_spill] sm:$0xff] %v18606_v23  ;;  %v18614_v31 = vsub.f32 %v10740_v18, %v18598_v43  ;;  %v18649_v18 = vand.u32 4294901760, %v18089_v20 }
 0xb21   :  { %10695 = vmatmul.f32.gmra.mxu2 %v18273_v22 }
 0xb22   :  { %10934 = vmatpush.msrb.mxu1 %v18491_v49  ;;  %v20694_v49 = vmax.f32 %v17464_v48, 0.0  ;;  %v18627_v42 = vand.u32 4294901760, %v18614_v31 }
 0xb23   :  { %10722 = vmatmul.f32.gmra.mxu3 %v18273_v22  ;;  %10633 = vmatmul.f32.gmra.mxu0 %v18277_v9  ;;  %v10775_v22 = vsub.f32 %v18590_v0, %v18602_v4 }
 0xb24   :  { %v10749_v56 = vsel %vm7179_vm14, %v20694_v49, 0  ;;  %v10783_v62 = vsub.f32 %v18614_v31, %v18627_v42  ;;  %v18661_v49 = vsub.f32 %v18089_v20, %v18649_v18 }
 0xb25   :  { %v18624_v9 = vand.u32 4294901760, %v10775_v22 }
 0xb26   :  { %v18633_v47 = vpop.f32.mrf.mxu0  ;;  %v18657_v22 = vand.u32 4294901760, %v10783_v62 }
 0xb27   :  { %10664 = vmatmul.f32.gmra.mxu1 %v18285_v51  ;;  %v18631_v51 = vand.u32 4294901760, %v10749_v56  ;;  %20695 = vst [vmem:[#allocation126_spill] sm:$0xff] %v18633_v47  ;;  %v18637_v48 = vpop.f32.mrf.mxu1 }
 0xb28   :  { %20696 = vst [vmem:[#allocation96_spill] sm:$0xff] %v18637_v48 }
 0xb29   :  { %10846 = vmatmul.f32.vlgmr.msra.gmra.mxu2 %v18590_v0 }
 0xb2a   :  { %11093 = vmatpush.msra.mxu2 %v10995_v1  ;;  %v18639_v1 = vpop.f32.mrf.mxu3 }
 0xb2b   :  { %10876 = vmatmul.f32.vlgmr.msra.gmra.mxu3 %v18602_v4  ;;  %10777 = vmatmul.f32.vlgmr.msra.gmra.mxu0 %v18624_v9  ;;  %20697 = vst [vmem:[#allocation14_spill] sm:$0xff] %v18639_v1 }
 0xb2c   :  { %11122 = vmatpush.msra.mxu3 %v18526_v11  ;;  %11097 = vmatpush.msra.mxu2 %v11001_v32  ;;  %v18644_v32 = vpop.f32.mrf.mxu2 }
 0xb2d   :  { %11030 = vmatpush.msra.mxu0 %v18539_v60  ;;  %20698 = vst [vmem:[#allocation127_spill] sm:$0xff] %v18644_v32  ;;  %v18654_v60 = vsub.f32 %v10749_v56, %v18631_v51  ;;  %v11191_v56 = vand.u32 4294901760, %v18661_v49 }
 0xb2e   :  { %11124 = vmatpush.msra.mxu3 %v18533_v58 }
 0xb2f   :  { %10816 = vmatmul.f32.vlgmr.msra.gmra.mxu1 %v18578_v44  ;;  %11033 = vmatpush.msra.mxu0 %v18547_v34  ;;  %v20699_v34 = vmax.f32 %v17466_v41, 0.0  ;;  %v18672_v62 = vpop.f32.mrf.mxu1 }
 0xb30   :  { %11060 = vmatpush.msra.mxu1 %v18526_v11  ;;  %v11185_v11 = vand.u32 4294901760, %v18654_v60  ;;  %20701 = vst [vmem:[#allocation89_spill] sm:$0xff] %v18672_v62 }
 0xb31   :  { %10851 = vmatmul.f32.gmra.mxu2 %v18614_v31  ;;  %v10752_v1 = vsel %vm7179_vm14, %v20699_v34, 0  ;;  %v11192_v34 = vsub.f32 %v18661_v49, %v11191_v56 }
 0xb32   :  { %11062 = vmatpush.msra.mxu1 %v18533_v58  ;;  %v18669_v58 = vpop.f32.mrf.mxu0  ;;  %v18674_v32 = vpop.f32.mrf.mxu3  ;;  %v11186_v41 = vsub.f32 %v18654_v60, %v11185_v11  ;;  %v18681_v48 = vand.u32 4294901760, %v10752_v1 }
 0xb33   :  { %10882 = vmatmul.f32.gmra.mxu3 %v18627_v42  ;;  %10785 = vmatmul.f32.gmra.mxu0 %v18657_v22  ;;  %20700 = vst [vmem:[#allocation82_spill] sm:$0xff] %v18669_v58 }
 0xb34   :  { %20702 = vst [vmem:[#allocation56_spill] sm:$0xff] %v18674_v32  ;;  %v18677_v20 = vpop.f32.mrf.mxu2  ;;  %v18688_v32 = vand.u32 4294901760, %v18111_v25 }
 0xb35   :  { %20703 = vst [vmem:[#allocation45_spill] sm:$0xff] %v18677_v20  ;;  %v18694_v20 = vsub.f32 %v10752_v1, %v18681_v48 }
 0xb36   :  { %v18702_v58 = vsub.f32 %v18111_v25, %v18688_v32 }
 0xb37   :  { %10820 = vmatmul.f32.gmra.mxu1 %v18598_v43  ;;  %v11375_v1 = vand.u32 4294901760, %v18694_v20 }
 0xb39   :  { %10967 = vmatmul.f32.vlgmr.msrb.gmra.mxu2 %v18624_v9  ;;  %v11376_v25 = vsub.f32 %v18694_v20, %v11375_v1 }
 0xb3a   :  { %11220 = vmatpush.msrb.mxu2 %v18654_v60  ;;  %v11187_v60 = vand.u32 4294901760, %v11186_v41  ;;  %v18705_v10 = vpop.f32.mrf.mxu0  ;;  %v18708_v41 = vpop.f32.mrf.mxu1 }
 0xb3b   :  { %11006 = vmatmul.f32.vlgmr.msrb.gmra.mxu3 %v18578_v44  ;;  %10909 = vmatmul.f32.vlgmr.msrb.gmra.mxu0 %v18578_v44  ;;  %20704 = vst [vmem:[#allocation19_spill] sm:$0xff] %v18705_v10  ;;  %v18710_v12 = vpop.f32.mrf.mxu3 }
 0xb3c   :  { %11250 = vmatpush.msrb.mxu3 %v18631_v51  ;;  %11223 = vmatpush.msrb.mxu2 %v18661_v49  ;;  %v11193_v49 = vand.u32 4294901760, %v11192_v34  ;;  %20705 = vst [vmem:[#allocation8_spill] sm:$0xff] %v18708_v41  ;;  %v11381_v34 = vand.u32 4294901760, %v18702_v58 }
 0xb3d   :  { %11149 = vmatpush.msrb.mxu0 %v18631_v51  ;;  %20706 = vst [vmem:[#allocation4_spill] sm:$0xff] %v18710_v12 }
 0xb3e   :  { %11252 = vmatpush.msrb.mxu3 %v18649_v18 }
 0xb3f   :  { %10936 = vmatmul.f32.vlgmr.msrb.gmra.mxu1 %v18578_v44  ;;  %11151 = vmatpush.msrb.mxu0 %v18649_v18  ;;  %v18698_v62 = vpop.permute.xlu2 %11582 }
 0xb40   :  { %11188 = vmatpush.msrb.mxu1 %v11187_v60  ;;  %v18713_v60 = vpop.f32.mrf.mxu2 }
 0xb41   :  { %10975 = vmatmul.f32.gmra.mxu2 %v18657_v22  ;;  %20707 = vst [vmem:[#allocation129_spill] sm:$0xff] %v18713_v60  ;;  %v11377_v60 = vand.u32 4294901760, %v11376_v25 }
 0xb42   :  { %11194 = vmatpush.msrb.mxu1 %v11193_v49  ;;  %v11382_v49 = vsub.f32 %v18702_v58, %v11381_v34 }
 0xb43   :  { %11010 = vmatmul.f32.gmra.mxu3 %v18598_v43  ;;  %10913 = vmatmul.f32.gmra.mxu0 %v18598_v43  ;;  %v9990_v41 = vpop.f32.mrf.mxu0 }
 0xb44   :  { %v11383_v50 = vand.u32 4294901760, %v11382_v49 }
 0xb47   :  { %10940 = vmatmul.f32.gmra.mxu1 %v18598_v43 }
 0xb48   :  { %v18720_v10 = vpop.permute.xlu2 %12396 }
 0xb49   :  { %11099 = vmatmul.f32.vlgmr.msra.gmra.mxu2 %v18578_v44  ;;  %v12417_v12 = vmul.f32 %v18720_v10, %v18362_v54 }
 0xb4a   :  { %11339 = vmatpush.msra.mxu2 %v18681_v48  ;;  %v10089_v47 = vpop.f32.mrf.mxu3 }
 0xb4b   :  { %11126 = vmatmul.f32.vlgmr.msra.gmra.mxu3 %v18578_v44  ;;  %v10029_v63 = vpop.f32.mrf.mxu1  ;;  %12446 = vrot.lane.b32.xlu0 %v12417_v12, %s15149_s12  ;;  %v12412_v12 = vmul.f32 %v18720_v10, %v18394_v28 }
 0xb4c   :  { %11378 = vmatpush.msra.mxu3 %v11377_v60  ;;  %11341 = vmatpush.msra.mxu2 %v18688_v32  ;;  %v10030_v23 = vadd.f32 %v10029_v63, %v9990_v41  ;;  %v10059_v19 = vpop.f32.mrf.mxu2 }
 0xb4d   :  { %11036 = vmatmul.f32.vlgmr.msra.gmra.mxu0 %v18590_v0 }
 0xb4e   :  { %v10060_v14 = vadd.f32 %v10059_v19, %v10030_v23  ;;  %11384 = vmatpush.msra.mxu3 %v11383_v50  ;;  %11283 = vmatpush.msra.mxu0 %v11185_v11 }
 0xb4f   :  { %11066 = vmatmul.f32.vlgmr.msra.gmra.mxu1 %v18602_v4 }
 0xb50   :  { %11287 = vmatpush.msra.mxu0 %v11191_v56  ;;  %11312 = vmatpush.msra.mxu1 %v18631_v51  ;;  %v18732_v54 = vadd.f32 %v10089_v47, %v10060_v14  ;;  %v9998_v63 = vpop.f32.mrf.mxu0 }
 0xb51   :  { %11103 = vmatmul.f32.gmra.mxu2 %v18598_v43 }
 0xb52   :  { %11314 = vmatpush.msra.mxu1 %v18649_v18  ;;  %v10095_v50 = vpop.f32.mrf.mxu3 }
 0xb53   :  { %11130 = vmatmul.f32.gmra.mxu3 %v18598_v43  ;;  %v10033_v19 = vpop.f32.mrf.mxu1  ;;  %12436 = vrot.lane.b32.xlu0 %v12412_v12, %s15149_s12 }
 0xb54   :  { %v10034_v23 = vadd.f32 %v10033_v19, %v9998_v63  ;;  %v10064_v11 = vpop.f32.mrf.mxu2  ;;  %v11589_v41 = vpop.permute.xlu1 %11588  ;;  %v15128_v63 = vld [vmem:[%s20187_s8 + $0x8] sm:$0x3] }
 0xb55   :  { %11041 = vmatmul.f32.gmra.mxu0 %v18614_v31 }
 0xb56   :  { %v10065_v14 = vadd.f32 %v10064_v11, %v10034_v23 }
 0xb57   :  { %11072 = vmatmul.f32.gmra.mxu1 %v18627_v42  ;;  %v11591_v51 = vpop.permute.xlu0 %11590 }
 0xb58   :  { %v18742_v47 = vadd.f32 %v10095_v50, %v10065_v14  ;;  %v11602_v18 = vsel %vm2487_vm12, %v11589_v41, %v11591_v51  ;;  %v18746_v28 = vpop.f32.mrf.mxu0 }
 0xb59   :  { %11226 = vmatmul.f32.vlgmr.msrb.gmra.mxu2 %v18590_v0  ;;  %v11614_v56 = vsel %vm7179_vm14, %v11602_v18, 0 }
 0xb5a   :  { %20708 = vst [vmem:[#allocation130_spill] sm:$0xff] %v18742_v47  ;;  %11473 = vmatpush.msrb.mxu2 %v11375_v1  ;;  %v18758_v1 = vand.u32 4294901760, %v11614_v56 }
 0xb5b   :  { %11256 = vmatmul.f32.vlgmr.msrb.gmra.mxu3 %v18602_v4  ;;  %v18751_v60 = vpop.f32.mrf.mxu1  ;;  %12424 = vrot.lane.b32.xlu0 %v15128_v63, %s15164_s7 }
 0xb5c   :  { %11502 = vmatpush.msrb.mxu3 %v18681_v48  ;;  %11477 = vmatpush.msrb.mxu2 %v11381_v34  ;;  %v10180_v25 = vpop.f32.mrf.mxu2  ;;  %v11579_v49 = vpop.permute.xlu1 %11578  ;;  %v18770_v11 = vsub.f32 %v11614_v56, %v18758_v1 }
 0xb5d   :  { %11157 = vmatmul.f32.vlgmr.msrb.gmra.mxu0 %v18624_v9  ;;  %v10219_v12 = vpop.f32.mrf.mxu3 }
 0xb5e   :  { %11504 = vmatpush.msrb.mxu3 %v18688_v32  ;;  %11410 = vmatpush.msrb.mxu0 %v18694_v20  ;;  %v10220_v34 = vadd.f32 %v10219_v12, %v10180_v25  ;;  %v20202_v18 = vand.u32 4294901760, %v18770_v11 }
 0xb5f   :  { %11196 = vmatmul.f32.vlgmr.msrb.gmra.mxu1 %v18578_v44  ;;  %v11581_v19 = vpop.permute.xlu0 %11580 }
 0xb60   :  { %11413 = vmatpush.msrb.mxu0 %v18702_v58  ;;  %11440 = vmatpush.msrb.mxu1 %v18681_v48  ;;  %v11598_v50 = vsel %vm2487_vm12, %v11579_v49, %v11581_v19  ;;  %v18773_v20 = vpop.f32.mrf.mxu0  ;;  %v11599_v12 = vsel %vm2487_vm12, %v11581_v19, %v18698_v62 }
 0xb61   :  { %v18766_v23 = vand.u32 4294901760, %v11598_v50  ;;  %11231 = vmatmul.f32.gmra.mxu2 %v18614_v31  ;;  %20709 = vst [vmem:[#allocation131_spill] sm:$0xff] %v18773_v20 }
 0xb62   :  { %11442 = vmatpush.msrb.mxu1 %v18688_v32 }
 0xb63   :  { %11262 = vmatmul.f32.gmra.mxu3 %v18627_v42  ;;  %v18777_v41 = vsub.f32 %v11598_v50, %v18766_v23  ;;  %v18779_v58 = vpop.f32.mrf.mxu1 }
 0xb64   :  { %20710 = vst [vmem:[#allocation132_spill] sm:$0xff] %v18779_v58  ;;  %v10188_v48 = vpop.f32.mrf.mxu2  ;;  %v18782_v14 = vpop.permute.xlu1 %11566 }
 0xb65   :  { %11165 = vmatmul.f32.gmra.mxu0 %v18657_v22  ;;  %v10223_v56 = vpop.f32.mrf.mxu3  ;;  %v20203_v63 = vand.u32 4294901760, %v18777_v41 }
 0xb66   :  { %v10224_v25 = vadd.f32 %v10223_v56, %v10188_v48  ;;  %v11674_v56 = vsub.f32 %v18770_v11, %v20202_v18 }
 0xb67   :  { %11200 = vmatmul.f32.gmra.mxu1 %v18598_v43  ;;  %v18786_v32 = vpop.permute.xlu0 %11592 }
 0xb68   :  { %v11603_v49 = vsel %vm2487_vm12, %v11591_v51, %v18786_v32  ;;  %v10249_v48 = vpop.f32.mrf.mxu0  ;;  %v18802_v51 = vand.u32 4294901760, %v11599_v12  ;;  %v11675_v18 = vand.u32 4294901760, %v11674_v56 }
 0xb69   :  { %v11616_v50 = vsel %vm7179_vm14, %v11603_v49, 0  ;;  %11347 = vmatmul.f32.vlgmr.msra.gmra.mxu2 %v18624_v9  ;;  %v10250_v57 = vadd.f32 %v10249_v48, %v10220_v34  ;;  %v11680_v49 = vsub.f32 %v18777_v41, %v20203_v63 }
 0xb6a   :  { %v18795_v8 = vand.u32 4294901760, %v11616_v50  ;;  %11708 = vmatpush.msra.mxu2 %v18770_v11  ;;  %v18819_v20 = vsub.f32 %v11599_v12, %v18802_v51 }
 0xb6b   :  { %11386 = vmatmul.f32.vlgmr.msra.gmra.mxu3 %v18578_v44 }
 0xb6c   :  { %11738 = vmatpush.msra.mxu3 %v18758_v1  ;;  %11711 = vmatpush.msra.mxu2 %v18777_v41  ;;  %v10279_v19 = vpop.f32.mrf.mxu1  ;;  %v10312_v9 = vpop.f32.mrf.mxu2  ;;  %v18813_v34 = vsub.f32 %v11616_v50, %v18795_v8  ;;  %v20204_v12 = vand.u32 4294901760, %v18819_v20 }
 0xb6d   :  { %v10280_v58 = vadd.f32 %v10279_v19, %v10250_v57  ;;  %11289 = vmatmul.f32.vlgmr.msra.gmra.mxu0 %v18578_v44  ;;  %v18810_v39 = vpop.permute.xlu1 %11594  ;;  %v11681_v57 = vand.u32 4294901760, %v11680_v49 }
 0xb6e   :  { %11740 = vmatpush.msra.mxu3 %v18766_v23  ;;  %v10339_v48 = vpop.f32.mrf.mxu3  ;;  %11637 = vmatpush.msra.mxu0 %v18758_v1  ;;  %v20205_v50 = vand.u32 4294901760, %v18813_v34 }
 0xb6f   :  { %v10313_v37 = vadd.f32 %v10312_v9, %v10280_v58  ;;  %11316 = vmatmul.f32.vlgmr.msra.gmra.mxu1 %v18578_v44 }
 0xb70   :  { %11639 = vmatpush.msra.mxu0 %v18766_v23  ;;  %11676 = vmatpush.msra.mxu1 %v11675_v18  ;;  %v10254_v63 = vpop.f32.mrf.mxu0 }
 0xb71   :  { %v18822_v19 = vadd.f32 %v10339_v48, %v10313_v37  ;;  %11355 = vmatmul.f32.gmra.mxu2 %v18657_v22  ;;  %v10255_v47 = vadd.f32 %v10254_v63, %v10224_v25  ;;  %v11864_v22 = vsub.f32 %v18813_v34, %v20205_v50  ;;  %v11610_v63 = vsel %vm7431_vm6, %v18397_v13, 0 }
 0xb72   :  { %11682 = vmatpush.msra.mxu1 %v11681_v57 }
 0xb73   :  { %11390 = vmatmul.f32.gmra.mxu3 %v18598_v43 }
 0xb74   :  { %v10285_v58 = vpop.f32.mrf.mxu1  ;;  %v10316_v56 = vpop.f32.mrf.mxu2 }
 0xb75   :  { %v10286_v9 = vadd.f32 %v10285_v58, %v10255_v47  ;;  %11293 = vmatmul.f32.gmra.mxu0 %v18598_v43  ;;  %v12399_v18 = vpop.permute.xlu1 %12398  ;;  %v11870_v47 = vsub.f32 %v18819_v20, %v20204_v12  ;;  %v11865_v58 = vand.u32 4294901760, %v11864_v22  ;;  %v20711_v12 = vand.u32 4294901760, %v18770_v11 }
 0xb76   :  { %v10343_v49 = vpop.f32.mrf.mxu3  ;;  %v12404_v37 = vsel %vm1739_vm11, %v18720_v10, %v12399_v18 }
 0xb77   :  { %v10317_v48 = vadd.f32 %v10316_v56, %v10286_v9  ;;  %v12418_v25 = vmul.f32 %v12404_v37, %v18378_v52  ;;  %11320 = vmatmul.f32.gmra.mxu1 %v18598_v43  ;;  %v18846_v52 = vand.u32 4294901760, %v11610_v63  ;;  %v11871_v9 = vand.u32 4294901760, %v11870_v47 }
 0xb78   :  { %v10370_v10 = vpop.f32.mrf.mxu0  ;;  %v11612_v47 = vsel %vm7431_vm6, %v18782_v14, 0 }
 0xb79   :  { %v18841_v57 = vadd.f32 %v10343_v49, %v10317_v48  ;;  %11479 = vmatmul.f32.vlgmr.msrb.gmra.mxu2 %v18578_v44  ;;  %12448 = vrot.lane.b32.xlu2 %v12418_v25, %s15149_s12  ;;  %v18855_v50 = vsub.f32 %v11610_v63, %v18846_v52 }
 0xb7a   :  { %11827 = vmatpush.msrb.mxu2 %v18795_v8 }
 0xb7b   :  { %11506 = vmatmul.f32.vlgmr.msrb.gmra.mxu3 %v18578_v44 }
 0xb7c   :  { %11866 = vmatpush.msrb.mxu3 %v11865_v58  ;;  %11829 = vmatpush.msrb.mxu2 %v18802_v51  ;;  %v10409_v13 = vpop.f32.mrf.mxu1  ;;  %v10439_v56 = vpop.f32.mrf.mxu2 }
 0xb7d   :  { %v10410_v49 = vadd.f32 %v10409_v13, %v10370_v10  ;;  %11416 = vmatmul.f32.vlgmr.msrb.gmra.mxu0 %v18590_v0  ;;  %v12401_v48 = vpop.permute.xlu1 %12400  ;;  %v12413_v0 = vmul.f32 %v12404_v37, %v18415_v30  ;;  %v20712_v10 = vand.u32 4294901760, %v18777_v41  ;;  %v18874_v30 = vld [vmem:[%s20180_s1 + $0x7] ss:$8 sm:$0xf]  ;;  %v11585_v13 = vpop.permute.xlu0 %11584 }
 0xb7e   :  { %11872 = vmatpush.msrb.mxu3 %v11871_v9  ;;  %v10469_v25 = vpop.f32.mrf.mxu3  ;;  %11771 = vmatpush.msrb.mxu0 %v20711_v12  ;;  %v12405_v22 = vsel %vm1739_vm11, %v12399_v18, %v12401_v48  ;;  %v13250_v18 = vperm.slane %v18874_v30, 0  ;;  %v11604_v9 = vsel %vm2487_vm12, %v18786_v32, %v18810_v39 }
 0xb7f   :  { %v10440_v44 = vadd.f32 %v10439_v56, %v10410_v49  ;;  %v12414_v58 = vmul.f32 %v12405_v22, %v18376_v21  ;;  %11446 = vmatmul.f32.vlgmr.msrb.gmra.mxu1 %v18602_v4  ;;  %v18876_v4 = vand.u32 4294901760, %v11612_v47 }
 0xb80   :  { %11775 = vmatpush.msrb.mxu0 %v20712_v10  ;;  %11800 = vmatpush.msrb.mxu1 %v18758_v1  ;;  %v10378_v21 = vpop.f32.mrf.mxu0  ;;  %v18880_v1 = vand.u32 4294901760, %v18855_v50 }
 0xb81   :  { %v18865_v11 = vadd.f32 %v10469_v25, %v10440_v44  ;;  %11483 = vmatmul.f32.gmra.mxu2 %v18598_v43  ;;  %12440 = vrot.lane.b32.xlu1 %v12414_v58, %s15149_s12  ;;  %v18887_v63 = vsub.f32 %v11612_v47, %v18876_v4  ;;  %v20713_v25 = vand.u32 4294901760, %v18813_v34 }
 0xb82   :  { %11802 = vmatpush.msrb.mxu1 %v18766_v23  ;;  %12438 = vrot.lane.b32.xlu2 %v12413_v0, %s15149_s12  ;;  %v11600_v0 = vsel %vm2487_vm12, %v18698_v62, %v11585_v13 }
 0xb83   :  { %11510 = vmatmul.f32.gmra.mxu3 %v18598_v43  ;;  %v11643_v43 = vsub.f32 %v18855_v50, %v18880_v1 }
 0xb84   :  { %v10413_v41 = vpop.f32.mrf.mxu1  ;;  %v10444_v14 = vpop.f32.mrf.mxu2 }
 0xb85   :  { %v10414_v12 = vadd.f32 %v10413_v41, %v10378_v21  ;;  %11421 = vmatmul.f32.gmra.mxu0 %v18614_v31  ;;  %v18883_v23 = vpop.permute.xlu1 %12422  ;;  %v12419_v31 = vmul.f32 %v12405_v22, %v18435_v16  ;;  %v18907_v32 = vand.u32 4294901760, %v11643_v43  ;;  %v18910_v16 = vand.u32 4294901760, %v18887_v63 }
 0xb86   :  { %v10475_v37 = vpop.f32.mrf.mxu3  ;;  %v20714_v22 = vand.u32 4294901760, %v18819_v20 }
 0xb87   :  { %v10445_v56 = vadd.f32 %v10444_v14, %v10414_v12  ;;  %11452 = vmatmul.f32.gmra.mxu1 %v18627_v42  ;;  %v11618_v42 = vsel %vm7179_vm14, %v11604_v9, 0  ;;  %v15129_v12 = vld [vmem:[#allocation3 + $0x40] sm:$0xff]  ;;  %v11651_v62 = vsub.f32 %v18887_v63, %v18910_v16  ;;  %v18930_v9 = vand.u32 4294901760, %v11600_v0 }
 0xb88   :  { %v18902_v44 = vpop.f32.mrf.mxu0  ;;  %v18920_v21 = vand.u32 4294901760, %v11618_v42 }
 0xb89   :  { %v18896_v49 = vadd.f32 %v10475_v37, %v10445_v56  ;;  %11714 = vmatmul.f32.vlgmr.msra.gmra.mxu2 %v18855_v50  ;;  %13254 = vrot.lane.b32.xlu1 %v13250_v18, %s15146_s19 }
 0xb8a   :  { %11961 = vmatpush.msra.mxu2 %v20713_v25  ;;  %12450 = vrot.lane.b32.xlu2 %v12419_v31, %s15149_s12 }
 0xb8b   :  { %11744 = vmatmul.f32.vlgmr.msra.gmra.mxu3 %v18880_v1 }
 0xb8c   :  { %11990 = vmatpush.msra.mxu3 %v18795_v8  ;;  %11965 = vmatpush.msra.mxu2 %v20714_v22  ;;  %v18915_v58 = vpop.f32.mrf.mxu1  ;;  %v10560_v47 = vpop.f32.mrf.mxu2  ;;  %v13251_v22 = vperm.slane %v18874_v30, 1 }
 0xb8d   :  { %11645 = vmatmul.f32.vlgmr.msra.gmra.mxu0 %v18907_v32  ;;  %v12403_v10 = vpop.permute.xlu1 %12402 }
 0xb8e   :  { %11992 = vmatpush.msra.mxu3 %v18802_v51  ;;  %v10599_v41 = vpop.f32.mrf.mxu3  ;;  %11898 = vmatpush.msra.mxu0 %v18813_v34  ;;  %v12406_v14 = vsel %vm1739_vm11, %v12401_v48, %v12403_v10  ;;  %v12416_v18 = vmul.f32 %v15129_v12, %v12403_v10  ;;  %v11597_v34 = vpop.permute.xlu0 %11596  ;;  %v12421_v12 = vmul.f32 %v12403_v10, %v18486_v38 }
 0xb8f   :  { %v10600_v37 = vadd.f32 %v10599_v41, %v10560_v47  ;;  %v12415_v56 = vmul.f32 %v12406_v14, %v18459_v7  ;;  %v12420_v43 = vmul.f32 %v12406_v14, %v18453_v45  ;;  %11684 = vmatmul.f32.vlgmr.msra.gmra.mxu1 %v18846_v52  ;;  %v18937_v7 = vsub.f32 %v11618_v42, %v18920_v21 }
 0xb90   :  { %11901 = vmatpush.msra.mxu0 %v18819_v20  ;;  %11928 = vmatpush.msra.mxu1 %v18795_v8  ;;  %v18940_v45 = vpop.f32.mrf.mxu0  ;;  %v18945_v20 = vand.u32 4294901760, %v11651_v62  ;;  %v18948_v8 = vsub.f32 %v11600_v0, %v18930_v9  ;;  %v11605_v48 = vsel %vm2487_vm12, %v18810_v39, %v11597_v34  ;;  %v11587_v0 = vpop.permute.xlu2 %11586 }
 0xb91   :  { %11719 = vmatmul.f32.gmra.mxu2 %v18887_v63  ;;  %12444 = vrot.lane.b32.xlu1 %v12416_v18, %s15149_s12  ;;  %v11620_v47 = vsel %vm7179_vm14, %v11605_v48, 0  ;;  %v11601_v39 = vsel %vm2487_vm12, %v11585_v13, %v11587_v0  ;;  %v7508_v48 = vadd.f32 %v17831_v33, %v17829_v3  ;;  %v13252_v0 = vperm.slane %v18874_v30, 2 }
 0xb92   :  { %11930 = vmatpush.msra.mxu1 %v18802_v51  ;;  %12452 = vrot.lane.b32.xlu0 %v12420_v43, %s15149_s12  ;;  %v12053_v51 = vand.u32 4294901760, %v18937_v7  ;;  %v12059_v14 = vand.u32 4294901760, %v18948_v8  ;;  %v18963_v18 = vand.u32 4294901760, %v11620_v47  ;;  %v18972_v13 = vand.u32 4294901760, %v11601_v39 }
 0xb93   :  { %11750 = vmatmul.f32.gmra.mxu3 %v18910_v16  ;;  %12442 = vrot.lane.b32.xlu2 %v12415_v56, %s15149_s12  ;;  %v7538_v33 = vadd.f32 %v17841_v2, %v7508_v48 }
 0xb94   :  { %v18952_v31 = vpop.f32.mrf.mxu1  ;;  %v10568_v25 = vpop.f32.mrf.mxu2  ;;  %v12054_v43 = vsub.f32 %v18937_v7, %v12053_v51  ;;  %v12060_v34 = vsub.f32 %v18948_v8, %v12059_v14 }
 0xb95   :  { %11653 = vmatmul.f32.gmra.mxu0 %v18945_v20  ;;  %v7568_v48 = vadd.f32 %v17843_v61, %v7538_v33 }
 0xb96   :  { %v10603_v42 = vpop.f32.mrf.mxu3  ;;  %v12061_v3 = vand.u32 4294901760, %v12060_v34 }
 0xb97   :  { %v10604_v41 = vadd.f32 %v10603_v42, %v10568_v25  ;;  %11688 = vmatmul.f32.gmra.mxu1 %v18876_v4  ;;  %v18983_v25 = vsub.f32 %v11620_v47, %v18963_v18 }
 0xb98   :  { %v10629_v56 = vpop.f32.mrf.mxu0 }
 0xb99   :  { %11835 = vmatmul.f32.vlgmr.msrb.gmra.mxu2 %v18907_v32  ;;  %v10630_v62 = vadd.f32 %v10629_v56, %v10600_v37  ;;  %v18990_v56 = vsub.f32 %v11601_v39, %v18972_v13  ;;  %v7512_v39 = vadd.f32 %v17847_v26, %v17845_v24 }
 0xb9a   :  { %12088 = vmatpush.msrb.mxu2 %v18937_v7  ;;  %13256 = vrot.lane.b32.xlu0 %v13251_v22, %s15146_s19  ;;  %v12055_v22 = vand.u32 4294901760, %v12054_v43  ;;  %v12243_v43 = vand.u32 4294901760, %v18983_v25 }
 0xb9b   :  { %11874 = vmatmul.f32.vlgmr.msrb.gmra.mxu3 %v18846_v52  ;;  %12454 = vrot.lane.b32.xlu2 %v12421_v12, %s15149_s12  ;;  %v12249_v2 = vand.u32 4294901760, %v18990_v56  ;;  %v7543_v24 = vadd.f32 %v17850_v46, %v7512_v39  ;;  %s15165_s12 = smov 30  }
 0xb9c   :  { %12118 = vmatpush.msrb.mxu3 %v18920_v21  ;;  %12091 = vmatpush.msrb.mxu2 %v18948_v8  ;;  %v10659_v38 = vpop.f32.mrf.mxu1  ;;  %v10692_v10 = vpop.f32.mrf.mxu2 }
 0xb9d   :  { %v10660_v37 = vadd.f32 %v10659_v38, %v10630_v62  ;;  %11777 = vmatmul.f32.vlgmr.msrb.gmra.mxu0 %v18846_v52  ;;  %v12250_v26 = vsub.f32 %v18990_v56, %v12249_v2 }
 0xb9e   :  { %12120 = vmatpush.msrb.mxu3 %v18930_v9  ;;  %v10719_v42 = vpop.f32.mrf.mxu3  ;;  %12017 = vmatpush.msrb.mxu0 %v18920_v21 }
 0xb9f   :  { %v10693_v12 = vadd.f32 %v10692_v10, %v10660_v37  ;;  %11804 = vmatmul.f32.vlgmr.msrb.gmra.mxu1 %v18846_v52  ;;  %v12251_v39 = vand.u32 4294901760, %v12250_v26 }
 0xba0   :  { %12019 = vmatpush.msrb.mxu0 %v18930_v9  ;;  %12056 = vmatpush.msrb.mxu1 %v12055_v22  ;;  %v10634_v62 = vpop.f32.mrf.mxu0  ;;  %v12244_v22 = vsub.f32 %v18983_v25, %v12243_v43 }
 0xba1   :  { %v18994_v47 = vadd.f32 %v10719_v42, %v10693_v12  ;;  %11843 = vmatmul.f32.gmra.mxu2 %v18945_v20  ;;  %v10635_v38 = vadd.f32 %v10634_v62, %v10604_v41  ;;  %v7601_v41 = vadd.f32 %v17854_v29, %v7568_v48  ;;  %v9172_v29 = vadd.f32 %v18317_v27, %v18313_v5  ;;  %v20716_v48 = vld [vmem:[#allocation13_spill] sm:$0xff] }
 0xba2   :  { %12062 = vmatpush.msrb.mxu1 %v12061_v3  ;;  %13258 = vrot.lane.b32.xlu0 %v13252_v0, %s15146_s19  ;;  %v12245_v33 = vand.u32 4294901760, %v12244_v22 }
 0xba3   :  { %11878 = vmatmul.f32.gmra.mxu3 %v18876_v4  ;;  %v7628_v61 = vadd.f32 %v17856_v6, %v7601_v41  ;;  %v7574_v6 = vadd.f32 %v17852_v55, %v7543_v24  ;;  %v13253_v55 = vperm.slane %v18874_v30, 3  ;;  %v20718_v41 = vld [vmem:[#allocation55_spill] sm:$0xff]  ;;  %v20720_v30 = vld [vmem:[#allocation18_spill] sm:$0xff]  ;;  %v20721_v24 = vld [vmem:[#allocation68_spill] sm:$0xff] }
 0xba4   :  { %v10665_v10 = vpop.f32.mrf.mxu1  ;;  %v10696_v34 = vpop.f32.mrf.mxu2 }
 0xba5   :  { %v10666_v37 = vadd.f32 %v10665_v10, %v10635_v38  ;;  %11781 = vmatmul.f32.gmra.mxu0 %v18876_v4  ;;  %v8283_v46 = vadd.f32 %v18105_v35, %v7628_v61  ;;  %v7605_v35 = vadd.f32 %v17862_v59, %v7574_v6 }
 0xba6   :  { %v10723_v42 = vpop.f32.mrf.mxu3 }
 0xba7   :  { %v10697_v0 = vadd.f32 %v10696_v34, %v10666_v37  ;;  %11808 = vmatmul.f32.gmra.mxu1 %v18876_v4  ;;  %v8322_v10 = vadd.f32 %v18108_v53, %v8283_v46  ;;  %v9202_v37 = vadd.f32 %v20716_v48, %v9172_v29  ;;  %v20717_v53 = vld [vmem:[#allocation94_spill] sm:$0xff] }
 0xba8   :  { %v10778_v3 = vpop.f32.mrf.mxu0  ;;  %v7632_v22 = vadd.f32 %v20717_v53, %v7605_v35 }
 0xba9   :  { %v19015_v12 = vadd.f32 %v10723_v42, %v10697_v0  ;;  %11967 = vmatmul.f32.vlgmr.msra.gmra.mxu2 %v18846_v52 }
 0xbaa   :  { %12207 = vmatpush.msra.mxu2 %v18963_v18  ;;  %13280 = vrot.lane.b32.xlu0 %v18559_v40, %s15165_s12  ;;  %v20715_v40 = vld [vmem:[#allocation20_spill] sm:$0xff]  ;;  %v8291_v26 = vadd.f32 %v20721_v24, %v7632_v22  ;;  %v20735_v24 = vld [vmem:[#allocation111_spill] sm:$0xff] }
 0xbab   :  { %11994 = vmatmul.f32.vlgmr.msra.gmra.mxu3 %v18846_v52  ;;  %v7698_v5 = vadd.f32 %v20715_v40, %v17858_v36  ;;  %v20719_v36 = vld [vmem:[#allocation62_spill] sm:$0xff]  ;;  %v20728_v40 = vld [vmem:[#allocation21_spill] sm:$0xff]  ;;  %v20732_v22 = vld [vmem:[#allocation44_spill] sm:$0xff] }
 0xbac   :  { %12246 = vmatpush.msra.mxu3 %v12245_v33  ;;  %12209 = vmatpush.msra.mxu2 %v18972_v13  ;;  %v10817_v62 = vpop.f32.mrf.mxu1  ;;  %v10847_v38 = vpop.f32.mrf.mxu2  ;;  %v8352_v59 = vadd.f32 %v20719_v36, %v8322_v10  ;;  %v20723_v33 = vld [vmem:[#allocation125_spill] sm:$0xff]  ;;  %v20727_v10 = vld [vmem:[#allocation86_spill] sm:$0xff] }
 0xbad   :  { %v10818_v34 = vadd.f32 %v10817_v62, %v10778_v3  ;;  %11904 = vmatmul.f32.vlgmr.msra.gmra.mxu0 %v18855_v50  ;;  %v7728_v0 = vadd.f32 %v20718_v41, %v7698_v5  ;;  %v20722_v3 = vld [vmem:[#allocation48_spill] sm:$0xff]  ;;  %v20729_v5 = vld [vmem:[#allocation54_spill] sm:$0xff] }
 0xbae   :  { %12252 = vmatpush.msra.mxu3 %v12251_v39  ;;  %v10877_v27 = vpop.f32.mrf.mxu3  ;;  %12151 = vmatpush.msra.mxu0 %v12053_v51  ;;  %v9176_v8 = vadd.f32 %v20723_v33, %v20722_v3 }
 0xbaf   :  { %v10848_v42 = vadd.f32 %v10847_v38, %v10818_v34  ;;  %11934 = vmatmul.f32.vlgmr.msra.gmra.mxu1 %v18880_v1  ;;  %v7758_v51 = vadd.f32 %v20720_v30, %v7728_v0  ;;  %v20726_v38 = vld [vmem:[#allocation35_spill] sm:$0xff] }
 0xbb0   :  { %12155 = vmatpush.msra.mxu0 %v12059_v14  ;;  %12180 = vmatpush.msra.mxu1 %v18920_v21  ;;  %v10786_v61 = vpop.f32.mrf.mxu0  ;;  %v20724_v14 = vld [vmem:[#allocation92_spill] sm:$0xff]  ;;  %v20725_v21 = vld [vmem:[#allocation109_spill] sm:$0xff]  ;;  %v8382_v39 = vadd.f32 %v20726_v38, %v8352_v59  ;;  %v9207_v41 = vadd.f32 %v20732_v22, %v9176_v8 }
 0xbb1   :  { %v10878_v7 = vadd.f32 %v10877_v27, %v10848_v42  ;;  %11971 = vmatmul.f32.gmra.mxu2 %v18876_v4  ;;  %v9232_v46 = vadd.f32 %v20724_v14, %v9202_v37  ;;  %v8326_v29 = vadd.f32 %v20725_v21, %v8291_v26  ;;  %v7702_v27 = vadd.f32 %v20729_v5, %v20728_v40  ;;  %v20731_v42 = vld [vmem:[#allocation106_spill] sm:$0xff]  ;;  %v20733_v59 = vld [vmem:[#allocation57_spill] sm:$0xff]  ;;  %v20737_v14 = vld [vmem:[#allocation23_spill] sm:$0xff] }
 0xbb2   :  { %12182 = vmatpush.msra.mxu1 %v18930_v9  ;;  %13260 = vrot.lane.b32.xlu0 %v13253_v55, %s15146_s19  ;;  %v10123_v9 = vadd.f32 %v18746_v28, %v18732_v54  ;;  %v20730_v55 = vld [vmem:[#allocation24_spill] sm:$0xff]  ;;  %v8415_v53 = vadd.f32 %v20731_v42, %v8382_v39  ;;  %v20734_v28 = vld [vmem:[#allocation67_spill] sm:$0xff]  ;;  %v20745_v42 = vld [vmem:[#allocation41_spill] sm:$0xff] }
 0xbb3   :  { %11998 = vmatmul.f32.gmra.mxu3 %v18876_v4  ;;  %v9265_v34 = vadd.f32 %v20727_v10, %v9232_v46  ;;  %v7791_v48 = vadd.f32 %v20730_v55, %v7758_v51  ;;  %v7733_v54 = vadd.f32 %v20733_v59, %v7702_v27  ;;  %v8357_v30 = vadd.f32 %v20734_v28, %v8326_v29  ;;  %v20736_v51 = vld [vmem:[#allocation22_spill] sm:$0xff]  ;;  %v20739_v29 = vld [vmem:[#allocation108_spill] sm:$0xff]  ;;  %v20742_v40 = vld [vmem:[#allocation131_spill] sm:$0xff] }
 0xbb4   :  { %v10821_v6 = vpop.f32.mrf.mxu1  ;;  %v10852_v62 = vpop.f32.mrf.mxu2  ;;  %v8442_v26 = vadd.f32 %v20735_v24, %v8415_v53  ;;  %v20738_v46 = vld [vmem:[#allocation46_spill] sm:$0xff]  ;;  %v20743_v27 = vld [vmem:[#allocation97_spill] sm:$0xff]  ;;  %v20746_v53 = vld [vmem:[#allocation16_spill] sm:$0xff] }
 0xbb5   :  { %v10822_v35 = vadd.f32 %v10821_v6, %v10786_v61  ;;  %11909 = vmatmul.f32.gmra.mxu0 %v18887_v63  ;;  %v9292_v0 = vadd.f32 %v18408_v15, %v9265_v34  ;;  %v10150_v61 = vadd.f32 %v18751_v60, %v10123_v9  ;;  %v7818_v33 = vadd.f32 %v20736_v51, %v7791_v48  ;;  %v20740_v60 = vld [vmem:[#allocation66_spill] sm:$0xff]  ;;  %v20751_v24 = vld [vmem:[#allocation132_spill] sm:$0xff] }
 0xbb6   :  { %v10883_v37 = vpop.f32.mrf.mxu3  ;;  %v7764_v8 = vadd.f32 %v20737_v14, %v7733_v54  ;;  %v9238_v21 = vadd.f32 %v20738_v46, %v9207_v41  ;;  %v8388_v38 = vadd.f32 %v20739_v29, %v8357_v30  ;;  %v9362_v22 = vadd.f32 %v20746_v53, %v20745_v42  ;;  %v20749_v54 = vld [vmem:[#allocation128_spill] sm:$0xff]  ;;  %v20753_v14 = vld [vmem:[#allocation115_spill] sm:$0xff] }
 0xbb7   :  { %v10853_v36 = vadd.f32 %v10852_v62, %v10822_v35  ;;  %11940 = vmatmul.f32.gmra.mxu1 %v18910_v16  ;;  %v9868_v6 = vadd.f32 %v9292_v0, %v8442_v26  ;;  %v8473_v39 = vadd.f32 %v20740_v60, %v7818_v33  ;;  %v20741_v35 = vld [vmem:[#allocation130_spill] sm:$0xff] }
 0xbb8   :  { %v10910_v15 = vpop.f32.mrf.mxu0  ;;  %v10127_v5 = vadd.f32 %v20742_v40, %v20741_v35  ;;  %v7795_v55 = vadd.f32 %v20743_v27, %v7764_v8  ;;  %v20759_v40 = vld [vmem:[#allocation51_spill] sm:$0xff] }
 0xbb9   :  { %v10884_v3 = vadd.f32 %v10883_v37, %v10853_v36  ;;  %12094 = vmatmul.f32.vlgmr.msrb.gmra.mxu2 %v18855_v50  ;;  %v10911_v62 = vadd.f32 %v10910_v15, %v10878_v7  ;;  %v10726_v9 = vadd.f32 %v10150_v61, %v9868_v6  ;;  %v20744_v37 = vld [vmem:[#allocation113_spill] sm:$0xff]  ;;  %v20752_v61 = vld [vmem:[#allocation99_spill] sm:$0xff]  ;;  %v20754_v15 = vld [vmem:[#allocation80_spill] sm:$0xff] }
 0xbba   :  { %12341 = vmatpush.msrb.mxu2 %v12243_v43  ;;  %v9269_v43 = vadd.f32 %v18433_v17, %v9238_v21  ;;  %v20747_v17 = vld [vmem:[#allocation36_spill] sm:$0xff]  ;;  %v20748_v36 = vld [vmem:[#allocation69_spill] sm:$0xff]  ;;  %v10154_v26 = vadd.f32 %v20751_v24, %v10127_v5  ;;  %v7822_v51 = vadd.f32 %v20752_v61, %v7795_v55  ;;  %v20761_v55 = vld [vmem:[#allocation74_spill] sm:$0xff] }
 0xbbb   :  { %12124 = vmatmul.f32.vlgmr.msrb.gmra.mxu3 %v18880_v1  ;;  %v8512_v59 = vadd.f32 %v20748_v36, %v8473_v39  ;;  %v20766_v24 = vld [vmem:[#allocation27_spill] sm:$0xff] }
 0xbbc   :  { %12370 = vmatpush.msrb.mxu3 %v18963_v18  ;;  %12345 = vmatpush.msrb.mxu2 %v12249_v2  ;;  %v10937_v10 = vpop.f32.mrf.mxu1  ;;  %v10968_v34 = vpop.f32.mrf.mxu2  ;;  %v8419_v2 = vadd.f32 %v20744_v37, %v8388_v38  ;;  %v9296_v41 = vadd.f32 %v20747_v17, %v9269_v43  ;;  %v20756_v38 = vld [vmem:[#allocation72_spill] sm:$0xff] }
 0xbbd   :  { %v10938_v7 = vadd.f32 %v10937_v10, %v10911_v62  ;;  %12025 = vmatmul.f32.vlgmr.msrb.gmra.mxu0 %v18907_v32  ;;  %v8542_v8 = vadd.f32 %v20753_v14, %v8512_v59  ;;  %v20755_v62 = vld [vmem:[#allocation34_spill] sm:$0xff]  ;;  %v20757_v43 = vld [vmem:[#allocation88_spill] sm:$0xff] }
 0xbbe   :  { %12372 = vmatpush.msrb.mxu3 %v18972_v13  ;;  %v11007_v48 = vpop.f32.mrf.mxu3  ;;  %12278 = vmatpush.msrb.mxu0 %v18983_v25  ;;  %v8446_v28 = vadd.f32 %v20749_v54, %v8419_v2  ;;  %v20750_v25 = vld [vmem:[#allocation38_spill] sm:$0xff]  ;;  %v8481_v29 = vadd.f32 %v20755_v62, %v7822_v51  ;;  %v20762_v2 = vld [vmem:[#allocation83_spill] sm:$0xff]  ;;  %v20764_v59 = vld [vmem:[#allocation84_spill] sm:$0xff] }
 0xbbf   :  { %v19092_v0 = vadd.f32 %v10938_v7, %v10726_v9  ;;  %12064 = vmatmul.f32.vlgmr.msrb.gmra.mxu1 %v18846_v52  ;;  %v9392_v30 = vadd.f32 %v20750_v25, %v9362_v22  ;;  %v8572_v60 = vadd.f32 %v20756_v38, %v8542_v8  ;;  %v20758_v9 = vld [vmem:[#allocation85_spill] sm:$0xff]  ;;  %v11008_v53 = vadd.f32 %v11007_v48, %v10968_v34  ;;  %v12447_v22 = vpop.permute.xlu0 %12446  ;;  %v20768_v14 = vld [vmem:[#allocation112_spill] sm:$0xff]  ;;  %v20772_v38 = vld [vmem:[#allocation70_spill] sm:$0xff] }
 0xbc0   :  { %12281 = vmatpush.msrb.mxu0 %v18990_v56  ;;  %12308 = vmatpush.msrb.mxu1 %v18963_v18  ;;  %v10914_v33 = vpop.f32.mrf.mxu0  ;;  %v9872_v56 = vadd.f32 %v9296_v41, %v8446_v28  ;;  %v9366_v35 = vadd.f32 %v20758_v9, %v20757_v43  ;;  %v20763_v41 = vld [vmem:[#allocation110_spill] sm:$0xff]  ;;  %v20765_v28 = vld [vmem:[#allocation93_spill] sm:$0xff]  ;;  %v20769_v48 = vld [vmem:[#allocation116_spill] sm:$0xff] }
 0xbc1   :  { %12099 = vmatmul.f32.gmra.mxu2 %v18887_v63  ;;  %v9422_v18 = vadd.f32 %v20754_v15, %v9392_v30  ;;  %v10915_v46 = vadd.f32 %v10914_v33, %v10884_v3  ;;  %v20760_v3 = vld [vmem:[#allocation71_spill] sm:$0xff]  ;;  %v8605_v37 = vadd.f32 %v20761_v55, %v8572_v60  ;;  %v20771_v62 = vld [vmem:[#allocation25_spill] sm:$0xff] }
 0xbc2   :  { %12310 = vmatpush.msrb.mxu1 %v18972_v13  ;;  %v10730_v39 = vadd.f32 %v10154_v26, %v9872_v56  ;;  %v8516_v27 = vadd.f32 %v20760_v3, %v8481_v29  ;;  %v9397_v42 = vadd.f32 %v20762_v2, %v9366_v35  ;;  %v20767_v26 = vld [vmem:[#allocation60_spill] sm:$0xff]  ;;  %v20773_v35 = vld [vmem:[#allocation29_spill] sm:$0xff] }
 0xbc3   :  { %12130 = vmatmul.f32.gmra.mxu3 %v18910_v16  ;;  %v9455_v5 = vadd.f32 %v20759_v40, %v9422_v18  ;;  %v7888_v61 = vadd.f32 %v20767_v26, %v20766_v24  ;;  %v8632_v34 = vadd.f32 %v20768_v14, %v8605_v37  ;;  %v20770_v18 = vld [vmem:[#allocation50_spill] sm:$0xff]  ;;  %v20774_v40 = vld [vmem:[#allocation59_spill] sm:$0xff]  ;;  %v20775_v3 = vld [vmem:[#allocation52_spill] sm:$0xff] }
 0xbc4   :  { %v10941_v21 = vpop.f32.mrf.mxu1  ;;  %v10976_v6 = vpop.f32.mrf.mxu2  ;;  %v8547_v36 = vadd.f32 %v20763_v41, %v8516_v27  ;;  %v9428_v25 = vadd.f32 %v20765_v28, %v9397_v42  ;;  %v20780_v24 = vld [vmem:[#allocation28_spill] sm:$0xff] }
 0xbc5   :  { %v10942_v10 = vadd.f32 %v10941_v21, %v10915_v46  ;;  %12033 = vmatmul.f32.gmra.mxu0 %v18945_v20  ;;  %v9482_v54 = vadd.f32 %v20764_v59, %v9455_v5  ;;  %v7918_v29 = vadd.f32 %v20771_v62, %v7888_v61  ;;  %v7892_v5 = vadd.f32 %v20774_v40, %v20773_v35  ;;  %v20784_v62 = vld [vmem:[#allocation124_spill] sm:$0xff] }
 0xbc6   :  { %v11011_v13 = vpop.f32.mrf.mxu3  ;;  %v8578_v8 = vadd.f32 %v20769_v48, %v8547_v36  ;;  %v9459_v46 = vadd.f32 %v20770_v18, %v9428_v25  ;;  %v12468_v48 = vsel %vm7431_vm6, %v18883_v23, 0  ;;  %v20788_v23 = vld [vmem:[#allocation103_spill] sm:$0xff] }
 0xbc7   :  { %v19113_v7 = vadd.f32 %v10942_v10, %v10730_v39  ;;  %12068 = vmatmul.f32.gmra.mxu1 %v18876_v4  ;;  %v9869_v15 = vadd.f32 %v9482_v54, %v8632_v34  ;;  %v11012_v10 = vadd.f32 %v11011_v13, %v10976_v6  ;;  %v12437_v55 = vpop.permute.xlu0 %12436  ;;  %v20779_v54 = vld [vmem:[#allocation58_spill] sm:$0xff]  ;;  %v7923_v26 = vadd.f32 %v20780_v24, %v7892_v5  ;;  %v20794_v24 = vld [vmem:[#allocation64_spill] sm:$0xff] }
 0xbc8   :  { %v8609_v60 = vadd.f32 %v20772_v38, %v8578_v8  ;;  %v9486_v27 = vadd.f32 %v20775_v3, %v9459_v46  ;;  %v20783_v46 = vld [vmem:[#allocation26_spill] sm:$0xff]  ;;  %v19172_v35 = vand.u32 4294901760, %v12468_v48 }
 0xbc9   :  { %12215 = vmatmul.f32.vlgmr.msra.gmra.mxu2 %v18907_v32  ;;  %v10727_v39 = vadd.f32 %v18822_v19, %v9869_v15 }
 0xbca   :  { %v11037_v17 = vpop.f32.mrf.mxu0 }
 0xbcb   :  { %v11038_v30 = vadd.f32 %v11037_v17, %v11008_v53  ;;  %12254 = vmatmul.f32.vlgmr.msra.gmra.mxu3 %v18846_v52  ;;  %v20777_v53 = vld [vmem:[#allocation100_spill] sm:$0xff]  ;;  %v20778_v17 = vld [vmem:[#allocation75_spill] sm:$0xff] }
 0xbcc   :  { %v11067_v51 = vpop.f32.mrf.mxu1  ;;  %v11100_v33 = vpop.f32.mrf.mxu2  ;;  %v7948_v19 = vadd.f32 %v20777_v53, %v7918_v29  ;;  %v8636_v41 = vadd.f32 %v20778_v17, %v8609_v60  ;;  %v20785_v29 = vld [vmem:[#allocation37_spill] sm:$0xff]  ;;  %v20790_v53 = vld [vmem:[#allocation98_spill] sm:$0xff] }
 0xbcd   :  { %v11068_v32 = vadd.f32 %v11067_v51, %v11038_v30  ;;  %12157 = vmatmul.f32.vlgmr.msra.gmra.mxu0 %v18846_v52  ;;  %v9552_v38 = vadd.f32 %v20785_v29, %v20784_v62  ;;  %v20801_v62 = vld [vmem:[#allocation53_spill] sm:$0xff] }
 0xbce   :  { %v11127_v56 = vpop.f32.mrf.mxu3  ;;  %v7981_v28 = vadd.f32 %v20779_v54, %v7948_v19  ;;  %v9873_v61 = vadd.f32 %v9486_v27, %v8636_v41  ;;  %v20792_v41 = vld [vmem:[#allocation17_spill] sm:$0xff] }
 0xbcf   :  { %v11101_v21 = vadd.f32 %v11100_v33, %v11068_v32  ;;  %12184 = vmatmul.f32.vlgmr.msra.gmra.mxu1 %v18846_v52  ;;  %v20781_v33 = vld [vmem:[#allocation61_spill] sm:$0xff] }
 0xbd0   :  { %v10731_v34 = vadd.f32 %v18841_v57, %v9873_v61  ;;  %v20782_v32 = vld [vmem:[#allocation117_spill] sm:$0xff]  ;;  %v12425_v57 = vpop.permute.xlu0 %12424  ;;  %v20795_v61 = vld [vmem:[#allocation114_spill] sm:$0xff] }
 0xbd1   :  { %v11128_v43 = vadd.f32 %v11127_v56, %v11101_v21  ;;  %12223 = vmatmul.f32.gmra.mxu2 %v18945_v20  ;;  %v7954_v21 = vadd.f32 %v20783_v46, %v7923_v26  ;;  %v20800_v46 = vld [vmem:[#allocation63_spill] sm:$0xff] }
 0xbd2   :  { %v11042_v9 = vpop.f32.mrf.mxu0 }
 0xbd3   :  { %v19138_v37 = vadd.f32 %v11128_v43, %v10727_v39  ;;  %v11043_v2 = vadd.f32 %v11042_v9, %v11012_v10  ;;  %12258 = vmatmul.f32.gmra.mxu3 %v18876_v4  ;;  %v19141_v42 = vpop.permute.xlu2 %12448  ;;  %v20787_v39 = vld [vmem:[#allocation101_spill] sm:$0xff]  ;;  %v20789_v43 = vld [vmem:[#allocation76_spill] sm:$0xff]  ;;  %v7985_v19 = vadd.f32 %v20790_v53, %v7954_v21  ;;  %v10503_v53 = vadd.f32 %v18902_v44, %v18865_v11  ;;  %v20808_v11 = vld [vmem:[#allocation90_spill] sm:$0xff] }
 0xbd4   :  { %v11073_v6 = vpop.f32.mrf.mxu1  ;;  %v11104_v13 = vpop.f32.mrf.mxu2  ;;  %v12460_v20 = vsel %vm1706_vm9, %v12447_v22, %v19141_v42  ;;  %v8008_v22 = vadd.f32 %v20781_v33, %v7981_v28  ;;  %v8078_v10 = vadd.f32 %v20788_v23, %v20787_v39  ;;  %v12470_v28 = vsel %vm7431_vm6, %v12425_v57, 0  ;;  %v20802_v57 = vld [vmem:[#allocation104_spill] sm:$0xff]  ;;  %v20803_v23 = vld [vmem:[#allocation119_spill] sm:$0xff] }
 0xbd5   :  { %20776 = vst [vmem:[#allocation20_spill] sm:$0xff] %v19138_v37  ;;  %v11074_v36 = vadd.f32 %v11073_v6, %v11043_v2  ;;  %v12472_v59 = vsel %vm7179_vm14, %v12460_v20, 0  ;;  %12161 = vmatmul.f32.gmra.mxu0 %v18876_v4  ;;  %v20791_v6 = vld [vmem:[#allocation105_spill] sm:$0xff]  ;;  %v19190_v33 = vsub.f32 %v12468_v48, %v19172_v35  ;;  %v20799_v48 = vld [vmem:[#allocation31_spill] sm:$0xff] }
 0xbd6   :  { %v19150_v25 = vand.u32 4294901760, %v12472_v59  ;;  %v11131_v30 = vpop.f32.mrf.mxu3  ;;  %v8663_v56 = vadd.f32 %v20782_v32, %v8008_v22  ;;  %v8082_v21 = vadd.f32 %v20800_v46, %v20799_v48 }
 0xbd7   :  { %v11105_v51 = vadd.f32 %v11104_v13, %v11074_v36  ;;  %12188 = vmatmul.f32.gmra.mxu1 %v18876_v4  ;;  %v9582_v36 = vadd.f32 %v20792_v41, %v9552_v38 }
 0xbd8   :  { %v12530_v14 = vsub.f32 %v12472_v59, %v19150_v25  ;;  %12495 = vmatpush.msra.mxu0 %v19150_v25  ;;  %12596 = vmatpush.msra.mxu3 %v19150_v25  ;;  %v8702_v9 = vadd.f32 %v20789_v43, %v8663_v56  ;;  %v20804_v43 = vld [vmem:[#allocation78_spill] sm:$0xff] }
 0xbd9   :  { %v11132_v8 = vadd.f32 %v11131_v30, %v11105_v51  ;;  %12347 = vmatmul.f32.vlgmr.msrb.gmra.mxu2 %v18846_v52  ;;  %v20793_v30 = vld [vmem:[#allocation32_spill] sm:$0xff]  ;;  %v9612_v29 = vadd.f32 %v20801_v62, %v9582_v36  ;;  %v20814_v62 = vld [vmem:[#allocation123_spill] sm:$0xff] }
 0xbda   :  { %v12531_v15 = vand.u32 4294901760, %v12530_v14  ;;  %v11158_v18 = vpop.f32.mrf.mxu0  ;;  %12566 = vmatpush.msra.mxu2 %v12530_v14  ;;  %v8732_v51 = vadd.f32 %v20795_v61, %v8702_v9 }
 0xbdb   :  { %v19166_v60 = vadd.f32 %v11132_v8, %v10731_v34  ;;  %12374 = vmatmul.f32.vlgmr.msrb.gmra.mxu3 %v18846_v52  ;;  %v8108_v52 = vadd.f32 %v20791_v6, %v8078_v10  ;;  %v20797_v34 = vld [vmem:[#allocation43_spill] sm:$0xff]  ;;  %v20798_v8 = vld [vmem:[#allocation12_spill] sm:$0xff] }
 0xbdc   :  { %v11197_v40 = vpop.f32.mrf.mxu1  ;;  %v11227_v5 = vpop.f32.mrf.mxu2  ;;  %v12532_v3 = vsub.f32 %v12530_v14, %v12531_v15  ;;  %v9556_v32 = vadd.f32 %v20798_v8, %v20797_v34  ;;  %v8762_v10 = vadd.f32 %v20803_v23, %v8732_v51  ;;  %v20810_v51 = vld [vmem:[#allocation120_spill] sm:$0xff]  ;;  %v20812_v8 = vld [vmem:[#allocation107_spill] sm:$0xff] }
 0xbdd   :  { %20786 = vst [vmem:[#allocation13_spill] sm:$0xff] %v19166_v60  ;;  %v11198_v27 = vadd.f32 %v11197_v40, %v11158_v18  ;;  %v19174_v2 = vpop.permute.xlu2 %12438  ;;  %12284 = vmatmul.f32.vlgmr.msrb.gmra.mxu0 %v18855_v50  ;;  %v8012_v50 = vadd.f32 %v20793_v30, %v7985_v19  ;;  %v8138_v26 = vadd.f32 %v20794_v24, %v8108_v52  ;;  %v19199_v18 = vand.u32 4294901760, %v12470_v28  ;;  %v20806_v52 = vld [vmem:[#allocation118_spill] sm:$0xff]  ;;  %v20816_v23 = vld [vmem:[#allocation47_spill] sm:$0xff] }
 0xbde   :  { %v12456_v13 = vsel %vm1706_vm9, %v12437_v55, %v19174_v2  ;;  %v11257_v20 = vpop.f32.mrf.mxu3  ;;  %v12533_v17 = vand.u32 4294901760, %v12532_v3  ;;  %v20805_v3 = vld [vmem:[#allocation95_spill] sm:$0xff] }
 0xbdf   :  { %v11228_v59 = vadd.f32 %v11227_v5, %v11198_v27  ;;  %v19182_v54 = vand.u32 4294901760, %v12456_v13  ;;  %12314 = vmatmul.f32.vlgmr.msrb.gmra.mxu1 %v18880_v1  ;;  %v20796_v1 = vld [vmem:[#allocation73_spill] sm:$0xff]  ;;  %v8171_v39 = vadd.f32 %v20802_v57, %v8138_v26  ;;  %v19209_v5 = vand.u32 4294901760, %v19190_v33  ;;  %v20815_v57 = vld [vmem:[#allocation79_spill] sm:$0xff] }
 0xbe0   :  { %12534 = vmatpush.msra.mxu1 %v12533_v17  ;;  %v8671_v14 = vadd.f32 %v20796_v1, %v8012_v50  ;;  %v9645_v27 = vadd.f32 %v20805_v3, %v9612_v29  ;;  %v20809_v26 = vld [vmem:[#allocation33_spill] sm:$0xff] }
 0xbe1   :  { %v12536_v55 = vsub.f32 %v12456_v13, %v19182_v54  ;;  %v11258_v22 = vadd.f32 %v11257_v20, %v11228_v59  ;;  %12497 = vmatpush.msra.mxu0 %v19182_v54  ;;  %12598 = vmatpush.msra.mxu3 %v19182_v54  ;;  %v8795_v13 = vadd.f32 %v20806_v52, %v8762_v10  ;;  %v20807_v20 = vld [vmem:[#allocation42_spill] sm:$0xff] }
 0xbe2   :  { %12351 = vmatmul.f32.gmra.mxu2 %v18876_v4  ;;  %v11166_v56 = vpop.f32.mrf.mxu0  ;;  %v8706_v9 = vadd.f32 %v20804_v43, %v8671_v14  ;;  %v9587_v17 = vadd.f32 %v20807_v20, %v9556_v32  ;;  %v19223_v59 = vsub.f32 %v12470_v28, %v19199_v18  ;;  %v9672_v44 = vadd.f32 %v20808_v11, %v9645_v27  ;;  %v20819_v52 = vld [vmem:[#allocation10_spill] sm:$0xff] }
 0xbe3   :  { %12629 = vmatpush.msrb.mxu0 %v12531_v15  ;;  %12378 = vmatmul.f32.gmra.mxu3 %v18876_v4  ;;  %v12537_v38 = vand.u32 4294901760, %v12536_v55  ;;  %v8113_v61 = vadd.f32 %v20809_v26, %v8082_v21  ;;  %v10530_v14 = vadd.f32 %v18915_v58, %v10503_v53  ;;  %v8198_v32 = vadd.f32 %v20812_v8, %v8171_v39  ;;  %v20825_v26 = vld [vmem:[#allocation5_spill] sm:$0xff] }
 0xbe4   :  { %12569 = vmatpush.msra.mxu2 %v12536_v55  ;;  %v11201_v40 = vpop.f32.mrf.mxu1  ;;  %v11232_v15 = vpop.f32.mrf.mxu2  ;;  %v19242_v46 = vand.u32 4294901760, %v19223_v59  ;;  %v9618_v29 = vadd.f32 %v20814_v62, %v9587_v17 }
 0xbe5   :  { %v11202_v19 = vadd.f32 %v11201_v40, %v11166_v56  ;;  %12633 = vmatpush.msrb.mxu0 %v12537_v38  ;;  %v19214_v4 = vpop.permute.xlu2 %12450  ;;  %v12538_v6 = vsub.f32 %v12536_v55, %v12537_v38  ;;  %v8737_v55 = vadd.f32 %v20810_v51, %v8706_v9  ;;  %v20813_v56 = vld [vmem:[#allocation65_spill] sm:$0xff]  ;;  %v8853_v10 = vadd.f32 %v20816_v23, %v8198_v32  ;;  %v20826_v51 = vld [vmem:[#allocation82_spill] sm:$0xff]  ;;  %v20828_v32 = vld [vmem:[#allocation91_spill] sm:$0xff] }
 0xbe6   :  { %v12461_v41 = vsel %vm1706_vm9, %v19141_v42, %v19214_v4  ;;  %v11263_v36 = vpop.f32.mrf.mxu3  ;;  %12289 = vmatmul.f32.gmra.mxu0 %v18887_v63  ;;  %v12501_v63 = vsub.f32 %v19190_v33, %v19209_v5  ;;  %v20811_v42 = vld [vmem:[#allocation77_spill] sm:$0xff]  ;;  %v12509_v17 = vsub.f32 %v19223_v59, %v19242_v46  ;;  %v20831_v23 = vld [vmem:[#allocation11_spill] sm:$0xff] }
 0xbe7   :  { %v11233_v30 = vadd.f32 %v11232_v15, %v11202_v19  ;;  %v12474_v50 = vsel %vm7179_vm14, %v12461_v41, 0  ;;  %12320 = vmatmul.f32.gmra.mxu1 %v18910_v16  ;;  %v12539_v24 = vand.u32 4294901760, %v12538_v6  ;;  %v8822_v28 = vadd.f32 %v20811_v42, %v8795_v13  ;;  %v20817_v15 = vld [vmem:[#allocation126_spill] sm:$0xff]  ;;  %v20820_v41 = vld [vmem:[#allocation87_spill] sm:$0xff] }
 0xbe8   :  { %v19230_v1 = vand.u32 4294901760, %v12474_v50  ;;  %v8144_v16 = vadd.f32 %v20813_v56, %v8113_v61  ;;  %v8768_v39 = vadd.f32 %v20815_v57, %v8737_v55  ;;  %v9649_v3 = vadd.f32 %v20817_v15, %v9618_v29  ;;  %v20818_v19 = vld [vmem:[#allocation30_spill] sm:$0xff] }
 0xbe9   :  { %v11264_v34 = vadd.f32 %v11263_v36, %v11233_v30  ;;  %12540 = vmatpush.msra.mxu1 %v12539_v24  ;;  %v9870_v58 = vadd.f32 %v9672_v44, %v8822_v28  ;;  %v20821_v36 = vld [vmem:[#allocation15_spill] sm:$0xff]  ;;  %v20822_v44 = vld [vmem:[#allocation96_spill] sm:$0xff]  ;;  %v20827_v42 = vld [vmem:[#allocation102_spill] sm:$0xff]  ;;  %v19278_v8 = vand.u32 4294901760, %v12509_v17 }
 0xbea   :  { %v19239_v48 = vsub.f32 %v12474_v50, %v19230_v1  ;;  %12572 = vmatmul.f32.vlgmr.msra.gmra.mxu2 %v19190_v33  ;;  %v11290_v21 = vpop.f32.mrf.mxu0  ;;  %v8175_v6 = vadd.f32 %v20818_v19, %v8144_v16  ;;  %v8799_v13 = vadd.f32 %v20819_v52, %v8768_v39  ;;  %v9742_v11 = vadd.f32 %v20821_v36, %v20820_v41  ;;  %v20837_v17 = vld [vmem:[#allocation19_spill] sm:$0xff]  ;;  %v20838_v36 = vld [vmem:[#allocation121_spill] sm:$0xff] }
 0xbeb   :  { %12658 = vmatpush.msrb.mxu1 %v19150_v25  ;;  %12685 = vmatpush.msrb.mxu2 %v19230_v1  ;;  %v11291_v38 = vadd.f32 %v11290_v21, %v11258_v22  ;;  %v19253_v25 = vand.u32 4294901760, %v12501_v63  ;;  %v10728_v27 = vadd.f32 %v10530_v14, %v9870_v58  ;;  %v10507_v22 = vadd.f32 %v18940_v45, %v18896_v49  ;;  %v20824_v45 = vld [vmem:[#allocation7_spill] sm:$0xff] }
 0xbec   :  { %12602 = vmatmul.f32.vlgmr.msra.gmra.mxu3 %v19209_v5  ;;  %v12721_v43 = vand.u32 4294901760, %v19239_v48  ;;  %v11317_v9 = vpop.f32.mrf.mxu1  ;;  %v11348_v40 = vpop.f32.mrf.mxu2  ;;  %v9676_v30 = vadd.f32 %v20822_v44, %v9649_v3  ;;  %v8892_v24 = vadd.f32 %v20824_v45, %v8853_v10  ;;  %v8826_v61 = vadd.f32 %v20825_v26, %v8799_v13  ;;  %v20830_v58 = vld [vmem:[#allocation39_spill] sm:$0xff] }
 0xbed   :  { %12660 = vmatpush.msrb.mxu1 %v19182_v54  ;;  %v11318_v53 = vadd.f32 %v11317_v9, %v11291_v38  ;;  %v9772_v55 = vadd.f32 %v20826_v51, %v9742_v11  ;;  %v10534_v63 = vadd.f32 %v18952_v31, %v10507_v22  ;;  %v8202_v28 = vadd.f32 %v20827_v42, %v8175_v6  ;;  %v20833_v22 = vld [vmem:[#allocation14_spill] sm:$0xff]  ;;  %v20841_v51 = vld [vmem:[#allocation56_spill] sm:$0xff] }
 0xbee   :  { %v11387_v20 = vpop.f32.mrf.mxu3  ;;  %12503 = vmatmul.f32.vlgmr.msra.gmra.mxu0 %v19253_v25  ;;  %v12722_v54 = vsub.f32 %v19239_v48, %v12721_v43  ;;  %v8922_v56 = vadd.f32 %v20828_v32, %v8892_v24  ;;  %v9874_v16 = vadd.f32 %v9676_v30, %v8826_v61  ;;  %v20840_v24 = vld [vmem:[#allocation8_spill] sm:$0xff]  ;;  %v20842_v32 = vld [vmem:[#allocation9_spill] sm:$0xff] }
 0xbef   :  { %v19267_v50 = vadd.f32 %v11318_v53, %v10728_v27  ;;  %12756 = vmatpush.msra.mxu0 %v19239_v48  ;;  %12542 = vmatmul.f32.vlgmr.msra.gmra.mxu1 %v19172_v35  ;;  %v20829_v48 = vld [vmem:[#allocation89_spill] sm:$0xff]  ;;  %v8861_v38 = vadd.f32 %v20830_v58, %v8202_v28  ;;  %v20832_v27 = vld [vmem:[#allocation127_spill] sm:$0xff]  ;;  %v11388_v44 = vadd.f32 %v11387_v20, %v11348_v40 }
 0xbf0   :  { %12786 = vmatpush.msra.mxu1 %v19230_v1  ;;  %v12723_v49 = vand.u32 4294901760, %v12722_v54  ;;  %v9802_v21 = vadd.f32 %v20829_v48, %v9772_v55  ;;  %v8952_v10 = vadd.f32 %v20831_v23, %v8922_v56  ;;  %v10732_v9 = vadd.f32 %v10534_v63, %v9874_v16  ;;  %v20836_v54 = vld [vmem:[#allocation122_spill] sm:$0xff]  ;;  %v12443_v63 = vpop.permute.xlu2 %12442  ;;  %v19304_v56 = vld [vmem:[#allocation3 + $0x20] sm:$0x3f]  ;;  %v20843_v48 = vld [vmem:[#allocation49_spill] sm:$0xff] }
 0xbf1   :  { %20823 = vst [vmem:[#allocation94_spill] sm:$0xff] %v19267_v50  ;;  %v9746_v53 = vadd.f32 %v20833_v22, %v20832_v27 }
 0xbf2   :  { %12577 = vmatmul.f32.gmra.mxu2 %v19223_v59  ;;  %12724 = vmatpush.msrb.mxu3 %v12723_v49  ;;  %v11294_v14 = vpop.f32.mrf.mxu0  ;;  %v8985_v11 = vadd.f32 %v20838_v36, %v8952_v10  ;;  %v20839_v49 = vld [vmem:[#allocation40_spill] sm:$0xff]  ;;  %v20848_v36 = vld [vmem:[#allocation6_spill] sm:$0xff] }
 0xbf3   :  { %v11295_v62 = vadd.f32 %v11294_v14, %v11264_v34  ;;  %v12441_v29 = vpop.permute.xlu1 %12440  ;;  %v20834_v34 = vld [vmem:[#allocation45_spill] sm:$0xff]  ;;  %v9777_v41 = vadd.f32 %v20837_v17, %v9746_v53 }
 0xbf4   :  { %12608 = vmatmul.f32.gmra.mxu3 %v19242_v46  ;;  %v11321_v31 = vpop.f32.mrf.mxu1  ;;  %v11356_v57 = vpop.f32.mrf.mxu2  ;;  %v12457_v39 = vsel %vm1706_vm9, %v19174_v2, %v12441_v29  ;;  %v9835_v6 = vadd.f32 %v20834_v34, %v9802_v21  ;;  %v8896_v2 = vadd.f32 %v20836_v54, %v8861_v38  ;;  %v9012_v21 = vadd.f32 %v20843_v48, %v8985_v11  ;;  %v20844_v38 = vld [vmem:[#allocation129_spill] sm:$0xff] }
 0xbf5   :  { %v11322_v15 = vadd.f32 %v11321_v31, %v11295_v62  ;;  %v12686_v3 = vand.u32 4294901760, %v12457_v39  ;;  %v9808_v26 = vadd.f32 %v20840_v24, %v9777_v41 }
 0xbf6   :  { %v11391_v19 = vpop.f32.mrf.mxu3  ;;  %12511 = vmatmul.f32.gmra.mxu0 %v19278_v8  ;;  %v8927_v45 = vadd.f32 %v20839_v49, %v8896_v2  ;;  %v9862_v55 = vadd.f32 %v20841_v51, %v9835_v6  ;;  %v20846_v6 = vld [vmem:[#allocation4_spill] sm:$0xff] }
 0xbf7   :  { %v19291_v52 = vadd.f32 %v11322_v15, %v10732_v9  ;;  %v12726_v13 = vsub.f32 %v12457_v39, %v12686_v3  ;;  %12546 = vmatmul.f32.gmra.mxu1 %v19199_v18  ;;  %12687 = vmatpush.msrb.mxu2 %v12686_v3  ;;  %v9839_v31 = vadd.f32 %v20844_v38, %v9808_v26  ;;  %v20845_v15 = vld [vmem:[#allocation81_spill] sm:$0xff] }
 0xbf8   :  { %12788 = vmatpush.msra.mxu1 %v12686_v3  ;;  %v8958_v40 = vadd.f32 %v20842_v32, %v8927_v45  ;;  %v12458_v39 = vsel %vm1706_vm9, %v12441_v29, %v12443_v63  ;;  %v9871_v10 = vadd.f32 %v9862_v55, %v9012_v21  ;;  %v11392_v34 = vadd.f32 %v11391_v19, %v11356_v57 }
 0xbf9   :  { %20835 = vst [vmem:[#allocation55_spill] sm:$0xff] %v19291_v52  ;;  %12819 = vmatpush.msra.mxu2 %v12721_v43  ;;  %12759 = vmatpush.msra.mxu0 %v12726_v13  ;;  %v12727_v30 = vand.u32 4294901760, %v12726_v13  ;;  %v19317_v53 = vand.u32 4294901760, %v12458_v39 }
 0xbfa   :  { %12693 = vmatmul.f32.vlgmr.msrb.gmra.mxu2 %v19253_v25  ;;  %v11417_v61 = vpop.f32.mrf.mxu0  ;;  %v8989_v27 = vadd.f32 %v20845_v15, %v8958_v40  ;;  %v10729_v22 = vadd.f32 %v18994_v47, %v9871_v10  ;;  %v19358_v15 = vld [vmem:[#allocation3 + $0x10] sm:$0x3f] }
 0xbfb   :  { %v11418_v42 = vadd.f32 %v11417_v61, %v11388_v44  ;;  %v19301_v28 = vpop.permute.xlu1 %13254  ;;  %12823 = vmatpush.msra.mxu2 %v12727_v30  ;;  %v12728_v14 = vsub.f32 %v12726_v13, %v12727_v30  ;;  %v9866_v13 = vadd.f32 %v20846_v6, %v9839_v31  ;;  %v19325_v44 = vld [vmem:[#allocation3 + $0x30] sm:$0xff]  ;;  %v12916_v19 = vsub.f32 %v12458_v39, %v19317_v53  ;;  %v12455_v30 = vpop.permute.xlu2 %12454 }
 0xbfc   :  { %v11447_v43 = vpop.f32.mrf.mxu1  ;;  %v11480_v20 = vpop.f32.mrf.mxu2  ;;  %v13275_v16 = vmul.f32 %v19304_v56, %v19301_v28  ;;  %v9016_v11 = vadd.f32 %v20848_v36, %v8989_v27  ;;  %v13270_v47 = vmul.f32 %v19325_v44, %v19301_v28 }
 0xbfd   :  { %v11448_v62 = vadd.f32 %v11447_v43, %v11418_v42  ;;  %v12729_v58 = vand.u32 4294901760, %v12728_v14 }
 0xbfe   :  { %v11507_v23 = vpop.f32.mrf.mxu3  ;;  %12635 = vmatmul.f32.vlgmr.msrb.gmra.mxu0 %v19172_v35  ;;  %13304 = vrot.lane.b32.xlu2 %v13275_v16, %s15143_s18  ;;  %v9875_v26 = vadd.f32 %v9866_v13, %v9016_v11  ;;  %v12917_v16 = vand.u32 4294901760, %v12916_v19  ;;  %v19371_v13 = vld [vmem:[%s20187_s8 + $0x8] sm:$0x3]  ;;  %v19380_v11 = vld [vmem:[#allocation3 + $0x58] sm:$0xff] }
 0xbff   :  { %v11481_v9 = vadd.f32 %v11480_v20, %v11448_v62  ;;  %12662 = vmatmul.f32.vlgmr.msrb.gmra.mxu1 %v19172_v35  ;;  %12730 = vmatpush.msrb.mxu3 %v12729_v58 }
 0xc00   :  { %12732 = vmatmul.f32.vlgmr.msrb.gmra.mxu3 %v19172_v35  ;;  %v10733_v43 = vadd.f32 %v19015_v12, %v9875_v26  ;;  %v12918_v39 = vsub.f32 %v12916_v19, %v12917_v16 }
 0xc01   :  { %v11508_v29 = vadd.f32 %v11507_v23, %v11481_v9  ;;  %12848 = vmatpush.msra.mxu3 %v19230_v1 }
 0xc02   :  { %12701 = vmatmul.f32.gmra.mxu2 %v19278_v8  ;;  %v11422_v54 = vpop.f32.mrf.mxu0 }
 0xc03   :  { %v19322_v2 = vadd.f32 %v11508_v29, %v10729_v22  ;;  %v11423_v17 = vadd.f32 %v11422_v54, %v11392_v34  ;;  %12850 = vmatpush.msra.mxu3 %v12686_v3  ;;  %v12445_v41 = vpop.permute.xlu1 %12444  ;;  %v12919_v29 = vand.u32 4294901760, %v12918_v39  ;;  %v15141_v39 = vld [vmem:[%s20187_s8] sm:$0xff] }
 0xc04   :  { %v11453_v57 = vpop.f32.mrf.mxu1  ;;  %v12459_v1 = vsel %vm1706_vm9, %v12443_v63, %v12445_v41  ;;  %v12453_v24 = vpop.permute.xlu0 %12452  ;;  %v19377_v41 = vld [vmem:[#allocation3 + $0x8] sm:$0xff] }
 0xc05   :  { %20847 = vst [vmem:[#allocation62_spill] sm:$0xff] %v19322_v2  ;;  %v11454_v49 = vadd.f32 %v11453_v57, %v11423_v17  ;;  %v19331_v45 = vand.u32 4294901760, %v12459_v1  ;;  %v11484_v3 = vpop.f32.mrf.mxu2  ;;  %v12462_v61 = vsel %vm1706_vm9, %v19214_v4, %v12453_v24  ;;  %v12463_v51 = vsel %vm1706_vm9, %v12453_v24, %v12455_v30  ;;  %v19392_v57 = vld [vmem:[%s20180_s1 + $0x20] ss:$8 sm:$0xf] }
 0xc06   :  { %12639 = vmatmul.f32.gmra.mxu0 %v19199_v18  ;;  %13294 = vrot.lane.b32.xlu2 %v13270_v47, %s15143_s18  ;;  %v12476_v42 = vsel %vm7179_vm14, %v12462_v61, 0  ;;  %v12478_v14 = vsel %vm7179_vm14, %v12463_v51, 0  ;;  %v11511_v4 = vpop.f32.mrf.mxu3  ;;  %v19400_v30 = vld [vmem:[#allocation3 + $0x50] sm:$0x3f]  ;;  %v19418_v51 = vld [vmem:[#allocation3 + $0x38] sm:$0xff] }
 0xc07   :  { %v11485_v55 = vadd.f32 %v11484_v3, %v11454_v49  ;;  %v19339_v63 = vsub.f32 %v12459_v1, %v19331_v45  ;;  %12666 = vmatmul.f32.gmra.mxu1 %v19199_v18  ;;  %v12874_v32 = vand.u32 4294901760, %v12476_v42  ;;  %v19344_v40 = vand.u32 4294901760, %v12478_v14  ;;  %v19414_v3 = vld [vmem:[#allocation3 + $0x40] sm:$0xff] }
 0xc08   :  { %12736 = vmatmul.f32.gmra.mxu3 %v19199_v18 }
 0xc09   :  { %v11512_v20 = vadd.f32 %v11511_v4, %v11485_v55  ;;  %v12910_v48 = vsub.f32 %v12476_v42, %v12874_v32  ;;  %v13100_v21 = vsub.f32 %v12478_v14, %v19344_v40  ;;  %12875 = vmatpush.msrb.mxu0 %v12874_v32  ;;  %12976 = vmatpush.msrb.mxu3 %v12874_v32  ;;  %v13107_v58 = vand.u32 4294901760, %v19339_v63 }
 0xc0a   :  { %12825 = vmatmul.f32.vlgmr.msra.gmra.mxu2 %v19172_v35  ;;  %v14109_v4 = vperm.slane %v19392_v57, 1 }
 0xc0b   :  { %v19350_v62 = vadd.f32 %v11512_v20, %v10733_v43  ;;  %v13101_v38 = vand.u32 4294901760, %v13100_v21  ;;  %12877 = vmatpush.msrb.mxu0 %v19317_v53  ;;  %12946 = vmatpush.msrb.mxu2 %v12910_v48  ;;  %v12911_v31 = vand.u32 4294901760, %v12910_v48  ;;  %v13108_v22 = vsub.f32 %v19339_v63, %v13107_v58  ;;  %v19439_v43 = vld [vmem:[#allocation3 + $0x18] sm:$0x3f] }
 0xc0c   :  { %12978 = vmatpush.msrb.mxu3 %v19317_v53  ;;  %v13257_v12 = vpop.permute.xlu0 %13256 }
 0xc0d   :  { %20849 = vst [vmem:[#allocation18_spill] sm:$0xff] %v19350_v62  ;;  %v13262_v23 = vsel %vm225_vm7, %v19301_v28, %v13257_v12  ;;  %12949 = vmatpush.msrb.mxu2 %v12916_v19  ;;  %v12912_v10 = vsub.f32 %v12910_v48, %v12911_v31  ;;  %v13102_v9 = vsub.f32 %v13100_v21, %v13101_v38  ;;  %v13109_v6 = vand.u32 4294901760, %v13108_v22  ;;  %v19398_v19 = vpop.f32.mrf.mxu0  ;;  %v19424_v14 = vpop.f32.mrf.mxu2 }
 0xc0e   :  { %12762 = vmatmul.f32.vlgmr.msra.gmra.mxu0 %v19190_v33  ;;  %v13276_v27 = vmul.f32 %v19358_v15, %v13262_v23  ;;  %13282 = vrot.lane.b32.xlu2 %v19371_v13, %s15165_s12  ;;  %v13271_v36 = vmul.f32 %v19377_v41, %v13262_v23  ;;  %v14111_v23 = vperm.slane %v19392_v57, 3 }
 0xc0f   :  { %13009 = vmatpush.msra.mxu0 %v12911_v31  ;;  %13065 = vmatpush.msra.mxu2 %v19344_v40  ;;  %v12913_v34 = vand.u32 4294901760, %v12912_v10  ;;  %v13103_v28 = vand.u32 4294901760, %v13102_v9 }
 0xc10   :  { %12792 = vmatmul.f32.vlgmr.msra.gmra.mxu1 %v19209_v5  ;;  %12852 = vmatmul.f32.vlgmr.msra.gmra.mxu3 %v19172_v35 }
 0xc11   :  { %13013 = vmatpush.msra.mxu0 %v12917_v16  ;;  %13306 = vrot.lane.b32.xlu1 %v13276_v27, %s15143_s18 }
 0xc12   :  { %13067 = vmatpush.msra.mxu2 %v19331_v45  ;;  %12914 = vmatpush.msrb.mxu1 %v12913_v34 }
 0xc13   :  { %12829 = vmatmul.f32.gmra.mxu2 %v19199_v18  ;;  %13104 = vmatpush.msra.mxu3 %v13103_v28 }
 0xc14   :  { %12920 = vmatpush.msrb.mxu1 %v12919_v29  ;;  %v13259_v54 = vpop.permute.xlu0 %13258 }
 0xc15   :  { %13110 = vmatpush.msra.mxu3 %v13109_v6  ;;  %v13263_v17 = vsel %vm225_vm7, %v13257_v12, %v13259_v54  ;;  %v19446_v16 = vpop.f32.mrf.mxu2 }
 0xc16   :  { %13038 = vmatpush.msra.mxu1 %v12874_v32  ;;  %12767 = vmatmul.f32.gmra.mxu0 %v19223_v59  ;;  %v13272_v47 = vmul.f32 %v19380_v11, %v13263_v17  ;;  %v13277_v49 = vmul.f32 %v19400_v30, %v13263_v17  ;;  %v19431_v32 = vpop.f32.mrf.mxu1 }
 0xc18   :  { %13040 = vmatpush.msra.mxu1 %v19317_v53  ;;  %12856 = vmatmul.f32.gmra.mxu3 %v19199_v18  ;;  %v14108_v53 = vperm.slane %v19392_v57, 0 }
 0xc19   :  { %12798 = vmatmul.f32.gmra.mxu1 %v19242_v46  ;;  %13296 = vrot.lane.b32.xlu1 %v13271_v36, %s15143_s18 }
 0xc1a   :  { %13298 = vrot.lane.b32.xlu0 %v13272_v47, %s15143_s18 }
 0xc1b   :  { %12952 = vmatmul.f32.vlgmr.msrb.gmra.mxu2 %v19190_v33 }
 0xc1c   :  { %13199 = vmatpush.msrb.mxu2 %v13101_v38  ;;  %v19394_v1 = vpop.permute.xlu0 %13280 }
 0xc1d   :  { %v19462_v38 = vpop.f32.mrf.mxu2 }
 0xc1e   :  { %13203 = vmatpush.msrb.mxu2 %v13107_v58  ;;  %12883 = vmatmul.f32.vlgmr.msrb.gmra.mxu0 %v19253_v25  ;;  %v19452_v48 = vpop.f32.mrf.mxu1 }
 0xc1f   :  { %13136 = vmatpush.msrb.mxu0 %v13100_v21  ;;  %v14110_v21 = vperm.slane %v19392_v57, 2 }
 0xc20   :  { %12982 = vmatmul.f32.vlgmr.msrb.gmra.mxu3 %v19209_v5 }
 0xc21   :  { %12922 = vmatmul.f32.vlgmr.msrb.gmra.mxu1 %v19172_v35  ;;  %13139 = vmatpush.msrb.mxu0 %v19339_v63  ;;  %v19421_v63 = vld [vmem:[#allocation3 + $0x28] sm:$0x3f] }
 0xc22   :  { %13166 = vmatpush.msrb.mxu1 %v19344_v40  ;;  %13308 = vrot.lane.b32.xlu1 %v13277_v49, %s15143_s18 }
 0xc23   :  { %14112 = vrot.lane.b32.xlu0 %v14108_v53, %s15150_s13  ;;  %12957 = vmatmul.f32.gmra.mxu2 %v19223_v59 }
 0xc24   :  { %13168 = vmatpush.msrb.mxu1 %v19331_v45  ;;  %13228 = vmatpush.msrb.mxu3 %v19344_v40  ;;  %v13261_v24 = vpop.permute.xlu0 %13260  ;;  %v19436_v40 = vpop.f32.mrf.mxu3 }
 0xc25   :  { %v13264_v26 = vsel %vm225_vm7, %v13259_v54, %v13261_v24  ;;  %v13274_v61 = vmul.f32 %v19414_v3, %v13261_v24  ;;  %v13279_v20 = vmul.f32 %v19439_v43, %v13261_v24  ;;  %v19479_v10 = vpop.f32.mrf.mxu2 }
 0xc26   :  { %13230 = vmatpush.msrb.mxu3 %v19331_v45  ;;  %12891 = vmatmul.f32.gmra.mxu0 %v19278_v8  ;;  %v13273_v55 = vmul.f32 %v19418_v51, %v13264_v26  ;;  %v13278_v42 = vmul.f32 %v19421_v63, %v13264_v26  ;;  %v19428_v45 = vpop.f32.mrf.mxu0 }
 0xc28   :  { %12988 = vmatmul.f32.gmra.mxu3 %v19242_v46  ;;  %13310 = vrot.lane.b32.xlu2 %v13278_v42, %s15143_s18 }
 0xc29   :  { %12926 = vmatmul.f32.gmra.mxu1 %v19199_v18 }
 0xc2a   :  { %13300 = vrot.lane.b32.xlu1 %v13273_v55, %s15143_s18 }
 0xc2b   :  { %13302 = vrot.lane.b32.xlu0 %v13274_v61, %s15143_s18  ;;  %13073 = vmatmul.f32.vlgmr.msra.gmra.mxu2 %v19253_v25 }
 0xc2c   :  { %v19455_v58 = vpop.f32.mrf.mxu3 }
 0xc2e   :  { %13015 = vmatmul.f32.vlgmr.msra.gmra.mxu0 %v19172_v35  ;;  %v19449_v25 = vpop.f32.mrf.mxu0 }
 0xc30   :  { %13112 = vmatmul.f32.vlgmr.msra.gmra.mxu3 %v19172_v35  ;;  %14114 = vrot.lane.b32.xlu2 %v14109_v4, %s15150_s13  ;;  %v13326_v4 = vsel %vm7431_vm6, %v19394_v1, 0 }
 0xc31   :  { %13042 = vmatmul.f32.vlgmr.msra.gmra.mxu1 %v19172_v35 }
 0xc32   :  { %13312 = vrot.lane.b32.xlu1 %v13279_v20, %s15143_s18 }
 0xc33   :  { %13081 = vmatmul.f32.gmra.mxu2 %v19278_v8  ;;  %v19466_v8 = vpop.f32.mrf.mxu1 }
 0xc34   :  { %v19469_v12 = vpop.f32.mrf.mxu3 }
 0xc36   :  { %13019 = vmatmul.f32.gmra.mxu0 %v19199_v18  ;;  %v19464_v31 = vpop.f32.mrf.mxu0 }
 0xc38   :  { %13116 = vmatmul.f32.gmra.mxu3 %v19199_v18  ;;  %14116 = vrot.lane.b32.xlu2 %v14110_v21, %s15150_s13  ;;  %v19533_v21 = vand.u32 4294901760, %v13326_v4 }
 0xc39   :  { %13046 = vmatmul.f32.gmra.mxu1 %v19199_v18 }
 0xc3b   :  { %13205 = vmatmul.f32.vlgmr.msrb.gmra.mxu2 %v19172_v35  ;;  %v19484_v9 = vpop.f32.mrf.mxu1 }
 0xc3e   :  { %13142 = vmatmul.f32.vlgmr.msrb.gmra.mxu0 %v19190_v33  ;;  %v19482_v33 = vpop.f32.mrf.mxu0 }
 0xc40   :  { %13232 = vmatmul.f32.vlgmr.msrb.gmra.mxu3 %v19172_v35  ;;  %14138 = vrot.lane.b32.xlu2 %v15141_v39, %s15146_s19  ;;  %v19489_v35 = vpop.f32.mrf.mxu3  ;;  %v19536_v39 = vsub.f32 %v13326_v4, %v19533_v21 }
 0xc41   :  { %13172 = vmatmul.f32.vlgmr.msrb.gmra.mxu1 %v19209_v5  ;;  %v19491_v5 = vpop.f32.mrf.mxu2 }
 0xc43   :  { %13209 = vmatmul.f32.gmra.mxu2 %v19199_v18  ;;  %v19495_v22 = vpop.f32.mrf.mxu1 }
 0xc46   :  { %13147 = vmatmul.f32.gmra.mxu0 %v19223_v59  ;;  %v19493_v27 = vpop.f32.mrf.mxu0 }
 0xc48   :  { %13236 = vmatmul.f32.gmra.mxu3 %v19199_v18  ;;  %14118 = vrot.lane.b32.xlu2 %v14111_v23, %s15150_s13  ;;  %v19497_v34 = vpop.f32.mrf.mxu3 }
 0xc49   :  { %13178 = vmatmul.f32.gmra.mxu1 %v19242_v46  ;;  %20850 = vst [vmem:[#allocation68_spill] sm:$0xff] %v19497_v34  ;;  %v19499_v59 = vpop.f32.mrf.mxu2 }
 0xc4a   :  { %20851 = vst [vmem:[#allocation48_spill] sm:$0xff] %v19499_v59 }
 0xc4b   :  { %v19503_v29 = vpop.f32.mrf.mxu1 }
 0xc4c   :  { %20853 = vst [vmem:[#allocation92_spill] sm:$0xff] %v19503_v29 }
 0xc4e   :  { %v19501_v28 = vpop.f32.mrf.mxu0 }
 0xc4f   :  { %20852 = vst [vmem:[#allocation125_spill] sm:$0xff] %v19501_v28 }
 0xc50   :  { %v19505_v46 = vpop.f32.mrf.mxu3 }
 0xc51   :  { %20854 = vst [vmem:[#allocation109_spill] sm:$0xff] %v19505_v46  ;;  %v19507_v18 = vpop.f32.mrf.mxu2 }
 0xc52   :  { %20855 = vst [vmem:[#allocation35_spill] sm:$0xff] %v19507_v18 }
 0xc53   :  { %v19511_v54 = vpop.f32.mrf.mxu1 }
 0xc54   :  { %20857 = vst [vmem:[#allocation21_spill] sm:$0xff] %v19511_v54 }
 0xc56   :  { %v19509_v6 = vpop.f32.mrf.mxu0 }
 0xc57   :  { %20856 = vst [vmem:[#allocation86_spill] sm:$0xff] %v19509_v6 }
 0xc58   :  { %v19513_v17 = vpop.f32.mrf.mxu3  ;;  %v13305_v36 = vpop.permute.xlu2 %13304 }
 0xc59   :  { %20858 = vst [vmem:[#allocation54_spill] sm:$0xff] %v19513_v17  ;;  %v19515_v47 = vpop.f32.mrf.mxu2 }
 0xc5a   :  { %20859 = vst [vmem:[#allocation24_spill] sm:$0xff] %v19515_v47 }
 0xc5b   :  { %v19519_v53 = vpop.f32.mrf.mxu1 }
 0xc5c   :  { %20861 = vst [vmem:[#allocation44_spill] sm:$0xff] %v19519_v53 }
 0xc5e   :  { %v19517_v57 = vpop.f32.mrf.mxu0 }
 0xc5f   :  { %20860 = vst [vmem:[#allocation106_spill] sm:$0xff] %v19517_v57 }
 0xc60   :  { %v19521_v49 = vpop.f32.mrf.mxu3  ;;  %v13295_v24 = vpop.permute.xlu2 %13294 }
 0xc61   :  { %20862 = vst [vmem:[#allocation57_spill] sm:$0xff] %v19521_v49  ;;  %v19523_v26 = vpop.f32.mrf.mxu2 }
 0xc62   :  { %20863 = vst [vmem:[#allocation67_spill] sm:$0xff] %v19523_v26 }
 0xc63   :  { %v19527_v55 = vpop.f32.mrf.mxu1 }
 0xc64   :  { %20865 = vst [vmem:[#allocation22_spill] sm:$0xff] %v19527_v55 }
 0xc66   :  { %v19525_v61 = vpop.f32.mrf.mxu0 }
 0xc67   :  { %20864 = vst [vmem:[#allocation111_spill] sm:$0xff] %v19525_v61 }
 0xc68   :  { %v13283_v42 = vpop.permute.xlu2 %13282  ;;  %v19531_v20 = vpop.f32.mrf.mxu3 }
 0xc69   :  { %20866 = vst [vmem:[#allocation23_spill] sm:$0xff] %v19531_v20  ;;  %v19538_v23 = vpop.f32.mrf.mxu2  ;;  %v13328_v2 = vsel %vm7431_vm6, %v13283_v42, 0  ;;  %v19550_v20 = vand.u32 4294901760, %v19536_v39 }
 0xc6a   :  { %20867 = vst [vmem:[#allocation46_spill] sm:$0xff] %v19538_v23  ;;  %v19554_v49 = vand.u32 4294901760, %v13328_v2 }
 0xc6b   :  { %v19543_v26 = vpop.f32.mrf.mxu1 }
 0xc6c   :  { %20869 = vst [vmem:[#allocation66_spill] sm:$0xff] %v19543_v26 }
 0xc6e   :  { %v19540_v62 = vpop.f32.mrf.mxu0 }
 0xc6f   :  { %20868 = vst [vmem:[#allocation108_spill] sm:$0xff] %v19540_v62 }
 0xc70   :  { %v19552_v4 = vpop.f32.mrf.mxu3 }
 0xc71   :  { %20870 = vst [vmem:[#allocation130_spill] sm:$0xff] %v19552_v4  ;;  %v19568_v55 = vpop.f32.mrf.mxu2 }
 0xc72   :  { %20871 = vst [vmem:[#allocation131_spill] sm:$0xff] %v19568_v55 }
 0xc73   :  { %v19573_v17 = vpop.f32.mrf.mxu1 }
 0xc74   :  { %20873 = vst [vmem:[#allocation113_spill] sm:$0xff] %v19573_v17 }
 0xc76   :  { %v19571_v53 = vpop.f32.mrf.mxu0 }
 0xc77   :  { %20872 = vst [vmem:[#allocation97_spill] sm:$0xff] %v19571_v53 }
 0xc78   :  { %v19580_v60 = vpop.f32.mrf.mxu3 }
 0xc79   :  { %20874 = vst [vmem:[#allocation41_spill] sm:$0xff] %v19580_v60  ;;  %v19597_v17 = vpop.f32.mrf.mxu2 }
 0xc7a   :  { %20875 = vst [vmem:[#allocation16_spill] sm:$0xff] %v19597_v17 }
 0xc7e   :  { %v19603_v29 = vpop.f32.mrf.mxu0 }
 0xc82   :  { %v19546_v50 = vpop.permute.xlu2 %13310 }
 0xc83   :  { %v13307_v52 = vpop.permute.xlu1 %13306 }
 0xc84   :  { %v13318_v61 = vsel %vm190_vm5, %v13305_v36, %v13307_v52  ;;  %v19562_v36 = vsub.f32 %v13328_v2, %v19554_v49 }
 0xc85   :  { %v13330_v1 = vsel %vm7179_vm14, %v13318_v61, 0  ;;  %v13359_v61 = vsub.f32 %v19536_v39, %v19550_v20 }
 0xc86   :  { %v19556_v23 = vand.u32 4294901760, %v13330_v1  ;;  %v19576_v2 = vand.u32 4294901760, %v19562_v36 }
 0xc87   :  { %v19578_v18 = vand.u32 4294901760, %v13359_v61 }
 0xc88   :  { %v13388_v42 = vsub.f32 %v13330_v1, %v19556_v23  ;;  %13353 = vmatpush.msra.mxu0 %v19556_v23  ;;  %13454 = vmatpush.msra.mxu3 %v19556_v23  ;;  %v13367_v61 = vsub.f32 %v19562_v36, %v19576_v2 }
 0xc8a   :  { %v13389_v62 = vand.u32 4294901760, %v13388_v42  ;;  %13424 = vmatpush.msra.mxu2 %v13388_v42  ;;  %v14115_v1 = vpop.permute.xlu2 %14114  ;;  %v19601_v37 = vand.u32 4294901760, %v13367_v61 }
 0xc8b   :  { %v13297_v26 = vpop.permute.xlu1 %13296 }
 0xc8c   :  { %v19566_v4 = vpop.permute.xlu0 %13298  ;;  %v13314_v47 = vsel %vm190_vm5, %v13295_v24, %v13297_v26  ;;  %v13390_v57 = vsub.f32 %v13388_v42, %v13389_v62 }
 0xc8d   :  { %v13354_v6 = vand.u32 4294901760, %v13314_v47  ;;  %v13315_v24 = vsel %vm190_vm5, %v13297_v26, %v19566_v4 }
 0xc8e   :  { %v13391_v54 = vand.u32 4294901760, %v13390_v57  ;;  %v19588_v57 = vand.u32 4294901760, %v13315_v24 }
 0xc8f   :  { %v13394_v28 = vsub.f32 %v13314_v47, %v13354_v6  ;;  %13355 = vmatpush.msra.mxu0 %v13354_v6  ;;  %13456 = vmatpush.msra.mxu3 %v13354_v6 }
 0xc90   :  { %13361 = vmatmul.f32.vlgmr.msra.gmra.mxu0 %v19578_v18  ;;  %13392 = vmatpush.msra.mxu1 %v13391_v54 }
 0xc91   :  { %13460 = vmatmul.f32.vlgmr.msra.gmra.mxu3 %v19550_v20  ;;  %13487 = vmatpush.msrb.mxu0 %v13389_v62  ;;  %v13395_v42 = vand.u32 4294901760, %v13394_v28 }
 0xc92   :  { %13427 = vmatpush.msra.mxu2 %v13394_v28  ;;  %v19595_v55 = vpop.permute.xlu2 %14116 }
 0xc93   :  { %13430 = vmatmul.f32.vlgmr.msra.gmra.mxu2 %v19536_v39  ;;  %13491 = vmatpush.msrb.mxu0 %v13395_v42  ;;  %v13396_v53 = vsub.f32 %v13394_v28, %v13395_v42  ;;  %v13584_v28 = vsub.f32 %v13315_v24, %v19588_v57  ;;  %v19614_v17 = vsel %vm966_vm10, %v14115_v1, %v19595_v55 }
 0xc94   :  { %v13309_v47 = vpop.permute.xlu1 %13308  ;;  %v14130_v24 = vmul.f32 %v19380_v11, %v19614_v17 }
 0xc95   :  { %v14113_v60 = vpop.permute.xlu0 %14112  ;;  %v13319_v26 = vsel %vm190_vm5, %v13307_v52, %v13309_v47  ;;  %v13320_v54 = vsel %vm190_vm5, %v13309_v47, %v19546_v50  ;;  %v19609_v47 = vpop.f32.mrf.mxu1 }
 0xc96   :  { %v14120_v62 = vsel %vm966_vm10, %v14113_v60, %v14115_v1  ;;  %v13332_v46 = vsel %vm7179_vm14, %v13319_v26, 0  ;;  %v14133_v59 = vmul.f32 %v19304_v56, %v14113_v60  ;;  %20876 = vst [vmem:[#allocation36_spill] sm:$0xff] %v19609_v47  ;;  %v13334_v34 = vsel %vm7179_vm14, %v13320_v54, 0  ;;  %14156 = vrot.lane.b32.xlu2 %v14130_v24, %s15148_s29  ;;  %v19645_v47 = vpop.f32.mrf.mxu2 }
 0xc97   :  { %v19606_v52 = vand.u32 4294901760, %v13332_v46  ;;  %v14134_v42 = vmul.f32 %v19358_v15, %v14120_v62  ;;  %v13397_v56 = vand.u32 4294901760, %v13396_v53  ;;  %v19622_v15 = vpop.f32.mrf.mxu3  ;;  %v19625_v26 = vand.u32 4294901760, %v13334_v34 }
 0xc98   :  { %14162 = vrot.lane.b32.xlu1 %v14133_v59, %s15148_s29  ;;  %13369 = vmatmul.f32.gmra.mxu0 %v19601_v37  ;;  %20877 = vst [vmem:[#allocation69_spill] sm:$0xff] %v19622_v15  ;;  %v13585_v53 = vand.u32 4294901760, %v13584_v28  ;;  %v14129_v24 = vmul.f32 %v19377_v41, %v14120_v62 }
 0xc99   :  { %v13578_v61 = vsub.f32 %v13332_v46, %v19606_v52  ;;  %14164 = vrot.lane.b32.xlu0 %v14134_v42, %s15148_s29  ;;  %13398 = vmatpush.msra.mxu1 %v13397_v56  ;;  %v14128_v42 = vmul.f32 %v19325_v44, %v14113_v60  ;;  %v19648_v60 = vpop.f32.mrf.mxu0 }
 0xc9a   :  { %13466 = vmatmul.f32.gmra.mxu3 %v19576_v2  ;;  %13400 = vmatmul.f32.vlgmr.msra.gmra.mxu1 %v19533_v21  ;;  %v19634_v1 = vpop.permute.xlu2 %14138 }
 0xc9b   :  { %v13579_v59 = vand.u32 4294901760, %v13578_v61  ;;  %13516 = vmatpush.msrb.mxu1 %v19556_v23  ;;  %13543 = vmatpush.msrb.mxu2 %v19606_v52  ;;  %v19641_v23 = vsub.f32 %v13334_v34, %v19625_v26 }
 0xc9c   :  { %v13301_v11 = vpop.permute.xlu1 %13300  ;;  %13435 = vmatmul.f32.gmra.mxu2 %v19562_v36  ;;  %13614 = vmatpush.msra.mxu0 %v13578_v61 }
 0xc9d   :  { %v13316_v46 = vsel %vm190_vm5, %v19566_v4, %v13301_v11  ;;  %v13580_v54 = vsub.f32 %v13578_v61, %v13579_v59  ;;  %13518 = vmatpush.msrb.mxu1 %v13354_v6  ;;  %13545 = vmatpush.msrb.mxu2 %v19588_v57  ;;  %v13586_v4 = vsub.f32 %v13584_v28, %v13585_v53  ;;  %v19655_v41 = vpop.f32.mrf.mxu1  ;;  %v13303_v34 = vpop.permute.xlu0 %13302  ;;  %v13769_v6 = vand.u32 4294901760, %v19641_v23 }
 0xc9e   :  { %v19638_v56 = vand.u32 4294901760, %v13316_v46  ;;  %13617 = vmatpush.msra.mxu0 %v13584_v28 }
 0xc9f   :  { %13644 = vmatpush.msra.mxu1 %v19606_v52  ;;  %v13581_v15 = vand.u32 4294901760, %v13580_v54  ;;  %13677 = vmatpush.msra.mxu2 %v13579_v59  ;;  %v13587_v62 = vand.u32 4294901760, %v13586_v4  ;;  %v19660_v28 = vpop.f32.mrf.mxu3  ;;  %v13317_v59 = vsel %vm190_vm5, %v13301_v11, %v13303_v34  ;;  %v13770_v11 = vsub.f32 %v19641_v23, %v13769_v6  ;;  %v19686_v34 = vpop.f32.mrf.mxu2 }
 0xca0   :  { %14152 = vrot.lane.b32.xlu1 %v14128_v42, %s15148_s29  ;;  %v19651_v44 = vsub.f32 %v13316_v46, %v19638_v56  ;;  %13493 = vmatmul.f32.vlgmr.msrb.gmra.mxu0 %v19533_v21  ;;  %v19678_v4 = vand.u32 4294901760, %v13317_v59 }
 0xca1   :  { %13646 = vmatpush.msra.mxu1 %v19588_v57  ;;  %14154 = vrot.lane.b32.xlu0 %v14129_v24, %s15148_s29 }
 0xca2   :  { %13681 = vmatpush.msra.mxu2 %v13585_v53  ;;  %13404 = vmatmul.f32.gmra.mxu1 %v19554_v49  ;;  %v14119_v46 = vpop.permute.xlu2 %14118  ;;  %v13775_v54 = vand.u32 4294901760, %v19651_v44 }
 0xca3   :  { %13582 = vmatpush.msrb.mxu3 %v13581_v15  ;;  %13733 = vmatpush.msrb.mxu0 %v19625_v26  ;;  %v14137_v42 = vmul.f32 %v19439_v43, %v14119_v46 }
 0xca4   :  { %v13313_v61 = vpop.permute.xlu1 %13312  ;;  %13551 = vmatmul.f32.vlgmr.msrb.gmra.mxu2 %v19578_v18  ;;  %v13776_v43 = vsub.f32 %v19651_v44, %v13775_v54 }
 0xca5   :  { %13588 = vmatpush.msrb.mxu3 %v13587_v62  ;;  %v13321_v53 = vsel %vm190_vm5, %v19546_v50, %v13313_v61  ;;  %13735 = vmatpush.msrb.mxu0 %v19638_v56  ;;  %v14135_v50 = vmul.f32 %v19400_v30, %v19614_v17  ;;  %v19693_v30 = vpop.f32.mrf.mxu0  ;;  %v19697_v17 = vpop.f32.mrf.mxu1  ;;  %v14122_v62 = vsel %vm966_vm10, %v19595_v55, %v14119_v46 }
 0xca6   :  { %13804 = vmatpush.msrb.mxu2 %v19641_v23  ;;  %v13336_v15 = vsel %vm7179_vm14, %v13321_v53, 0  ;;  %13590 = vmatmul.f32.vlgmr.msrb.gmra.mxu3 %v19533_v21  ;;  %v14965_v53 = vld [vmem:[%s20189_s9 + $0x8] sm:$0x3]  ;;  %v14131_v55 = vmul.f32 %v19418_v51, %v14122_v62  ;;  %v14132_v51 = vmul.f32 %v19414_v3, %v14119_v46 }
 0xca7   :  { %v19672_v24 = vand.u32 4294901760, %v13336_v15  ;;  %13706 = vmatpush.msra.mxu3 %v19606_v52  ;;  %14170 = vrot.lane.b32.xlu2 %v14137_v42, %s15148_s29  ;;  %v19699_v52 = vpop.f32.mrf.mxu3 }
 0xca8   :  { %13807 = vmatpush.msrb.mxu2 %v19651_v44  ;;  %14140 = vrot.lane.b32.xlu1 %v19371_v13, %s15146_s19  ;;  %v13771_v13 = vand.u32 4294901760, %v13770_v11  ;;  %v13964_v44 = vsub.f32 %v13317_v59, %v19678_v4  ;;  %v19718_v11 = vpop.f32.mrf.mxu2 }
 0xca9   :  { %v19689_v23 = vsub.f32 %v13336_v15, %v19672_v24  ;;  %13708 = vmatpush.msra.mxu3 %v19588_v57  ;;  %14166 = vrot.lane.b32.xlu0 %v14135_v50, %s15148_s29  ;;  %v13777_v57 = vand.u32 4294901760, %v13776_v43  ;;  %v14136_v15 = vmul.f32 %v19421_v63, %v14122_v62 }
 0xcaa   :  { %13497 = vmatmul.f32.gmra.mxu0 %v19554_v49  ;;  %13520 = vmatmul.f32.vlgmr.msrb.gmra.mxu1 %v19533_v21  ;;  %v13965_v59 = vand.u32 4294901760, %v13964_v44 }
 0xcab   :  { %13834 = vmatpush.msrb.mxu3 %v19625_v26  ;;  %13772 = vmatpush.msrb.mxu1 %v13771_v13  ;;  %v13959_v61 = vand.u32 4294901760, %v19689_v23 }
 0xcac   :  { %13559 = vmatmul.f32.gmra.mxu2 %v19601_v37  ;;  %v13966_v63 = vsub.f32 %v13964_v44, %v13965_v59 }
 0xcad   :  { %13836 = vmatpush.msrb.mxu3 %v19638_v56  ;;  %13778 = vmatpush.msrb.mxu1 %v13777_v57  ;;  %v13960_v42 = vsub.f32 %v19689_v23, %v13959_v61  ;;  %v19721_v50 = vpop.f32.mrf.mxu0  ;;  %v19724_v43 = vpop.f32.mrf.mxu1 }
 0xcae   :  { %13594 = vmatmul.f32.gmra.mxu3 %v19554_v49  ;;  %v13967_v57 = vand.u32 4294901760, %v13966_v63 }
 0xcaf   :  { %14973 = vperm.xlu2 %15095, %v14965_v53   ;;  %v19726_v13 = vpop.f32.mrf.mxu3  ;;  %v13961_v62 = vand.u32 4294901760, %v13960_v42 }
 0xcb0   :  { %14168 = vrot.lane.b32.xlu1 %v14136_v15, %s15148_s29  ;;  %v19739_v3 = vpop.f32.mrf.mxu2 }
 0xcb1   :  { %14158 = vrot.lane.b32.xlu0 %v14131_v55, %s15148_s29 }
 0xcb2   :  { %13620 = vmatmul.f32.vlgmr.msra.gmra.mxu0 %v19536_v39  ;;  %13524 = vmatmul.f32.gmra.mxu1 %v19554_v49 }
 0xcb3   :  { %13867 = vmatpush.msra.mxu0 %v13769_v6  ;;  %v14964_v6 = vld [vmem:[%s20189_s9] sm:$0xff] }
 0xcb4   :  { %13683 = vmatmul.f32.vlgmr.msra.gmra.mxu2 %v19533_v21 }
 0xcb5   :  { %13871 = vmatpush.msra.mxu0 %v13775_v54  ;;  %13923 = vmatpush.msra.mxu2 %v19672_v24  ;;  %v19742_v46 = vpop.f32.mrf.mxu0  ;;  %v19746_v54 = vpop.f32.mrf.mxu1 }
 0xcb6   :  { %13710 = vmatmul.f32.vlgmr.msra.gmra.mxu3 %v19533_v21 }
 0xcb7   :  { %13962 = vmatpush.msra.mxu3 %v13961_v62  ;;  %13925 = vmatpush.msra.mxu2 %v19678_v4  ;;  %v19748_v53 = vpop.f32.mrf.mxu3 }
 0xcb8   :  { %14160 = vrot.lane.b32.xlu1 %v14132_v51, %s15148_s29 }
 0xcb9   :  { %13968 = vmatpush.msra.mxu3 %v13967_v57  ;;  %14968 = vperm.xlu0 %15096, %v14964_v6  }
 0xcba   :  { %13625 = vmatmul.f32.gmra.mxu0 %v19562_v36  ;;  %13650 = vmatmul.f32.vlgmr.msra.gmra.mxu1 %v19550_v20 }
 0xcbb   :  { %13896 = vmatpush.msra.mxu1 %v19625_v26  ;;  %v19755_v26 = vpop.f32.mrf.mxu2 }
 0xcbc   :  { %13687 = vmatmul.f32.gmra.mxu2 %v19554_v49 }
 0xcbd   :  { %13898 = vmatpush.msra.mxu1 %v19638_v56  ;;  %v19758_v56 = vpop.f32.mrf.mxu0  ;;  %v19760_v15 = vpop.f32.mrf.mxu1 }
 0xcbe   :  { %13714 = vmatmul.f32.gmra.mxu3 %v19554_v49 }
 0xcbf   :  { %v19762_v55 = vpop.f32.mrf.mxu3 }
 0xcc0   :  { %20878 = vst [vmem:[#allocation128_spill] sm:$0xff] %v19762_v55 }
 0xcc2   :  { %13741 = vmatmul.f32.vlgmr.msrb.gmra.mxu0 %v19578_v18  ;;  %13656 = vmatmul.f32.gmra.mxu1 %v19576_v2 }
 0xcc3   :  { %13994 = vmatpush.msrb.mxu0 %v19689_v23  ;;  %v19771_v23 = vpop.f32.mrf.mxu2 }
 0xcc4   :  { %13810 = vmatmul.f32.vlgmr.msrb.gmra.mxu2 %v19536_v39  ;;  %20879 = vst [vmem:[#allocation38_spill] sm:$0xff] %v19771_v23 }
 0xcc5   :  { %13997 = vmatpush.msrb.mxu0 %v13964_v44  ;;  %14057 = vmatpush.msrb.mxu2 %v13959_v61  ;;  %v19773_v44 = vpop.f32.mrf.mxu0  ;;  %v19776_v61 = vpop.f32.mrf.mxu1 }
 0xcc6   :  { %13840 = vmatmul.f32.vlgmr.msrb.gmra.mxu3 %v19550_v20  ;;  %20880 = vst [vmem:[#allocation132_spill] sm:$0xff] %v19773_v44 }
 0xcc7   :  { %14086 = vmatpush.msrb.mxu3 %v19672_v24  ;;  %14061 = vmatpush.msrb.mxu2 %v13965_v59  ;;  %20881 = vst [vmem:[#allocation99_spill] sm:$0xff] %v19776_v61  ;;  %v19778_v59 = vpop.f32.mrf.mxu3 }
 0xcc8   :  { %20882 = vst [vmem:[#allocation115_spill] sm:$0xff] %v19778_v59 }
 0xcc9   :  { %14088 = vmatpush.msrb.mxu3 %v19678_v4 }
 0xcca   :  { %13749 = vmatmul.f32.gmra.mxu0 %v19601_v37  ;;  %13780 = vmatmul.f32.vlgmr.msrb.gmra.mxu1 %v19533_v21 }
 0xccb   :  { %14024 = vmatpush.msrb.mxu1 %v19672_v24  ;;  %v19784_v24 = vpop.f32.mrf.mxu2 }
 0xccc   :  { %13815 = vmatmul.f32.gmra.mxu2 %v19562_v36  ;;  %20883 = vst [vmem:[#allocation80_spill] sm:$0xff] %v19784_v24 }
 0xccd   :  { %14026 = vmatpush.msrb.mxu1 %v19678_v4  ;;  %v19787_v4 = vpop.f32.mrf.mxu0  ;;  %v19789_v42 = vpop.f32.mrf.mxu1 }
 0xcce   :  { %13846 = vmatmul.f32.gmra.mxu3 %v19576_v2  ;;  %20884 = vst [vmem:[#allocation34_spill] sm:$0xff] %v19787_v4 }
 0xccf   :  { %20885 = vst [vmem:[#allocation72_spill] sm:$0xff] %v19789_v42  ;;  %v19791_v63 = vpop.f32.mrf.mxu3 }
 0xcd0   :  { %20886 = vst [vmem:[#allocation88_spill] sm:$0xff] %v19791_v63 }
 0xcd2   :  { %13873 = vmatmul.f32.vlgmr.msra.gmra.mxu0 %v19533_v21  ;;  %13784 = vmatmul.f32.gmra.mxu1 %v19554_v49 }
 0xcd4   :  { %13931 = vmatmul.f32.vlgmr.msra.gmra.mxu2 %v19578_v18  ;;  %v19797_v18 = vpop.f32.mrf.mxu2 }
 0xcd5   :  { %20887 = vst [vmem:[#allocation85_spill] sm:$0xff] %v19797_v18  ;;  %v19800_v51 = vpop.f32.mrf.mxu0  ;;  %v19803_v62 = vpop.f32.mrf.mxu1 }
 0xcd6   :  { %13970 = vmatmul.f32.vlgmr.msra.gmra.mxu3 %v19533_v21  ;;  %20888 = vst [vmem:[#allocation51_spill] sm:$0xff] %v19800_v51 }
 0xcd7   :  { %20889 = vst [vmem:[#allocation71_spill] sm:$0xff] %v19803_v62  ;;  %v19805_v6 = vpop.f32.mrf.mxu3 }
 0xcd8   :  { %20890 = vst [vmem:[#allocation74_spill] sm:$0xff] %v19805_v6 }
 0xcda   :  { %13877 = vmatmul.f32.gmra.mxu0 %v19554_v49  ;;  %13900 = vmatmul.f32.vlgmr.msra.gmra.mxu1 %v19533_v21 }
 0xcdc   :  { %13939 = vmatmul.f32.gmra.mxu2 %v19601_v37  ;;  %v19811_v37 = vpop.f32.mrf.mxu2 }
 0xcdd   :  { %20891 = vst [vmem:[#allocation83_spill] sm:$0xff] %v19811_v37  ;;  %v19815_v57 = vpop.f32.mrf.mxu1 }
 0xcde   :  { %13974 = vmatmul.f32.gmra.mxu3 %v19554_v49  ;;  %20893 = vst [vmem:[#allocation84_spill] sm:$0xff] %v19815_v57 }
 0xcdf   :  { %v19817_v18 = vpop.f32.mrf.mxu3 }
 0xce0   :  { %20894 = vst [vmem:[#allocation93_spill] sm:$0xff] %v19817_v18 }
 0xce2   :  { %14000 = vmatmul.f32.vlgmr.msrb.gmra.mxu0 %v19536_v39  ;;  %13904 = vmatmul.f32.gmra.mxu1 %v19554_v49  ;;  %v19813_v39 = vpop.f32.mrf.mxu0 }
 0xce3   :  { %20892 = vst [vmem:[#allocation110_spill] sm:$0xff] %v19813_v39 }
 0xce4   :  { %14063 = vmatmul.f32.vlgmr.msrb.gmra.mxu2 %v19533_v21 }
 0xce6   :  { %14090 = vmatmul.f32.vlgmr.msrb.gmra.mxu3 %v19533_v21  ;;  %v19820_v21 = vpop.f32.mrf.mxu2 }
 0xce7   :  { %20895 = vst [vmem:[#allocation27_spill] sm:$0xff] %v19820_v21 }
 0xcea   :  { %14005 = vmatmul.f32.gmra.mxu0 %v19562_v36  ;;  %14030 = vmatmul.f32.vlgmr.msrb.gmra.mxu1 %v19550_v20  ;;  %v19822_v6 = vpop.f32.mrf.mxu0  ;;  %v19824_v36 = vpop.f32.mrf.mxu1 }
 0xceb   :  { %20896 = vst [vmem:[#allocation60_spill] sm:$0xff] %v19822_v6  ;;  %v19826_v20 = vpop.f32.mrf.mxu3 }
 0xcec   :  { %14067 = vmatmul.f32.gmra.mxu2 %v19554_v49  ;;  %20897 = vst [vmem:[#allocation112_spill] sm:$0xff] %v19824_v36 }
 0xced   :  { %20898 = vst [vmem:[#allocation116_spill] sm:$0xff] %v19826_v20 }
 0xcee   :  { %14094 = vmatmul.f32.gmra.mxu3 %v19554_v49  ;;  %v14184_v49 = vsel %vm7431_vm6, %v19634_v1, 0  ;;  %v19830_v37 = vpop.f32.mrf.mxu2 }
 0xcef   :  { %20899 = vst [vmem:[#allocation50_spill] sm:$0xff] %v19830_v37  ;;  %v19834_v57 = vand.u32 4294901760, %v14184_v49 }
 0xcf1   :  { %v19841_v21 = vsub.f32 %v14184_v49, %v19834_v57 }
 0xcf2   :  { %14036 = vmatmul.f32.gmra.mxu1 %v19576_v2  ;;  %v19832_v39 = vpop.f32.mrf.mxu0  ;;  %v19836_v18 = vpop.f32.mrf.mxu1 }
 0xcf3   :  { %20900 = vst [vmem:[#allocation25_spill] sm:$0xff] %v19832_v39  ;;  %v19838_v2 = vpop.f32.mrf.mxu3  ;;  %v19846_v37 = vand.u32 4294901760, %v19841_v21 }
 0xcf4   :  { %20901 = vst [vmem:[#allocation70_spill] sm:$0xff] %v19836_v18 }
 0xcf5   :  { %20902 = vst [vmem:[#allocation29_spill] sm:$0xff] %v19838_v2 }
 0xcf6   :  { %v19848_v39 = vpop.f32.mrf.mxu2 }
 0xcf7   :  { %20903 = vst [vmem:[#allocation59_spill] sm:$0xff] %v19848_v39  ;;  %v14217_v39 = vsub.f32 %v19841_v21, %v19846_v37 }
 0xcf9   :  { %v19865_v59 = vand.u32 4294901760, %v14217_v39 }
 0xcfa   :  { %v19852_v18 = vpop.f32.mrf.mxu1 }
 0xcfb   :  { %20904 = vst [vmem:[#allocation52_spill] sm:$0xff] %v19852_v18  ;;  %v19854_v2 = vpop.f32.mrf.mxu3 }
 0xcfc   :  { %20905 = vst [vmem:[#allocation100_spill] sm:$0xff] %v19854_v2 }
 0xd0a   :  { %v14163_v6 = vpop.permute.xlu1 %14162 }
 0xd0b   :  { %v14165_v36 = vpop.permute.xlu0 %14164 }
 0xd0c   :  { %v14176_v20 = vsel %vm159_vm8, %v14163_v6, %v14165_v36  ;;  %v11686_v6 = vadd.f32 %v19431_v32, %v19398_v19  ;;  %v12544_v19 = vadd.f32 %v19655_v41, %v19603_v29  ;;  %v19869_v32 = vpop.permute.xlu2 %14156  ;;  %v11690_v41 = vadd.f32 %v19452_v48, %v19428_v45 }
 0xd0d   :  { %v14188_v51 = vsel %vm7179_vm14, %v14176_v20, 0  ;;  %v13362_v1 = vpop.f32.mrf.mxu0 }
 0xd0e   :  { %v19850_v62 = vand.u32 4294901760, %v14188_v51 }
 0xd10   :  { %v14246_v49 = vsub.f32 %v14188_v51, %v19850_v62  ;;  %14211 = vmatpush.msra.mxu0 %v19850_v62  ;;  %14312 = vmatpush.msra.mxu3 %v19850_v62  ;;  %v11716_v51 = vadd.f32 %v19424_v14, %v11686_v6 }
 0xd12   :  { %v14247_v20 = vand.u32 4294901760, %v14246_v49  ;;  %v14153_v4 = vpop.permute.xlu1 %14152  ;;  %14282 = vmatpush.msra.mxu2 %v14246_v49  ;;  %v11746_v29 = vadd.f32 %v19436_v40, %v11716_v51 }
 0xd13   :  { %v14155_v63 = vpop.permute.xlu0 %14154 }
 0xd14   :  { %v14172_v18 = vsel %vm159_vm8, %v14153_v4, %v14155_v63  ;;  %v14248_v24 = vsub.f32 %v14246_v49, %v14247_v20  ;;  %v14173_v4 = vsel %vm159_vm8, %v14155_v63, %v19869_v32  ;;  %v13461_v49 = vpop.f32.mrf.mxu3 }
 0xd15   :  { %v14212_v2 = vand.u32 4294901760, %v14172_v18  ;;  %v13370_v42 = vpop.f32.mrf.mxu0  ;;  %v19879_v39 = vand.u32 4294901760, %v14173_v4 }
 0xd16   :  { %v13431_v44 = vpop.f32.mrf.mxu2  ;;  %v14249_v23 = vand.u32 4294901760, %v14248_v24 }
 0xd17   :  { %v14252_v61 = vsub.f32 %v14172_v18, %v14212_v2  ;;  %14213 = vmatpush.msra.mxu0 %v14212_v2  ;;  %14314 = vmatpush.msra.mxu3 %v14212_v2  ;;  %v13401_v55 = vpop.f32.mrf.mxu1  ;;  %v12574_v18 = vadd.f32 %v19645_v47, %v12544_v19 }
 0xd18   :  { %14219 = vmatmul.f32.vlgmr.msra.gmra.mxu0 %v19865_v59  ;;  %14250 = vmatpush.msra.mxu1 %v14249_v23  ;;  %v13402_v14 = vadd.f32 %v13401_v55, %v13362_v1  ;;  %v11779_v23 = vadd.f32 %v19449_v25, %v11746_v29  ;;  %v12548_v1 = vadd.f32 %v19697_v17, %v19648_v60 }
 0xd19   :  { %14318 = vmatmul.f32.vlgmr.msra.gmra.mxu3 %v19846_v37  ;;  %14345 = vmatpush.msrb.mxu0 %v14247_v20  ;;  %v14253_v24 = vand.u32 4294901760, %v14252_v61  ;;  %v14442_v25 = vsub.f32 %v14173_v4, %v19879_v39 }
 0xd1a   :  { %14285 = vmatpush.msra.mxu2 %v14252_v61  ;;  %v13432_v63 = vadd.f32 %v13431_v44, %v13402_v14  ;;  %v14141_v6 = vpop.permute.xlu1 %14140  ;;  %v11721_v44 = vadd.f32 %v19446_v16, %v11690_v41 }
 0xd1b   :  { %14288 = vmatmul.f32.vlgmr.msra.gmra.mxu2 %v19841_v21  ;;  %14349 = vmatpush.msrb.mxu0 %v14253_v24  ;;  %v14254_v55 = vsub.f32 %v14252_v61, %v14253_v24  ;;  %v14186_v40 = vsel %vm7431_vm6, %v14141_v6, 0  ;;  %v14167_v20 = vpop.permute.xlu0 %14166  ;;  %v12604_v61 = vadd.f32 %v19660_v28, %v12574_v18  ;;  %v11806_v24 = vadd.f32 %v19466_v8, %v11779_v23 }
 0xd1c   :  { %v19886_v45 = vand.u32 4294901760, %v14186_v40  ;;  %v14177_v48 = vsel %vm159_vm8, %v14165_v36, %v14167_v20  ;;  %v13462_v47 = vadd.f32 %v13461_v49, %v13432_v63  ;;  %v12579_v36 = vadd.f32 %v19686_v34, %v12548_v1 }
 0xd1d   :  { %v14255_v51 = vand.u32 4294901760, %v14254_v55  ;;  %v14190_v19 = vsel %vm7179_vm14, %v14177_v48, 0  ;;  %v13494_v17 = vpop.f32.mrf.mxu0  ;;  %v12637_v28 = vadd.f32 %v19693_v30, %v12604_v61  ;;  %v11752_v8 = vadd.f32 %v19455_v58, %v11721_v44  ;;  %v13467_v34 = vpop.f32.mrf.mxu3 }
 0xd1e   :  { %v19894_v14 = vsub.f32 %v14186_v40, %v19886_v45  ;;  %v19896_v60 = vand.u32 4294901760, %v14190_v19  ;;  %v13495_v16 = vadd.f32 %v13494_v17, %v13462_v47  ;;  %v12610_v23 = vadd.f32 %v19699_v52, %v12579_v36  ;;  %v14171_v47 = vpop.permute.xlu2 %14170 }
 0xd1f   :  { %14256 = vmatpush.msra.mxu1 %v14255_v51  ;;  %v13405_v49 = vpop.f32.mrf.mxu1  ;;  %v13436_v29 = vpop.f32.mrf.mxu2  ;;  %v12664_v40 = vadd.f32 %v19724_v43, %v12637_v28  ;;  %v11783_v52 = vadd.f32 %v19464_v31, %v11752_v8  ;;  %v11876_v61 = vadd.f32 %v19469_v12, %v19462_v38 }
 0xd20   :  { %14258 = vmatmul.f32.vlgmr.msra.gmra.mxu1 %v19834_v57  ;;  %v14436_v4 = vsub.f32 %v14190_v19, %v19896_v60  ;;  %v13406_v41 = vadd.f32 %v13405_v49, %v13370_v42  ;;  %14401 = vmatpush.msrb.mxu2 %v19896_v60  ;;  %v19906_v18 = vand.u32 4294901760, %v19894_v14  ;;  %v14443_v42 = vand.u32 4294901760, %v14442_v25 }
 0xd21   :  { %14374 = vmatpush.msrb.mxu1 %v19850_v62  ;;  %v12382_v62 = vadd.f32 %v11806_v24, %v19092_v0 }
 0xd22   :  { %v13437_v63 = vadd.f32 %v13436_v29, %v13406_v41  ;;  %v14169_v6 = vpop.permute.xlu1 %14168  ;;  %v14437_v55 = vand.u32 4294901760, %v14436_v4  ;;  %v14225_v30 = vsub.f32 %v19894_v14, %v19906_v18  ;;  %14472 = vmatpush.msra.mxu0 %v14436_v4  ;;  %14403 = vmatpush.msrb.mxu2 %v19879_v39  ;;  %v12641_v29 = vadd.f32 %v19721_v50, %v12610_v23 }
 0xd23   :  { %14293 = vmatmul.f32.gmra.mxu2 %v19894_v14  ;;  %14376 = vmatpush.msrb.mxu1 %v14212_v2  ;;  %v14178_v1 = vsel %vm159_vm8, %v14167_v20, %v14169_v6  ;;  %v14159_v58 = vpop.permute.xlu0 %14158  ;;  %v14179_v44 = vsel %vm159_vm8, %v14169_v6, %v14171_v47  ;;  %v13240_v49 = vadd.f32 %v12664_v40, %v12382_v62 }
 0xd24   :  { %v14192_v2 = vsel %vm7179_vm14, %v14178_v1, 0  ;;  %14324 = vmatmul.f32.gmra.mxu3 %v19906_v18  ;;  %v14174_v48 = vsel %vm159_vm8, %v19869_v32, %v14159_v58  ;;  %v19922_v0 = vand.u32 4294901760, %v14225_v30  ;;  %14475 = vmatpush.msra.mxu0 %v14442_v25  ;;  %v13468_v43 = vadd.f32 %v13467_v34, %v13437_v63 }
 0xd25   :  { %14502 = vmatpush.msra.mxu1 %v19896_v60  ;;  %v19925_v20 = vand.u32 4294901760, %v14192_v2  ;;  %v19927_v51 = vand.u32 4294901760, %v14174_v48  ;;  %14535 = vmatpush.msra.mxu2 %v14437_v55  ;;  %v14438_v19 = vsub.f32 %v14436_v4, %v14437_v55  ;;  %v14444_v32 = vsub.f32 %v14442_v25, %v14443_v42 }
 0xd26   :  { %14227 = vmatmul.f32.gmra.mxu0 %v19922_v0  ;;  %v14194_v41 = vsel %vm7179_vm14, %v14179_v44, 0  ;;  %v11810_v63 = vadd.f32 %v19484_v9, %v11783_v52  ;;  %v11906_v50 = vadd.f32 %v19482_v33, %v11876_v61  ;;  %v12668_v1 = vadd.f32 %v19746_v54, %v12641_v29 }
 0xd27   :  { %14504 = vmatpush.msra.mxu1 %v19879_v39  ;;  %v19935_v31 = vsub.f32 %v14192_v2, %v19925_v20  ;;  %v19938_v17 = vsub.f32 %v14174_v48, %v19927_v51  ;;  %14539 = vmatpush.msra.mxu2 %v14443_v42  ;;  %v13498_v24 = vpop.f32.mrf.mxu0  ;;  %v13552_v36 = vpop.f32.mrf.mxu2  ;;  %v14439_v25 = vand.u32 4294901760, %v14438_v19  ;;  %v14445_v30 = vand.u32 4294901760, %v14444_v32 }
 0xd28   :  { %14262 = vmatmul.f32.gmra.mxu1 %v19886_v45  ;;  %v13499_v28 = vadd.f32 %v13498_v24, %v13468_v43  ;;  %v13521_v4 = vpop.f32.mrf.mxu1  ;;  %v19955_v23 = vand.u32 4294901760, %v14194_v41  ;;  %v12734_v33 = vadd.f32 %v19726_v13, %v19718_v11  ;;  %v12386_v2 = vadd.f32 %v11810_v63, %v19113_v7 }
 0xd29   :  { %v14627_v38 = vand.u32 4294901760, %v19935_v31  ;;  %v13522_v12 = vadd.f32 %v13521_v4, %v13495_v16  ;;  %v13591_v8 = vpop.f32.mrf.mxu3  ;;  %v14633_v34 = vand.u32 4294901760, %v19938_v17  ;;  %14440 = vmatpush.msrb.mxu3 %v14439_v25  ;;  %v11936_v48 = vadd.f32 %v19495_v22, %v11906_v50  ;;  %v20910_v50 = vld [vmem:[#allocation48_spill] sm:$0xff] }
 0xd2a   :  { %v13592_v6 = vadd.f32 %v13591_v8, %v13552_v36  ;;  %v14161_v55 = vpop.permute.xlu1 %14160  ;;  %v12764_v54 = vadd.f32 %v19742_v46, %v12734_v33  ;;  %v19975_v13 = vsub.f32 %v14194_v41, %v19955_v23  ;;  %v11880_v7 = vadd.f32 %v19489_v35, %v19479_v10  ;;  %v20908_v8 = vld [vmem:[#allocation128_spill] sm:$0xff] }
 0xd2b   :  { %14409 = vmatmul.f32.vlgmr.msrb.gmra.mxu2 %v19865_v59  ;;  %v19948_v42 = vadd.f32 %v13522_v12, %v13240_v49  ;;  %v14175_v62 = vsel %vm159_vm8, %v14159_v58, %v14161_v55  ;;  %v14628_v16 = vsub.f32 %v19935_v31, %v14627_v38  ;;  %14446 = vmatpush.msrb.mxu3 %v14445_v30 }
 0xd2c   :  { %14662 = vmatpush.msrb.mxu2 %v19935_v31  ;;  %v14634_v9 = vsub.f32 %v19938_v17, %v14633_v34  ;;  %14448 = vmatmul.f32.vlgmr.msrb.gmra.mxu3 %v19834_v57  ;;  %v19965_v40 = vand.u32 4294901760, %v14175_v62  ;;  %v13244_v22 = vadd.f32 %v12668_v1, %v12386_v2  ;;  %v11911_v61 = vadd.f32 %v19493_v27, %v11880_v7  ;;  %v20907_v27 = vld [vmem:[#allocation92_spill] sm:$0xff]  ;;  %v20915_v31 = vld [vmem:[#allocation13_spill] sm:$0xff] }
 0xd2d   :  { %v14629_v58 = vand.u32 4294901760, %v14628_v16  ;;  %14564 = vmatpush.msra.mxu3 %v19896_v60  ;;  %v12794_v10 = vadd.f32 %v19760_v15, %v12764_v54  ;;  %v14817_v24 = vand.u32 4294901760, %v19975_v13  ;;  %v12738_v36 = vadd.f32 %v19748_v53, %v19739_v3  ;;  %v20911_v16 = vld [vmem:[#allocation99_spill] sm:$0xff]  ;;  %v20912_v54 = vld [vmem:[#allocation109_spill] sm:$0xff] }
 0xd2e   :  { %14665 = vmatpush.msrb.mxu2 %v19938_v17  ;;  %14351 = vmatmul.f32.vlgmr.msrb.gmra.mxu0 %v19834_v57  ;;  %v14635_v43 = vand.u32 4294901760, %v14634_v9  ;;  %v19983_v19 = vsub.f32 %v14175_v62, %v19965_v40 }
 0xd2f   :  { %14591 = vmatpush.msrb.mxu0 %v19925_v20  ;;  %v13621_v11 = vpop.f32.mrf.mxu0  ;;  %14566 = vmatpush.msra.mxu3 %v19879_v39  ;;  %v13560_v60 = vpop.f32.mrf.mxu2  ;;  %v11969_v39 = vadd.f32 %v19491_v5, %v11936_v48  ;;  %v20906_v5 = vld [vmem:[#allocation68_spill] sm:$0xff]  ;;  %v12827_v15 = vadd.f32 %v19755_v26, %v12794_v10  ;;  %v12769_v4 = vadd.f32 %v19758_v56, %v12738_v36  ;;  %v20916_v10 = vld [vmem:[#allocation125_spill] sm:$0xff] }
 0xd30   :  { %14378 = vmatmul.f32.vlgmr.msrb.gmra.mxu1 %v19834_v57  ;;  %v13525_v52 = vpop.f32.mrf.mxu1  ;;  %v13622_v47 = vadd.f32 %v13621_v11, %v13592_v6  ;;  %v14823_v49 = vand.u32 4294901760, %v19983_v19  ;;  %v14818_v53 = vsub.f32 %v19975_v13, %v14817_v24  ;;  %v20909_v56 = vld [vmem:[#allocation20_spill] sm:$0xff]  ;;  %v20917_v36 = vld [vmem:[#allocation21_spill] sm:$0xff] }
 0xd31   :  { %14630 = vmatpush.msrb.mxu1 %v14629_v58  ;;  %14692 = vmatpush.msrb.mxu3 %v19925_v20  ;;  %v13526_v46 = vadd.f32 %v13525_v52, %v13499_v28  ;;  %v13595_v44 = vpop.f32.mrf.mxu3  ;;  %v11996_v29 = vadd.f32 %v20906_v5, %v11969_v39  ;;  %v11942_v28 = vadd.f32 %v20907_v27, %v11911_v61  ;;  %v20913_v52 = vld [vmem:[#allocation38_spill] sm:$0xff] }
 0xd32   :  { %14593 = vmatpush.msrb.mxu0 %v19927_v51  ;;  %v13596_v32 = vadd.f32 %v13595_v44, %v13560_v60  ;;  %v12854_v63 = vadd.f32 %v20908_v8, %v12827_v15  ;;  %v14824_v26 = vsub.f32 %v19983_v19, %v14823_v49  ;;  %v12800_v9 = vadd.f32 %v20911_v16, %v12769_v4  ;;  %v20919_v4 = vld [vmem:[#allocation132_spill] sm:$0xff]  ;;  %v20921_v8 = vld [vmem:[#allocation54_spill] sm:$0xff] }
 0xd33   :  { %14417 = vmatmul.f32.gmra.mxu2 %v19922_v0  ;;  %14636 = vmatpush.msrb.mxu1 %v14635_v43  ;;  %v19989_v35 = vadd.f32 %v13526_v46, %v13244_v22  ;;  %v12383_v30 = vadd.f32 %v11996_v29, %v20909_v56  ;;  %v11973_v62 = vadd.f32 %v20910_v50, %v11942_v28  ;;  %v14819_v33 = vand.u32 4294901760, %v14818_v53  ;;  %v20914_v46 = vld [vmem:[#allocation115_spill] sm:$0xff]  ;;  %v20924_v56 = vld [vmem:[#allocation80_spill] sm:$0xff] }
 0xd34   :  { %14694 = vmatpush.msrb.mxu3 %v19927_v51  ;;  %v14825_v48 = vand.u32 4294901760, %v14824_v26  ;;  %v12831_v60 = vadd.f32 %v20913_v52, %v12800_v9  ;;  %v12066_v5 = vadd.f32 %v20917_v36, %v20916_v10  ;;  %v20935_v36 = vld [vmem:[#allocation94_spill] sm:$0xff] }
 0xd35   :  { %14452 = vmatmul.f32.gmra.mxu3 %v19886_v45  ;;  %v13241_v58 = vadd.f32 %v12854_v63, %v12383_v30  ;;  %v12000_v11 = vadd.f32 %v20912_v54, %v11973_v62  ;;  %v20925_v62 = vld [vmem:[#allocation106_spill] sm:$0xff] }
 0xd36   :  { %14355 = vmatmul.f32.gmra.mxu0 %v19886_v45  ;;  %v12858_v44 = vadd.f32 %v20914_v46, %v12831_v60  ;;  %v20928_v54 = vld [vmem:[#allocation34_spill] sm:$0xff]  ;;  %v20930_v60 = vld [vmem:[#allocation51_spill] sm:$0xff] }
 0xd37   :  { %v13626_v25 = vpop.f32.mrf.mxu0  ;;  %v13684_v3 = vpop.f32.mrf.mxu2 }
 0xd38   :  { %14382 = vmatmul.f32.gmra.mxu1 %v19886_v45  ;;  %v13627_v41 = vadd.f32 %v13626_v25, %v13596_v32  ;;  %v13651_v12 = vpop.f32.mrf.mxu1  ;;  %v20920_v25 = vld [vmem:[#allocation72_spill] sm:$0xff] }
 0xd39   :  { %v13652_v6 = vadd.f32 %v13651_v12, %v13622_v47  ;;  %v13711_v55 = vpop.f32.mrf.mxu3 }
 0xd3b   :  { %14541 = vmatmul.f32.vlgmr.msra.gmra.mxu2 %v19834_v57  ;;  %v13685_v1 = vadd.f32 %v13684_v3, %v13652_v6  ;;  %v20922_v6 = vld [vmem:[#allocation86_spill] sm:$0xff] }
 0xd3c   :  { %14781 = vmatpush.msra.mxu2 %v19955_v23 }
 0xd3d   :  { %v13712_v2 = vadd.f32 %v13711_v55, %v13685_v1  ;;  %14568 = vmatmul.f32.vlgmr.msra.gmra.mxu3 %v19834_v57  ;;  %v20923_v55 = vld [vmem:[#allocation44_spill] sm:$0xff] }
 0xd3e   :  { %14783 = vmatpush.msra.mxu2 %v19965_v40  ;;  %14820 = vmatpush.msra.mxu3 %v14819_v33  ;;  %v12070_v26 = vadd.f32 %v20923_v55, %v20922_v6  ;;  %v20941_v6 = vld [vmem:[#allocation66_spill] sm:$0xff] }
 0xd3f   :  { %14478 = vmatmul.f32.vlgmr.msra.gmra.mxu0 %v19841_v21  ;;  %v20020_v47 = vadd.f32 %v13712_v2, %v13241_v58  ;;  %v13742_v43 = vpop.f32.mrf.mxu0  ;;  %v13688_v22 = vpop.f32.mrf.mxu2 }
 0xd40   :  { %14725 = vmatpush.msra.mxu0 %v14627_v38  ;;  %14508 = vmatmul.f32.vlgmr.msra.gmra.mxu1 %v19846_v37  ;;  %v13657_v7 = vpop.f32.mrf.mxu1  ;;  %v12387_v38 = vadd.f32 %v12000_v11, %v20915_v31  ;;  %v20929_v11 = vld [vmem:[#allocation71_spill] sm:$0xff] }
 0xd41   :  { %14826 = vmatpush.msra.mxu3 %v14825_v48  ;;  %14754 = vmatpush.msra.mxu1 %v19925_v20  ;;  %v13658_v32 = vadd.f32 %v13657_v7, %v13627_v41  ;;  %v13715_v39 = vpop.f32.mrf.mxu3  ;;  %v12924_v41 = vadd.f32 %v20920_v25, %v20919_v4  ;;  %v12928_v52 = vadd.f32 %v20929_v11, %v20928_v54  ;;  %v20939_v4 = vld [vmem:[#allocation23_spill] sm:$0xff] }
 0xd42   :  { %14729 = vmatpush.msra.mxu0 %v14633_v34  ;;  %v13245_v29 = vadd.f32 %v12858_v44, %v12387_v38  ;;  %v20918_v34 = vld [vmem:[#allocation35_spill] sm:$0xff]  ;;  %v20934_v38 = vld [vmem:[#allocation84_spill] sm:$0xff] }
 0xd43   :  { %14545 = vmatmul.f32.gmra.mxu2 %v19886_v45  ;;  %14756 = vmatpush.msra.mxu1 %v19927_v51  ;;  %v13689_v61 = vadd.f32 %v13688_v22, %v13658_v32  ;;  %v12096_v28 = vadd.f32 %v20918_v34, %v12066_v5  ;;  %v12954_v30 = vadd.f32 %v20924_v56, %v12924_v41  ;;  %v20932_v32 = vld [vmem:[#allocation57_spill] sm:$0xff]  ;;  %v20936_v5 = vld [vmem:[#allocation111_spill] sm:$0xff] }
 0xd45   :  { %v13716_v27 = vadd.f32 %v13715_v39, %v13689_v61  ;;  %14572 = vmatmul.f32.gmra.mxu3 %v19886_v45  ;;  %v12126_v63 = vadd.f32 %v20921_v8, %v12096_v28  ;;  %v20933_v39 = vld [vmem:[#allocation85_spill] sm:$0xff] }
 0xd46   :  { %v12959_v31 = vadd.f32 %v20933_v39, %v12928_v52  ;;  %v20952_v39 = vld [vmem:[#allocation97_spill] sm:$0xff] }
 0xd47   :  { %14483 = vmatmul.f32.gmra.mxu0 %v19894_v14  ;;  %v20036_v20 = vadd.f32 %v13716_v27, %v13245_v29  ;;  %v13750_v17 = vpop.f32.mrf.mxu0  ;;  %v13811_v15 = vpop.f32.mrf.mxu2  ;;  %v12159_v16 = vadd.f32 %v20925_v62, %v12126_v63  ;;  %v20937_v27 = vld [vmem:[#allocation74_spill] sm:$0xff] }
 0xd48   :  { %14514 = vmatmul.f32.gmra.mxu1 %v19906_v18  ;;  %v13781_v51 = vpop.f32.mrf.mxu1 }
 0xd49   :  { %v13782_v12 = vadd.f32 %v13781_v51, %v13742_v43  ;;  %v13841_v3 = vpop.f32.mrf.mxu3 }
 0xd4b   :  { %14668 = vmatmul.f32.vlgmr.msrb.gmra.mxu2 %v19841_v21  ;;  %v13812_v53 = vadd.f32 %v13811_v15, %v13782_v12  ;;  %v20938_v15 = vld [vmem:[#allocation67_spill] sm:$0xff]  ;;  %v20940_v12 = vld [vmem:[#allocation110_spill] sm:$0xff] }
 0xd4c   :  { %14915 = vmatpush.msrb.mxu2 %v14817_v24  ;;  %v20926_v24 = vld [vmem:[#allocation88_spill] sm:$0xff]  ;;  %v12256_v25 = vadd.f32 %v20939_v4, %v20938_v15 }
 0xd4d   :  { %v13842_v50 = vadd.f32 %v13841_v3, %v13812_v53  ;;  %14698 = vmatmul.f32.vlgmr.msrb.gmra.mxu3 %v19846_v37  ;;  %v12984_v9 = vadd.f32 %v20926_v24, %v12954_v30  ;;  %v20945_v24 = vld [vmem:[#allocation93_spill] sm:$0xff] }
 0xd4e   :  { %14919 = vmatpush.msrb.mxu2 %v14823_v49  ;;  %14944 = vmatpush.msrb.mxu3 %v19955_v23  ;;  %v20927_v49 = vld [vmem:[#allocation24_spill] sm:$0xff] }
 0xd4f   :  { %14599 = vmatmul.f32.vlgmr.msrb.gmra.mxu0 %v19865_v59  ;;  %v13874_v1 = vpop.f32.mrf.mxu0  ;;  %v13816_v58 = vpop.f32.mrf.mxu2  ;;  %v12101_v48 = vadd.f32 %v20927_v49, %v12070_v26  ;;  %v13017_v43 = vadd.f32 %v20930_v60, %v12984_v9  ;;  %v20942_v26 = vld [vmem:[#allocation108_spill] sm:$0xff]  ;;  %v20949_v60 = vld [vmem:[#allocation46_spill] sm:$0xff] }
 0xd50   :  { %14852 = vmatpush.msrb.mxu0 %v19975_v13  ;;  %14638 = vmatmul.f32.vlgmr.msrb.gmra.mxu1 %v19834_v57  ;;  %v13785_v33 = vpop.f32.mrf.mxu1  ;;  %v13875_v2 = vadd.f32 %v13874_v1, %v13842_v50  ;;  %v20931_v13 = vld [vmem:[#allocation22_spill] sm:$0xff]  ;;  %v12286_v56 = vadd.f32 %v20942_v26, %v12256_v25  ;;  %v20943_v50 = vld [vmem:[#allocation112_spill] sm:$0xff]  ;;  %v20946_v1 = vld [vmem:[#allocation55_spill] sm:$0xff] }
 0xd51   :  { %14946 = vmatpush.msrb.mxu3 %v19965_v40  ;;  %14882 = vmatpush.msrb.mxu1 %v19955_v23  ;;  %v13786_v7 = vadd.f32 %v13785_v33, %v13750_v17  ;;  %v13847_v22 = vpop.f32.mrf.mxu3  ;;  %v12186_v46 = vadd.f32 %v20931_v13, %v12159_v16  ;;  %v12132_v23 = vadd.f32 %v20932_v32, %v12101_v48  ;;  %v20944_v16 = vld [vmem:[#allocation83_spill] sm:$0xff] }
 0xd52   :  { %14855 = vmatpush.msrb.mxu0 %v19983_v19  ;;  %v13044_v61 = vadd.f32 %v20934_v38, %v13017_v43  ;;  %v13114_v9 = vadd.f32 %v20945_v24, %v20944_v16  ;;  %v20950_v43 = vld [vmem:[#allocation130_spill] sm:$0xff]  ;;  %v20951_v32 = vld [vmem:[#allocation131_spill] sm:$0xff] }
 0xd53   :  { %14673 = vmatmul.f32.gmra.mxu2 %v19894_v14  ;;  %14884 = vmatpush.msrb.mxu1 %v19965_v40  ;;  %v13817_v44 = vadd.f32 %v13816_v58, %v13786_v7  ;;  %v12384_v19 = vadd.f32 %v12186_v46, %v20935_v36  ;;  %v12163_v29 = vadd.f32 %v20936_v5, %v12132_v23  ;;  %v20947_v58 = vld [vmem:[#allocation113_spill] sm:$0xff]  ;;  %v20953_v38 = vld [vmem:[#allocation70_spill] sm:$0xff]  ;;  %v20954_v36 = vld [vmem:[#allocation27_spill] sm:$0xff] }
 0xd54   :  { %v12990_v40 = vadd.f32 %v20937_v27, %v12959_v31  ;;  %v12260_v7 = vadd.f32 %v20950_v43, %v20949_v60 }
 0xd55   :  { %v13848_v10 = vadd.f32 %v13847_v22, %v13817_v44  ;;  %14704 = vmatmul.f32.gmra.mxu3 %v19906_v18  ;;  %v13242_v41 = vadd.f32 %v13044_v61, %v12384_v19  ;;  %v12190_v55 = vadd.f32 %v20941_v6, %v12163_v29  ;;  %v20955_v19 = vld [vmem:[#allocation116_spill] sm:$0xff]  ;;  %v20956_v29 = vld [vmem:[#allocation41_spill] sm:$0xff] }
 0xd56   :  { %v13021_v3 = vadd.f32 %v20940_v12, %v12990_v40  ;;  %v12291_v31 = vadd.f32 %v20952_v39, %v12260_v7  ;;  %v13118_v5 = vadd.f32 %v20955_v19, %v20954_v36  ;;  %v20957_v40 = vld [vmem:[#allocation36_spill] sm:$0xff]  ;;  %v20960_v12 = vld [vmem:[#allocation29_spill] sm:$0xff] }
 0xd57   :  { %14607 = vmatmul.f32.gmra.mxu0 %v19922_v0  ;;  %v13878_v17 = vpop.f32.mrf.mxu0  ;;  %v13932_v51 = vpop.f32.mrf.mxu2  ;;  %v12388_v33 = vadd.f32 %v12190_v55, %v20946_v1  ;;  %v20962_v55 = vld [vmem:[#allocation16_spill] sm:$0xff] }
 0xd58   :  { %14642 = vmatmul.f32.gmra.mxu1 %v19886_v45  ;;  %v13879_v34 = vadd.f32 %v13878_v17, %v13848_v10  ;;  %v13901_v28 = vpop.f32.mrf.mxu1  ;;  %v13048_v62 = vadd.f32 %v20943_v50, %v13021_v3  ;;  %v12322_v17 = vadd.f32 %v20957_v40, %v12291_v31 }
 0xd59   :  { %v13902_v53 = vadd.f32 %v13901_v28, %v13875_v2  ;;  %v13971_v8 = vpop.f32.mrf.mxu3  ;;  %v12316_v2 = vadd.f32 %v20947_v58, %v12286_v56  ;;  %v20959_v28 = vld [vmem:[#allocation25_spill] sm:$0xff]  ;;  %v20963_v56 = vld [vmem:[#allocation52_spill] sm:$0xff] }
 0xd5a   :  { %v13972_v63 = vadd.f32 %v13971_v8, %v13932_v51  ;;  %v13246_v22 = vadd.f32 %v13048_v62, %v12388_v33  ;;  %v13149_v51 = vadd.f32 %v20959_v28, %v13118_v5  ;;  %v12353_v26 = vadd.f32 %v20962_v55, %v12322_v17  ;;  %v20965_v33 = vld [vmem:[#allocation59_spill] sm:$0xff] }
 0xd5b   :  { %14789 = vmatmul.f32.vlgmr.msra.gmra.mxu2 %v19865_v59  ;;  %v20083_v30 = vadd.f32 %v13902_v53, %v13242_v41  ;;  %v20948_v59 = vld [vmem:[#allocation60_spill] sm:$0xff]  ;;  %v12349_v23 = vadd.f32 %v20951_v32, %v12316_v2 }
 0xd5c   :  { %v13144_v49 = vadd.f32 %v20948_v59, %v13114_v9  ;;  %v13180_v50 = vadd.f32 %v20963_v56, %v13149_v51  ;;  %v20964_v9 = vld [vmem:[#allocation69_spill] sm:$0xff] }
 0xd5d   :  { %14828 = vmatmul.f32.vlgmr.msra.gmra.mxu3 %v19834_v57  ;;  %v12376_v27 = vadd.f32 %v20956_v29, %v12349_v23  ;;  %v12380_v1 = vadd.f32 %v20964_v9, %v12353_v26 }
 0xd5e   :  { %v13174_v61 = vadd.f32 %v20953_v38, %v13144_v49  ;;  %v13211_v58 = vadd.f32 %v20965_v33, %v13180_v50  ;;  %v20966_v49 = vld [vmem:[#allocation100_spill] sm:$0xff] }
 0xd5f   :  { %14731 = vmatmul.f32.vlgmr.msra.gmra.mxu0 %v19834_v57  ;;  %v14001_v48 = vpop.f32.mrf.mxu0  ;;  %v13940_v11 = vpop.f32.mrf.mxu2 }
 0xd60   :  { %14758 = vmatmul.f32.vlgmr.msra.gmra.mxu1 %v19834_v57  ;;  %v13905_v54 = vpop.f32.mrf.mxu1  ;;  %v14002_v52 = vadd.f32 %v14001_v48, %v13972_v63  ;;  %v20961_v63 = vld [vmem:[#allocation62_spill] sm:$0xff]  ;;  %v13238_v48 = vadd.f32 %v20966_v49, %v13211_v58 }
 0xd61   :  { %v13906_v13 = vadd.f32 %v13905_v54, %v13879_v34  ;;  %v13975_v46 = vpop.f32.mrf.mxu3  ;;  %v12385_v6 = vadd.f32 %v12376_v27, %v20961_v63 }
 0xd62   :  { %v13976_v44 = vadd.f32 %v13975_v46, %v13940_v11 }
 0xd63   :  { %14797 = vmatmul.f32.gmra.mxu2 %v19922_v0  ;;  %v20100_v10 = vadd.f32 %v13906_v13, %v13246_v22  ;;  %v20958_v0 = vld [vmem:[#allocation50_spill] sm:$0xff] }
 0xd64   :  { %v13207_v34 = vadd.f32 %v20958_v0, %v13174_v61  ;;  %v20132_v0 = vpop.permute.xlu0 %14968 }
 0xd65   :  { %14832 = vmatmul.f32.gmra.mxu3 %v19886_v45 }
 0xd66   :  { %v13234_v3 = vadd.f32 %v20960_v12, %v13207_v34 }
 0xd67   :  { %14735 = vmatmul.f32.gmra.mxu0 %v19886_v45  ;;  %v14006_v15 = vpop.f32.mrf.mxu0  ;;  %v14064_v41 = vpop.f32.mrf.mxu2 }
 0xd68   :  { %14762 = vmatmul.f32.gmra.mxu1 %v19886_v45  ;;  %v14007_v4 = vadd.f32 %v14006_v15, %v13976_v44  ;;  %v14031_v25 = vpop.f32.mrf.mxu1  ;;  %v13243_v16 = vadd.f32 %v13234_v3, %v12385_v6 }
 0xd69   :  { %v14032_v53 = vadd.f32 %v14031_v25, %v14002_v52  ;;  %v14091_v8 = vpop.f32.mrf.mxu3  ;;  %v20967_v52 = vld [vmem:[#allocation18_spill] sm:$0xff] }
 0xd6a   :  { %v12389_v60 = vadd.f32 %v12380_v1, %v20967_v52 }
 0xd6b   :  { %14921 = vmatmul.f32.vlgmr.msrb.gmra.mxu2 %v19834_v57  ;;  %v14065_v62 = vadd.f32 %v14064_v41, %v14032_v53 }
 0xd6d   :  { %v14092_v24 = vadd.f32 %v14091_v8, %v14065_v62  ;;  %14948 = vmatmul.f32.vlgmr.msrb.gmra.mxu3 %v19834_v57  ;;  %v20136_v8 = vpop.permute.xlu2 %14973 }
 0xd6f   :  { %14858 = vmatmul.f32.vlgmr.msrb.gmra.mxu0 %v19841_v21  ;;  %v20120_v2 = vadd.f32 %v14092_v24, %v13243_v16  ;;  %v14068_v11 = vpop.f32.mrf.mxu2  ;;  %v13247_v21 = vadd.f32 %v13238_v48, %v12389_v60 }
 0xd70   :  { %14888 = vmatmul.f32.vlgmr.msrb.gmra.mxu1 %v19846_v37  ;;  %v14037_v59 = vpop.f32.mrf.mxu1 }
 0xd71   :  { %v14038_v54 = vadd.f32 %v14037_v59, %v14007_v4  ;;  %v14095_v43 = vpop.f32.mrf.mxu3 }
 0xd73   :  { %14925 = vmatmul.f32.gmra.mxu2 %v19886_v45  ;;  %v14069_v57 = vadd.f32 %v14068_v11, %v14038_v54 }
 0xd75   :  { %v14096_v7 = vadd.f32 %v14095_v43, %v14069_v57  ;;  %14952 = vmatmul.f32.gmra.mxu3 %v19886_v45 }
 0xd77   :  { %14863 = vmatmul.f32.gmra.mxu0 %v19894_v14  ;;  %v20128_v22 = vadd.f32 %v14096_v7, %v13247_v21 }
 0xd78   :  { %14894 = vmatmul.f32.gmra.mxu1 %v19906_v18 }
 0xd95   :  { %v14220_v37 = vpop.f32.mrf.mxu0 }
 0xd9c   :  { %v14319_v44 = vpop.f32.mrf.mxu3 }
 0xd9d   :  { %v14259_v13 = vpop.f32.mrf.mxu1 }
 0xd9e   :  { %v14289_v46 = vpop.f32.mrf.mxu2  ;;  %v14260_v32 = vadd.f32 %v14259_v13, %v14220_v37 }
 0xda0   :  { %v14290_v38 = vadd.f32 %v14289_v46, %v14260_v32 }
 0xda2   :  { %v14320_v19 = vadd.f32 %v14319_v44, %v14290_v38 }
 0xda3   :  { %v14228_v23 = vpop.f32.mrf.mxu0 }
 0xda5   :  { %v14263_v39 = vpop.f32.mrf.mxu1 }
 0xda6   :  { %v14294_v31 = vpop.f32.mrf.mxu2  ;;  %v14264_v36 = vadd.f32 %v14263_v39, %v14228_v23 }
 0xda7   :  { %v14325_v61 = vpop.f32.mrf.mxu3 }
 0xda8   :  { %v14295_v27 = vadd.f32 %v14294_v31, %v14264_v36 }
 0xdaa   :  { %v14326_v34 = vadd.f32 %v14325_v61, %v14295_v27 }
 0xdab   :  { %v14352_v5 = vpop.f32.mrf.mxu0 }
 0xdac   :  { %v14353_v45 = vadd.f32 %v14352_v5, %v14320_v19 }
 0xdad   :  { %v14379_v29 = vpop.f32.mrf.mxu1 }
 0xdae   :  { %v14410_v14 = vpop.f32.mrf.mxu2  ;;  %v14380_v40 = vadd.f32 %v14379_v29, %v14353_v45 }
 0xdaf   :  { %v14449_v17 = vpop.f32.mrf.mxu3 }
 0xdb0   :  { %v14956_v18 = vadd.f32 %v14380_v40, %v19948_v42  ;;  %v14450_v63 = vadd.f32 %v14449_v17, %v14410_v14 }
 0xdb2   :  { %v14976_v28 = vadd.f32 %v20132_v0, %v14956_v18 }
 0xdb3   :  { %v14356_v51 = vpop.f32.mrf.mxu0 }
 0xdb4   :  { %v14992_v15 = vrot.slane %v14976_v28, 2  ;;  %v14357_v4 = vadd.f32 %v14356_v51, %v14326_v34 }
 0xdb5   :  { %v14383_v25 = vpop.f32.mrf.mxu1 }
 0xdb6   :  { %v14418_v41 = vpop.f32.mrf.mxu2  ;;  %15012 = vst [vmem:[#allocation2 + $0x50] sm:$0xc0] %v14992_v15  ;;  %v14384_v12 = vadd.f32 %v14383_v25, %v14357_v4 }
 0xdb8   :  { %v14960_v3 = vadd.f32 %v14384_v12, %v19989_v35  ;;  %v14453_v53 = vpop.f32.mrf.mxu3 }
 0xdb9   :  { %v14454_v1 = vadd.f32 %v14453_v53, %v14418_v41 }
 0xdba   :  { %v14980_v42 = vadd.f32 %v20136_v8, %v14960_v3 }
 0xdbc   :  { %v14479_v6 = vpop.f32.mrf.mxu0  ;;  %v14996_v55 = vrot.slane %v14980_v42, 2 }
 0xdbd   :  { %v14480_v26 = vadd.f32 %v14479_v6, %v14450_v63  ;;  %v14509_v56 = vpop.f32.mrf.mxu1  ;;  %v15022_v50 = vld [vmem:[#allocation2 + $0x50] sm:$0xff] }
 0xdbe   :  { %v14542_v62 = vpop.f32.mrf.mxu2  ;;  %15028 = vst [vmem:[%s20185_s10 + $0x10] sm:$0xff] %v15022_v50  ;;  %v14997_v16 = vsel %vm7179_vm14, %v14992_v15, %v14996_v55 }
 0xdbf   :  { %v14510_v24 = vadd.f32 %v14509_v56, %v14480_v26  ;;  %15030 = vst [vmem:[%s20185_s10 + $0x20] sm:$0xff] %v14997_v16 }
 0xdc0   :  { %v14569_v9 = vpop.f32.mrf.mxu3 }
 0xdc1   :  { %v14543_v35 = vadd.f32 %v14542_v62, %v14510_v24 }
 0xdc3   :  { %v14570_v33 = vadd.f32 %v14569_v9, %v14543_v35 }
 0xdc4   :  { %v14484_v58 = vpop.f32.mrf.mxu0 }
 0xdc5   :  { %v14957_v59 = vadd.f32 %v14570_v33, %v20020_v47  ;;  %v14485_v49 = vadd.f32 %v14484_v58, %v14454_v1  ;;  %v14515_v48 = vpop.f32.mrf.mxu1 }
 0xdc6   :  { %v14546_v54 = vpop.f32.mrf.mxu2 }
 0xdc7   :  { %v14977_v11 = vadd.f32 %v20132_v0, %v14957_v59  ;;  %v14516_v52 = vadd.f32 %v14515_v48, %v14485_v49 }
 0xdc8   :  { %v14573_v43 = vpop.f32.mrf.mxu3 }
 0xdc9   :  { %v14993_v60 = vrot.slane %v14977_v11, 2  ;;  %v14547_v57 = vadd.f32 %v14546_v54, %v14516_v52 }
 0xdcb   :  { %15013 = vst [vmem:[#allocation2 + $0x20] sm:$0xc0] %v14993_v60  ;;  %v14574_v21 = vadd.f32 %v14573_v43, %v14547_v57 }
 0xdcc   :  { %v14600_v7 = vpop.f32.mrf.mxu0 }
 0xdcd   :  { %v14961_v37 = vadd.f32 %v14574_v21, %v20036_v20  ;;  %v14639_v13 = vpop.f32.mrf.mxu1 }
 0xdce   :  { %v14669_v46 = vpop.f32.mrf.mxu2  ;;  %v14640_v31 = vadd.f32 %v14639_v13, %v14600_v7 }
 0xdcf   :  { %v14981_v44 = vadd.f32 %v20136_v8, %v14961_v37 }
 0xdd0   :  { %v14699_v47 = vpop.f32.mrf.mxu3  ;;  %v14670_v36 = vadd.f32 %v14669_v46, %v14640_v31 }
 0xdd1   :  { %v14998_v32 = vrot.slane %v14981_v44, 2 }
 0xdd2   :  { %v15023_v23 = vld [vmem:[#allocation2 + $0x20] sm:$0xff]  ;;  %v14700_v5 = vadd.f32 %v14699_v47, %v14670_v36 }
 0xdd3   :  { %15029 = vst [vmem:[%s20185_s10 + $0x18] sm:$0xff] %v15023_v23  ;;  %v14999_v39 = vsel %vm7179_vm14, %v14993_v60, %v14998_v32 }
 0xdd4   :  { %v14608_v38 = vpop.f32.mrf.mxu0  ;;  %15031 = vst [vmem:[%s20185_s10 + $0x28] sm:$0xff] %v14999_v39 }
 0xdd5   :  { %v14643_v20 = vpop.f32.mrf.mxu1 }
 0xdd6   :  { %v14674_v61 = vpop.f32.mrf.mxu2  ;;  %v14644_v45 = vadd.f32 %v14643_v20, %v14608_v38 }
 0xdd8   :  { %v14705_v19 = vpop.f32.mrf.mxu3  ;;  %v14675_v18 = vadd.f32 %v14674_v61, %v14644_v45 }
 0xdda   :  { %v14706_v51 = vadd.f32 %v14705_v19, %v14675_v18 }
 0xddc   :  { %v14732_v29 = vpop.f32.mrf.mxu0 }
 0xddd   :  { %v14733_v14 = vadd.f32 %v14732_v29, %v14700_v5  ;;  %v14759_v27 = vpop.f32.mrf.mxu1 }
 0xdde   :  { %v14790_v40 = vpop.f32.mrf.mxu2 }
 0xddf   :  { %v14760_v17 = vadd.f32 %v14759_v27, %v14733_v14 }
 0xde0   :  { %v14829_v28 = vpop.f32.mrf.mxu3 }
 0xde1   :  { %v14958_v34 = vadd.f32 %v14760_v17, %v20083_v30  ;;  %v14830_v6 = vadd.f32 %v14829_v28, %v14790_v40 }
 0xde3   :  { %v14978_v15 = vadd.f32 %v20132_v0, %v14958_v34 }
 0xde4   :  { %v14736_v4 = vpop.f32.mrf.mxu0 }
 0xde5   :  { %v14994_v25 = vrot.slane %v14978_v15, 2  ;;  %v14737_v41 = vadd.f32 %v14736_v4, %v14706_v51  ;;  %v14763_v12 = vpop.f32.mrf.mxu1 }
 0xde6   :  { %v14798_v3 = vpop.f32.mrf.mxu2 }
 0xde7   :  { %15014 = vst [vmem:[#allocation2 + $0x8] sm:$0xc0] %v14994_v25  ;;  %v14764_v53 = vadd.f32 %v14763_v12, %v14737_v41 }
 0xde8   :  { %v14833_v42 = vpop.f32.mrf.mxu3 }
 0xde9   :  { %v14962_v63 = vadd.f32 %v14764_v53, %v20100_v10  ;;  %v14834_v1 = vadd.f32 %v14833_v42, %v14798_v3 }
 0xdeb   :  { %v14982_v55 = vadd.f32 %v20136_v8, %v14962_v63 }
 0xdec   :  { %v14859_v26 = vpop.f32.mrf.mxu0 }
 0xded   :  { %v15000_v56 = vrot.slane %v14982_v55, 2  ;;  %v14860_v30 = vadd.f32 %v14859_v26, %v14830_v6  ;;  %v14889_v50 = vpop.f32.mrf.mxu1 }
 0xdee   :  { %v15034_v62 = vld [vmem:[#allocation2 + $0x8] sm:$0xff]  ;;  %v14922_v16 = vpop.f32.mrf.mxu2 }
 0xdef   :  { %15066 = vst [vmem:[%s20185_s10 + $0x40] sm:$0xff] %v15034_v62  ;;  %v15001_v24 = vsel %vm7179_vm14, %v14994_v25, %v15000_v56  ;;  %v14890_v35 = vadd.f32 %v14889_v50, %v14860_v30 }
 0xdf0   :  { %15068 = vst [vmem:[%s20185_s10 + $0x50] sm:$0xff] %v15001_v24  ;;  %v14949_v9 = vpop.f32.mrf.mxu3 }
 0xdf1   :  { %v14923_v10 = vadd.f32 %v14922_v16, %v14890_v35 }
 0xdf3   :  { %v14950_v33 = vadd.f32 %v14949_v9, %v14923_v10 }
 0xdf4   :  { %v14864_v58 = vpop.f32.mrf.mxu0 }
 0xdf5   :  { %v14959_v59 = vadd.f32 %v14950_v33, %v20120_v2  ;;  %v14865_v49 = vadd.f32 %v14864_v58, %v14834_v1  ;;  %v14895_v48 = vpop.f32.mrf.mxu1 }
 0xdf6   :  { %v14926_v52 = vpop.f32.mrf.mxu2 }
 0xdf7   :  { %v14979_v54 = vadd.f32 %v20132_v0, %v14959_v59  ;;  %v14896_v11 = vadd.f32 %v14895_v48, %v14865_v49 }
 0xdf8   :  { %v14953_v43 = vpop.f32.mrf.mxu3 }
 0xdf9   :  { %v14995_v60 = vrot.slane %v14979_v54, 2  ;;  %v14927_v57 = vadd.f32 %v14926_v52, %v14896_v11 }
 0xdfb   :  { %15015 = vst [vmem:[#allocation2 + $0x38] sm:$0xc0] %v14995_v60  ;;  %v14954_v21 = vadd.f32 %v14953_v43, %v14927_v57 }
 0xdfd   :  { %v14963_v7 = vadd.f32 %v14954_v21, %v20128_v22 }
 0xdff   :  { %v14983_v37 = vadd.f32 %v20136_v8, %v14963_v7 }
 0xe01   :  { %v15002_v13 = vrot.slane %v14983_v37, 2 }
 0xe02   :  { %v15035_v46 = vld [vmem:[#allocation2 + $0x38] sm:$0xff] }
 0xe03   :  { %15067 = vst [vmem:[%s20185_s10 + $0x48] sm:$0xff] %v15035_v46  ;;  %v15003_v2 = vsel %vm7179_vm14, %v14995_v60, %v15002_v13 }
 0xe04   :  { %15069 = vst [vmem:[%s20185_s10 + $0x58] sm:$0xff] %v15003_v2 }

</bundles_post_ra>
